<compile_context>
chip_gen: v5e
topology: v5e:2x2
jax: 0.10.0
libtpu: 0.0.40
codegen_flags: <defaults>
</compile_context>

<pallas_src>
import math

import jax
import jax.numpy as jnp
from jax import lax
from jax.experimental import pallas as pl
from jax.experimental.pallas import tpu as pltpu


# ---------------------------------------------------------------------------
# Fused Encoder_Pos kernel (per batch tile of block_b elements).
#   inputs : patches p0..p3 (Bt,N,Ki) bf16, conv weights w0..w3 (Ki,C) bf16
#            (BN scale pre-folded), shifts (4,1,C) f32, x (Bt,C,N) f32,
#            Wq (C,dqp) bf16, bq (1,dqp), Wk (dqp,C) bf16, bk (dqp,1),
#            Wv (C,C) bf16, bv (C,1), pos (dqp,N) f32, gamma (1,1) f32 [SMEM]
#   outputs: out (Bt,C,N) f32, attention (Bt,N,N) f32
# ---------------------------------------------------------------------------
def encoder_pos_kernel(p0_ref, p1_ref, p2_ref, p3_ref,
                       w0_ref, w1_ref, w2_ref, w3_ref,
                       shifts_ref, x_ref,
                       wq_ref, bq_ref, wk_ref, bk_ref, wv_ref, bv_ref,
                       pos_ref, gamma_ref,
                       out_ref, attn_ref):
    f32 = jnp.float32
    bf16 = jnp.bfloat16
    Bt, C, N = x_ref.shape

    # ---- 4 fused SPP_Q branches on the whole batch tile --------------------
    # (Bt*N, Ki) @ (Ki, C): the leading-dim merge is layout-free (N % 8 == 0)
    # and fills the MXU M dimension with Bt*N rows.
    multi = None
    branches = ((p0_ref, w0_ref), (p1_ref, w1_ref),
                (p2_ref, w2_ref), (p3_ref, w3_ref))
    for i, (p_ref, w_ref) in enumerate(branches):
        ki = p_ref.shape[2]
        p = p_ref[...].reshape(Bt * N, ki)
        acc = jnp.dot(p, w_ref[...], preferred_element_type=f32)   # (Bt*N, C)
        y = jnp.maximum(acc + shifts_ref[i], 0.0)                  # BN shift + ReLU
        multi = y if multi is None else multi + y

    # ---- Q projection, also at M = Bt*N (bf16 MXU operands, f32 acc) -------
    q = jnp.dot(multi.astype(bf16), wq_ref[...],
                preferred_element_type=f32) + bq_ref[...]          # (Bt*N, dqp)
    q_bf = q.astype(bf16)

    pos = pos_ref[...]                                             # (dqp, N)
    gamma = gamma_ref[0, 0]

    # ---- per-batch-element attention (unrolled; small vs. the SPP work) ----
    for b in range(Bt):
        x_cn = x_ref[b]                                            # (C, N) f32
        x_bf = x_cn.astype(bf16)

        # 1x1-conv projections (Wk stored (dqp, C) so K comes out transposed).
        k_t = jnp.dot(wk_ref[...], x_bf,
                      preferred_element_type=f32) + bk_ref[...]    # (dqp, N) == K^T
        v_cn = jnp.dot(wv_ref[...], x_bf,
                       preferred_element_type=f32) + bv_ref[...]   # (C, N)

        # energy = Q @ K^T + Q @ pos  ==  Q @ (K^T + pos): single MXU pass.
        kpp = (k_t + pos).astype(bf16)                             # (dqp, N)
        q_b = q_bf[b * N:(b + 1) * N]                              # (N, dqp)
        energy = jnp.dot(q_b, kpp, preferred_element_type=f32)     # (N, N)

        # softmax over the last axis (f32 VPU/EUP math).
        m = jnp.max(energy, axis=-1, keepdims=True)
        e = jnp.exp(energy - m)
        attn = e * pl.reciprocal(jnp.sum(e, axis=-1, keepdims=True), approx=True)
        attn_ref[b] = attn.astype(attn_ref.dtype)                  # lane-dense (N mult of 128)

        # out[c, n] = sum_m V[c, m] * attn[n, m]   (torch: bmm(V, attn^T)).
        # Contract both operands' last dims -> no explicit attn transpose.
        out_cn = lax.dot_general(v_cn.astype(bf16), attn.astype(bf16),
                                 dimension_numbers=(((1,), (1,)), ((), ())),
                                 preferred_element_type=f32)       # (C, N)
        out_ref[b] = (gamma * out_cn + x_cn).astype(out_ref.dtype)


def encoder_pos_pallas(patches, weights, shifts, x_cn,
                       wq, bq, wk, bk, wv, bv, pos, gamma, *, block_b):
    B, C, N = x_cn.shape
    dqp = wq.shape[1]
    assert B % block_b == 0, "B must be divisible by block_b"
    # NOTE: if N < 128 (e.g. 8x8 inputs) the minor output dim is lane-masked;
    # in that case flatten the outputs to (B, C*N)/(B, N*N) for dense stores.
    in_specs = (
        [pl.BlockSpec((block_b,) + p.shape[1:], lambda b: (b, 0, 0)) for p in patches]
        + [pl.BlockSpec(w.shape, lambda b: (0, 0)) for w in weights]
        + [
            pl.BlockSpec(shifts.shape, lambda b: (0, 0, 0)),               # shifts
            pl.BlockSpec((block_b, C, N), lambda b: (b, 0, 0)),            # x
            pl.BlockSpec((C, dqp), lambda b: (0, 0)),                      # Wq
            pl.BlockSpec((1, dqp), lambda b: (0, 0)),                      # bq
            pl.BlockSpec((dqp, C), lambda b: (0, 0)),                      # Wk
            pl.BlockSpec((dqp, 1), lambda b: (0, 0)),                      # bk
            pl.BlockSpec((C, C), lambda b: (0, 0)),                        # Wv
            pl.BlockSpec((C, 1), lambda b: (0, 0)),                        # bv
            pl.BlockSpec((dqp, N), lambda b: (0, 0)),                      # rel_h + rel_w
            pl.BlockSpec(memory_space=pltpu.MemorySpace.SMEM),             # gamma scalar
        ]
    )
    out_specs = (pl.BlockSpec((block_b, C, N), lambda b: (b, 0, 0)),
                 pl.BlockSpec((block_b, N, N), lambda b: (b, 0, 0)))
    return pl.pallas_call(
        encoder_pos_kernel,
        out_shape=(jax.ShapeDtypeStruct((B, C, N), jnp.float32),
                   jax.ShapeDtypeStruct((B, N, N), jnp.float32)),
        grid=(B // block_b,),
        in_specs=in_specs,
        out_specs=out_specs,
        compiler_params=pltpu.CompilerParams(
            # "parallel": with >= 2 grid steps v7x can shard batch tiles over
            # both TensorCores (no-op on single-TC v5e/v6e).
            dimension_semantics=("parallel",),
            # Explicit scoped-VMEM budget (v5e default is only 16 MiB);
            # actual per-step footprint here is < 8 MiB.
            vmem_limit_bytes=32 * 1024 * 1024),
    )(*patches, *weights, shifts, x_cn, wq, bq, wk, bk, wv, bv, pos, gamma)


# ---------------------------------------------------------------------------
# JAX glue: PyTorch-exact bilinear resize (align_corners=False) and 3x3 im2col.
# ---------------------------------------------------------------------------
def bilinear_resize_nchw(x, scale):
    # TODO(synk): the gather-based bilinear interpolation (and the im2col
    # below) stay in plain JAX; a data-dependent row/col gather has no clean
    # rectangular-BlockSpec equivalent, so only the matmul/BN/ReLU/attention
    # math is fused into the Pallas kernel.
    B, C, H, W = x.shape
    out_h = int(math.floor(H * scale))
    out_w = int(math.floor(W * scale))

    def src_idx(out_size, in_size):
        o = jnp.arange(out_size, dtype=jnp.float32)
        src = (o + 0.5) * (in_size / out_size) - 0.5
        src = jnp.maximum(src, 0.0)
        i0 = jnp.minimum(jnp.floor(src).astype(jnp.int32), in_size - 1)
        i1 = jnp.minimum(i0 + 1, in_size - 1)
        f = src - i0.astype(jnp.float32)
        return i0, i1, f

    h0, h1, fh = src_idx(out_h, H)
    w0, w1, fw = src_idx(out_w, W)

    top = x[:, :, h0, :]
    bot = x[:, :, h1, :]
    row = top * (1.0 - fh)[None, None, :, None] + bot * fh[None, None, :, None]
    left = row[:, :, :, w0]
    right = row[:, :, :, w1]
    return left * (1.0 - fw) + right * fw


def im2col_3x3(x):
    # x: (B, C, H, W) -> patches (B, H*W, C*9), (c, di, dj) ordering (matches
    # the (out_ch, in_ch, kh, kw) weight flatten).
    B, C, H, W = x.shape
    xp = jnp.pad(x, ((0, 0), (0, 0), (1, 1), (1, 1)))
    cols = []
    for di in range(3):
        for dj in range(3):
            cols.append(xp[:, :, di:di + H, dj:dj + W])
    p = jnp.stack(cols, axis=2)                  # (B, C, 9, H, W)
    p = p.reshape(B, C * 9, H * W)
    return p.transpose(0, 2, 1)                  # (B, H*W, C*9)


# ---------------------------------------------------------------------------
# Parameter init (deterministic, shapes from Encoder_Pos.__init__)
# ---------------------------------------------------------------------------
def init_params(key, n_dims, width, height, filters):
    dq = n_dims // 8
    ks = jax.random.split(key, 32)
    p = {}
    p["rel_h"] = jax.random.normal(ks[0], (1, dq, height, 1), jnp.float32)
    p["rel_w"] = jax.random.normal(ks[1], (1, dq, 1, width), jnp.float32)
    for i, f in enumerate(filters):
        p[f"spp{i}_w"] = jax.random.normal(ks[2 + i], (n_dims, f, 3, 3),
                                           jnp.float32) / math.sqrt(9 * f)
        p[f"spp{i}_bn_w"] = 1.0 + 0.1 * jax.random.normal(ks[6 + i], (n_dims,), jnp.float32)
        p[f"spp{i}_bn_b"] = 0.1 * jax.random.normal(ks[10 + i], (n_dims,), jnp.float32)
        p[f"spp{i}_bn_rm"] = 0.1 * jax.random.normal(ks[14 + i], (n_dims,), jnp.float32)
        p[f"spp{i}_bn_rv"] = 0.5 + jax.random.uniform(ks[18 + i], (n_dims,), jnp.float32)
    p["q_w"] = jax.random.normal(ks[22], (dq, n_dims, 1, 1), jnp.float32) / math.sqrt(n_dims)
    p["q_b"] = 0.1 * jax.random.normal(ks[23], (dq,), jnp.float32)
    p["k_w"] = jax.random.normal(ks[24], (dq, n_dims, 1, 1), jnp.float32) / math.sqrt(n_dims)
    p["k_b"] = 0.1 * jax.random.normal(ks[25], (dq,), jnp.float32)
    p["v_w"] = jax.random.normal(ks[26], (n_dims, n_dims, 1, 1), jnp.float32) / math.sqrt(n_dims)
    p["v_b"] = 0.1 * jax.random.normal(ks[27], (n_dims,), jnp.float32)
    # PyTorch inits gamma to 0; use 0.5 here so the attention path is exercised.
    p["gamma"] = jnp.array(0.5, jnp.float32)
    return p


# ---------------------------------------------------------------------------
# Full forward pass
# ---------------------------------------------------------------------------
def encoder_pos_forward(params, x, x_list, *, block_b=None):
    B, C, S2, S3 = x.shape            # torch: m_batchsize, C, width, height
    N = S2 * S3
    dq = C // 8
    dqp = max(8, -(-dq // 8) * 8)     # pad q/k head dim to a sublane multiple
    scales = (1.0 / 16, 1.0 / 8, 1.0 / 4, 1.0 / 2)

    if block_b is None:
        # 2 batch elements per grid step: fills the MXU M dim (2*N rows for the
        # SPP/Q dots) while keeping >= 2 parallel grid steps when B >= 4 so the
        # two v7x TensorCores both get work.  Raise to 4 on v6e if B allows.
        block_b = 2 if B % 2 == 0 else 1

    # SPP branches: resize + im2col in XLA glue; matmul/BN/ReLU fused in-kernel.
    patches, weights, shifts = [], [], []
    for i, (xi, sf) in enumerate(zip(x_list, scales)):
        x_d = bilinear_resize_nchw(xi, sf)                           # (B, Cin, S2, S3)
        patches.append(im2col_3x3(x_d).astype(jnp.bfloat16))         # (B, N, Cin*9)
        scale = params[f"spp{i}_bn_w"] * lax.rsqrt(params[f"spp{i}_bn_rv"] + 1e-5)
        shift = params[f"spp{i}_bn_b"] - params[f"spp{i}_bn_rm"] * scale
        wflat = params[f"spp{i}_w"].reshape(C, -1).T                 # (Cin*9, C)
        weights.append((wflat * scale[None, :]).astype(jnp.bfloat16))  # BN scale folded
        shifts.append(shift)
    shifts = jnp.stack(shifts).reshape(4, 1, C).astype(jnp.float32)

    x_cn = x.reshape(B, C, N)                                        # channels-first, no transpose

    def pad_to(a, shape):
        out = jnp.zeros(shape, a.dtype)
        return out.at[tuple(slice(0, s) for s in a.shape)].set(a)

    # 1x1 conv weights; zero-padding dq -> dqp is bit-exact (padded rows of
    # K^T and pos are zero, so padded q columns contribute nothing).
    wq = pad_to(params["q_w"].reshape(dq, C).T, (C, dqp)).astype(jnp.bfloat16)
    bq = pad_to(params["q_b"].reshape(1, dq), (1, dqp))
    wk = pad_to(params["k_w"].reshape(dq, C), (dqp, C)).astype(jnp.bfloat16)
    bk = pad_to(params["k_b"].reshape(dq, 1), (dqp, 1))
    wv = params["v_w"].reshape(C, C).astype(jnp.bfloat16)            # (out, in)
    bv = params["v_b"].reshape(C, 1)
    # NOTE: matches torch's (rel_h + rel_w).view(1, dq, -1); assumes the
    # constructor's (height, width) match x's (dim2, dim3) as in the reference.
    pos = pad_to((params["rel_h"] + params["rel_w"]).reshape(dq, N), (dqp, N))
    gamma = params["gamma"].reshape(1, 1)

    out_cn, attn = encoder_pos_pallas(patches, weights, shifts, x_cn,
                                      wq, bq, wk, bk, wv, bv, pos, gamma,
                                      block_b=block_b)
    return out_cn.reshape(B, C, S2, S3), attn


if __name__ == "__main__":
    key = jax.random.PRNGKey(0)
    B, n_dims, S = 4, 32, 16                  # x spatial 16x16 -> N = 256 (lane-dense)
    filters = [8, 16, 32, 64]                 # SPP branch input channels

    k0, k1, k2, k3, k4, kp = jax.random.split(key, 6)
    x = jax.random.normal(k0, (B, n_dims, S, S), jnp.float32)
    x_list = [
        jax.random.normal(k1, (B, filters[0], S * 16, S * 16), jnp.float32),
        jax.random.normal(k2, (B, filters[1], S * 8, S * 8), jnp.float32),
        jax.random.normal(k3, (B, filters[2], S * 4, S * 4), jnp.float32),
        jax.random.normal(k4, (B, filters[3], S * 2, S * 2), jnp.float32),
    ]

    params = init_params(kp, n_dims, width=S, height=S, filters=filters)

    fwd = jax.jit(encoder_pos_forward)
    out, attn = fwd(params, x, x_list)
    jax.block_until_ready((out, attn))
    assert out.shape == (B, n_dims, S, S)
    assert attn.shape == (B, S * S, S * S)
    assert bool(jnp.all(jnp.isfinite(out))) and bool(jnp.all(jnp.isfinite(attn)))
    # softmax rows must sum to ~1 (sanity on the in-kernel attention math).
    assert bool(jnp.all(jnp.abs(jnp.sum(attn, axis=-1) - 1.0) < 1e-2))
    print("KERNEL_OK")
</pallas_src>

<mosaic_0001>
module attributes {stable_mosaic.version = 11 : i64} {
  func.func @encoder_pos_kernel(%arg0: i32, %arg1: memref<2x256x72xbf16, #tpu.memory_space<vmem>>, %arg2: memref<2x256x144xbf16, #tpu.memory_space<vmem>>, %arg3: memref<2x256x288xbf16, #tpu.memory_space<vmem>>, %arg4: memref<2x256x576xbf16, #tpu.memory_space<vmem>>, %arg5: memref<72x32xbf16, #tpu.memory_space<vmem>>, %arg6: memref<144x32xbf16, #tpu.memory_space<vmem>>, %arg7: memref<288x32xbf16, #tpu.memory_space<vmem>>, %arg8: memref<576x32xbf16, #tpu.memory_space<vmem>>, %arg9: memref<4x1x32xf32, #tpu.memory_space<vmem>>, %arg10: memref<2x32x256xf32, #tpu.memory_space<vmem>>, %arg11: memref<32x8xbf16, #tpu.memory_space<vmem>>, %arg12: memref<1x8xf32, #tpu.memory_space<vmem>>, %arg13: memref<8x32xbf16, #tpu.memory_space<vmem>>, %arg14: memref<8x1xf32, #tpu.memory_space<vmem>>, %arg15: memref<32x32xbf16, #tpu.memory_space<vmem>>, %arg16: memref<32x1xf32, #tpu.memory_space<vmem>>, %arg17: memref<8x256xf32, #tpu.memory_space<vmem>>, %arg18: memref<1x1xf32, #tpu.memory_space<smem>>, %arg19: memref<2x32x256xf32, #tpu.memory_space<vmem>>, %arg20: memref<2x256x256xf32, #tpu.memory_space<vmem>>) attributes {dimension_semantics = [#tpu.dimension_semantics<parallel>], iteration_bounds = array<i64: 2>, scalar_prefetch = 0 : i64, scratch_operands = 0 : i64, tpu.core_type = #tpu.core_type<tc>, window_params = [{transform_indices = @transform_0, window_bounds = array<i64: 2, 256, 72>}, {transform_indices = @transform_1, window_bounds = array<i64: 2, 256, 144>}, {transform_indices = @transform_2, window_bounds = array<i64: 2, 256, 288>}, {transform_indices = @transform_3, window_bounds = array<i64: 2, 256, 576>}, {pipeline_mode = #tpu.pipeline_mode<synchronous>, transform_indices = @transform_4, window_bounds = array<i64: 72, 32>}, {pipeline_mode = #tpu.pipeline_mode<synchronous>, transform_indices = @transform_5, window_bounds = array<i64: 144, 32>}, {pipeline_mode = #tpu.pipeline_mode<synchronous>, transform_indices = @transform_6, window_bounds = array<i64: 288, 32>}, {pipeline_mode = #tpu.pipeline_mode<synchronous>, transform_indices = @transform_7, window_bounds = array<i64: 576, 32>}, {pipeline_mode = #tpu.pipeline_mode<synchronous>, transform_indices = @transform_8, window_bounds = array<i64: 4, 1, 32>}, {transform_indices = @transform_9, window_bounds = array<i64: 2, 32, 256>}, {pipeline_mode = #tpu.pipeline_mode<synchronous>, transform_indices = @transform_10, window_bounds = array<i64: 32, 8>}, {pipeline_mode = #tpu.pipeline_mode<synchronous>, transform_indices = @transform_11, window_bounds = array<i64: 1, 8>}, {pipeline_mode = #tpu.pipeline_mode<synchronous>, transform_indices = @transform_12, window_bounds = array<i64: 8, 32>}, {pipeline_mode = #tpu.pipeline_mode<synchronous>, transform_indices = @transform_13, window_bounds = array<i64: 8, 1>}, {pipeline_mode = #tpu.pipeline_mode<synchronous>, transform_indices = @transform_14, window_bounds = array<i64: 32, 32>}, {pipeline_mode = #tpu.pipeline_mode<synchronous>, transform_indices = @transform_15, window_bounds = array<i64: 32, 1>}, {pipeline_mode = #tpu.pipeline_mode<synchronous>, transform_indices = @transform_16, window_bounds = array<i64: 8, 256>}, {transform_indices = @transform_17, window_bounds = array<i64: 1, 1>}, {transform_indices = @transform_18, window_bounds = array<i64: 2, 32, 256>}, {transform_indices = @transform_19, window_bounds = array<i64: 2, 256, 256>}]} {
    %c0 = arith.constant 0 : index
    %c0_0 = arith.constant 0 : index
    %c0_1 = arith.constant 0 : index
    %0 = vector.load %arg1[%c0, %c0_0, %c0_1] : memref<2x256x72xbf16, #tpu.memory_space<vmem>>, vector<2x256x72xbf16>
    %1 = vector.shape_cast %0 : vector<2x256x72xbf16> to vector<512x72xbf16>
    %c0_2 = arith.constant 0 : index
    %c0_3 = arith.constant 0 : index
    %2 = vector.load %arg5[%c0_2, %c0_3] : memref<72x32xbf16, #tpu.memory_space<vmem>>, vector<72x32xbf16>
    %cst = arith.constant dense<0.000000e+00> : vector<512x32xf32>
    %3 = tpu.matmul %1, %2, %cst {dimension_numbers = #tpu.dot_dimension_numbers<[1], [0], [0], [1], [0, 0, 1, 1], [], []>} : vector<512x72xbf16>, vector<72x32xbf16>, vector<512x32xf32> -> vector<512x32xf32>
    %c0_4 = arith.constant 0 : index
    %c0_5 = arith.constant 0 : index
    %c0_6 = arith.constant 0 : index
    %4 = vector.load %arg9[%c0_4, %c0_5, %c0_6] : memref<4x1x32xf32, #tpu.memory_space<vmem>>, vector<1x1x32xf32>
    %5 = vector.shape_cast %4 : vector<1x1x32xf32> to vector<1x32xf32>
    %6 = vector.broadcast %5 : vector<1x32xf32> to vector<512x32xf32>
    %7 = arith.addf %3, %6 : vector<512x32xf32>
    %cst_7 = arith.constant 0.000000e+00 : f32
    %8 = vector.broadcast %cst_7 : f32 to vector<512x32xf32>
    %9 = arith.maximumf %7, %8 : vector<512x32xf32>
    %c0_8 = arith.constant 0 : index
    %c0_9 = arith.constant 0 : index
    %c0_10 = arith.constant 0 : index
    %10 = vector.load %arg2[%c0_8, %c0_9, %c0_10] : memref<2x256x144xbf16, #tpu.memory_space<vmem>>, vector<2x256x144xbf16>
    %11 = vector.shape_cast %10 : vector<2x256x144xbf16> to vector<512x144xbf16>
    %c0_11 = arith.constant 0 : index
    %c0_12 = arith.constant 0 : index
    %12 = vector.load %arg6[%c0_11, %c0_12] : memref<144x32xbf16, #tpu.memory_space<vmem>>, vector<144x32xbf16>
    %cst_13 = arith.constant dense<0.000000e+00> : vector<512x32xf32>
    %13 = tpu.matmul %11, %12, %cst_13 {dimension_numbers = #tpu.dot_dimension_numbers<[1], [0], [0], [1], [0, 0, 1, 1], [], []>} : vector<512x144xbf16>, vector<144x32xbf16>, vector<512x32xf32> -> vector<512x32xf32>
    %c1 = arith.constant 1 : index
    %c0_14 = arith.constant 0 : index
    %c0_15 = arith.constant 0 : index
    %14 = vector.load %arg9[%c1, %c0_14, %c0_15] : memref<4x1x32xf32, #tpu.memory_space<vmem>>, vector<1x1x32xf32>
    %15 = vector.shape_cast %14 : vector<1x1x32xf32> to vector<1x32xf32>
    %16 = vector.broadcast %15 : vector<1x32xf32> to vector<512x32xf32>
    %17 = arith.addf %13, %16 : vector<512x32xf32>
    %cst_16 = arith.constant 0.000000e+00 : f32
    %18 = vector.broadcast %cst_16 : f32 to vector<512x32xf32>
    %19 = arith.maximumf %17, %18 : vector<512x32xf32>
    %20 = arith.addf %9, %19 : vector<512x32xf32>
    %c0_17 = arith.constant 0 : index
    %c0_18 = arith.constant 0 : index
    %c0_19 = arith.constant 0 : index
    %21 = vector.load %arg3[%c0_17, %c0_18, %c0_19] : memref<2x256x288xbf16, #tpu.memory_space<vmem>>, vector<2x256x288xbf16>
    %22 = vector.shape_cast %21 : vector<2x256x288xbf16> to vector<512x288xbf16>
    %c0_20 = arith.constant 0 : index
    %c0_21 = arith.constant 0 : index
    %23 = vector.load %arg7[%c0_20, %c0_21] : memref<288x32xbf16, #tpu.memory_space<vmem>>, vector<288x32xbf16>
    %cst_22 = arith.constant dense<0.000000e+00> : vector<512x32xf32>
    %24 = tpu.matmul %22, %23, %cst_22 {dimension_numbers = #tpu.dot_dimension_numbers<[1], [0], [0], [1], [0, 0, 1, 1], [], []>} : vector<512x288xbf16>, vector<288x32xbf16>, vector<512x32xf32> -> vector<512x32xf32>
    %c2 = arith.constant 2 : index
    %c0_23 = arith.constant 0 : index
    %c0_24 = arith.constant 0 : index
    %25 = vector.load %arg9[%c2, %c0_23, %c0_24] : memref<4x1x32xf32, #tpu.memory_space<vmem>>, vector<1x1x32xf32>
    %26 = vector.shape_cast %25 : vector<1x1x32xf32> to vector<1x32xf32>
    %27 = vector.broadcast %26 : vector<1x32xf32> to vector<512x32xf32>
    %28 = arith.addf %24, %27 : vector<512x32xf32>
    %cst_25 = arith.constant 0.000000e+00 : f32
    %29 = vector.broadcast %cst_25 : f32 to vector<512x32xf32>
    %30 = arith.maximumf %28, %29 : vector<512x32xf32>
    %31 = arith.addf %20, %30 : vector<512x32xf32>
    %c0_26 = arith.constant 0 : index
    %c0_27 = arith.constant 0 : index
    %c0_28 = arith.constant 0 : index
    %32 = vector.load %arg4[%c0_26, %c0_27, %c0_28] : memref<2x256x576xbf16, #tpu.memory_space<vmem>>, vector<2x256x576xbf16>
    %33 = vector.shape_cast %32 : vector<2x256x576xbf16> to vector<512x576xbf16>
    %c0_29 = arith.constant 0 : index
    %c0_30 = arith.constant 0 : index
    %34 = vector.load %arg8[%c0_29, %c0_30] : memref<576x32xbf16, #tpu.memory_space<vmem>>, vector<576x32xbf16>
    %cst_31 = arith.constant dense<0.000000e+00> : vector<512x32xf32>
    %35 = tpu.matmul %33, %34, %cst_31 {dimension_numbers = #tpu.dot_dimension_numbers<[1], [0], [0], [1], [0, 0, 1, 1], [], []>} : vector<512x576xbf16>, vector<576x32xbf16>, vector<512x32xf32> -> vector<512x32xf32>
    %c3 = arith.constant 3 : index
    %c0_32 = arith.constant 0 : index
    %c0_33 = arith.constant 0 : index
    %36 = vector.load %arg9[%c3, %c0_32, %c0_33] : memref<4x1x32xf32, #tpu.memory_space<vmem>>, vector<1x1x32xf32>
    %37 = vector.shape_cast %36 : vector<1x1x32xf32> to vector<1x32xf32>
    %38 = vector.broadcast %37 : vector<1x32xf32> to vector<512x32xf32>
    %39 = arith.addf %35, %38 : vector<512x32xf32>
    %cst_34 = arith.constant 0.000000e+00 : f32
    %40 = vector.broadcast %cst_34 : f32 to vector<512x32xf32>
    %41 = arith.maximumf %39, %40 : vector<512x32xf32>
    %42 = arith.addf %31, %41 : vector<512x32xf32>
    %43 = arith.truncf %42 : vector<512x32xf32> to vector<512x32xbf16>
    %c0_35 = arith.constant 0 : index
    %c0_36 = arith.constant 0 : index
    %44 = vector.load %arg11[%c0_35, %c0_36] : memref<32x8xbf16, #tpu.memory_space<vmem>>, vector<32x8xbf16>
    %cst_37 = arith.constant dense<0.000000e+00> : vector<512x8xf32>
    %45 = tpu.matmul %43, %44, %cst_37 {dimension_numbers = #tpu.dot_dimension_numbers<[1], [0], [0], [1], [0, 0, 1, 1], [], []>} : vector<512x32xbf16>, vector<32x8xbf16>, vector<512x8xf32> -> vector<512x8xf32>
    %c0_38 = arith.constant 0 : index
    %c0_39 = arith.constant 0 : index
    %46 = vector.load %arg12[%c0_38, %c0_39] : memref<1x8xf32, #tpu.memory_space<vmem>>, vector<1x8xf32>
    %47 = vector.broadcast %46 : vector<1x8xf32> to vector<512x8xf32>
    %48 = arith.addf %45, %47 : vector<512x8xf32>
    %49 = arith.truncf %48 : vector<512x8xf32> to vector<512x8xbf16>
    %c0_40 = arith.constant 0 : index
    %c0_41 = arith.constant 0 : index
    %50 = vector.load %arg17[%c0_40, %c0_41] : memref<8x256xf32, #tpu.memory_space<vmem>>, vector<8x256xf32>
    %c0_42 = arith.constant 0 : index
    %c0_43 = arith.constant 0 : index
    %51 = memref.load %arg18[%c0_42, %c0_43] : memref<1x1xf32, #tpu.memory_space<smem>>
    %c0_44 = arith.constant 0 : index
    %c0_45 = arith.constant 0 : index
    %c0_46 = arith.constant 0 : index
    %52 = vector.load %arg10[%c0_44, %c0_45, %c0_46] : memref<2x32x256xf32, #tpu.memory_space<vmem>>, vector<1x32x256xf32>
    %53 = vector.shape_cast %52 : vector<1x32x256xf32> to vector<32x256xf32>
    %54 = arith.truncf %53 : vector<32x256xf32> to vector<32x256xbf16>
    %c0_47 = arith.constant 0 : index
    %c0_48 = arith.constant 0 : index
    %55 = vector.load %arg13[%c0_47, %c0_48] : memref<8x32xbf16, #tpu.memory_space<vmem>>, vector<8x32xbf16>
    %cst_49 = arith.constant dense<0.000000e+00> : vector<8x256xf32>
    %56 = tpu.matmul %55, %54, %cst_49 {dimension_numbers = #tpu.dot_dimension_numbers<[1], [0], [0], [1], [0, 0, 1, 1], [], []>} : vector<8x32xbf16>, vector<32x256xbf16>, vector<8x256xf32> -> vector<8x256xf32>
    %c0_50 = arith.constant 0 : index
    %c0_51 = arith.constant 0 : index
    %57 = vector.load %arg14[%c0_50, %c0_51] : memref<8x1xf32, #tpu.memory_space<vmem>>, vector<8x1xf32>
    %58 = vector.broadcast %57 : vector<8x1xf32> to vector<8x256xf32>
    %59 = arith.addf %56, %58 : vector<8x256xf32>
    %c0_52 = arith.constant 0 : index
    %c0_53 = arith.constant 0 : index
    %60 = vector.load %arg15[%c0_52, %c0_53] : memref<32x32xbf16, #tpu.memory_space<vmem>>, vector<32x32xbf16>
    %cst_54 = arith.constant dense<0.000000e+00> : vector<32x256xf32>
    %61 = tpu.matmul %60, %54, %cst_54 {dimension_numbers = #tpu.dot_dimension_numbers<[1], [0], [0], [1], [0, 0, 1, 1], [], []>} : vector<32x32xbf16>, vector<32x256xbf16>, vector<32x256xf32> -> vector<32x256xf32>
    %c0_55 = arith.constant 0 : index
    %c0_56 = arith.constant 0 : index
    %62 = vector.load %arg16[%c0_55, %c0_56] : memref<32x1xf32, #tpu.memory_space<vmem>>, vector<32x1xf32>
    %63 = vector.broadcast %62 : vector<32x1xf32> to vector<32x256xf32>
    %64 = arith.addf %61, %63 : vector<32x256xf32>
    %65 = arith.addf %59, %50 : vector<8x256xf32>
    %66 = arith.truncf %65 : vector<8x256xf32> to vector<8x256xbf16>
    %67 = vector.extract_strided_slice %49 {offsets = [0, 0], sizes = [256, 8], strides = [1, 1]} : vector<512x8xbf16> to vector<256x8xbf16>
    %cst_57 = arith.constant dense<0.000000e+00> : vector<256x256xf32>
    %68 = tpu.matmul %67, %66, %cst_57 {dimension_numbers = #tpu.dot_dimension_numbers<[1], [0], [0], [1], [0, 0, 1, 1], [], []>} : vector<256x8xbf16>, vector<8x256xbf16>, vector<256x256xf32> -> vector<256x256xf32>
    %cst_58 = arith.constant dense<0xFF800000> : vector<256xf32>
    %69 = vector.multi_reduction <maximumf>, %68, %cst_58 [1] : vector<256x256xf32> to vector<256xf32>
    %70 = vector.shape_cast %69 : vector<256xf32> to vector<256x1xf32>
    %71 = vector.broadcast %70 : vector<256x1xf32> to vector<256x256xf32>
    %72 = arith.subf %68, %71 : vector<256x256xf32>
    %73 = math.exp %72 : vector<256x256xf32>
    %cst_59 = arith.constant dense<0.000000e+00> : vector<256xf32>
    %74 = vector.multi_reduction <add>, %73, %cst_59 [1] : vector<256x256xf32> to vector<256xf32>
    %75 = vector.shape_cast %74 : vector<256xf32> to vector<256x1xf32>
    %76 = tpu.reciprocal %75 {approx = true} : vector<256x1xf32> -> vector<256x1xf32>
    %77 = vector.broadcast %76 : vector<256x1xf32> to vector<256x256xf32>
    %78 = arith.mulf %73, %77 : vector<256x256xf32>
    %c0_60 = arith.constant 0 : index
    %c0_61 = arith.constant 0 : index
    %c0_62 = arith.constant 0 : index
    %79 = vector.load %arg20[%c0_60, %c0_61, %c0_62] : memref<2x256x256xf32, #tpu.memory_space<vmem>>, vector<1x256x256xf32>
    %80 = vector.shape_cast %79 : vector<1x256x256xf32> to vector<256x256xf32>
    %81 = vector.shape_cast %78 : vector<256x256xf32> to vector<1x256x256xf32>
    tpu.vector_store %arg20[%c0_60, %c0_61, %c0_62], %81 {strides = array<i32>} : memref<2x256x256xf32, #tpu.memory_space<vmem>>, vector<1x256x256xf32>,
    %82 = arith.truncf %64 : vector<32x256xf32> to vector<32x256xbf16>
    %83 = arith.truncf %78 : vector<256x256xf32> to vector<256x256xbf16>
    %cst_63 = arith.constant dense<0.000000e+00> : vector<32x256xf32>
    %84 = tpu.matmul %82, %83, %cst_63 {dimension_numbers = #tpu.dot_dimension_numbers<[1], [1], [0], [0], [0, 0, 1, 0], [], []>} : vector<32x256xbf16>, vector<256x256xbf16>, vector<32x256xf32> -> vector<32x256xf32>
    %85 = vector.broadcast %51 : f32 to vector<32x256xf32>
    %86 = arith.mulf %85, %84 : vector<32x256xf32>
    %87 = arith.addf %86, %53 : vector<32x256xf32>
    %c0_64 = arith.constant 0 : index
    %c0_65 = arith.constant 0 : index
    %c0_66 = arith.constant 0 : index
    %88 = vector.load %arg19[%c0_64, %c0_65, %c0_66] : memref<2x32x256xf32, #tpu.memory_space<vmem>>, vector<1x32x256xf32>
    %89 = vector.shape_cast %88 : vector<1x32x256xf32> to vector<32x256xf32>
    %90 = vector.shape_cast %87 : vector<32x256xf32> to vector<1x32x256xf32>
    tpu.vector_store %arg19[%c0_64, %c0_65, %c0_66], %90 {strides = array<i32>} : memref<2x32x256xf32, #tpu.memory_space<vmem>>, vector<1x32x256xf32>,
    %c1_67 = arith.constant 1 : index
    %c0_68 = arith.constant 0 : index
    %c0_69 = arith.constant 0 : index
    %91 = vector.load %arg10[%c1_67, %c0_68, %c0_69] : memref<2x32x256xf32, #tpu.memory_space<vmem>>, vector<1x32x256xf32>
    %92 = vector.shape_cast %91 : vector<1x32x256xf32> to vector<32x256xf32>
    %93 = arith.truncf %92 : vector<32x256xf32> to vector<32x256xbf16>
    %c0_70 = arith.constant 0 : index
    %c0_71 = arith.constant 0 : index
    %94 = vector.load %arg13[%c0_70, %c0_71] : memref<8x32xbf16, #tpu.memory_space<vmem>>, vector<8x32xbf16>
    %cst_72 = arith.constant dense<0.000000e+00> : vector<8x256xf32>
    %95 = tpu.matmul %94, %93, %cst_72 {dimension_numbers = #tpu.dot_dimension_numbers<[1], [0], [0], [1], [0, 0, 1, 1], [], []>} : vector<8x32xbf16>, vector<32x256xbf16>, vector<8x256xf32> -> vector<8x256xf32>
    %c0_73 = arith.constant 0 : index
    %c0_74 = arith.constant 0 : index
    %96 = vector.load %arg14[%c0_73, %c0_74] : memref<8x1xf32, #tpu.memory_space<vmem>>, vector<8x1xf32>
    %97 = vector.broadcast %96 : vector<8x1xf32> to vector<8x256xf32>
    %98 = arith.addf %95, %97 : vector<8x256xf32>
    %c0_75 = arith.constant 0 : index
    %c0_76 = arith.constant 0 : index
    %99 = vector.load %arg15[%c0_75, %c0_76] : memref<32x32xbf16, #tpu.memory_space<vmem>>, vector<32x32xbf16>
    %cst_77 = arith.constant dense<0.000000e+00> : vector<32x256xf32>
    %100 = tpu.matmul %99, %93, %cst_77 {dimension_numbers = #tpu.dot_dimension_numbers<[1], [0], [0], [1], [0, 0, 1, 1], [], []>} : vector<32x32xbf16>, vector<32x256xbf16>, vector<32x256xf32> -> vector<32x256xf32>
    %c0_78 = arith.constant 0 : index
    %c0_79 = arith.constant 0 : index
    %101 = vector.load %arg16[%c0_78, %c0_79] : memref<32x1xf32, #tpu.memory_space<vmem>>, vector<32x1xf32>
    %102 = vector.broadcast %101 : vector<32x1xf32> to vector<32x256xf32>
    %103 = arith.addf %100, %102 : vector<32x256xf32>
    %104 = arith.addf %98, %50 : vector<8x256xf32>
    %105 = arith.truncf %104 : vector<8x256xf32> to vector<8x256xbf16>
    %106 = vector.extract_strided_slice %49 {offsets = [256, 0], sizes = [256, 8], strides = [1, 1]} : vector<512x8xbf16> to vector<256x8xbf16>
    %cst_80 = arith.constant dense<0.000000e+00> : vector<256x256xf32>
    %107 = tpu.matmul %106, %105, %cst_80 {dimension_numbers = #tpu.dot_dimension_numbers<[1], [0], [0], [1], [0, 0, 1, 1], [], []>} : vector<256x8xbf16>, vector<8x256xbf16>, vector<256x256xf32> -> vector<256x256xf32>
    %cst_81 = arith.constant dense<0xFF800000> : vector<256xf32>
    %108 = vector.multi_reduction <maximumf>, %107, %cst_81 [1] : vector<256x256xf32> to vector<256xf32>
    %109 = vector.shape_cast %108 : vector<256xf32> to vector<256x1xf32>
    %110 = vector.broadcast %109 : vector<256x1xf32> to vector<256x256xf32>
    %111 = arith.subf %107, %110 : vector<256x256xf32>
    %112 = math.exp %111 : vector<256x256xf32>
    %cst_82 = arith.constant dense<0.000000e+00> : vector<256xf32>
    %113 = vector.multi_reduction <add>, %112, %cst_82 [1] : vector<256x256xf32> to vector<256xf32>
    %114 = vector.shape_cast %113 : vector<256xf32> to vector<256x1xf32>
    %115 = tpu.reciprocal %114 {approx = true} : vector<256x1xf32> -> vector<256x1xf32>
    %116 = vector.broadcast %115 : vector<256x1xf32> to vector<256x256xf32>
    %117 = arith.mulf %112, %116 : vector<256x256xf32>
    %c1_83 = arith.constant 1 : index
    %c0_84 = arith.constant 0 : index
    %c0_85 = arith.constant 0 : index
    %118 = vector.load %arg20[%c1_83, %c0_84, %c0_85] : memref<2x256x256xf32, #tpu.memory_space<vmem>>, vector<1x256x256xf32>
    %119 = vector.shape_cast %118 : vector<1x256x256xf32> to vector<256x256xf32>
    %120 = vector.shape_cast %117 : vector<256x256xf32> to vector<1x256x256xf32>
    tpu.vector_store %arg20[%c1_83, %c0_84, %c0_85], %120 {strides = array<i32>} : memref<2x256x256xf32, #tpu.memory_space<vmem>>, vector<1x256x256xf32>,
    %121 = arith.truncf %103 : vector<32x256xf32> to vector<32x256xbf16>
    %122 = arith.truncf %117 : vector<256x256xf32> to vector<256x256xbf16>
    %cst_86 = arith.constant dense<0.000000e+00> : vector<32x256xf32>
    %123 = tpu.matmul %121, %122, %cst_86 {dimension_numbers = #tpu.dot_dimension_numbers<[1], [1], [0], [0], [0, 0, 1, 0], [], []>} : vector<32x256xbf16>, vector<256x256xbf16>, vector<32x256xf32> -> vector<32x256xf32>
    %124 = vector.broadcast %51 : f32 to vector<32x256xf32>
    %125 = arith.mulf %124, %123 : vector<32x256xf32>
    %126 = arith.addf %125, %92 : vector<32x256xf32>
    %c1_87 = arith.constant 1 : index
    %c0_88 = arith.constant 0 : index
    %c0_89 = arith.constant 0 : index
    %127 = vector.load %arg19[%c1_87, %c0_88, %c0_89] : memref<2x32x256xf32, #tpu.memory_space<vmem>>, vector<1x32x256xf32>
    %128 = vector.shape_cast %127 : vector<1x32x256xf32> to vector<32x256xf32>
    %129 = vector.shape_cast %126 : vector<32x256xf32> to vector<1x32x256xf32>
    tpu.vector_store %arg19[%c1_87, %c0_88, %c0_89], %129 {strides = array<i32>} : memref<2x32x256xf32, #tpu.memory_space<vmem>>, vector<1x32x256xf32>,
    return
  }
  func.func @transform_0(%arg0: i32) -> (i32, i32, i32) {
    %c0_i32 = arith.constant 0 : i32
    %c0_i32_0 = arith.constant 0 : i32
    %c0_i32_1 = arith.constant 0 : i32
    return %arg0, %c0_i32, %c0_i32_0 : i32, i32, i32
  }
  func.func @transform_1(%arg0: i32) -> (i32, i32, i32) {
    %c0_i32 = arith.constant 0 : i32
    %c0_i32_0 = arith.constant 0 : i32
    %c0_i32_1 = arith.constant 0 : i32
    return %arg0, %c0_i32, %c0_i32_0 : i32, i32, i32
  }
  func.func @transform_2(%arg0: i32) -> (i32, i32, i32) {
    %c0_i32 = arith.constant 0 : i32
    %c0_i32_0 = arith.constant 0 : i32
    %c0_i32_1 = arith.constant 0 : i32
    return %arg0, %c0_i32, %c0_i32_0 : i32, i32, i32
  }
  func.func @transform_3(%arg0: i32) -> (i32, i32, i32) {
    %c0_i32 = arith.constant 0 : i32
    %c0_i32_0 = arith.constant 0 : i32
    %c0_i32_1 = arith.constant 0 : i32
    return %arg0, %c0_i32, %c0_i32_0 : i32, i32, i32
  }
  func.func @transform_4(%arg0: i32) -> (i32, i32) {
    %c0_i32 = arith.constant 0 : i32
    %c0_i32_0 = arith.constant 0 : i32
    %c0_i32_1 = arith.constant 0 : i32
    return %c0_i32, %c0_i32_0 : i32, i32
  }
  func.func @transform_5(%arg0: i32) -> (i32, i32) {
    %c0_i32 = arith.constant 0 : i32
    %c0_i32_0 = arith.constant 0 : i32
    %c0_i32_1 = arith.constant 0 : i32
    return %c0_i32, %c0_i32_0 : i32, i32
  }
  func.func @transform_6(%arg0: i32) -> (i32, i32) {
    %c0_i32 = arith.constant 0 : i32
    %c0_i32_0 = arith.constant 0 : i32
    %c0_i32_1 = arith.constant 0 : i32
    return %c0_i32, %c0_i32_0 : i32, i32
  }
  func.func @transform_7(%arg0: i32) -> (i32, i32) {
    %c0_i32 = arith.constant 0 : i32
    %c0_i32_0 = arith.constant 0 : i32
    %c0_i32_1 = arith.constant 0 : i32
    return %c0_i32, %c0_i32_0 : i32, i32
  }
  func.func @transform_8(%arg0: i32) -> (i32, i32, i32) {
    %c0_i32 = arith.constant 0 : i32
    %c0_i32_0 = arith.constant 0 : i32
    %c0_i32_1 = arith.constant 0 : i32
    %c0_i32_2 = arith.constant 0 : i32
    return %c0_i32, %c0_i32_0, %c0_i32_1 : i32, i32, i32
  }
  func.func @transform_9(%arg0: i32) -> (i32, i32, i32) {
    %c0_i32 = arith.constant 0 : i32
    %c0_i32_0 = arith.constant 0 : i32
    %c0_i32_1 = arith.constant 0 : i32
    return %arg0, %c0_i32, %c0_i32_0 : i32, i32, i32
  }
  func.func @transform_10(%arg0: i32) -> (i32, i32) {
    %c0_i32 = arith.constant 0 : i32
    %c0_i32_0 = arith.constant 0 : i32
    %c0_i32_1 = arith.constant 0 : i32
    return %c0_i32, %c0_i32_0 : i32, i32
  }
  func.func @transform_11(%arg0: i32) -> (i32, i32) {
    %c0_i32 = arith.constant 0 : i32
    %c0_i32_0 = arith.constant 0 : i32
    %c0_i32_1 = arith.constant 0 : i32
    return %c0_i32, %c0_i32_0 : i32, i32
  }
  func.func @transform_12(%arg0: i32) -> (i32, i32) {
    %c0_i32 = arith.constant 0 : i32
    %c0_i32_0 = arith.constant 0 : i32
    %c0_i32_1 = arith.constant 0 : i32
    return %c0_i32, %c0_i32_0 : i32, i32
  }
  func.func @transform_13(%arg0: i32) -> (i32, i32) {
    %c0_i32 = arith.constant 0 : i32
    %c0_i32_0 = arith.constant 0 : i32
    %c0_i32_1 = arith.constant 0 : i32
    return %c0_i32, %c0_i32_0 : i32, i32
  }
  func.func @transform_14(%arg0: i32) -> (i32, i32) {
    %c0_i32 = arith.constant 0 : i32
    %c0_i32_0 = arith.constant 0 : i32
    %c0_i32_1 = arith.constant 0 : i32
    return %c0_i32, %c0_i32_0 : i32, i32
  }
  func.func @transform_15(%arg0: i32) -> (i32, i32) {
    %c0_i32 = arith.constant 0 : i32
    %c0_i32_0 = arith.constant 0 : i32
    %c0_i32_1 = arith.constant 0 : i32
    return %c0_i32, %c0_i32_0 : i32, i32
  }
  func.func @transform_16(%arg0: i32) -> (i32, i32) {
    %c0_i32 = arith.constant 0 : i32
    %c0_i32_0 = arith.constant 0 : i32
    %c0_i32_1 = arith.constant 0 : i32
    return %c0_i32, %c0_i32_0 : i32, i32
  }
  func.func @transform_17(%arg0: i32) -> (i32, i32) {
    %c0_i32 = arith.constant 0 : i32
    %c0_i32_0 = arith.constant 0 : i32
    %c0_i32_1 = arith.constant 0 : i32
    return %c0_i32, %c0_i32_0 : i32, i32
  }
  func.func @transform_18(%arg0: i32) -> (i32, i32, i32) {
    %c0_i32 = arith.constant 0 : i32
    %c0_i32_0 = arith.constant 0 : i32
    %c0_i32_1 = arith.constant 0 : i32
    return %arg0, %c0_i32, %c0_i32_0 : i32, i32, i32
  }
  func.func @transform_19(%arg0: i32) -> (i32, i32, i32) {
    %c0_i32 = arith.constant 0 : i32
    %c0_i32_0 = arith.constant 0 : i32
    %c0_i32_1 = arith.constant 0 : i32
    return %arg0, %c0_i32, %c0_i32_0 : i32, i32, i32
  }
}

</mosaic_0001>

<bundles_post_ra>
// kernel: encoder_pos_forward.1
= control target key start
LH: loop header
LB: loop body
LE: loop exit
PB: predicated region body
PF: predicated region fallthrough
CT: control target
= control target key end

     0   :  { %s17033_s0 = inlined_call_operand.vmem [shape: bf16[4,256,72], index: 0, kind: input, shape index: {}]   ;;  %s17034_s1 = inlined_call_operand.vmem [shape: bf16[4,256,144], index: 1, kind: input, shape index: {}]   ;;  %s17035_s2 = inlined_call_operand.vmem [shape: bf16[4,256,288], index: 2, kind: input, shape index: {}]   ;;  %s17036_s3 = inlined_call_operand.vmem [shape: bf16[4,256,576], index: 3, kind: input, shape index: {}]   ;;  %s17037_s4 = inlined_call_operand.vmem [shape: bf16[72,32], index: 4, kind: input, shape index: {}]   ;;  %s17038_s5 = inlined_call_operand.vmem [shape: bf16[144,32], index: 5, kind: input, shape index: {}]   ;;  %s17039_s6 = inlined_call_operand.vmem [shape: bf16[288,32], index: 6, kind: input, shape index: {}]   ;;  %s17040_s7 = inlined_call_operand.vmem [shape: bf16[576,32], index: 7, kind: input, shape index: {}]   ;;  %s17041_s8 = inlined_call_operand.vmem [shape: f32[4,1,32], index: 8, kind: input, shape index: {}]   ;;  %s17042_s9 = inlined_call_operand.vmem [shape: f32[4,32,256], index: 9, kind: input, shape index: {}]   ;;  %s17043_s10 = inlined_call_operand.vmem [shape: bf16[32,8], index: 10, kind: input, shape index: {}]   ;;  %s17044_s11 = inlined_call_operand.vmem [shape: f32[1,8], index: 11, kind: input, shape index: {}]   ;;  %s17045_s12 = inlined_call_operand.vmem [shape: bf16[8,32], index: 12, kind: input, shape index: {}]   ;;  %s17046_s13 = inlined_call_operand.vmem [shape: f32[8,1], index: 13, kind: input, shape index: {}]   ;;  %s17047_s14 = inlined_call_operand.vmem [shape: bf16[32,32], index: 14, kind: input, shape index: {}]   ;;  %s17048_s15 = inlined_call_operand.vmem [shape: f32[32,1], index: 15, kind: input, shape index: {}]   ;;  %s17049_s16 = inlined_call_operand.vmem [shape: f32[8,256], index: 16, kind: input, shape index: {}]   ;;  %s17050_s17 = inlined_call_operand.<no memory space> [shape: f32[1,1], index: 17, kind: input, shape index: {}]   ;;  %s17051_s18 = inlined_call_operand.vmem [shape: f32[4,32,256], index: 18, kind: output, shape index: {0}]   ;;  %s17052_s19 = inlined_call_operand.hbm [shape: f32[4,256,256], index: 19, kind: output, shape index: {1}]  }
   0x1   :  { %17109 = sst [smem:[#allocation112_spill]] %s17033_s0 }
   0x2   :  { %17110 = sst [smem:[#allocation113_spill]] %s17034_s1 }
   0x3   :  { %17111 = sst [smem:[#allocation114_spill]] %s17035_s2 }
   0x4   :  { %17112 = sst [smem:[#allocation115_spill]] %s17036_s3 }
   0x5   :  { %17113 = sst [smem:[#allocation116_spill]] %s17037_s4 }
   0x6   :  { %25 = sst [smem:[#allocation2]] %s17050_s17 }
   0x7   :  { %26 = vsyncpa [#allocation4], 0 }
   0x8   :  { %28 = vsyncpa [#allocation4 + $0x1], 0  ;;  %s12076_s20 = smov 0   ;;  %s12078_s21 = smov 0  }
   0x9   :  { %s12080_s1 = smov 0   ;;  %s12082_s22 = smov 0  }
   0xa LB: > { %17114 = sst [smem:[#allocation6_spill]] %s11956_s20  ;;  %s12097_s17 = sadd.s32 4294967295, %s11968_s22   ;;  %s11968_s22 = sphi %s12082_s22, %s17647_s22   ;;  %s11964_s1 = sphi %s12080_s1, %s17649_s1   ;;  %s11960_s21 = sphi %s12078_s21, %s17651_s21   ;;  %s11956_s20 = sphi %s12076_s20, %s17650_s20  }
   0xb   : > { %17115 = sst [smem:[#allocation7_spill]] %s11964_s1  ;;  %s8963_s2 = sadd.s32 4294967294, %s11968_s22  }
   0xc   : > { %17116 = sst [smem:[#allocation8_spill]] %s11968_s22  ;;  %s12101_s23 = sadd.s32 1, %s11968_s22  }
   0xd   : > { %17117 = sst [smem:[#allocation9_spill]] %s12101_s23  ;;  %s470_s24 = sadd.s32 1, %s11964_s1 }
   0xe   : > { %s467_s25 = ssub.s32 %s11968_s22, %s12101_s23  ;;  %p480_p0 = scmp.ne.s32.totalorder %s11964_s1, %s11960_s21 }
   0xf   : > { %p468_p1 = scmp.eq.s32.totalorder %s467_s25, 0  ;;  %p481_p2 = scmp.eq.s32.totalorder %s12097_s17, 1 }
  0x10   : > { %p486_p3 = scmp.ne.s32.totalorder %s11960_s21, %s11956_s20  ;;  %p487_p4 = scmp.eq.s32.totalorder %s8963_s2, 1 }
  0x11   : > { %s12112_s3 = scalar_select %p468_p1, %s11964_s1, %s470_s24  }
  0x12   : > { %p12114_p5 = por %p481_p2, %p480_p0  ;;  %p12118_p6 = por %p487_p4, %p486_p3 }
  0x13   : > { %17118 = sst [smem:[#allocation10_spill]] %s12112_s3  ;;  %p8966_p7 = scmp.ge.s32.totalorder %s11968_s22, 1 }
  0x14   : > { %s17120_s27 = scalar_select %p12118_p6, 1, 0 }
  0x15   : > { %p594_p8 = scmp.lt.s32.totalorder %s11968_s22, 3 }
  0x16   : > { %17121 = sst [smem:[#allocation11_spill]] %s17120_s27 }
  0x17   : > { %p595_p9 = pnand %p8966_p7, %p594_p8 }
  0x19   : > { %598 = sbr.rel (%p595_p9) target bundleno = 3605 (0xe15), region = 92 }
  0x1e   : > { %v11120_v0 = vld [vmem:[%s17038_s5 + $0x38] sm:$0xff]  ;;  %s17122_s4 = sld [smem:[#allocation116_spill]]  ;;  %s8968_s2 = sshll.u32 %s12097_s17, 1  ;;  %v11121_v3 = vld [vmem:[%s17038_s5 + $0x40] sm:$0xff]  ;;  %vm1086_vm0 = vcmask 1043456   ;;  %v11119_v4 = vld [vmem:[%s17038_s5 + $0x30] sm:$0xff] }
  0x1f   : > { %p682_p10 = scmp.lt.s32.totalorder %s8968_s2, 3  ;;  %1849 = vmatpush.bf16.msra.mxu1 %v11120_v0  ;;  %v11225_v5 = vld [vmem:[%s17039_s6 + $0x38] sm:$0xff]  ;;  %11440 = vmatpush.bf16.msra.mxu2 %v11121_v3  ;;  %v11224_v7 = vld [vmem:[%s17039_s6 + $0x30] sm:$0xff]  ;;  %s17123_s29 = sld [smem:[#allocation113_spill]]  ;;  %vm1752_vm1 = vcmask 130048   ;;  %v11118_v10 = vld [vmem:[%s17038_s5 + $0x28] sm:$0xff] }
  0x20   : > { %11441 = vmatpush.bf16.msra.mxu3 %v11121_v3  ;;  %v11223_v16 = vld [vmem:[%s17039_s6 + $0x28] sm:$0xff]  ;;  %v11117_v19 = vld [vmem:[%s17038_s5 + $0x20] sm:$0xff]  ;;  %v11116_v22 = vld [vmem:[%s17038_s5 + $0x18] sm:$0xff]  ;;  %s17124_s20 = sld [smem:[#allocation112_spill]]  ;;  %vm989_vm2 = vcmask 588800   ;;  %vm3072_vm3 = vcmask 261120  }
  0x21   : > { %s17653_s2 = smov (!%p682_p10, %s8968_s2), 3  ;;  %v11222_v20 = vld [vmem:[%s17039_s6 + $0x20] sm:$0xff]  ;;  %v11221_v23 = vld [vmem:[%s17039_s6 + $0x18] sm:$0xff]  ;;  %v11115_v25 = vld [vmem:[%s17038_s5 + $0x10] sm:$0xff]  ;;  %vm5089_vm4 = vcmask 523264   ;;  %vm6757_vm5 = vcmask 64512  }
  0x22   : > { %s11010_s24 = sshll.u32 %s17653_s2, 8  ;;  %s11009_s28 = sshll.u32 %s17653_s2, 7  ;;  %v11220_v30 = vld [vmem:[%s17039_s6 + $0x10] sm:$0xff]  ;;  %v11114_v34 = vld [vmem:[%s17038_s5 + $0x8] sm:$0xff]  ;;  %v11113_v36 = vld [vmem:[%s17038_s5] sm:$0xff] }
  0x23   : > { %1850 = vmatpush.bf16.msra.mxu1 %v11119_v4  ;;  %v11219_v35 = vld [vmem:[%s17039_s6 + $0x8] sm:$0xff]  ;;  %v11218_v39 = vld [vmem:[%s17039_s6] sm:$0xff]  ;;  %s11442_s27 = smul.u32 384, %s17653_s2  ;;  %s11011_s1 = sshll.u32 %s17653_s2, 6 }
  0x24   : > { %v797_v1 = vld [vmem:[%s17122_s4 + $0x20] sm:$0xf]  ;;  %3169 = vmatpush.bf16.msrb.mxu3 %v11225_v5  ;;  %v11048_v9 = vld [vmem:[%s17122_s4 + $0x18] sm:$0xff]  ;;  %v11047_v18 = vld [vmem:[%s17122_s4 + $0x10] sm:$0xff]  ;;  %s14614_s25 = scalar_lea.vmem %s17042_s9, %s11011_s1 }
  0x25   : > { %v979_v2 = vunpack.c.l.b16 %v797_v1  ;;  %s12153_s23 = scalar_lea.vmem %s17123_s29, %s11010_s24  ;;  %v11046_v21 = vld [vmem:[%s17122_s4 + $0x8] sm:$0xff]  ;;  %v11045_v24 = vld [vmem:[%s17122_s4] sm:$0xff]  ;;  %s6542_s29 = sld [smem:[#allocation2]] }
  0x26   : > { %v11051_v11 = vld [vmem:[%s12153_s23 + $0x14] sm:$0xf]  ;;  %v9173_v12 = vld [vmem:[%s12153_s23 + $0x18] sm:$0xf0]  ;;  %v11109_v13 = vld [vmem:[%s12153_s23 + $0x1e4] sm:$0xf]  ;;  %s12192_s22 = scalar_lea.vmem %s17124_s20, %s11009_s28 }
  0x27   : > { %v984_v6 = vpack.c.b16 %v979_v2, %v979_v2  ;;  %v9176_v14 = vor.u32 %v11051_v11, %v9173_v12  ;;  %v9405_v15 = vld [vmem:[%s12153_s23 + $0x1e8] sm:$0xf0]  ;;  %1851 = vmatpush.bf16.msra.mxu1 %v11118_v10  ;;  %v11053_v26 = vld [vmem:[%s12153_s23 + $0x24] sm:$0xf]  ;;  %v11111_v28 = vld [vmem:[%s12153_s23 + $0x1f4] sm:$0xf] }
  0x28   : > { %3170 = vmatpush.bf16.msrb.mxu3 %v11224_v7  ;;  %v9408_v17 = vor.u32 %v11109_v13, %v9405_v15  ;;  %v9181_v27 = vld [vmem:[%s12153_s23 + $0x28] sm:$0xf0]  ;;  %v9413_v29 = vld [vmem:[%s12153_s23 + $0x1f8] sm:$0xf0]  ;;  %v11013_v31 = vld [vmem:[%s12192_s22] sm:$0xff]  ;;  %s17125_s28 = sld [smem:[#allocation114_spill]] }
  0x29   : > { %v1088_v8 = vsel %vm1086_vm0, %v984_v6, 0  ;;  %9454 = vmatmul.msk.bf16.vlgmr.msra.gmra.mxu2 %vm1752_vm1, %v9176_v14  ;;  %v9184_v32 = vor.u32 %v11053_v26, %v9181_v27  ;;  %v9416_v33 = vor.u32 %v11111_v28, %v9413_v29  ;;  %v9163_v37 = vld [vmem:[%s12153_s23] sm:$0xf]  ;;  %v11050_v38 = vld [vmem:[%s12153_s23 + $0x4] sm:$0xf0]  ;;  %v11015_v55 = vld [vmem:[%s12192_s22 + $0x10] sm:$0xff] }
  0x2a   : > { %1093 = vmatpush.bf16.msra.mxu0 %v1088_v8  ;;  %9483 = vmatmul.msk.bf16.vlgmr.msra.gmra.mxu3 %vm1752_vm1, %v9408_v17  ;;  %v9164_v40 = vor.u32 %v11050_v38, %v9163_v37  ;;  %v11055_v41 = vld [vmem:[%s12153_s23 + $0x34] sm:$0xf]  ;;  %v9189_v42 = vld [vmem:[%s12153_s23 + $0x38] sm:$0xf0]  ;;  %v11014_v45 = vld [vmem:[%s12192_s22 + $0x8] sm:$0xff]  ;;  %s17188_s20 = sld [smem:[#allocation115_spill]] }
  0x2b   : > { %1852 = vmatpush.bf16.msra.mxu1 %v11117_v19  ;;  %v9192_v46 = vor.u32 %v11055_v41, %v9189_v42  ;;  %v9171_v48 = vld [vmem:[%s12153_s23 + $0x10] sm:$0xf]  ;;  %v11052_v49 = vld [vmem:[%s12153_s23 + $0x14] sm:$0xf0]  ;;  %v11057_v51 = vld [vmem:[%s12153_s23 + $0x44] sm:$0xf] }
  0x2c   : > { %3171 = vmatpush.bf16.msrb.mxu3 %v11223_v16  ;;  %v9172_v50 = vor.u32 %v11052_v49, %v9171_v48  ;;  %v9197_v52 = vld [vmem:[%s12153_s23 + $0x48] sm:$0xf0]  ;;  %v9179_v58 = vld [vmem:[%s12153_s23 + $0x20] sm:$0xf]  ;;  %v11054_v59 = vld [vmem:[%s12153_s23 + $0x24] sm:$0xf0] }
  0x2d   : > { %v9200_v56 = vor.u32 %v11057_v51, %v9197_v52  ;;  %v9180_v60 = vor.u32 %v11054_v59, %v9179_v58  ;;  %v11059_v61 = vld [vmem:[%s12153_s23 + $0x54] sm:$0xf]  ;;  %v9205_v62 = vld [vmem:[%s12153_s23 + $0x58] sm:$0xf0]  ;;  %v9187_v4 = vld [vmem:[%s12153_s23 + $0x30] sm:$0xf] }
  0x2e   : > { %1094 = vmatpush.bf16.msra.mxu0 %v11048_v9  ;;  %s12226_s0 = scalar_lea.vmem %s17125_s28, %s11442_s27  ;;  %v11016_v1 = vld [vmem:[%s12192_s22 + $0x18] sm:$0xff]  ;;  %v9208_v2 = vor.u32 %v11059_v61, %v9205_v62  ;;  %v11061_v7 = vld [vmem:[%s12153_s23 + $0x64] sm:$0xf]  ;;  %v9213_v8 = vld [vmem:[%s12153_s23 + $0x68] sm:$0xf0] }
  0x2f   : > { %1853 = vmatpush.bf16.msra.mxu1 %v11116_v22  ;;  %v9488_v43 = vld [vmem:[%s12226_s0] sm:$0xf]  ;;  %v11123_v44 = vld [vmem:[%s12226_s0 + $0x8] sm:$0xf0]  ;;  %v9500_v53 = vld [vmem:[%s12226_s0 + $0x18] sm:$0xf]  ;;  %v9216_v12 = vor.u32 %v11061_v7, %v9213_v8 }
  0x30   : > { %3172 = vmatpush.bf16.msrb.mxu3 %v11222_v20  ;;  %v9489_v47 = vor.u32 %v11123_v44, %v9488_v43  ;;  %v11126_v54 = vld [vmem:[%s12226_s0 + $0x20] sm:$0xf0]  ;;  %v9512_v63 = vld [vmem:[%s12226_s0 + $0x30] sm:$0xf]  ;;  %v11129_v0 = vld [vmem:[%s12226_s0 + $0x38] sm:$0xf0] }
  0x31   : > { %v9501_v57 = vor.u32 %v11126_v54, %v9500_v53  ;;  %v11056_v5 = vld [vmem:[%s12153_s23 + $0x34] sm:$0xf0]  ;;  %v9524_v9 = vld [vmem:[%s12226_s0 + $0x48] sm:$0xf]  ;;  %v11132_v10 = vld [vmem:[%s12226_s0 + $0x50] sm:$0xf0] }
  0x32   : > { %1095 = vmatpush.bf16.msra.mxu0 %v11047_v18  ;;  %v9188_v6 = vor.u32 %v11056_v5, %v9187_v4  ;;  %v11017_v11 = vld [vmem:[%s12192_s22 + $0x20] sm:$0xff]  ;;  %v9525_v13 = vor.u32 %v11132_v10, %v9524_v9  ;;  %v11058_v15 = vld [vmem:[%s12153_s23 + $0x44] sm:$0xf0]  ;;  %v11063_v17 = vld [vmem:[%s12153_s23 + $0x74] sm:$0xf] }
  0x33   : > { %1854 = vmatpush.bf16.msra.mxu1 %v11115_v25  ;;  %v9195_v14 = vld [vmem:[%s12153_s23 + $0x40] sm:$0xf]  ;;  %v9221_v18 = vld [vmem:[%s12153_s23 + $0x78] sm:$0xf0]  ;;  %v11135_v20 = vld [vmem:[%s12226_s0 + $0x68] sm:$0xf0] }
  0x34   : > { %3173 = vmatpush.bf16.msrb.mxu3 %v11221_v23  ;;  %v9196_v16 = vor.u32 %v11058_v15, %v9195_v14  ;;  %v9536_v19 = vld [vmem:[%s12226_s0 + $0x60] sm:$0xf]  ;;  %v9224_v22 = vor.u32 %v11063_v17, %v9221_v18  ;;  %v11060_v25 = vld [vmem:[%s12153_s23 + $0x54] sm:$0xf0]  ;;  %v11065_v27 = vld [vmem:[%s12153_s23 + $0x84] sm:$0xf] }
  0x35   : > { %v9537_v23 = vor.u32 %v11135_v20, %v9536_v19  ;;  %v9229_v28 = vld [vmem:[%s12153_s23 + $0x88] sm:$0xf0]  ;;  %v9548_v29 = vld [vmem:[%s12226_s0 + $0x78] sm:$0xf]  ;;  %v11067_v37 = vld [vmem:[%s12153_s23 + $0x94] sm:$0xf] }
  0x36   : > { %1096 = vmatpush.bf16.msra.mxu0 %v11046_v21  ;;  %v11018_v21 = vld [vmem:[%s12192_s22 + $0x28] sm:$0xff]  ;;  %v9237_v38 = vld [vmem:[%s12153_s23 + $0x98] sm:$0xf0]  ;;  %v9219_v44 = vld [vmem:[%s12153_s23 + $0x70] sm:$0xf] }
  0x37   : > { %1855 = vmatpush.bf16.msra.mxu1 %v11114_v34  ;;  %v9211_v34 = vld [vmem:[%s12153_s23 + $0x60] sm:$0xf]  ;;  %v11020_v41 = vld [vmem:[%s12192_s22 + $0x38] sm:$0xff]  ;;  %v9240_v42 = vor.u32 %v11067_v37, %v9237_v38  ;;  %v11069_v49 = vld [vmem:[%s12153_s23 + $0xa4] sm:$0xf] }
  0x38   : > { %3174 = vmatpush.bf16.msrb.mxu3 %v11220_v30  ;;  %v11138_v30 = vld [vmem:[%s12226_s0 + $0x80] sm:$0xf0]  ;;  %v9572_v51 = vld [vmem:[%s12226_s0 + $0xa8] sm:$0xf]  ;;  %v11144_v52 = vld [vmem:[%s12226_s0 + $0xb0] sm:$0xf0] }
  0x39   : > { %9455 = vmatmul.msk.bf16.gmra.mxu2 %vm1752_vm1, %v9184_v32  ;;  %v9232_v32 = vor.u32 %v11065_v27, %v9229_v28  ;;  %v11021_v54 = vld [vmem:[%s12192_s22 + $0x40] sm:$0xff]  ;;  %v9573_v58 = vor.u32 %v11144_v52, %v9572_v51  ;;  %v11147_v5 = vld [vmem:[%s12226_s0 + $0xc8] sm:$0xf0]  ;;  %v11068_v14 = vld [vmem:[%s12153_s23 + $0x94] sm:$0xf0] }
  0x3a   : > { %1097 = vmatpush.bf16.msra.mxu0 %v11045_v24  ;;  %9484 = vmatmul.msk.bf16.gmra.mxu3 %vm1752_vm1, %v9416_v33  ;;  %v9203_v24 = vld [vmem:[%s12153_s23 + $0x50] sm:$0xf]  ;;  %v9549_v33 = vor.u32 %v11138_v30, %v9548_v29  ;;  %v9227_v59 = vld [vmem:[%s12153_s23 + $0x80] sm:$0xf]  ;;  %v11022_v7 = vld [vmem:[%s12192_s22 + $0x48] sm:$0xff] }
  0x3b   : > { %1856 = vmatpush.bf16.msra.mxu1 %v11113_v36  ;;  %v9204_v26 = vor.u32 %v11060_v25, %v9203_v24  ;;  %v9584_v4 = vld [vmem:[%s12226_s0 + $0xc0] sm:$0xf]  ;;  %v11073_v25 = vld [vmem:[%s12153_s23 + $0xc4] sm:$0xf]  ;;  %v9596_v29 = vld [vmem:[%s12226_s0 + $0xd8] sm:$0xf] }
  0x3c   : > { %3175 = vmatpush.bf16.msrb.mxu3 %v11219_v35  ;;  %v11062_v35 = vld [vmem:[%s12153_s23 + $0x64] sm:$0xf0]  ;;  %v12339_v17 = vld [vmem:[%s17041_s8 + $0x1] ss:$0 sm:$0xff]  ;;  %v11150_v30 = vld [vmem:[%s12226_s0 + $0xe0] sm:$0xf0] }
  0x3d   : > { %9128 = vmatmul.msk.bf16.vlgmr.msra.gmra.mxu0 %vm989_vm2, %v11013_v31  ;;  %v11019_v31 = vld [vmem:[%s12192_s22 + $0x30] sm:$0xff]  ;;  %v9212_v36 = vor.u32 %v11062_v35, %v9211_v34  ;;  %v9597_v38 = vor.u32 %v11150_v30, %v9596_v29 }
  0x3e   : > { %2025 = vmatpush.bf16.msrb.mxu0 %v11121_v3  ;;  %1857 = vmatmul.bf16.vlgmr.msra.gmra.mxu1 %v9164_v40  ;;  %v9513_v3 = vor.u32 %v11129_v0, %v9512_v63  ;;  %v11141_v40 = vld [vmem:[%s12226_s0 + $0x98] sm:$0xf0] }
  0x40   : > { %3176 = vmatpush.bf16.msrb.mxu3 %v11218_v39  ;;  %v9560_v39 = vld [vmem:[%s12226_s0 + $0x90] sm:$0xf] }
  0x41   : > { %v9561_v43 = vor.u32 %v11141_v40, %v9560_v39 }
  0x49   : > { %9456 = vmatmul.msk.bf16.gmra.mxu2 %vm1752_vm1, %v9192_v46 }
  0x4a   : > { %3177 = vmatmul.bf16.vlgmr.msrb.gmra.mxu3 %v9489_v47 }
  0x4d   : > { %9129 = vmatmul.msk.bf16.gmra.mxu0 %vm989_vm2, %v11014_v45  ;;  %v11064_v45 = vld [vmem:[%s12153_s23 + $0x74] sm:$0xf0] }
  0x4e   : > { %1862 = vmatmul.bf16.gmra.mxu1 %v9172_v50  ;;  %v9220_v48 = vor.u32 %v11064_v45, %v9219_v44  ;;  %v9245_v50 = vld [vmem:[%s12153_s23 + $0xa8] sm:$0xf0] }
  0x59   : > { %9457 = vmatmul.msk.bf16.gmra.mxu2 %vm1752_vm1, %v9200_v56 }
  0x5a   : > { %3182 = vmatmul.bf16.gmra.mxu3 %v9501_v57  ;;  %v9248_v57 = vor.u32 %v11069_v49, %v9245_v50 }
  0x5d   : > { %9130 = vmatmul.msk.bf16.gmra.mxu0 %vm989_vm2, %v11015_v55 }
  0x5e   : > { %1867 = vmatmul.bf16.gmra.mxu1 %v9180_v60  ;;  %v11066_v60 = vld [vmem:[%s12153_s23 + $0x84] sm:$0xf0] }
  0x5f   : > { %v9228_v0 = vor.u32 %v11066_v60, %v9227_v59  ;;  %v9269_v59 = vld [vmem:[%s12153_s23 + $0xd8] sm:$0xf0] }
  0x69   : > { %9458 = vmatmul.msk.bf16.gmra.mxu2 %vm1752_vm1, %v9208_v2  ;;  %v11071_v2 = vld [vmem:[%s12153_s23 + $0xb4] sm:$0xf] }
  0x6a   : > { %3187 = vmatmul.bf16.gmra.mxu3 %v9513_v3  ;;  %v9253_v3 = vld [vmem:[%s12153_s23 + $0xb8] sm:$0xf0] }
  0x6b   : > { %v9256_v10 = vor.u32 %v11071_v2, %v9253_v3  ;;  %v9608_v2 = vld [vmem:[%s12226_s0 + $0xf0] sm:$0xf]  ;;  %v11153_v3 = vld [vmem:[%s12226_s0 + $0xf8] sm:$0xf0] }
  0x6d   : > { %9131 = vmatmul.msk.bf16.gmra.mxu0 %vm989_vm2, %v11016_v1 }
  0x6e   : > { %1872 = vmatmul.bf16.gmra.mxu1 %v9188_v6 }
  0x79   : > { %9459 = vmatmul.msk.bf16.gmra.mxu2 %vm1752_vm1, %v9216_v12  ;;  %v9585_v12 = vor.u32 %v11147_v5, %v9584_v4  ;;  %v11024_v5 = vld [vmem:[%s12192_s22 + $0x58] sm:$0xff] }
  0x7a   : > { %3192 = vmatmul.bf16.gmra.mxu3 %v9525_v13  ;;  %v9235_v13 = vld [vmem:[%s12153_s23 + $0x90] sm:$0xf] }
  0x7b   : > { %v9236_v20 = vor.u32 %v11068_v14, %v9235_v13 }
  0x7d   : > { %9132 = vmatmul.msk.bf16.gmra.mxu0 %vm989_vm2, %v11017_v11 }
  0x7e   : > { %1877 = vmatmul.bf16.gmra.mxu1 %v9196_v16  ;;  %v12334_v16 = vld [vmem:[%s17041_s8] ss:$0 sm:$0xff] }
  0x89   : > { %9460 = vmatmul.msk.bf16.gmra.mxu2 %vm1752_vm1, %v9224_v22 }
  0x8a   : > { %3197 = vmatmul.bf16.gmra.mxu3 %v9537_v23 }
  0x8d   : > { %9133 = vmatmul.msk.bf16.gmra.mxu0 %vm989_vm2, %v11018_v21 }
  0x8e   : > { %1882 = vmatmul.bf16.gmra.mxu1 %v9204_v26  ;;  %v9261_v26 = vld [vmem:[%s12153_s23 + $0xc8] sm:$0xf0] }
  0x8f   : > { %v9264_v35 = vor.u32 %v11073_v25, %v9261_v26 }
  0x99   : > { %9461 = vmatmul.msk.bf16.gmra.mxu2 %vm1752_vm1, %v9232_v32  ;;  %v11023_v32 = vld [vmem:[%s12192_s22 + $0x50] sm:$0xff] }
  0x9a   : > { %3202 = vmatmul.bf16.gmra.mxu3 %v9549_v33 }
  0x9d   : > { %9134 = vmatmul.msk.bf16.gmra.mxu0 %vm989_vm2, %v11019_v31 }
  0x9e   : > { %1887 = vmatmul.bf16.gmra.mxu1 %v9212_v36 }
  0xa9   : > { %9462 = vmatmul.msk.bf16.gmra.mxu2 %vm1752_vm1, %v9240_v42  ;;  %v9243_v42 = vld [vmem:[%s12153_s23 + $0xa0] sm:$0xf] }
  0xaa   : > { %3207 = vmatmul.bf16.gmra.mxu3 %v9561_v43  ;;  %v11070_v43 = vld [vmem:[%s12153_s23 + $0xa4] sm:$0xf0] }
  0xab   : > { %v9244_v50 = vor.u32 %v11070_v43, %v9243_v42  ;;  %v11025_v43 = vld [vmem:[%s12192_s22 + $0x60] sm:$0xff] }
  0xac   : > { %v2032_v46 = vpop.f32.mrf.mxu2 }
  0xad   : > { %9135 = vmatmul.msk.bf16.gmra.mxu0 %vm989_vm2, %v11020_v41  ;;  %v12291_v47 = vpop.f32.mrf.mxu3 }
  0xae   : > { %1892 = vmatmul.bf16.gmra.mxu1 %v9220_v48 }
  0xb4   : > { %v2034_v53 = vpop.f32.mrf.mxu2 }
  0xb5   : > { %v12298_v55 = vpop.f32.mrf.mxu3 }
  0xb9   : > { %9463 = vmatmul.msk.bf16.gmra.mxu2 %vm1752_vm1, %v9248_v57 }
  0xba   : > { %v12300_v56 = vpop.f32.mrf.mxu0  ;;  %3212 = vmatmul.bf16.gmra.mxu3 %v9573_v58  ;;  %v11075_v58 = vld [vmem:[%s12153_s23 + $0xd4] sm:$0xf] }
  0xbb   : > { %v12312_v1 = vpop.f32.mrf.mxu1 }
  0xbc   : > { %v12306_v61 = vpop.f32.mrf.mxu2 }
  0xbd   : > { %9136 = vmatmul.msk.bf16.gmra.mxu0 %vm989_vm2, %v11021_v54  ;;  %v12308_v62 = vpop.f32.mrf.mxu3 }
  0xbe   : > { %1897 = vmatmul.bf16.gmra.mxu1 %v9228_v0 }
  0xc2   : > { %v12310_v63 = vpop.f32.mrf.mxu0 }
  0xc3   : > { %v12323_v11 = vpop.f32.mrf.mxu1 }
  0xc4   : > { %v12318_v6 = vpop.f32.mrf.mxu2 }
  0xc5   : > { %v12321_v8 = vpop.f32.mrf.mxu3 }
  0xc9   : > { %9464 = vmatmul.msk.bf16.gmra.mxu2 %vm1752_vm1, %v9256_v10  ;;  %v9272_v10 = vor.u32 %v11075_v58, %v9269_v59  ;;  %v9259_v58 = vld [vmem:[%s12153_s23 + $0xc0] sm:$0xf]  ;;  %v11074_v59 = vld [vmem:[%s12153_s23 + $0xc4] sm:$0xf0] }
  0xca   : > { %v1104_v9 = vpop.f32.mrf.mxu0  ;;  %3217 = vmatmul.bf16.gmra.mxu3 %v9585_v12 }
  0xcb   : > { %v1863_v21 = vpop.f32.mrf.mxu1  ;;  %v1105_v22 = vadd.f32 %v12334_v16, %v1104_v9 }
  0xcc   : > { %v12329_v15 = vpop.f32.mrf.mxu2  ;;  %v1864_v23 = vadd.f32 %v12339_v17, %v1863_v21  ;;  %v9251_v21 = vld [vmem:[%s12153_s23 + $0xb0] sm:$0xf] }
  0xcd   : > { %9137 = vmatmul.msk.bf16.gmra.mxu0 %vm989_vm2, %v11022_v7  ;;  %v12341_v18 = vpop.f32.mrf.mxu3  ;;  %v1261_v27 = vmax.f32 %v1105_v22, 0.0  ;;  %v11072_v22 = vld [vmem:[%s12153_s23 + $0xb4] sm:$0xf0] }
  0xce   : > { %v2033_v24 = vadd.f32 %v2032_v46, %v1864_v23  ;;  %1902 = vmatmul.bf16.gmra.mxu1 %v9236_v20 }
  0xd0   : > { %v2189_v28 = vmax.f32 %v2033_v24, 0.0 }
  0xd2   : > { %v1106_v19 = vpop.f32.mrf.mxu0  ;;  %v12354_v36 = vadd.f32 %v2189_v28, %v1261_v27  ;;  %v9252_v28 = vor.u32 %v11072_v22, %v9251_v21 }
  0xd3   : > { %v1865_v37 = vpop.f32.mrf.mxu1  ;;  %v1107_v39 = vadd.f32 %v12334_v16, %v1106_v19 }
  0xd4   : > { %v12349_v31 = vpop.f32.mrf.mxu2  ;;  %v1866_v40 = vadd.f32 %v12339_v17, %v1865_v37  ;;  %v9277_v37 = vld [vmem:[%s12153_s23 + $0xe8] sm:$0xf0] }
  0xd5   : > { %v12352_v33 = vpop.f32.mrf.mxu3  ;;  %v1262_v44 = vmax.f32 %v1107_v39, 0.0 }
  0xd6   : > { %v2035_v41 = vadd.f32 %v2034_v53, %v1866_v40  ;;  %v9620_v40 = vld [vmem:[%s12226_s0 + $0x108] sm:$0xf] }
  0xd8   : > { %v2190_v45 = vmax.f32 %v2035_v41, 0.0  ;;  %v11156_v41 = vld [vmem:[%s12226_s0 + $0x110] sm:$0xf0] }
  0xd9   : > { %9465 = vmatmul.msk.bf16.gmra.mxu2 %vm1752_vm1, %v9264_v35  ;;  %v11077_v35 = vld [vmem:[%s12153_s23 + $0xe4] sm:$0xf] }
  0xda   : > { %v1109_v34 = vpop.f32.mrf.mxu0  ;;  %3222 = vmatmul.bf16.gmra.mxu3 %v9597_v38  ;;  %v12366_v51 = vadd.f32 %v2190_v45, %v1262_v44 }
  0xdb   : > { %v1868_v52 = vpop.f32.mrf.mxu1  ;;  %v1110_v53 = vadd.f32 %v12334_v16, %v1109_v34 }
  0xdc   : > { %v12362_v46 = vpop.f32.mrf.mxu2  ;;  %v1869_v54 = vadd.f32 %v12339_v17, %v1868_v52 }
  0xdd   : > { %9138 = vmatmul.msk.bf16.gmra.mxu0 %vm989_vm2, %v11023_v32  ;;  %v12364_v48 = vpop.f32.mrf.mxu3  ;;  %v1263_v60 = vmax.f32 %v1110_v53, 0.0 }
  0xde   : > { %v2038_v57 = vadd.f32 %v12306_v61, %v1869_v54  ;;  %1907 = vmatmul.bf16.gmra.mxu1 %v9244_v50  ;;  %v9609_v61 = vor.u32 %v11153_v3, %v9608_v2 }
  0xe0   : > { %v2191_v0 = vmax.f32 %v2038_v57, 0.0 }
  0xe2   : > { %v1111_v49 = vpop.f32.mrf.mxu0  ;;  %v12380_v12 = vadd.f32 %v2191_v0, %v1263_v60 }
  0xe3   : > { %v1870_v13 = vpop.f32.mrf.mxu1  ;;  %v1112_v14 = vadd.f32 %v12334_v16, %v1111_v49  ;;  %v9280_v49 = vor.u32 %v11077_v35, %v9277_v37 }
  0xe4   : > { %v12375_v4 = vpop.f32.mrf.mxu2  ;;  %v1871_v19 = vadd.f32 %v12339_v17, %v1870_v13 }
  0xe5   : > { %v12378_v7 = vpop.f32.mrf.mxu3  ;;  %v1264_v23 = vmax.f32 %v1112_v14, 0.0 }
  0xe6   : > { %v2040_v20 = vadd.f32 %v12318_v6, %v1871_v19  ;;  %v11079_v19 = vld [vmem:[%s12153_s23 + $0xf4] sm:$0xf] }
  0xe8   : > { %v2192_v24 = vmax.f32 %v2040_v20, 0.0  ;;  %v9285_v20 = vld [vmem:[%s12153_s23 + $0xf8] sm:$0xf0] }
  0xe9   : > { %9466 = vmatmul.msk.bf16.gmra.mxu2 %vm1752_vm1, %v9272_v10 }
  0xea   : > { %v1114_v9 = vpop.f32.mrf.mxu0  ;;  %3227 = vmatmul.bf16.gmra.mxu3 %v9609_v61  ;;  %v12393_v29 = vadd.f32 %v2192_v24, %v1264_v23  ;;  %v9632_v23 = vld [vmem:[%s12226_s0 + $0x120] sm:$0xf]  ;;  %v11159_v24 = vld [vmem:[%s12226_s0 + $0x128] sm:$0xf0] }
  0xeb   : > { %v1873_v6 = vpop.f32.mrf.mxu1  ;;  %v1115_v30 = vadd.f32 %v12334_v16, %v1114_v9  ;;  %v9260_v9 = vor.u32 %v11074_v59, %v9259_v58 }
  0xec   : > { %v12389_v25 = vpop.f32.mrf.mxu2  ;;  %v1874_v32 = vadd.f32 %v12339_v17, %v1873_v6 }
  0xed   : > { %9139 = vmatmul.msk.bf16.gmra.mxu0 %vm989_vm2, %v11024_v5  ;;  %v12391_v26 = vpop.f32.mrf.mxu3  ;;  %v1265_v38 = vmax.f32 %v1115_v30, 0.0 }
  0xee   : > { %v2043_v34 = vadd.f32 %v12329_v15, %v1874_v32  ;;  %1912 = vmatmul.bf16.gmra.mxu1 %v9252_v28  ;;  %v9621_v15 = vor.u32 %v11156_v41, %v9620_v40  ;;  %v11026_v28 = vld [vmem:[%s12192_s22 + $0x68] sm:$0xff]  ;;  %v9288_v32 = vor.u32 %v11079_v19, %v9285_v20  ;;  %v9267_v40 = vld [vmem:[%s12153_s23 + $0xd0] sm:$0xf]  ;;  %v11076_v41 = vld [vmem:[%s12153_s23 + $0xd4] sm:$0xf0] }
  0xf0   : > { %v2193_v39 = vmax.f32 %v2043_v34, 0.0 }
  0xf2   : > { %v1116_v27 = vpop.f32.mrf.mxu0  ;;  %v12407_v50 = vadd.f32 %v2193_v39, %v1265_v38 }
  0xf3   : > { %v1875_v52 = vpop.f32.mrf.mxu1  ;;  %v1117_v53 = vadd.f32 %v12334_v16, %v1116_v27 }
  0xf4   : > { %v12402_v42 = vpop.f32.mrf.mxu2  ;;  %v1876_v54 = vadd.f32 %v12339_v17, %v1875_v52 }
  0xf5   : > { %v12405_v44 = vpop.f32.mrf.mxu3  ;;  %v1266_v60 = vmax.f32 %v1117_v53, 0.0  ;;  %v9268_v53 = vor.u32 %v11076_v41, %v9267_v40 }
  0xf6   : > { %v2045_v57 = vadd.f32 %v12349_v31, %v1876_v54 }
  0xf8   : > { %v2194_v0 = vmax.f32 %v2045_v57, 0.0 }
  0xf9   : > { %9467 = vmatmul.msk.bf16.gmra.mxu2 %vm1752_vm1, %v9280_v49 }
  0xfa   : > { %v1119_v45 = vpop.f32.mrf.mxu0  ;;  %3232 = vmatmul.bf16.gmra.mxu3 %v9621_v15  ;;  %v12420_v10 = vadd.f32 %v2194_v0, %v1266_v60  ;;  %v11081_v60 = vld [vmem:[%s12153_s23 + $0x104] sm:$0xf]  ;;  %v9293_v0 = vld [vmem:[%s12153_s23 + $0x108] sm:$0xf0] }
  0xfb   : > { %v1878_v31 = vpop.f32.mrf.mxu1  ;;  %v1120_v13 = vadd.f32 %v12334_v16, %v1119_v45 }
  0xfc   : > { %v12416_v2 = vpop.f32.mrf.mxu2  ;;  %v1879_v61 = vadd.f32 %v12339_v17, %v1878_v31  ;;  %v9644_v31 = vld [vmem:[%s12226_s0 + $0x138] sm:$0xf] }
  0xfd   : > { %9140 = vmatmul.msk.bf16.gmra.mxu0 %vm989_vm2, %v11025_v43  ;;  %v12418_v3 = vpop.f32.mrf.mxu3  ;;  %v1267_v21 = vmax.f32 %v1120_v13, 0.0  ;;  %v11162_v13 = vld [vmem:[%s12226_s0 + $0x140] sm:$0xf0] }
  0xfe   : > { %v2048_v14 = vadd.f32 %v12362_v46, %v1879_v61  ;;  %1917 = vmatmul.bf16.gmra.mxu1 %v9260_v9  ;;  %v9633_v46 = vor.u32 %v11159_v24, %v9632_v23 }
 0x100   : > { %v2195_v22 = vmax.f32 %v2048_v14, 0.0  ;;  %v11027_v14 = vld [vmem:[%s12192_s22 + $0x70] sm:$0xff] }
 0x102   : > { %v1121_v5 = vpop.f32.mrf.mxu0  ;;  %v12434_v34 = vadd.f32 %v2195_v22, %v1267_v21  ;;  %v9296_v21 = vor.u32 %v11081_v60, %v9293_v0  ;;  %v9656_v60 = vld [vmem:[%s12226_s0 + $0x150] sm:$0xf]  ;;  %v11165_v0 = vld [vmem:[%s12226_s0 + $0x158] sm:$0xf0] }
 0x103   : > { %v1880_v35 = vpop.f32.mrf.mxu1  ;;  %v1122_v37 = vadd.f32 %v12334_v16, %v1121_v5 }
 0x104   : > { %v12429_v27 = vpop.f32.mrf.mxu2  ;;  %v1881_v38 = vadd.f32 %v12339_v17, %v1880_v35  ;;  %v11078_v35 = vld [vmem:[%s12153_s23 + $0xe4] sm:$0xf0] }
 0x105   : > { %v12432_v6 = vpop.f32.mrf.mxu3  ;;  %v1268_v43 = vmax.f32 %v1122_v37, 0.0 }
 0x106   : > { %v2050_v39 = vadd.f32 %v12375_v4, %v1881_v38 }
 0x108   : > { %v2196_v45 = vmax.f32 %v2050_v39, 0.0 }
 0x109   : > { %9468 = vmatmul.msk.bf16.gmra.mxu2 %vm1752_vm1, %v9288_v32  ;;  %v9275_v32 = vld [vmem:[%s12153_s23 + $0xe0] sm:$0xf] }
 0x10a   : > { %v1124_v30 = vpop.f32.mrf.mxu0  ;;  %3237 = vmatmul.bf16.gmra.mxu3 %v9633_v46  ;;  %v12447_v54 = vadd.f32 %v2196_v45, %v1268_v43  ;;  %v9276_v41 = vor.u32 %v11078_v35, %v9275_v32 }
 0x10b   : > { %v1883_v4 = vpop.f32.mrf.mxu1  ;;  %v1125_v57 = vadd.f32 %v12334_v16, %v1124_v30 }
 0x10c   : > { %v12443_v49 = vpop.f32.mrf.mxu2  ;;  %v1884_v58 = vadd.f32 %v12339_v17, %v1883_v4  ;;  %v11083_v4 = vld [vmem:[%s12153_s23 + $0x114] sm:$0xf] }
 0x10d   : > { %9141 = vmatmul.msk.bf16.gmra.mxu0 %vm989_vm2, %v11026_v28  ;;  %v12445_v52 = vpop.f32.mrf.mxu3  ;;  %v1269_v5 = vmax.f32 %v1125_v57, 0.0  ;;  %v9301_v57 = vld [vmem:[%s12153_s23 + $0x118] sm:$0xf0] }
 0x10e   : > { %v2053_v59 = vadd.f32 %v12389_v25, %v1884_v58  ;;  %1922 = vmatmul.bf16.gmra.mxu1 %v9268_v53  ;;  %v9645_v25 = vor.u32 %v11162_v13, %v9644_v31 }
 0x110   : > { %v2197_v9 = vmax.f32 %v2053_v59, 0.0 }
 0x112   : > { %v1126_v15 = vpop.f32.mrf.mxu0  ;;  %v12461_v22 = vadd.f32 %v2197_v9, %v1269_v5  ;;  %v11028_v9 = vld [vmem:[%s12192_s22 + $0x78] sm:$0xff] }
 0x113   : > { %v1885_v23 = vpop.f32.mrf.mxu1  ;;  %v1127_v24 = vadd.f32 %v12334_v16, %v1126_v15 }
 0x114   : > { %v12456_v61 = vpop.f32.mrf.mxu2  ;;  %v1886_v28 = vadd.f32 %v12339_v17, %v1885_v23 }
 0x115   : > { %v12459_v19 = vpop.f32.mrf.mxu3  ;;  %v1270_v46 = vmax.f32 %v1127_v24, 0.0 }
 0x116   : > { %v2055_v30 = vadd.f32 %v12402_v42, %v1886_v28  ;;  %v9283_v28 = vld [vmem:[%s12153_s23 + $0xf0] sm:$0xf] }
 0x118   : > { %v2198_v37 = vmax.f32 %v2055_v30, 0.0  ;;  %v11080_v30 = vld [vmem:[%s12153_s23 + $0xf4] sm:$0xf0] }
 0x119   : > { %9469 = vmatmul.msk.bf16.gmra.mxu2 %vm1752_vm1, %v9296_v21 }
 0x11a   : > { %v1129_v20 = vpop.f32.mrf.mxu0  ;;  %3242 = vmatmul.bf16.gmra.mxu3 %v9645_v25  ;;  %v12474_v43 = vadd.f32 %v2198_v37, %v1270_v46 }
 0x11b   : > { %v1888_v42 = vpop.f32.mrf.mxu1  ;;  %v1130_v45 = vadd.f32 %v12334_v16, %v1129_v20 }
 0x11c   : > { %v12470_v38 = vpop.f32.mrf.mxu2  ;;  %17126 = vst [vmem:[#allocation12_spill] sm:$0xff] %v12474_v43  ;;  %v1889_v15 = vadd.f32 %v12339_v17, %v1888_v42 }
 0x11d   : > { %9142 = vmatmul.msk.bf16.gmra.mxu0 %vm989_vm2, %v11027_v14  ;;  %v12472_v39 = vpop.f32.mrf.mxu3  ;;  %v1271_v58 = vmax.f32 %v1130_v45, 0.0  ;;  %v9304_v14 = vor.u32 %v11083_v4, %v9301_v57  ;;  %v11085_v4 = vld [vmem:[%s12153_s23 + $0x124] sm:$0xf]  ;;  %v9309_v57 = vld [vmem:[%s12153_s23 + $0x128] sm:$0xf0] }
 0x11e   : > { %v2058_v53 = vadd.f32 %v12416_v2, %v1889_v15  ;;  %1927 = vmatmul.bf16.gmra.mxu1 %v9276_v41  ;;  %v9657_v2 = vor.u32 %v11165_v0, %v9656_v60  ;;  %v9284_v41 = vor.u32 %v11080_v30, %v9283_v28  ;;  %v9668_v60 = vld [vmem:[%s12226_s0 + $0x168] sm:$0xf]  ;;  %v11168_v0 = vld [vmem:[%s12226_s0 + $0x170] sm:$0xf0] }
 0x120   : > { %v2199_v59 = vmax.f32 %v2058_v53, 0.0 }
 0x122   : > { %v1131_v40 = vpop.f32.mrf.mxu0  ;;  %v12488_v20 = vadd.f32 %v2199_v59, %v1271_v58 }
 0x123   : > { %v1890_v21 = vpop.f32.mrf.mxu1  ;;  %v1132_v23 = vadd.f32 %v12334_v16, %v1131_v40 }
 0x124   : > { %v12483_v5 = vpop.f32.mrf.mxu2  ;;  %17127 = vst [vmem:[#allocation13_spill] sm:$0xff] %v12488_v20  ;;  %v1891_v25 = vadd.f32 %v12339_v17, %v1890_v21  ;;  %v11180_v20 = vld [vmem:[%s12226_s0 + $0x1d0] sm:$0xf0] }
 0x125   : > { %v12486_v31 = vpop.f32.mrf.mxu3  ;;  %v1272_v32 = vmax.f32 %v1132_v23, 0.0 }
 0x126   : > { %v2060_v24 = vadd.f32 %v12429_v27, %v1891_v25 }
 0x128   : > { %v2200_v35 = vmax.f32 %v2060_v24, 0.0 }
 0x129   : > { %9470 = vmatmul.msk.bf16.gmra.mxu2 %vm1752_vm1, %v9304_v14  ;;  %v11029_v14 = vld [vmem:[%s12192_s22 + $0x80] sm:$0xff] }
 0x12a   : > { %v1134_v13 = vpop.f32.mrf.mxu0  ;;  %3247 = vmatmul.bf16.gmra.mxu3 %v9657_v2  ;;  %v12501_v42 = vadd.f32 %v2200_v35, %v1272_v32  ;;  %v9291_v32 = vld [vmem:[%s12153_s23 + $0x100] sm:$0xf]  ;;  %v11082_v35 = vld [vmem:[%s12153_s23 + $0x104] sm:$0xf0] }
 0x12b   : > { %v1893_v27 = vpop.f32.mrf.mxu1  ;;  %v1135_v45 = vadd.f32 %v12334_v16, %v1134_v13  ;;  %v9312_v13 = vor.u32 %v11085_v4, %v9309_v57 }
 0x12c   : > { %v12497_v46 = vpop.f32.mrf.mxu2  ;;  %17128 = vst [vmem:[#allocation14_spill] sm:$0xff] %v12501_v42  ;;  %v1894_v15 = vadd.f32 %v12339_v17, %v1893_v27 }
 0x12d   : > { %9143 = vmatmul.msk.bf16.gmra.mxu0 %vm989_vm2, %v11028_v9  ;;  %v12499_v37 = vpop.f32.mrf.mxu3  ;;  %v1273_v58 = vmax.f32 %v1135_v45, 0.0 }
 0x12e   : > { %v2063_v53 = vadd.f32 %v12443_v49, %v1894_v15  ;;  %1932 = vmatmul.bf16.gmra.mxu1 %v9284_v41  ;;  %v9669_v49 = vor.u32 %v11168_v0, %v9668_v60  ;;  %v11087_v60 = vld [vmem:[%s12153_s23 + $0x134] sm:$0xf]  ;;  %v9317_v0 = vld [vmem:[%s12153_s23 + $0x138] sm:$0xf0] }
 0x130   : > { %v2201_v59 = vmax.f32 %v2063_v53, 0.0  ;;  %v9292_v53 = vor.u32 %v11082_v35, %v9291_v32 }
 0x132   : > { %v1136_v40 = vpop.f32.mrf.mxu0  ;;  %v12515_v23 = vadd.f32 %v2201_v59, %v1273_v58 }
 0x133   : > { %v1895_v25 = vpop.f32.mrf.mxu1  ;;  %v1137_v24 = vadd.f32 %v12334_v16, %v1136_v40 }
 0x134   : > { %v12510_v9 = vpop.f32.mrf.mxu2  ;;  %17129 = vst [vmem:[#allocation15_spill] sm:$0xff] %v12515_v23  ;;  %v1896_v28 = vadd.f32 %v12339_v17, %v1895_v25  ;;  %v9680_v25 = vld [vmem:[%s12226_s0 + $0x180] sm:$0xf]  ;;  %v11177_v23 = vld [vmem:[%s12226_s0 + $0x1b8] sm:$0xf0] }
 0x135   : > { %v12513_v21 = vpop.f32.mrf.mxu3  ;;  %v1274_v41 = vmax.f32 %v1137_v24, 0.0 }
 0x136   : > { %v2065_v30 = vadd.f32 %v12456_v61, %v1896_v28  ;;  %v11030_v28 = vld [vmem:[%s12192_s22 + $0x88] sm:$0xff] }
 0x138   : > { %v2202_v27 = vmax.f32 %v2065_v30, 0.0 }
 0x139   : > { %9471 = vmatmul.msk.bf16.gmra.mxu2 %vm1752_vm1, %v9312_v13 }
 0x13a   : > { %v1139_v2 = vpop.f32.mrf.mxu0  ;;  %3252 = vmatmul.bf16.gmra.mxu3 %v9669_v49  ;;  %v12528_v4 = vadd.f32 %v2202_v27, %v1274_v41  ;;  %v11171_v49 = vld [vmem:[%s12226_s0 + $0x188] sm:$0xf0] }
 0x13b   : > { %v1898_v61 = vpop.f32.mrf.mxu1  ;;  %v1140_v57 = vadd.f32 %v12334_v16, %v1139_v2  ;;  %v9320_v2 = vor.u32 %v11087_v60, %v9317_v0 }
 0x13c   : > { %v12524_v45 = vpop.f32.mrf.mxu2  ;;  %17130 = vst [vmem:[#allocation16_spill] sm:$0xff] %v12528_v4  ;;  %v1899_v58 = vadd.f32 %v12339_v17, %v1898_v61 }
 0x13d   : > { %9144 = vmatmul.msk.bf16.gmra.mxu0 %vm989_vm2, %v11029_v14  ;;  %v12526_v40 = vpop.f32.mrf.mxu3  ;;  %v1275_v14 = vmax.f32 %v1140_v57, 0.0  ;;  %v9299_v57 = vld [vmem:[%s12153_s23 + $0x110] sm:$0xf] }
 0x13e   : > { %v2068_v59 = vadd.f32 %v12470_v38, %v1899_v58  ;;  %1937 = vmatmul.bf16.gmra.mxu1 %v9292_v53  ;;  %v9681_v38 = vor.u32 %v11171_v49, %v9680_v25  ;;  %v11084_v58 = vld [vmem:[%s12153_s23 + $0x114] sm:$0xf0] }
 0x140   : > { %v2203_v13 = vmax.f32 %v2068_v59, 0.0 }
 0x142   : > { %v1141_v15 = vpop.f32.mrf.mxu0  ;;  %v12542_v35 = vadd.f32 %v2203_v13, %v1275_v14  ;;  %v9300_v13 = vor.u32 %v11084_v58, %v9299_v57  ;;  %v11031_v57 = vld [vmem:[%s12192_s22 + $0x90] sm:$0xff] }
 0x143   : > { %v1900_v41 = vpop.f32.mrf.mxu1  ;;  %v1142_v27 = vadd.f32 %v12334_v16, %v1141_v15 }
 0x144   : > { %v12537_v24 = vpop.f32.mrf.mxu2  ;;  %17131 = vst [vmem:[#allocation17_spill] sm:$0xff] %v12542_v35  ;;  %v1901_v53 = vadd.f32 %v12339_v17, %v1900_v41  ;;  %v11089_v41 = vld [vmem:[%s12153_s23 + $0x144] sm:$0xf] }
 0x145   : > { %v12540_v30 = vpop.f32.mrf.mxu3  ;;  %v1276_v59 = vmax.f32 %v1142_v27, 0.0  ;;  %v11174_v35 = vld [vmem:[%s12226_s0 + $0x1a0] sm:$0xf0] }
 0x146   : > { %v2070_v61 = vadd.f32 %v12483_v5, %v1901_v53 }
 0x148   : > { %v2204_v60 = vmax.f32 %v2070_v61, 0.0  ;;  %v9692_v61 = vld [vmem:[%s12226_s0 + $0x198] sm:$0xf] }
 0x149   : > { %9472 = vmatmul.msk.bf16.gmra.mxu2 %vm1752_vm1, %v9320_v2 }
 0x14a   : > { %v1144_v32 = vpop.f32.mrf.mxu0  ;;  %3257 = vmatmul.bf16.gmra.mxu3 %v9681_v38  ;;  %v12555_v25 = vadd.f32 %v2204_v60, %v1276_v59  ;;  %v9325_v38 = vld [vmem:[%s12153_s23 + $0x148] sm:$0xf0] }
 0x14b   : > { %v1903_v5 = vpop.f32.mrf.mxu1  ;;  %v1145_v49 = vadd.f32 %v12334_v16, %v1144_v32  ;;  %v9328_v32 = vor.u32 %v11089_v41, %v9325_v38 }
 0x14c   : > { %v12551_v0 = vpop.f32.mrf.mxu2  ;;  %17132 = vst [vmem:[#allocation18_spill] sm:$0xff] %v12555_v25  ;;  %v11086_v25 = vld [vmem:[%s12153_s23 + $0x124] sm:$0xf0] }
 0x14d   : > { %9145 = vmatmul.msk.bf16.gmra.mxu0 %vm989_vm2, %v11030_v28  ;;  %v12553_v15 = vpop.f32.mrf.mxu3  ;;  %v1904_v28 = vadd.f32 %v12339_v17, %v1903_v5  ;;  %v1277_v27 = vmax.f32 %v1145_v49, 0.0 }
 0x14e   : > { %1942 = vmatmul.bf16.gmra.mxu1 %v9300_v13 }
 0x14f   : > { %v2073_v2 = vadd.f32 %v12497_v46, %v1904_v28  ;;  %v9693_v46 = vor.u32 %v11174_v35, %v9692_v61 }
 0x151   : > { %v2205_v53 = vmax.f32 %v2073_v2, 0.0  ;;  %v9307_v2 = vld [vmem:[%s12153_s23 + $0x120] sm:$0xf] }
 0x152   : > { %v1146_v14 = vpop.f32.mrf.mxu0 }
 0x153   : > { %v12569_v60 = vadd.f32 %v2205_v53, %v1277_v27  ;;  %v1905_v5 = vpop.f32.mrf.mxu1  ;;  %v1147_v13 = vadd.f32 %v12334_v16, %v1146_v14  ;;  %v9308_v53 = vor.u32 %v11086_v25, %v9307_v2  ;;  %v11032_v25 = vld [vmem:[%s12192_s22 + $0x98] sm:$0xff] }
 0x154   : > { %v12564_v4 = vpop.f32.mrf.mxu2  ;;  %v1906_v49 = vadd.f32 %v12339_v17, %v1905_v5 }
 0x155   : > { %v12567_v58 = vpop.f32.mrf.mxu3  ;;  %17133 = vst [vmem:[#allocation19_spill] sm:$0xff] %v12569_v60  ;;  %v1278_v41 = vmax.f32 %v1147_v13, 0.0  ;;  %v9333_v13 = vld [vmem:[%s12153_s23 + $0x158] sm:$0xf0]  ;;  %v9704_v60 = vld [vmem:[%s12226_s0 + $0x1b0] sm:$0xf] }
 0x156   : > { %v2075_v28 = vadd.f32 %v12510_v9, %v1906_v49 }
 0x158   : > { %v2206_v38 = vmax.f32 %v2075_v28, 0.0 }
 0x159   : > { %9473 = vmatmul.msk.bf16.gmra.mxu2 %vm1752_vm1, %v9328_v32 }
 0x15a   : > { %v1149_v59 = vpop.f32.mrf.mxu0  ;;  %3262 = vmatmul.bf16.gmra.mxu3 %v9693_v46  ;;  %v12582_v61 = vadd.f32 %v2206_v38, %v1278_v41  ;;  %v11091_v46 = vld [vmem:[%s12153_s23 + $0x154] sm:$0xf] }
 0x15b   : > { %v1908_v9 = vpop.f32.mrf.mxu1 }
 0x15c   : > { %v12578_v35 = vpop.f32.mrf.mxu2  ;;  %17134 = vst [vmem:[#allocation20_spill] sm:$0xff] %v12582_v61  ;;  %v1909_v32 = vadd.f32 %v12339_v17, %v1908_v9 }
 0x15d   : > { %9146 = vmatmul.msk.bf16.gmra.mxu0 %vm989_vm2, %v11031_v57  ;;  %v12580_v14 = vpop.f32.mrf.mxu3  ;;  %v1150_v57 = vadd.f32 %v12334_v16, %v1149_v59  ;;  %v9336_v59 = vor.u32 %v11091_v46, %v9333_v13  ;;  %v11088_v46 = vld [vmem:[%s12153_s23 + $0x134] sm:$0xf0] }
 0x15e   : > { %v2078_v5 = vadd.f32 %v12524_v45, %v1909_v32  ;;  %1947 = vmatmul.bf16.gmra.mxu1 %v9308_v53  ;;  %v9705_v45 = vor.u32 %v11177_v23, %v9704_v60 }
 0x15f   : > { %v1279_v49 = vmax.f32 %v1150_v57, 0.0 }
 0x160   : > { %v2207_v28 = vmax.f32 %v2078_v5, 0.0  ;;  %v9315_v5 = vld [vmem:[%s12153_s23 + $0x130] sm:$0xf] }
 0x162   : > { %v1151_v27 = vpop.f32.mrf.mxu0  ;;  %v12596_v38 = vadd.f32 %v2207_v28, %v1279_v49  ;;  %v9316_v28 = vor.u32 %v11088_v46, %v9315_v5  ;;  %v11403_v5 = vld [vmem:[%s17040_s7 + $0x38] sm:$0xff] }
 0x163   : > { %v1910_v9 = vpop.f32.mrf.mxu1  ;;  %v1152_v53 = vadd.f32 %v12334_v16, %v1151_v27  ;;  %5186 = vmatpush.bf16.msrb.mxu1 %v11403_v5 }
 0x164   : > { %v12591_v42 = vpop.f32.mrf.mxu2  ;;  %17135 = vst [vmem:[#allocation21_spill] sm:$0xff] %v12596_v38  ;;  %v1911_v57 = vadd.f32 %v12339_v17, %v1910_v9 }
 0x165   : > { %v12594_v2 = vpop.f32.mrf.mxu3  ;;  %v1280_v13 = vmax.f32 %v1152_v53, 0.0  ;;  %v11093_v53 = vld [vmem:[%s12153_s23 + $0x164] sm:$0xf] }
 0x166   : > { %v2080_v32 = vadd.f32 %v12537_v24, %v1911_v57  ;;  %v9341_v57 = vld [vmem:[%s12153_s23 + $0x168] sm:$0xf0] }
 0x168   : > { %v2208_v49 = vmax.f32 %v2080_v32, 0.0  ;;  %v9716_v32 = vld [vmem:[%s12226_s0 + $0x1c8] sm:$0xf] }
 0x169   : > { %9474 = vmatmul.msk.bf16.gmra.mxu2 %vm1752_vm1, %v9336_v59 }
 0x16a   : > { %v1154_v41 = vpop.f32.mrf.mxu0  ;;  %3267 = vmatmul.bf16.gmra.mxu3 %v9705_v45 }
 0x16b   : > { %v1913_v24 = vpop.f32.mrf.mxu1  ;;  %v1155_v59 = vadd.f32 %v12334_v16, %v1154_v41  ;;  %v11033_v41 = vld [vmem:[%s12192_s22 + $0xa0] sm:$0xff] }
 0x16c   : > { %v12605_v23 = vpop.f32.mrf.mxu2  ;;  %v1914_v9 = vadd.f32 %v12339_v17, %v1913_v24 }
 0x16d   : > { %9147 = vmatmul.msk.bf16.gmra.mxu0 %vm989_vm2, %v11032_v25  ;;  %v12607_v60 = vpop.f32.mrf.mxu3  ;;  %v12609_v25 = vadd.f32 %v2208_v49, %v1280_v13  ;;  %v1281_v38 = vmax.f32 %v1155_v59, 0.0  ;;  %v9717_v59 = vor.u32 %v11180_v20, %v9716_v32 }
 0x16e   : > { %17136 = vst [vmem:[#allocation22_spill] sm:$0xff] %v12607_v60  ;;  %v2083_v45 = vadd.f32 %v12551_v0, %v1914_v9  ;;  %1952 = vmatmul.bf16.gmra.mxu1 %v9316_v28  ;;  %v9344_v0 = vor.u32 %v11093_v53, %v9341_v57  ;;  %v11090_v53 = vld [vmem:[%s12153_s23 + $0x144] sm:$0xf0] }
 0x16f   : > { %17137 = vst [vmem:[#allocation23_spill] sm:$0xff] %v12609_v25 }
 0x170   : > { %v2209_v61 = vmax.f32 %v2083_v45, 0.0 }
 0x172   : > { %v1156_v27 = vpop.f32.mrf.mxu0  ;;  %v12626_v28 = vadd.f32 %v2209_v61, %v1281_v38 }
 0x173   : > { %v1915_v24 = vpop.f32.mrf.mxu1  ;;  %v1157_v9 = vadd.f32 %v12334_v16, %v1156_v27 }
 0x174   : > { %v12621_v46 = vpop.f32.mrf.mxu2  ;;  %17139 = vst [vmem:[#allocation25_spill] sm:$0xff] %v12626_v28  ;;  %v1916_v45 = vadd.f32 %v12339_v17, %v1915_v24  ;;  %v9728_v28 = vld [vmem:[%s12226_s0 + $0x1e0] sm:$0xf] }
 0x175   : > { %v12624_v13 = vpop.f32.mrf.mxu3  ;;  %v1282_v57 = vmax.f32 %v1157_v9, 0.0 }
 0x176   : > { %17138 = vst [vmem:[#allocation24_spill] sm:$0xff] %v12624_v13  ;;  %v2085_v25 = vadd.f32 %v12564_v4, %v1916_v45  ;;  %v9323_v13 = vld [vmem:[%s12153_s23 + $0x140] sm:$0xf] }
 0x177   : > { %v9324_v32 = vor.u32 %v11090_v53, %v9323_v13  ;;  %v11034_v13 = vld [vmem:[%s12192_s22 + $0xa8] sm:$0xff] }
 0x178   : > { %v2210_v61 = vmax.f32 %v2085_v25, 0.0  ;;  %v9349_v25 = vld [vmem:[%s12153_s23 + $0x178] sm:$0xf0] }
 0x179   : > { %9475 = vmatmul.msk.bf16.gmra.mxu2 %vm1752_vm1, %v9344_v0 }
 0x17a   : > { %v1159_v49 = vpop.f32.mrf.mxu0  ;;  %3272 = vmatmul.bf16.gmra.mxu3 %v9717_v59  ;;  %v12639_v5 = vadd.f32 %v2210_v61, %v1282_v57  ;;  %v11095_v59 = vld [vmem:[%s12153_s23 + $0x174] sm:$0xf] }
 0x17b   : > { %v1918_v4 = vpop.f32.mrf.mxu1 }
 0x17c   : > { %v12635_v20 = vpop.f32.mrf.mxu2  ;;  %17141 = vst [vmem:[#allocation27_spill] sm:$0xff] %v12639_v5  ;;  %v1919_v0 = vadd.f32 %v12339_v17, %v1918_v4  ;;  %v11092_v5 = vld [vmem:[%s12153_s23 + $0x154] sm:$0xf0] }
 0x17d   : > { %9148 = vmatmul.msk.bf16.gmra.mxu0 %vm989_vm2, %v11033_v41  ;;  %v12637_v38 = vpop.f32.mrf.mxu3  ;;  %v1160_v41 = vadd.f32 %v12334_v16, %v1159_v49  ;;  %v9352_v49 = vor.u32 %v11095_v59, %v9349_v25 }
 0x17e   : > { %17140 = vst [vmem:[#allocation26_spill] sm:$0xff] %v12637_v38  ;;  %v2088_v24 = vadd.f32 %v12578_v35, %v1919_v0  ;;  %1957 = vmatmul.bf16.gmra.mxu1 %v9324_v32  ;;  %v11183_v38 = vld [vmem:[%s12226_s0 + $0x1e8] sm:$0xf0] }
 0x17f   : > { %v1283_v9 = vmax.f32 %v1160_v41, 0.0  ;;  %v9729_v35 = vor.u32 %v11183_v38, %v9728_v28 }
 0x180   : > { %v2211_v45 = vmax.f32 %v2088_v24, 0.0  ;;  %v9331_v24 = vld [vmem:[%s12153_s23 + $0x150] sm:$0xf] }
 0x182   : > { %v1161_v27 = vpop.f32.mrf.mxu0  ;;  %v12653_v61 = vadd.f32 %v2211_v45, %v1283_v9  ;;  %v9332_v9 = vor.u32 %v11092_v5, %v9331_v24  ;;  %v11035_v5 = vld [vmem:[%s12192_s22 + $0xb0] sm:$0xff] }
 0x183   : > { %v1920_v4 = vpop.f32.mrf.mxu1  ;;  %v1162_v32 = vadd.f32 %v12334_v16, %v1161_v27 }
 0x184   : > { %v12648_v43 = vpop.f32.mrf.mxu2  ;;  %17143 = vst [vmem:[#allocation29_spill] sm:$0xff] %v12653_v61  ;;  %v1921_v41 = vadd.f32 %v12339_v17, %v1920_v4  ;;  %v9740_v61 = vld [vmem:[%s12226_s0 + $0x1f8] sm:$0xf] }
 0x185   : > { %v12651_v53 = vpop.f32.mrf.mxu3  ;;  %v1284_v59 = vmax.f32 %v1162_v32, 0.0  ;;  %v9357_v32 = vld [vmem:[%s12153_s23 + $0x188] sm:$0xf0] }
 0x186   : > { %17142 = vst [vmem:[#allocation28_spill] sm:$0xff] %v12651_v53  ;;  %v2090_v0 = vadd.f32 %v12591_v42, %v1921_v41  ;;  %v11186_v53 = vld [vmem:[%s12226_s0 + $0x200] sm:$0xf0] }
 0x188   : > { %v2212_v25 = vmax.f32 %v2090_v0, 0.0 }
 0x189   : > { %9476 = vmatmul.msk.bf16.gmra.mxu2 %vm1752_vm1, %v9352_v49 }
 0x18a   : > { %v1164_v57 = vpop.f32.mrf.mxu0  ;;  %3277 = vmatmul.bf16.gmra.mxu3 %v9729_v35  ;;  %v12666_v45 = vadd.f32 %v2212_v25, %v1284_v59  ;;  %v11097_v35 = vld [vmem:[%s12153_s23 + $0x184] sm:$0xf] }
 0x18b   : > { %v1923_v42 = vpop.f32.mrf.mxu1 }
 0x18c   : > { %v12662_v28 = vpop.f32.mrf.mxu2  ;;  %17145 = vst [vmem:[#allocation31_spill] sm:$0xff] %v12666_v45  ;;  %v1924_v49 = vadd.f32 %v12339_v17, %v1923_v42  ;;  %v9752_v45 = vld [vmem:[%s12226_s0 + $0x210] sm:$0xf] }
 0x18d   : > { %9149 = vmatmul.msk.bf16.gmra.mxu0 %vm989_vm2, %v11034_v13  ;;  %v12664_v38 = vpop.f32.mrf.mxu3  ;;  %v1165_v13 = vadd.f32 %v12334_v16, %v1164_v57  ;;  %v9360_v57 = vor.u32 %v11097_v35, %v9357_v32  ;;  %v9339_v35 = vld [vmem:[%s12153_s23 + $0x160] sm:$0xf] }
 0x18e   : > { %17144 = vst [vmem:[#allocation30_spill] sm:$0xff] %v12664_v38  ;;  %v2093_v4 = vadd.f32 %v12605_v23, %v1924_v49  ;;  %1962 = vmatmul.bf16.gmra.mxu1 %v9332_v9  ;;  %v9741_v23 = vor.u32 %v11186_v53, %v9740_v61  ;;  %v11233_v9 = vld [vmem:[%s17039_s6 + $0x78] sm:$0xff]  ;;  %v11094_v53 = vld [vmem:[%s12153_s23 + $0x164] sm:$0xf0] }
 0x18f   : > { %v1285_v41 = vmax.f32 %v1165_v13, 0.0  ;;  %3338 = vmatpush.bf16.msrb.mxu2 %v11233_v9 }
 0x190   : > { %v2213_v0 = vmax.f32 %v2093_v4, 0.0 }
 0x192   : > { %v1166_v27 = vpop.f32.mrf.mxu0  ;;  %v12680_v25 = vadd.f32 %v2213_v0, %v1285_v41 }
 0x193   : > { %v1925_v42 = vpop.f32.mrf.mxu1  ;;  %v1167_v13 = vadd.f32 %v12334_v16, %v1166_v27 }
 0x194   : > { %v12675_v38 = vpop.f32.mrf.mxu2  ;;  %17147 = vst [vmem:[#allocation33_spill] sm:$0xff] %v12680_v25  ;;  %v1926_v49 = vadd.f32 %v12339_v17, %v1925_v42 }
 0x195   : > { %v12678_v24 = vpop.f32.mrf.mxu3  ;;  %v1286_v61 = vmax.f32 %v1167_v13, 0.0  ;;  %v11099_v13 = vld [vmem:[%s12153_s23 + $0x194] sm:$0xf] }
 0x196   : > { %17146 = vst [vmem:[#allocation32_spill] sm:$0xff] %v12678_v24  ;;  %v2095_v4 = vadd.f32 %v12621_v46, %v1926_v49  ;;  %v9365_v49 = vld [vmem:[%s12153_s23 + $0x198] sm:$0xf0] }
 0x198   : > { %v2214_v32 = vmax.f32 %v2095_v4, 0.0 }
 0x199   : > { %9477 = vmatmul.msk.bf16.gmra.mxu2 %vm1752_vm1, %v9360_v57 }
 0x19a   : > { %v1169_v59 = vpop.f32.mrf.mxu0  ;;  %3282 = vmatmul.bf16.gmra.mxu3 %v9741_v23  ;;  %v12696_v42 = vadd.f32 %v2214_v32, %v1286_v61 }
 0x19b   : > { %v1928_v46 = vpop.f32.mrf.mxu1  ;;  %v1170_v57 = vadd.f32 %v12334_v16, %v1169_v59  ;;  %v9368_v59 = vor.u32 %v11099_v13, %v9365_v49  ;;  %v11096_v13 = vld [vmem:[%s12153_s23 + $0x174] sm:$0xf0] }
 0x19c   : > { %v12692_v41 = vpop.f32.mrf.mxu2  ;;  %17149 = vst [vmem:[#allocation35_spill] sm:$0xff] %v12696_v42  ;;  %v1929_v23 = vadd.f32 %v12339_v17, %v1928_v46 }
 0x19d   : > { %9150 = vmatmul.msk.bf16.gmra.mxu0 %vm989_vm2, %v11035_v5  ;;  %v12694_v27 = vpop.f32.mrf.mxu3  ;;  %v9340_v5 = vor.u32 %v11094_v53, %v9339_v35  ;;  %v1287_v4 = vmax.f32 %v1170_v57, 0.0  ;;  %v11036_v35 = vld [vmem:[%s12192_s22 + $0xb8] sm:$0xff] }
 0x19e   : > { %17148 = vst [vmem:[#allocation34_spill] sm:$0xff] %v12694_v27  ;;  %v2098_v9 = vadd.f32 %v12635_v20, %v1929_v23  ;;  %v11189_v27 = vld [vmem:[%s12226_s0 + $0x218] sm:$0xf0] }
 0x19f   : > { %1967 = vmatmul.bf16.gmra.mxu1 %v9340_v5  ;;  %v9753_v20 = vor.u32 %v11189_v27, %v9752_v45 }
 0x1a0   : > { %v2215_v25 = vmax.f32 %v2098_v9, 0.0  ;;  %v9347_v9 = vld [vmem:[%s12153_s23 + $0x170] sm:$0xf] }
 0x1a2   : > { %v1171_v0 = vpop.f32.mrf.mxu0  ;;  %v12710_v32 = vadd.f32 %v2215_v25, %v1287_v4  ;;  %v9348_v4 = vor.u32 %v11096_v13, %v9347_v9  ;;  %v11402_v9 = vld [vmem:[%s17040_s7 + $0x30] sm:$0xff] }
 0x1a3   : > { %v1930_v46 = vpop.f32.mrf.mxu1  ;;  %v1172_v5 = vadd.f32 %v12334_v16, %v1171_v0  ;;  %5187 = vmatpush.bf16.msrb.mxu1 %v11402_v9  ;;  %v11231_v9 = vld [vmem:[%s17039_s6 + $0x68] sm:$0xff] }
 0x1a4   : > { %v12705_v24 = vpop.f32.mrf.mxu2  ;;  %17151 = vst [vmem:[#allocation37_spill] sm:$0xff] %v12710_v32  ;;  %v1931_v57 = vadd.f32 %v12339_v17, %v1930_v46 }
 0x1a5   : > { %v12708_v53 = vpop.f32.mrf.mxu3  ;;  %v1288_v25 = vmax.f32 %v1172_v5, 0.0  ;;  %v11101_v5 = vld [vmem:[%s12153_s23 + $0x1a4] sm:$0xf] }
 0x1a6   : > { %17150 = vst [vmem:[#allocation36_spill] sm:$0xff] %v12708_v53  ;;  %v2100_v23 = vadd.f32 %v12648_v43, %v1931_v57  ;;  %v9373_v57 = vld [vmem:[%s12153_s23 + $0x1a8] sm:$0xf0]  ;;  %v11192_v53 = vld [vmem:[%s12226_s0 + $0x230] sm:$0xf0] }
 0x1a8   : > { %v2216_v49 = vmax.f32 %v2100_v23, 0.0  ;;  %v9764_v23 = vld [vmem:[%s12226_s0 + $0x228] sm:$0xf] }
 0x1a9   : > { %9478 = vmatmul.msk.bf16.gmra.mxu2 %vm1752_vm1, %v9368_v59 }
 0x1aa   : > { %v1174_v61 = vpop.f32.mrf.mxu0  ;;  %3287 = vmatmul.bf16.gmra.mxu3 %v9753_v20 }
 0x1ab   : > { %v1933_v43 = vpop.f32.mrf.mxu1  ;;  %v1175_v59 = vadd.f32 %v12334_v16, %v1174_v61  ;;  %v11037_v61 = vld [vmem:[%s12192_s22 + $0xc0] sm:$0xff] }
 0x1ac   : > { %v12719_v45 = vpop.f32.mrf.mxu2  ;;  %v1934_v46 = vadd.f32 %v12339_v17, %v1933_v43 }
 0x1ad   : > { %9151 = vmatmul.msk.bf16.gmra.mxu0 %vm989_vm2, %v11036_v35  ;;  %v12721_v27 = vpop.f32.mrf.mxu3  ;;  %v12723_v35 = vadd.f32 %v2216_v49, %v1288_v25  ;;  %v1289_v32 = vmax.f32 %v1175_v59, 0.0  ;;  %v9765_v59 = vor.u32 %v11192_v53, %v9764_v23 }
 0x1ae   : > { %17152 = vst [vmem:[#allocation38_spill] sm:$0xff] %v12721_v27  ;;  %v2103_v20 = vadd.f32 %v12662_v28, %v1934_v46  ;;  %v9376_v28 = vor.u32 %v11101_v5, %v9373_v57  ;;  %v9355_v27 = vld [vmem:[%s12153_s23 + $0x180] sm:$0xf] }
 0x1af   : > { %17153 = vst [vmem:[#allocation39_spill] sm:$0xff] %v12723_v35  ;;  %1972 = vmatmul.bf16.gmra.mxu1 %v9348_v4 }
 0x1b0   : > { %v2217_v42 = vmax.f32 %v2103_v20, 0.0 }
 0x1b2   : > { %v1176_v0 = vpop.f32.mrf.mxu0  ;;  %v12740_v4 = vadd.f32 %v2217_v42, %v1289_v32 }
 0x1b3   : > { %v1935_v43 = vpop.f32.mrf.mxu1  ;;  %v1177_v46 = vadd.f32 %v12334_v16, %v1176_v0 }
 0x1b4   : > { %v12735_v13 = vpop.f32.mrf.mxu2  ;;  %17155 = vst [vmem:[#allocation41_spill] sm:$0xff] %v12740_v4  ;;  %v1936_v20 = vadd.f32 %v12339_v17, %v1935_v43  ;;  %v11232_v17 = vld [vmem:[%s17039_s6 + $0x70] sm:$0xff] }
 0x1b5   : > { %v12738_v25 = vpop.f32.mrf.mxu3  ;;  %v1290_v60 = vmax.f32 %v1177_v46, 0.0  ;;  %3339 = vmatpush.bf16.msrb.mxu2 %v11232_v17  ;;  %v11230_v17 = vld [vmem:[%s17039_s6 + $0x60] sm:$0xff] }
 0x1b6   : > { %17154 = vst [vmem:[#allocation40_spill] sm:$0xff] %v12738_v25  ;;  %v2105_v35 = vadd.f32 %v12675_v38, %v1936_v20  ;;  %v11098_v25 = vld [vmem:[%s12153_s23 + $0x184] sm:$0xf0] }
 0x1b7   : > { %v9356_v32 = vor.u32 %v11098_v25, %v9355_v27  ;;  %v12767_v27 = vld [vmem:[%s17041_s8 + $0x1] ss:$0 sm:$0xff]  ;;  %v9381_v25 = vld [vmem:[%s12153_s23 + $0x1b8] sm:$0xf0]  ;;  %v11038_v20 = vld [vmem:[%s12192_s22 + $0xc8] sm:$0xff] }
 0x1b8   : > { %v2218_v5 = vmax.f32 %v2105_v35, 0.0  ;;  %v12761_v35 = vld [vmem:[%s17041_s8] ss:$0 sm:$0xff] }
 0x1b9   : > { %9479 = vmatmul.msk.bf16.gmra.mxu2 %vm1752_vm1, %v9376_v28 }
 0x1ba   : > { %v1179_v49 = vpop.f32.mrf.mxu0  ;;  %3292 = vmatmul.bf16.gmra.mxu3 %v9765_v59  ;;  %v12756_v38 = vadd.f32 %v2218_v5, %v1290_v60  ;;  %v11195_v59 = vld [vmem:[%s12226_s0 + $0x248] sm:$0xf0]  ;;  %3340 = vmatpush.bf16.msrb.mxu2 %v11231_v9 }
 0x1bb   : > { %v1938_v0 = vpop.f32.mrf.mxu1  ;;  %v1180_v57 = vadd.f32 %v12761_v35, %v1179_v49  ;;  %v9776_v49 = vld [vmem:[%s12226_s0 + $0x240] sm:$0xf] }
 0x1bc   : > { %v12749_v42 = vpop.f32.mrf.mxu2  ;;  %17157 = vst [vmem:[#allocation43_spill] sm:$0xff] %v12756_v38  ;;  %v1939_v23 = vadd.f32 %v12767_v27, %v1938_v0 }
 0x1bd   : > { %9152 = vmatmul.msk.bf16.gmra.mxu0 %vm989_vm2, %v11037_v61  ;;  %v12751_v53 = vpop.f32.mrf.mxu3  ;;  %v11103_v61 = vld [vmem:[%s12153_s23 + $0x1b4] sm:$0xf]  ;;  %v1291_v28 = vmax.f32 %v1180_v57, 0.0 }
 0x1be   : > { %17156 = vst [vmem:[#allocation42_spill] sm:$0xff] %v12751_v53  ;;  %v2108_v60 = vadd.f32 %v12692_v41, %v1939_v23  ;;  %v9777_v23 = vor.u32 %v11195_v59, %v9776_v49  ;;  %3341 = vmatpush.bf16.msrb.mxu2 %v11230_v17 }
 0x1bf   : > { %1977 = vmatmul.bf16.gmra.mxu1 %v9356_v32  ;;  %v9384_v32 = vor.u32 %v11103_v61, %v9381_v25  ;;  %v11229_v61 = vld [vmem:[%s17039_s6 + $0x58] sm:$0xff]  ;;  %v9363_v25 = vld [vmem:[%s12153_s23 + $0x190] sm:$0xf] }
 0x1c0   : > { %v2219_v43 = vmax.f32 %v2108_v60, 0.0 }
 0x1c2   : > { %v1181_v16 = vpop.f32.mrf.mxu0  ;;  %v12786_v0 = vadd.f32 %v2219_v43, %v1291_v28  ;;  %v11100_v28 = vld [vmem:[%s12153_s23 + $0x194] sm:$0xf0]  ;;  %3342 = vmatpush.bf16.msrb.mxu2 %v11229_v61  ;;  %v11105_v61 = vld [vmem:[%s12153_s23 + $0x1c4] sm:$0xf] }
 0x1c3   : > { %v1940_v57 = vpop.f32.mrf.mxu1  ;;  %v1182_v60 = vadd.f32 %v12761_v35, %v1181_v16 }
 0x1c4   : > { %v12778_v46 = vpop.f32.mrf.mxu2  ;;  %17159 = vst [vmem:[#allocation45_spill] sm:$0xff] %v12786_v0  ;;  %v1941_v9 = vadd.f32 %v12767_v27, %v1940_v57 }
 0x1c5   : > { %v12781_v5 = vpop.f32.mrf.mxu3  ;;  %v1292_v43 = vmax.f32 %v1182_v60, 0.0 }
 0x1c6   : > { %17158 = vst [vmem:[#allocation44_spill] sm:$0xff] %v12781_v5  ;;  %v2110_v38 = vadd.f32 %v12705_v24, %v1941_v9  ;;  %v11227_v9 = vld [vmem:[%s17039_s6 + $0x48] sm:$0xff] }
 0x1c8   : > { %v2220_v49 = vmax.f32 %v2110_v38, 0.0 }
 0x1c9   : > { %9480 = vmatmul.msk.bf16.gmra.mxu2 %vm1752_vm1, %v9384_v32  ;;  %v11228_v32 = vld [vmem:[%s17039_s6 + $0x50] sm:$0xff] }
 0x1ca   : > { %v1184_v41 = vpop.f32.mrf.mxu0  ;;  %3297 = vmatmul.bf16.gmra.mxu3 %v9777_v23  ;;  %v12805_v17 = vadd.f32 %v2220_v49, %v1292_v43  ;;  %3343 = vmatpush.bf16.msrb.mxu2 %v11228_v32  ;;  %v9788_v43 = vld [vmem:[%s12226_s0 + $0x258] sm:$0xf]  ;;  %v11198_v49 = vld [vmem:[%s12226_s0 + $0x260] sm:$0xf0] }
 0x1cb   : > { %v1943_v57 = vpop.f32.mrf.mxu1  ;;  %v1185_v38 = vadd.f32 %v12761_v35, %v1184_v41  ;;  %v11039_v41 = vld [vmem:[%s12192_s22 + $0xd0] sm:$0xff] }
 0x1cc   : > { %v12798_v16 = vpop.f32.mrf.mxu2  ;;  %17161 = vst [vmem:[#allocation47_spill] sm:$0xff] %v12805_v17  ;;  %v1944_v23 = vadd.f32 %v12767_v27, %v1943_v57  ;;  %v11226_v57 = vld [vmem:[%s17039_s6 + $0x40] sm:$0xff] }
 0x1cd   : > { %9153 = vmatmul.msk.bf16.gmra.mxu0 %vm989_vm2, %v11038_v20  ;;  %v12800_v59 = vpop.f32.mrf.mxu3  ;;  %v9364_v20 = vor.u32 %v11100_v28, %v9363_v25  ;;  %v9389_v25 = vld [vmem:[%s12153_s23 + $0x1c8] sm:$0xf0]  ;;  %v1293_v28 = vmax.f32 %v1185_v38, 0.0 }
 0x1ce   : > { %17160 = vst [vmem:[#allocation46_spill] sm:$0xff] %v12800_v59  ;;  %v2113_v60 = vadd.f32 %v12719_v45, %v1944_v23  ;;  %3344 = vmatpush.bf16.msrb.mxu2 %v11227_v9 }
 0x1cf   : > { %1982 = vmatmul.bf16.gmra.mxu1 %v9364_v20  ;;  %v9392_v20 = vor.u32 %v11105_v61, %v9389_v25  ;;  %v9371_v61 = vld [vmem:[%s12153_s23 + $0x1a0] sm:$0xf]  ;;  %v11102_v25 = vld [vmem:[%s12153_s23 + $0x1a4] sm:$0xf0] }
 0x1d0   : > { %v2221_v0 = vmax.f32 %v2113_v60, 0.0  ;;  %v9789_v60 = vor.u32 %v11198_v49, %v9788_v43 }
 0x1d2   : > { %v1186_v24 = vpop.f32.mrf.mxu0  ;;  %v12825_v23 = vadd.f32 %v2221_v0, %v1293_v28  ;;  %3345 = vmatpush.bf16.msrb.mxu2 %v11226_v57 }
 0x1d3   : > { %v1945_v38 = vpop.f32.mrf.mxu1  ;;  %v1187_v4 = vadd.f32 %v12761_v35, %v1186_v24 }
 0x1d4   : > { %v12817_v17 = vpop.f32.mrf.mxu2  ;;  %17163 = vst [vmem:[#allocation49_spill] sm:$0xff] %v12825_v23  ;;  %v1946_v9 = vadd.f32 %v12767_v27, %v1945_v38 }
 0x1d5   : > { %v12820_v32 = vpop.f32.mrf.mxu3  ;;  %v1294_v0 = vmax.f32 %v1187_v4, 0.0  ;;  %v11107_v4 = vld [vmem:[%s12153_s23 + $0x1d4] sm:$0xf] }
 0x1d6   : > { %17162 = vst [vmem:[#allocation48_spill] sm:$0xff] %v12820_v32  ;;  %v2115_v59 = vadd.f32 %v12735_v13, %v1946_v9  ;;  %v9800_v32 = vld [vmem:[%s12226_s0 + $0x270] sm:$0xf] }
 0x1d8   : > { %v2222_v28 = vmax.f32 %v2115_v59, 0.0  ;;  %v9397_v59 = vld [vmem:[%s12153_s23 + $0x1d8] sm:$0xf0] }
 0x1d9   : > { %9481 = vmatmul.msk.bf16.gmra.mxu2 %vm1752_vm1, %v9392_v20 }
 0x1da   : > { %v1189_v45 = vpop.f32.mrf.mxu0  ;;  %3302 = vmatmul.bf16.gmra.mxu3 %v9789_v60  ;;  %v12838_v57 = vadd.f32 %v2222_v28, %v1294_v0 }
 0x1db   : > { %v1948_v13 = vpop.f32.mrf.mxu1  ;;  %v1190_v20 = vadd.f32 %v12761_v35, %v1189_v45  ;;  %v9400_v45 = vor.u32 %v11107_v4, %v9397_v59  ;;  %v11104_v4 = vld [vmem:[%s12153_s23 + $0x1b4] sm:$0xf0] }
 0x1dc   : > { %v12834_v43 = vpop.f32.mrf.mxu2  ;;  %17165 = vst [vmem:[#allocation51_spill] sm:$0xff] %v12838_v57  ;;  %v1949_v38 = vadd.f32 %v12767_v27, %v1948_v13 }
 0x1dd   : > { %9154 = vmatmul.msk.bf16.gmra.mxu0 %vm989_vm2, %v11039_v41  ;;  %v12836_v24 = vpop.f32.mrf.mxu3  ;;  %v9372_v41 = vor.u32 %v11102_v25, %v9371_v61  ;;  %v1295_v9 = vmax.f32 %v1190_v20, 0.0  ;;  %v11040_v61 = vld [vmem:[%s12192_s22 + $0xd8] sm:$0xff] }
 0x1de   : > { %17164 = vst [vmem:[#allocation50_spill] sm:$0xff] %v12836_v24  ;;  %v2118_v60 = vadd.f32 %v12749_v42, %v1949_v38  ;;  %v11201_v24 = vld [vmem:[%s12226_s0 + $0x278] sm:$0xf0] }
 0x1df   : > { %1987 = vmatmul.bf16.gmra.mxu1 %v9372_v41  ;;  %v9801_v42 = vor.u32 %v11201_v24, %v9800_v32 }
 0x1e0   : > { %v2223_v23 = vmax.f32 %v2118_v60, 0.0  ;;  %v9379_v60 = vld [vmem:[%s12153_s23 + $0x1b0] sm:$0xf] }
 0x1e2   : > { %v1191_v49 = vpop.f32.mrf.mxu0  ;;  %v12852_v28 = vadd.f32 %v2223_v23, %v1295_v9  ;;  %v9380_v9 = vor.u32 %v11104_v4, %v9379_v60  ;;  %v11401_v60 = vld [vmem:[%s17040_s7 + $0x28] sm:$0xff] }
 0x1e3   : > { %v1950_v13 = vpop.f32.mrf.mxu1  ;;  %v1192_v41 = vadd.f32 %v12761_v35, %v1191_v49  ;;  %5188 = vmatpush.bf16.msrb.mxu1 %v11401_v60  ;;  %v11411_v60 = vld [vmem:[%s17040_s7 + $0x78] sm:$0xff] }
 0x1e4   : > { %v12847_v5 = vpop.f32.mrf.mxu2  ;;  %17167 = vst [vmem:[#allocation53_spill] sm:$0xff] %v12852_v28  ;;  %v1951_v20 = vadd.f32 %v12767_v27, %v1950_v13  ;;  %5355 = vmatpush.bf16.msra.mxu3 %v11411_v60 }
 0x1e5   : > { %v12850_v25 = vpop.f32.mrf.mxu3  ;;  %v1296_v23 = vmax.f32 %v1192_v41, 0.0  ;;  %v9812_v41 = vld [vmem:[%s12226_s0 + $0x288] sm:$0xf] }
 0x1e6   : > { %17166 = vst [vmem:[#allocation52_spill] sm:$0xff] %v12850_v25  ;;  %v2120_v38 = vadd.f32 %v12778_v46, %v1951_v20  ;;  %v11122_v20 = vld [vmem:[%s12226_s0 + $0x4] sm:$0xf]  ;;  %v11204_v25 = vld [vmem:[%s12226_s0 + $0x290] sm:$0xf0] }
 0x1e8   : > { %v2224_v59 = vmax.f32 %v2120_v38, 0.0  ;;  %v9490_v38 = vld [vmem:[%s12226_s0 + $0xc] sm:$0xf0] }
 0x1e9   : > { %9482 = vmatmul.msk.bf16.gmra.mxu2 %vm1752_vm1, %v9400_v45 }
 0x1ea   : > { %v1194_v0 = vpop.f32.mrf.mxu0  ;;  %3307 = vmatmul.bf16.gmra.mxu3 %v9801_v42 }
 0x1eb   : > { %v1953_v46 = vpop.f32.mrf.mxu1  ;;  %v1195_v45 = vadd.f32 %v12761_v35, %v1194_v0  ;;  %v11041_v0 = vld [vmem:[%s12192_s22 + $0xe0] sm:$0xff] }
 0x1ec   : > { %v12861_v32 = vpop.f32.mrf.mxu2  ;;  %v1954_v13 = vadd.f32 %v12767_v27, %v1953_v46 }
 0x1ed   : > { %9155 = vmatmul.msk.bf16.gmra.mxu0 %vm989_vm2, %v11040_v61  ;;  %v12863_v24 = vpop.f32.mrf.mxu3  ;;  %v12865_v61 = vadd.f32 %v2224_v59, %v1296_v23  ;;  %v1297_v28 = vmax.f32 %v1195_v45, 0.0  ;;  %v9813_v45 = vor.u32 %v11204_v25, %v9812_v41 }
 0x1ee   : > { %17168 = vst [vmem:[#allocation54_spill] sm:$0xff] %v12863_v24  ;;  %v2123_v42 = vadd.f32 %v12798_v16, %v1954_v13  ;;  %v9493_v16 = vor.u32 %v11122_v20, %v9490_v38  ;;  %v9387_v24 = vld [vmem:[%s12153_s23 + $0x1c0] sm:$0xf] }
 0x1ef   : > { %17169 = vst [vmem:[#allocation55_spill] sm:$0xff] %v12865_v61  ;;  %1992 = vmatmul.bf16.gmra.mxu1 %v9380_v9 }
 0x1f0   : > { %v2225_v57 = vmax.f32 %v2123_v42, 0.0 }
 0x1f2   : > { %v1196_v49 = vpop.f32.mrf.mxu0  ;;  %v12882_v9 = vadd.f32 %v2225_v57, %v1297_v28 }
 0x1f3   : > { %v1955_v46 = vpop.f32.mrf.mxu1  ;;  %v1197_v13 = vadd.f32 %v12761_v35, %v1196_v49 }
 0x1f4   : > { %v12877_v4 = vpop.f32.mrf.mxu2  ;;  %17171 = vst [vmem:[#allocation57_spill] sm:$0xff] %v12882_v9  ;;  %v1956_v42 = vadd.f32 %v12767_v27, %v1955_v46  ;;  %v11125_v46 = vld [vmem:[%s12226_s0 + $0x1c] sm:$0xf] }
 0x1f5   : > { %v12880_v23 = vpop.f32.mrf.mxu3  ;;  %v1298_v20 = vmax.f32 %v1197_v13, 0.0 }
 0x1f6   : > { %17170 = vst [vmem:[#allocation56_spill] sm:$0xff] %v12880_v23  ;;  %v2125_v61 = vadd.f32 %v12817_v17, %v1956_v42  ;;  %v11106_v23 = vld [vmem:[%s12153_s23 + $0x1c4] sm:$0xf0]  ;;  %v11207_v42 = vld [vmem:[%s12226_s0 + $0x2a8] sm:$0xf0] }
 0x1f7   : > { %v9388_v49 = vor.u32 %v11106_v23, %v9387_v24  ;;  %v9824_v23 = vld [vmem:[%s12226_s0 + $0x2a0] sm:$0xf] }
 0x1f8   : > { %v2226_v38 = vmax.f32 %v2125_v61, 0.0 }
 0x1f9   : > { %3346 = vmatmul.bf16.vlgmr.msrb.gmra.mxu2 %v9493_v16 }
 0x1fa   : > { %v1199_v59 = vpop.f32.mrf.mxu0  ;;  %3312 = vmatmul.bf16.gmra.mxu3 %v9813_v45  ;;  %v12894_v41 = vadd.f32 %v2226_v38, %v1298_v20  ;;  %v9502_v45 = vld [vmem:[%s12226_s0 + $0x24] sm:$0xf0] }
 0x1fb   : > { %v1958_v17 = vpop.f32.mrf.mxu1  ;;  %v11042_v38 = vld [vmem:[%s12192_s22 + $0xe8] sm:$0xff]  ;;  %v9505_v9 = vor.u32 %v11125_v46, %v9502_v45 }
 0x1fc   : > { %v12890_v57 = vpop.f32.mrf.mxu2  ;;  %17173 = vst [vmem:[#allocation59_spill] sm:$0xff] %v12894_v41  ;;  %v1959_v61 = vadd.f32 %v12767_v27, %v1958_v17 }
 0x1fd   : > { %9156 = vmatmul.msk.bf16.gmra.mxu0 %vm989_vm2, %v11041_v0  ;;  %v12892_v25 = vpop.f32.mrf.mxu3  ;;  %v1200_v0 = vadd.f32 %v12761_v35, %v1199_v59 }
 0x1fe   : > { %17172 = vst [vmem:[#allocation58_spill] sm:$0xff] %v12892_v25  ;;  %v2128_v16 = vadd.f32 %v12834_v43, %v1959_v61  ;;  %v9825_v43 = vor.u32 %v11207_v42, %v9824_v23  ;;  %v11108_v25 = vld [vmem:[%s12153_s23 + $0x1d4] sm:$0xf0]  ;;  %v11400_v23 = vld [vmem:[%s17040_s7 + $0x20] sm:$0xff] }
 0x1ff   : > { %1997 = vmatmul.bf16.gmra.mxu1 %v9388_v49  ;;  %v1299_v13 = vmax.f32 %v1200_v0, 0.0 }
 0x200   : > { %v2227_v24 = vmax.f32 %v2128_v16, 0.0  ;;  %v9395_v16 = vld [vmem:[%s12153_s23 + $0x1d0] sm:$0xf]  ;;  %5189 = vmatpush.bf16.msrb.mxu1 %v11400_v23  ;;  %v11408_v23 = vld [vmem:[%s17040_s7 + $0x60] sm:$0xff] }
 0x202   : > { %v1201_v28 = vpop.f32.mrf.mxu0  ;;  %v12911_v17 = vadd.f32 %v2227_v24, %v1299_v13  ;;  %v11410_v24 = vld [vmem:[%s17040_s7 + $0x70] sm:$0xff] }
 0x203   : > { %v1960_v60 = vpop.f32.mrf.mxu1  ;;  %v1202_v49 = vadd.f32 %v12761_v35, %v1201_v28  ;;  %v9396_v28 = vor.u32 %v11108_v25, %v9395_v16  ;;  %5356 = vmatpush.bf16.msra.mxu3 %v11410_v24  ;;  %v11043_v24 = vld [vmem:[%s12192_s22 + $0xf0] sm:$0xff] }
 0x204   : > { %v12906_v20 = vpop.f32.mrf.mxu2  ;;  %17175 = vst [vmem:[#allocation61_spill] sm:$0xff] %v12911_v17  ;;  %v1961_v0 = vadd.f32 %v12767_v27, %v1960_v60  ;;  %v9514_v60 = vld [vmem:[%s12226_s0 + $0x3c] sm:$0xf0] }
 0x205   : > { %v12909_v41 = vpop.f32.mrf.mxu3  ;;  %v1300_v53 = vmax.f32 %v1202_v49, 0.0 }
 0x206   : > { %17174 = vst [vmem:[#allocation60_spill] sm:$0xff] %v12909_v41  ;;  %v2130_v61 = vadd.f32 %v12847_v5, %v1961_v0  ;;  %v9836_v0 = vld [vmem:[%s12226_s0 + $0x2b8] sm:$0xf] }
 0x208   : > { %v2228_v41 = vmax.f32 %v2130_v61, 0.0  ;;  %v11210_v61 = vld [vmem:[%s12226_s0 + $0x2c0] sm:$0xf0] }
 0x209   : > { %3351 = vmatmul.bf16.gmra.mxu2 %v9505_v9 }
 0x20a   : > { %v1204_v59 = vpop.f32.mrf.mxu0  ;;  %3317 = vmatmul.bf16.gmra.mxu3 %v9825_v43  ;;  %v12926_v5 = vadd.f32 %v2228_v41, %v1300_v53  ;;  %v11409_v53 = vld [vmem:[%s17040_s7 + $0x68] sm:$0xff]  ;;  %v11128_v41 = vld [vmem:[%s12226_s0 + $0x34] sm:$0xf]  ;;  %v11399_v43 = vld [vmem:[%s17040_s7 + $0x18] sm:$0xff] }
 0x20b   : > { %v1963_v9 = vpop.f32.mrf.mxu1  ;;  %v1205_v42 = vadd.f32 %v12761_v35, %v1204_v59  ;;  %5357 = vmatpush.bf16.msra.mxu3 %v11409_v53  ;;  %5190 = vmatpush.bf16.msrb.mxu1 %v11399_v43  ;;  %v11398_v53 = vld [vmem:[%s17040_s7 + $0x10] sm:$0xff] }
 0x20c   : > { %v12919_v46 = vpop.f32.mrf.mxu2  ;;  %17177 = vst [vmem:[#allocation63_spill] sm:$0xff] %v12926_v5 }
 0x20d   : > { %9157 = vmatmul.msk.bf16.gmra.mxu0 %vm989_vm2, %v11042_v38  ;;  %v12921_v45 = vpop.f32.mrf.mxu3  ;;  %v1964_v38 = vadd.f32 %v12767_v27, %v1963_v9  ;;  %v1301_v49 = vmax.f32 %v1205_v42, 0.0  ;;  %v9517_v9 = vor.u32 %v11128_v41, %v9514_v60  ;;  %v11407_v60 = vld [vmem:[%s17040_s7 + $0x58] sm:$0xff] }
 0x20e   : > { %17176 = vst [vmem:[#allocation62_spill] sm:$0xff] %v12921_v45  ;;  %v11216_v45 = vld [vmem:[%s12226_s0 + $0x2f0] sm:$0xf0] }
 0x20f   : > { %v2133_v25 = vadd.f32 %v12861_v32, %v1964_v38  ;;  %2002 = vmatmul.bf16.gmra.mxu1 %v9396_v28  ;;  %5358 = vmatpush.bf16.msra.mxu3 %v11408_v23 }
 0x210   : > { %5191 = vmatpush.bf16.msrb.mxu1 %v11398_v53  ;;  %v11396_v53 = vld [vmem:[%s17040_s7] sm:$0xff] }
 0x211   : > { %v2229_v59 = vmax.f32 %v2133_v25, 0.0  ;;  %v9837_v25 = vor.u32 %v11210_v61, %v9836_v0 }
 0x212   : > { %v1206_v13 = vpop.f32.mrf.mxu0 }
 0x213   : > { %v12952_v38 = vadd.f32 %v2229_v59, %v1301_v49  ;;  %v1965_v42 = vpop.f32.mrf.mxu1  ;;  %v1207_v43 = vadd.f32 %v12761_v35, %v1206_v13  ;;  %v9403_v49 = vld [vmem:[%s12153_s23 + $0x1e0] sm:$0xf]  ;;  %v11110_v59 = vld [vmem:[%s12153_s23 + $0x1e4] sm:$0xf0]  ;;  %5359 = vmatpush.bf16.msra.mxu3 %v11407_v60 }
 0x214   : > { %v12944_v16 = vpop.f32.mrf.mxu2  ;;  %v1966_v5 = vadd.f32 %v12767_v27, %v1965_v42  ;;  %v11397_v13 = vld [vmem:[%s17040_s7 + $0x8] sm:$0xff] }
 0x215   : > { %v12947_v32 = vpop.f32.mrf.mxu3  ;;  %17179 = vst [vmem:[#allocation65_spill] sm:$0xff] %v12952_v38  ;;  %v1302_v0 = vmax.f32 %v1207_v43, 0.0  ;;  %5192 = vmatpush.bf16.msrb.mxu1 %v11397_v13  ;;  %v11235_v60 = vld [vmem:[%s17039_s6 + $0x88] sm:$0xff] }
 0x216   : > { %17178 = vst [vmem:[#allocation64_spill] sm:$0xff] %v12947_v32  ;;  %v2135_v41 = vadd.f32 %v12877_v4, %v1966_v5  ;;  %v11131_v13 = vld [vmem:[%s12226_s0 + $0x4c] sm:$0xf]  ;;  %3513 = vmatpush.bf16.msra.mxu0 %v11235_v60  ;;  %v9860_v32 = vld [vmem:[%s12226_s0 + $0x2e8] sm:$0xf] }
 0x218   : > { %v2230_v61 = vmax.f32 %v2135_v41, 0.0 }
 0x219   : > { %3356 = vmatmul.bf16.gmra.mxu2 %v9517_v9  ;;  %v11406_v9 = vld [vmem:[%s17040_s7 + $0x50] sm:$0xff]  ;;  %5193 = vmatpush.bf16.msrb.mxu1 %v11396_v53  ;;  %v11044_v53 = vld [vmem:[%s12192_s22 + $0xf8] sm:$0xff]  ;;  %s11443_s22 = smul.u32 640, %s17653_s2 }
 0x21a   : > { %v1209_v28 = vpop.f32.mrf.mxu0  ;;  %3322 = vmatmul.bf16.gmra.mxu3 %v9837_v25  ;;  %v12976_v42 = vadd.f32 %v2230_v61, %v1302_v0  ;;  %v9526_v0 = vld [vmem:[%s12226_s0 + $0x54] sm:$0xf0] }
 0x21b   : > { %v1210_v43 = vadd.f32 %v12761_v35, %v1209_v28  ;;  %5360 = vmatpush.bf16.msra.mxu3 %v11406_v9  ;;  %v9529_v38 = vor.u32 %v11131_v13, %v9526_v0  ;;  %v9411_v13 = vld [vmem:[%s12153_s23 + $0x1f0] sm:$0xf]  ;;  %v11112_v0 = vld [vmem:[%s12153_s23 + $0x1f4] sm:$0xf0]  ;;  %s13038_s28 = scalar_lea.vmem %s17188_s20, %s11443_s22  ;;  %s678_s20 = sand.u32 1, %s11960_s21  }
 0x21c   : > { %v12969_v23 = vpop.f32.mrf.mxu2  ;;  %17181 = vst [vmem:[#allocation67_spill] sm:$0xff] %v12976_v42  ;;  %v1968_v25 = vpop.f32.mrf.mxu1  ;;  %v11213_v42 = vld [vmem:[%s12226_s0 + $0x2d8] sm:$0xf0]  ;;  %s8967_s30 = sshll.u32 %s678_s20, 10 }
 0x21d   : > { %9158 = vmatmul.msk.bf16.gmra.mxu0 %vm989_vm2, %v11043_v24  ;;  %v12971_v4 = vpop.f32.mrf.mxu3  ;;  %v9404_v24 = vor.u32 %v11110_v59, %v9403_v49  ;;  %v1969_v41 = vadd.f32 %v12767_v27, %v1968_v25  ;;  %v11405_v59 = vld [vmem:[%s17040_s7 + $0x48] sm:$0xff]  ;;  %v1303_v28 = vmax.f32 %v1210_v43, 0.0  ;;  %v9848_v25 = vld [vmem:[%s12226_s0 + $0x2d0] sm:$0xf]  ;;  %v11404_v43 = vld [vmem:[%s17040_s7 + $0x40] sm:$0xff]  ;;  %s15434_s3 = scalar_lea.vmem [#allocation3], %s8967_s30  ;;  %s15986_s30 = scalar_lea.vmem %s17051_s18, %s11011_s1 }
 0x21e   : > { %17180 = vst [vmem:[#allocation66_spill] sm:$0xff] %v12971_v4  ;;  %s8824_s24 = sshll.u32 %s15434_s3, 4  ;;  %s8825_s24 = int_to_ptr.vmem [resolvable:$true] %s8824_s24 }
 0x21f   : > { %v2138_v49 = vadd.f32 %v12890_v57, %v1969_v41  ;;  %2007 = vmatmul.bf16.gmra.mxu1 %v9404_v24  ;;  %5361 = vmatpush.bf16.msra.mxu3 %v11405_v59  ;;  %v11234_v57 = vld [vmem:[%s17039_s6 + $0x80] sm:$0xff]  ;;  %v9849_v59 = vor.u32 %v11213_v42, %v9848_v25 }
 0x220   : > { %3514 = vmatpush.bf16.msra.mxu0 %v11234_v57 }
 0x221   : > { %v2231_v61 = vmax.f32 %v2138_v49, 0.0 }
 0x222   : > { %v1211_v5 = vpop.f32.mrf.mxu0 }
 0x223   : > { %v13005_v60 = vadd.f32 %v2231_v61, %v1303_v28  ;;  %v1212_v17 = vadd.f32 %v12761_v35, %v1211_v5  ;;  %5362 = vmatpush.bf16.msra.mxu3 %v11404_v43 }
 0x224   : > { %v12994_v9 = vpop.f32.mrf.mxu2  ;;  %v1970_v49 = vpop.f32.mrf.mxu1 }
 0x225   : > { %v13000_v24 = vpop.f32.mrf.mxu3  ;;  %17183 = vst [vmem:[#allocation69_spill] sm:$0xff] %v13005_v60  ;;  %v1971_v4 = vadd.f32 %v12767_v27, %v1970_v49  ;;  %v1304_v28 = vmax.f32 %v1212_v17, 0.0  ;;  %v11049_v17 = vld [vmem:[%s12153_s23 + $0x4] sm:$0xf] }
 0x226   : > { %17182 = vst [vmem:[#allocation68_spill] sm:$0xff] %v13000_v24  ;;  %v11134_v49 = vld [vmem:[%s12226_s0 + $0x64] sm:$0xf] }
 0x227   : > { %v2140_v24 = vadd.f32 %v12906_v20, %v1971_v4 }
 0x229   : > { %3361 = vmatmul.bf16.gmra.mxu2 %v9529_v38  ;;  %v2232_v42 = vmax.f32 %v2140_v24, 0.0  ;;  %v9165_v24 = vld [vmem:[%s12153_s23 + $0x8] sm:$0xf0] }
 0x22a   : > { %v1214_v41 = vpop.f32.mrf.mxu0  ;;  %3327 = vmatmul.bf16.gmra.mxu3 %v9849_v59  ;;  %v9538_v59 = vld [vmem:[%s12226_s0 + $0x6c] sm:$0xf0] }
 0x22b   : > { %v13017_v20 = vadd.f32 %v2232_v42, %v1304_v28  ;;  %v1215_v4 = vadd.f32 %v12761_v35, %v1214_v41  ;;  %v9541_v42 = vor.u32 %v11134_v49, %v9538_v59 }
 0x22c   : > { %v13013_v61 = vpop.f32.mrf.mxu2  ;;  %v1973_v38 = vpop.f32.mrf.mxu1 }
 0x22d   : > { %9159 = vmatmul.msk.bf16.gmra.mxu0 %vm989_vm2, %v11044_v53  ;;  %v13015_v5 = vpop.f32.mrf.mxu3  ;;  %v9412_v53 = vor.u32 %v11112_v0, %v9411_v13  ;;  %17185 = vst [vmem:[#allocation71_spill] sm:$0xff] %v13017_v20  ;;  %v1974_v57 = vadd.f32 %v12767_v27, %v1973_v38  ;;  %v1305_v60 = vmax.f32 %v1215_v4, 0.0  ;;  %v9168_v0 = vor.u32 %v11049_v17, %v9165_v24 }
 0x22e   : > { %17184 = vst [vmem:[#allocation70_spill] sm:$0xff] %v13015_v5 }
 0x22f   : > { %v2143_v43 = vadd.f32 %v12919_v46, %v1974_v57  ;;  %2012 = vmatmul.bf16.gmra.mxu1 %v9412_v53  ;;  %v9861_v53 = vor.u32 %v11216_v45, %v9860_v32  ;;  %v9977_v45 = vld [vmem:[%s13038_s28] sm:$0xf]  ;;  %v11238_v32 = vld [vmem:[%s13038_s28 + $0x10] sm:$0xf0] }
 0x230   : > { %v9978_v49 = vor.u32 %v11238_v32, %v9977_v45 }
 0x231   : > { %v2233_v5 = vmax.f32 %v2143_v43, 0.0 }
 0x232   : > { %v1216_v25 = vpop.f32.mrf.mxu0 }
 0x233   : > { %v13033_v38 = vadd.f32 %v2233_v5, %v1305_v60  ;;  %v1217_v4 = vadd.f32 %v12761_v35, %v1216_v25 }
 0x234   : > { %v13029_v13 = vpop.f32.mrf.mxu2  ;;  %v1975_v46 = vpop.f32.mrf.mxu1 }
 0x235   : > { %v13031_v28 = vpop.f32.mrf.mxu3  ;;  %17187 = vst [vmem:[#allocation73_spill] sm:$0xff] %v13033_v38  ;;  %v1976_v57 = vadd.f32 %v12767_v27, %v1975_v46  ;;  %v1306_v60 = vmax.f32 %v1217_v4, 0.0  ;;  %v11124_v4 = vld [vmem:[%s12226_s0 + $0x10] sm:$0xf0] }
 0x236   : > { %17186 = vst [vmem:[#allocation72_spill] sm:$0xff] %v13031_v28  ;;  %v9979_v28 = vld [vmem:[%s13038_s28 + $0x14] sm:$0xf0] }
 0x237   : > { %v2145_v43 = vadd.f32 %v12944_v16, %v1976_v57  ;;  %v11137_v57 = vld [vmem:[%s12226_s0 + $0x7c] sm:$0xf] }
 0x239   : > { %3366 = vmatmul.bf16.gmra.mxu2 %v9541_v42  ;;  %v2234_v5 = vmax.f32 %v2145_v43, 0.0  ;;  %v9550_v43 = vld [vmem:[%s12226_s0 + $0x84] sm:$0xf0] }
 0x23a   : > { %v1219_v41 = vpop.f32.mrf.mxu0  ;;  %3332 = vmatmul.bf16.gmra.mxu3 %v9861_v53  ;;  %v9496_v53 = vld [vmem:[%s12226_s0 + $0x8] sm:$0xf] }
 0x23b   : > { %v13050_v59 = vadd.f32 %v2234_v5, %v1306_v60  ;;  %v9497_v32 = vor.u32 %v11124_v4, %v9496_v53  ;;  %v9553_v5 = vor.u32 %v11137_v57, %v9550_v43  ;;  %v9997_v53 = vld [vmem:[%s13038_s28 + $0x28] sm:$0xf]  ;;  %v11243_v4 = vld [vmem:[%s13038_s28 + $0x38] sm:$0xf0] }
 0x23c   : > { %v13046_v17 = vpop.f32.mrf.mxu2  ;;  %v1978_v16 = vpop.f32.mrf.mxu1 }
 0x23d   : > { %9453 = vmatmul.msk.bf16.vlgmr.msrb.gmra.mxu0 %vm1752_vm1, %v9168_v0  ;;  %v13048_v25 = vpop.f32.mrf.mxu3  ;;  %17190 = vst [vmem:[#allocation75_spill] sm:$0xff] %v13050_v59  ;;  %v1220_v0 = vadd.f32 %v12761_v35, %v1219_v41  ;;  %v1979_v42 = vadd.f32 %v12767_v27, %v1978_v16 }
 0x23e   : > { %17189 = vst [vmem:[#allocation74_spill] sm:$0xff] %v13048_v25  ;;  %v11236_v25 = vld [vmem:[%s13038_s28 + $0x4] sm:$0xf] }
 0x23f   : > { %v2148_v46 = vadd.f32 %v12969_v23, %v1979_v42  ;;  %5194 = vmatmul.bf16.vlgmr.msrb.gmra.mxu1 %v9978_v49  ;;  %v1307_v38 = vmax.f32 %v1220_v0, 0.0  ;;  %v9982_v16 = vor.u32 %v11236_v25, %v9979_v28 }
 0x241   : > { %v2235_v20 = vmax.f32 %v2148_v46, 0.0 }
 0x242   : > { %v1221_v24 = vpop.f32.mrf.mxu0 }
 0x243   : > { %v13065_v23 = vadd.f32 %v2235_v20, %v1307_v38  ;;  %v1222_v42 = vadd.f32 %v12761_v35, %v1221_v24  ;;  %v9998_v24 = vor.u32 %v11243_v4, %v9997_v53 }
 0x244   : > { %v13061_v45 = vpop.f32.mrf.mxu2  ;;  %v1980_v49 = vpop.f32.mrf.mxu1 }
 0x245   : > { %v13063_v60 = vpop.f32.mrf.mxu3  ;;  %17192 = vst [vmem:[#allocation77_spill] sm:$0xff] %v13065_v23  ;;  %v1981_v0 = vadd.f32 %v12767_v27, %v1980_v49  ;;  %v1308_v20 = vmax.f32 %v1222_v42, 0.0  ;;  %v11127_v42 = vld [vmem:[%s12226_s0 + $0x28] sm:$0xf0] }
 0x246   : > { %17191 = vst [vmem:[#allocation76_spill] sm:$0xff] %v13063_v60  ;;  %v9999_v60 = vld [vmem:[%s13038_s28 + $0x3c] sm:$0xf0] }
 0x247   : > { %v2150_v46 = vadd.f32 %v12994_v9, %v1981_v0  ;;  %v11140_v0 = vld [vmem:[%s12226_s0 + $0x94] sm:$0xf] }
 0x249   : > { %3371 = vmatmul.bf16.gmra.mxu2 %v9553_v5  ;;  %v2236_v38 = vmax.f32 %v2150_v46, 0.0  ;;  %v9562_v46 = vld [vmem:[%s12226_s0 + $0x9c] sm:$0xf0] }
 0x24a   : > { %v1224_v41 = vpop.f32.mrf.mxu0  ;;  %5363 = vmatmul.bf16.vlgmr.msra.gmra.mxu3 %v9982_v16  ;;  %v9508_v16 = vld [vmem:[%s12226_s0 + $0x20] sm:$0xf] }
 0x24b   : > { %v13077_v43 = vadd.f32 %v2236_v38, %v1308_v20  ;;  %v9509_v4 = vor.u32 %v11127_v42, %v9508_v16  ;;  %v9565_v38 = vor.u32 %v11140_v0, %v9562_v46  ;;  %v10017_v16 = vld [vmem:[%s13038_s28 + $0x50] sm:$0xf]  ;;  %v11248_v42 = vld [vmem:[%s13038_s28 + $0x60] sm:$0xf0] }
 0x24c   : > { %v13073_v57 = vpop.f32.mrf.mxu2  ;;  %v1983_v9 = vpop.f32.mrf.mxu1 }
 0x24d   : > { %9942 = vmatmul.msk.bf16.vlgmr.msra.gmra.mxu0 %vm3072_vm3, %v9497_v32  ;;  %v13075_v28 = vpop.f32.mrf.mxu3  ;;  %17194 = vst [vmem:[#allocation79_spill] sm:$0xff] %v13077_v43  ;;  %v1225_v32 = vadd.f32 %v12761_v35, %v1224_v41  ;;  %v1984_v5 = vadd.f32 %v12767_v27, %v1983_v9 }
 0x24e   : > { %17193 = vst [vmem:[#allocation78_spill] sm:$0xff] %v13075_v28  ;;  %v11241_v28 = vld [vmem:[%s13038_s28 + $0x2c] sm:$0xf] }
 0x24f   : > { %v2153_v49 = vadd.f32 %v13013_v61, %v1984_v5  ;;  %5199 = vmatmul.bf16.gmra.mxu1 %v9998_v24  ;;  %v1309_v23 = vmax.f32 %v1225_v32, 0.0  ;;  %v10002_v24 = vor.u32 %v11241_v28, %v9999_v60 }
 0x251   : > { %v2237_v59 = vmax.f32 %v2153_v49, 0.0 }
 0x252   : > { %v1226_v25 = vpop.f32.mrf.mxu0 }
 0x253   : > { %v13092_v9 = vadd.f32 %v2237_v59, %v1309_v23  ;;  %v1227_v5 = vadd.f32 %v12761_v35, %v1226_v25  ;;  %v10018_v25 = vor.u32 %v11248_v42, %v10017_v16 }
 0x254   : > { %v13088_v53 = vpop.f32.mrf.mxu2  ;;  %v1985_v61 = vpop.f32.mrf.mxu1 }
 0x255   : > { %v13090_v20 = vpop.f32.mrf.mxu3  ;;  %17196 = vst [vmem:[#allocation81_spill] sm:$0xff] %v13092_v9  ;;  %v1986_v32 = vadd.f32 %v12767_v27, %v1985_v61  ;;  %v1310_v59 = vmax.f32 %v1227_v5, 0.0  ;;  %v11130_v5 = vld [vmem:[%s12226_s0 + $0x40] sm:$0xf0] }
 0x256   : > { %17195 = vst [vmem:[#allocation80_spill] sm:$0xff] %v13090_v20  ;;  %v10019_v20 = vld [vmem:[%s13038_s28 + $0x64] sm:$0xf0] }
 0x257   : > { %v2155_v49 = vadd.f32 %v13029_v13, %v1986_v32  ;;  %v11143_v32 = vld [vmem:[%s12226_s0 + $0xac] sm:$0xf] }
 0x259   : > { %3376 = vmatmul.bf16.gmra.mxu2 %v9565_v38  ;;  %v2238_v23 = vmax.f32 %v2155_v49, 0.0  ;;  %v9574_v49 = vld [vmem:[%s12226_s0 + $0xb4] sm:$0xf0] }
 0x25a   : > { %v1229_v41 = vpop.f32.mrf.mxu0  ;;  %5368 = vmatmul.bf16.gmra.mxu3 %v10002_v24  ;;  %v9520_v24 = vld [vmem:[%s12226_s0 + $0x38] sm:$0xf] }
 0x25b   : > { %v13104_v46 = vadd.f32 %v2238_v23, %v1310_v59  ;;  %v9521_v42 = vor.u32 %v11130_v5, %v9520_v24  ;;  %v9577_v23 = vor.u32 %v11143_v32, %v9574_v49  ;;  %v10037_v24 = vld [vmem:[%s13038_s28 + $0x78] sm:$0xf]  ;;  %v11253_v5 = vld [vmem:[%s13038_s28 + $0x88] sm:$0xf0] }
 0x25c   : > { %v13100_v0 = vpop.f32.mrf.mxu2  ;;  %v1988_v13 = vpop.f32.mrf.mxu1 }
 0x25d   : > { %9943 = vmatmul.msk.bf16.gmra.mxu0 %vm3072_vm3, %v9509_v4  ;;  %v13102_v60 = vpop.f32.mrf.mxu3  ;;  %17198 = vst [vmem:[#allocation83_spill] sm:$0xff] %v13104_v46  ;;  %v1230_v4 = vadd.f32 %v12761_v35, %v1229_v41  ;;  %v1989_v38 = vadd.f32 %v12767_v27, %v1988_v13 }
 0x25e   : > { %17197 = vst [vmem:[#allocation82_spill] sm:$0xff] %v13102_v60  ;;  %v11246_v60 = vld [vmem:[%s13038_s28 + $0x54] sm:$0xf] }
 0x25f   : > { %v2158_v61 = vadd.f32 %v13046_v17, %v1989_v38  ;;  %5204 = vmatmul.bf16.gmra.mxu1 %v10018_v25  ;;  %v1311_v9 = vmax.f32 %v1230_v4, 0.0  ;;  %v10022_v25 = vor.u32 %v11246_v60, %v10019_v20 }
 0x261   : > { %v2239_v43 = vmax.f32 %v2158_v61, 0.0 }
 0x262   : > { %v1231_v28 = vpop.f32.mrf.mxu0 }
 0x263   : > { %v13119_v13 = vadd.f32 %v2239_v43, %v1311_v9  ;;  %v1232_v38 = vadd.f32 %v12761_v35, %v1231_v28  ;;  %v10038_v28 = vor.u32 %v11253_v5, %v10037_v24 }
 0x264   : > { %v13115_v16 = vpop.f32.mrf.mxu2  ;;  %v1990_v17 = vpop.f32.mrf.mxu1 }
 0x265   : > { %v13117_v59 = vpop.f32.mrf.mxu3  ;;  %17200 = vst [vmem:[#allocation85_spill] sm:$0xff] %v13119_v13  ;;  %v1991_v4 = vadd.f32 %v12767_v27, %v1990_v17  ;;  %v1312_v43 = vmax.f32 %v1232_v38, 0.0  ;;  %v11133_v38 = vld [vmem:[%s12226_s0 + $0x58] sm:$0xf0] }
 0x266   : > { %17199 = vst [vmem:[#allocation84_spill] sm:$0xff] %v13117_v59  ;;  %v10039_v59 = vld [vmem:[%s13038_s28 + $0x8c] sm:$0xf0] }
 0x267   : > { %v2160_v61 = vadd.f32 %v13061_v45, %v1991_v4  ;;  %v11146_v4 = vld [vmem:[%s12226_s0 + $0xc4] sm:$0xf] }
 0x269   : > { %3381 = vmatmul.bf16.gmra.mxu2 %v9577_v23  ;;  %v2240_v9 = vmax.f32 %v2160_v61, 0.0  ;;  %v9586_v61 = vld [vmem:[%s12226_s0 + $0xcc] sm:$0xf0] }
 0x26a   : > { %v1234_v41 = vpop.f32.mrf.mxu0  ;;  %5373 = vmatmul.bf16.gmra.mxu3 %v10022_v25  ;;  %v9532_v25 = vld [vmem:[%s12226_s0 + $0x50] sm:$0xf] }
 0x26b   : > { %v13131_v49 = vadd.f32 %v2240_v9, %v1312_v43  ;;  %v9533_v5 = vor.u32 %v11133_v38, %v9532_v25  ;;  %v9589_v9 = vor.u32 %v11146_v4, %v9586_v61  ;;  %v10057_v38 = vld [vmem:[%s13038_s28 + $0xa0] sm:$0xf] }
 0x26c   : > { %v13127_v32 = vpop.f32.mrf.mxu2  ;;  %v1993_v45 = vpop.f32.mrf.mxu1 }
 0x26d   : > { %9944 = vmatmul.msk.bf16.gmra.mxu0 %vm3072_vm3, %v9521_v42  ;;  %v13129_v20 = vpop.f32.mrf.mxu3  ;;  %17202 = vst [vmem:[#allocation87_spill] sm:$0xff] %v13131_v49  ;;  %v1235_v42 = vadd.f32 %v12761_v35, %v1234_v41  ;;  %v1994_v23 = vadd.f32 %v12767_v27, %v1993_v45  ;;  %v9598_v49 = vld [vmem:[%s12226_s0 + $0xe4] sm:$0xf0] }
 0x26e   : > { %17201 = vst [vmem:[#allocation86_spill] sm:$0xff] %v13129_v20  ;;  %v11251_v20 = vld [vmem:[%s13038_s28 + $0x7c] sm:$0xf] }
 0x26f   : > { %v2163_v17 = vadd.f32 %v13073_v57, %v1994_v23  ;;  %5209 = vmatmul.bf16.gmra.mxu1 %v10038_v28  ;;  %v1313_v13 = vmax.f32 %v1235_v42, 0.0  ;;  %v10042_v28 = vor.u32 %v11251_v20, %v10039_v59  ;;  %v13151_v42 = vld [vmem:[%s17041_s8 + $0x2] ss:$0 sm:$0xff] }
 0x270   : > { %v3179_v59 = vadd.f32 %v13151_v42, %v12341_v18 }
 0x271   : > { %v2241_v46 = vmax.f32 %v2163_v17, 0.0 }
 0x272   : > { %v1236_v60 = vpop.f32.mrf.mxu0 }
 0x273   : > { %v13146_v45 = vadd.f32 %v2241_v46, %v1313_v13  ;;  %v1237_v23 = vadd.f32 %v12761_v35, %v1236_v60  ;;  %v11258_v46 = vld [vmem:[%s13038_s28 + $0xb0] sm:$0xf0] }
 0x274   : > { %v13142_v24 = vpop.f32.mrf.mxu2  ;;  %v1995_v57 = vpop.f32.mrf.mxu1 }
 0x275   : > { %v13144_v43 = vpop.f32.mrf.mxu3  ;;  %17204 = vst [vmem:[#allocation89_spill] sm:$0xff] %v13146_v45  ;;  %v1996_v17 = vadd.f32 %v12767_v27, %v1995_v57  ;;  %v1314_v13 = vmax.f32 %v1237_v23, 0.0  ;;  %v11149_v45 = vld [vmem:[%s12226_s0 + $0xdc] sm:$0xf] }
 0x276   : > { %17203 = vst [vmem:[#allocation88_spill] sm:$0xff] %v13144_v43 }
 0x277   : > { %v2165_v25 = vadd.f32 %v13088_v53, %v1996_v17  ;;  %v9544_v17 = vld [vmem:[%s12226_s0 + $0x68] sm:$0xf] }
 0x279   : > { %3386 = vmatmul.bf16.gmra.mxu2 %v9589_v9  ;;  %v2242_v20 = vmax.f32 %v2165_v25, 0.0  ;;  %v11136_v25 = vld [vmem:[%s12226_s0 + $0x70] sm:$0xf0] }
 0x27a   : > { %v1239_v41 = vpop.f32.mrf.mxu0  ;;  %5378 = vmatmul.bf16.gmra.mxu3 %v10042_v28 }
 0x27b   : > { %v13165_v9 = vadd.f32 %v2242_v20, %v1314_v13  ;;  %v1240_v28 = vadd.f32 %v12761_v35, %v1239_v41  ;;  %v9545_v41 = vor.u32 %v11136_v25, %v9544_v17  ;;  %v10077_v17 = vld [vmem:[%s13038_s28 + $0xc8] sm:$0xf]  ;;  %v11263_v25 = vld [vmem:[%s13038_s28 + $0xd8] sm:$0xf0] }
 0x27c   : > { %v3347_v60 = vpop.f32.mrf.mxu2  ;;  %v1998_v57 = vpop.f32.mrf.mxu1 }
 0x27d   : > { %9945 = vmatmul.msk.bf16.gmra.mxu0 %vm3072_vm3, %v9533_v5  ;;  %v13161_v4 = vpop.f32.mrf.mxu3  ;;  %v13163_v61 = vadd.f32 %v3347_v60, %v3179_v59  ;;  %v10058_v5 = vor.u32 %v11258_v46, %v10057_v38  ;;  %17206 = vst [vmem:[#allocation91_spill] sm:$0xff] %v13165_v9  ;;  %v1999_v18 = vadd.f32 %v12767_v27, %v1998_v57  ;;  %v1315_v60 = vmax.f32 %v1240_v28, 0.0  ;;  %v11256_v38 = vld [vmem:[%s13038_s28 + $0xa4] sm:$0xf]  ;;  %v10059_v46 = vld [vmem:[%s13038_s28 + $0xb4] sm:$0xf0] }
 0x27e   : > { %17205 = vst [vmem:[#allocation90_spill] sm:$0xff] %v13161_v4  ;;  %v3181_v59 = vadd.f32 %v13151_v42, %v12352_v33  ;;  %v10062_v43 = vor.u32 %v11256_v38, %v10059_v46 }
 0x27f   : > { %v2168_v23 = vadd.f32 %v13100_v0, %v1999_v18  ;;  %5214 = vmatmul.bf16.gmra.mxu1 %v10058_v5  ;;  %v9601_v5 = vor.u32 %v11149_v45, %v9598_v49  ;;  %v3184_v49 = vadd.f32 %v13151_v42, %v12364_v48 }
 0x281   : > { %v2243_v4 = vmax.f32 %v2168_v23, 0.0 }
 0x282   : > { %v1241_v53 = vpop.f32.mrf.mxu0 }
 0x283   : > { %v13182_v18 = vadd.f32 %v2243_v4, %v1315_v60  ;;  %v1242_v33 = vadd.f32 %v12761_v35, %v1241_v53 }
 0x284   : > { %v3349_v13 = vpop.f32.mrf.mxu2  ;;  %v2000_v9 = vpop.f32.mrf.mxu1 }
 0x285   : > { %v13178_v20 = vpop.f32.mrf.mxu3  ;;  %v13180_v57 = vadd.f32 %v3349_v13, %v3181_v59  ;;  %17207 = vst [vmem:[#allocation92_spill] sm:$0xff] %v13182_v18  ;;  %v2001_v28 = vadd.f32 %v12767_v27, %v2000_v9  ;;  %v1316_v45 = vmax.f32 %v1242_v33, 0.0  ;;  %v11152_v33 = vld [vmem:[%s12226_s0 + $0xf4] sm:$0xf] }
 0x287   : > { %v2170_v23 = vadd.f32 %v13115_v16, %v2001_v28  ;;  %v9610_v28 = vld [vmem:[%s12226_s0 + $0xfc] sm:$0xf0] }
 0x289   : > { %3391 = vmatmul.bf16.gmra.mxu2 %v9601_v5  ;;  %v2244_v4 = vmax.f32 %v2170_v23, 0.0  ;;  %v11139_v5 = vld [vmem:[%s12226_s0 + $0x88] sm:$0xf0]  ;;  %v3186_v23 = vadd.f32 %v13151_v42, %v12378_v7  ;;  %v13218_v7 = vld [vmem:[%s17041_s8] ss:$0 sm:$0xff] }
 0x28a   : > { %v1244_v0 = vpop.f32.mrf.mxu0  ;;  %5383 = vmatmul.bf16.gmra.mxu3 %v10062_v43  ;;  %v10078_v43 = vor.u32 %v11263_v25, %v10077_v17  ;;  %v11261_v17 = vld [vmem:[%s13038_s28 + $0xcc] sm:$0xf]  ;;  %v10079_v25 = vld [vmem:[%s13038_s28 + $0xdc] sm:$0xf0] }
 0x28b   : > { %v13196_v60 = vadd.f32 %v2244_v4, %v1316_v45  ;;  %v1245_v46 = vadd.f32 %v12761_v35, %v1244_v0  ;;  %v9613_v0 = vor.u32 %v11152_v33, %v9610_v28  ;;  %v10097_v33 = vld [vmem:[%s13038_s28 + $0xf0] sm:$0xf]  ;;  %v11268_v28 = vld [vmem:[%s13038_s28 + $0x100] sm:$0xf0] }
 0x28c   : > { %v3352_v53 = vpop.f32.mrf.mxu2  ;;  %v2003_v38 = vpop.f32.mrf.mxu1 }
 0x28d   : > { %9946 = vmatmul.msk.bf16.gmra.mxu0 %vm3072_vm3, %v9545_v41  ;;  %v13192_v59 = vpop.f32.mrf.mxu3  ;;  %v13194_v9 = vadd.f32 %v3352_v53, %v3184_v49  ;;  %17208 = vst [vmem:[#allocation93_spill] sm:$0xff] %v13196_v60  ;;  %v2004_v48 = vadd.f32 %v12767_v27, %v2003_v38  ;;  %v9556_v41 = vld [vmem:[%s12226_s0 + $0x80] sm:$0xf]  ;;  %v1317_v49 = vmax.f32 %v1245_v46, 0.0 }
 0x28e   : > { %v9557_v4 = vor.u32 %v11139_v5, %v9556_v41 }
 0x28f   : > { %v2173_v13 = vadd.f32 %v13127_v32, %v2004_v48  ;;  %5219 = vmatmul.bf16.gmra.mxu1 %v10078_v43  ;;  %v10082_v48 = vor.u32 %v11261_v17, %v10079_v25 }
 0x291   : > { %v2245_v53 = vmax.f32 %v2173_v13, 0.0  ;;  %v13224_v13 = vld [vmem:[%s17041_s8 + $0x1] ss:$0 sm:$0xff] }
 0x292   : > { %v1246_v16 = vpop.f32.mrf.mxu0 }
 0x293   : > { %v13213_v43 = vadd.f32 %v2245_v53, %v1317_v49  ;;  %v1247_v46 = vadd.f32 %v13218_v7, %v1246_v16  ;;  %v3189_v16 = vadd.f32 %v13151_v42, %v12391_v26 }
 0x294   : > { %v3354_v45 = vpop.f32.mrf.mxu2  ;;  %v2005_v38 = vpop.f32.mrf.mxu1 }
 0x295   : > { %v13209_v35 = vpop.f32.mrf.mxu3  ;;  %v13211_v27 = vadd.f32 %v3354_v45, %v3186_v23  ;;  %17209 = vst [vmem:[#allocation94_spill] sm:$0xff] %v13213_v43  ;;  %v2006_v41 = vadd.f32 %v13224_v13, %v2005_v38  ;;  %v1318_v23 = vmax.f32 %v1247_v46, 0.0  ;;  %v10098_v45 = vor.u32 %v11268_v28, %v10097_v33  ;;  %v9568_v46 = vld [vmem:[%s12226_s0 + $0x98] sm:$0xf]  ;;  %v11266_v33 = vld [vmem:[%s13038_s28 + $0xf4] sm:$0xf] }
 0x296   : > { %v9622_v43 = vld [vmem:[%s12226_s0 + $0x114] sm:$0xf0]  ;;  %v10099_v28 = vld [vmem:[%s13038_s28 + $0x104] sm:$0xf0] }
 0x297   : > { %v2175_v5 = vadd.f32 %v13142_v24, %v2006_v41  ;;  %v11142_v41 = vld [vmem:[%s12226_s0 + $0xa0] sm:$0xf0]  ;;  %v10102_v18 = vor.u32 %v11266_v33, %v10099_v28 }
 0x299   : > { %3396 = vmatmul.bf16.gmra.mxu2 %v9613_v0  ;;  %v2246_v49 = vmax.f32 %v2175_v5, 0.0  ;;  %v11155_v5 = vld [vmem:[%s12226_s0 + $0x10c] sm:$0xf] }
 0x29a   : > { %v1249_v32 = vpop.f32.mrf.mxu0  ;;  %5388 = vmatmul.bf16.gmra.mxu3 %v10082_v48 }
 0x29b   : > { %v1250_v38 = vadd.f32 %v13218_v7, %v1249_v32  ;;  %v9569_v32 = vor.u32 %v11142_v41, %v9568_v46  ;;  %v10117_v46 = vld [vmem:[%s13038_s28 + $0x118] sm:$0xf]  ;;  %v11273_v41 = vld [vmem:[%s13038_s28 + $0x128] sm:$0xf0] }
 0x29c   : > { %v3357_v53 = vpop.f32.mrf.mxu2  ;;  %v2008_v0 = vpop.f32.mrf.mxu1 }
 0x29d   : > { %9947 = vmatmul.msk.bf16.gmra.mxu0 %vm3072_vm3, %v9557_v4  ;;  %v13233_v17 = vpop.f32.mrf.mxu3  ;;  %v13235_v25 = vadd.f32 %v3357_v53, %v3189_v16  ;;  %v13237_v4 = vadd.f32 %v2246_v49, %v1318_v23  ;;  %v2009_v26 = vadd.f32 %v13224_v13, %v2008_v0  ;;  %v3191_v16 = vadd.f32 %v13151_v42, %v12405_v44 }
 0x29e   : > { %v1319_v53 = vmax.f32 %v1250_v38, 0.0 }
 0x29f   : > { %17210 = vst [vmem:[#allocation95_spill] sm:$0xff] %v13237_v4  ;;  %v2178_v48 = vadd.f32 %v12291_v47, %v2009_v26  ;;  %5224 = vmatmul.bf16.gmra.mxu1 %v10098_v45  ;;  %v9625_v45 = vor.u32 %v11155_v5, %v9622_v43 }
 0x2a1   : > { %v2247_v60 = vmax.f32 %v2178_v48, 0.0 }
 0x2a2   : > { %v1251_v24 = vpop.f32.mrf.mxu0 }
 0x2a3   : > { %v13254_v26 = vadd.f32 %v2247_v60, %v1319_v53  ;;  %v1252_v44 = vadd.f32 %v13218_v7, %v1251_v24  ;;  %v3194_v60 = vadd.f32 %v13151_v42, %v12418_v3 }
 0x2a4   : > { %v3359_v23 = vpop.f32.mrf.mxu2  ;;  %v2010_v4 = vpop.f32.mrf.mxu1 }
 0x2a5   : > { %v13250_v49 = vpop.f32.mrf.mxu3  ;;  %v13252_v0 = vadd.f32 %v3359_v23, %v3191_v16  ;;  %17212 = vst [vmem:[#allocation97_spill] sm:$0xff] %v13254_v26  ;;  %v2011_v38 = vadd.f32 %v13224_v13, %v2010_v4  ;;  %v1320_v43 = vmax.f32 %v1252_v44, 0.0  ;;  %v11158_v44 = vld [vmem:[%s12226_s0 + $0x124] sm:$0xf] }
 0x2a6   : > { %17211 = vst [vmem:[#allocation96_spill] sm:$0xff] %v13250_v49 }
 0x2a7   : > { %v2180_v48 = vadd.f32 %v12298_v55, %v2011_v38  ;;  %v9634_v38 = vld [vmem:[%s12226_s0 + $0x12c] sm:$0xf0] }
 0x2a9   : > { %3401 = vmatmul.bf16.gmra.mxu2 %v9625_v45  ;;  %v2248_v5 = vmax.f32 %v2180_v48, 0.0  ;;  %v11145_v45 = vld [vmem:[%s12226_s0 + $0xb8] sm:$0xf0]  ;;  %v3196_v48 = vadd.f32 %v13151_v42, %v12432_v6  ;;  %v9637_v6 = vor.u32 %v11158_v44, %v9634_v38  ;;  %v11278_v44 = vld [vmem:[%s13038_s28 + $0x150] sm:$0xf0]  ;;  %v3199_v38 = vadd.f32 %v13151_v42, %v12445_v52 }
 0x2aa   : > { %v1254_v47 = vpop.f32.mrf.mxu0  ;;  %5393 = vmatmul.bf16.gmra.mxu3 %v10102_v18  ;;  %v10118_v18 = vor.u32 %v11273_v41, %v10117_v46  ;;  %v11271_v46 = vld [vmem:[%s13038_s28 + $0x11c] sm:$0xf]  ;;  %v10119_v41 = vld [vmem:[%s13038_s28 + $0x12c] sm:$0xf0] }
 0x2ab   : > { %v13268_v53 = vadd.f32 %v2248_v5, %v1320_v43  ;;  %v1255_v28 = vadd.f32 %v13218_v7, %v1254_v47  ;;  %v1100_v43 = vadd.f32 %v13218_v7, %v12300_v56  ;;  %v1859_v47 = vadd.f32 %v13224_v13, %v12312_v1 }
 0x2ac   : > { %v3362_v24 = vpop.f32.mrf.mxu2  ;;  %v2013_v33 = vpop.f32.mrf.mxu1  ;;  %v10122_v26 = vor.u32 %v11271_v46, %v10119_v41 }
 0x2ad   : > { %9948 = vmatmul.msk.bf16.gmra.mxu0 %vm3072_vm3, %v9569_v32  ;;  %v13264_v16 = vpop.f32.mrf.mxu3  ;;  %v13266_v4 = vadd.f32 %v3362_v24, %v3194_v60  ;;  %17214 = vst [vmem:[#allocation99_spill] sm:$0xff] %v13268_v53  ;;  %v2014_v3 = vadd.f32 %v13224_v13, %v2013_v33  ;;  %v9580_v32 = vld [vmem:[%s12226_s0 + $0xb0] sm:$0xf]  ;;  %v1321_v60 = vmax.f32 %v1255_v28, 0.0  ;;  %v1259_v1 = vmax.f32 %v1100_v43, 0.0 }
 0x2ae   : > { %17213 = vst [vmem:[#allocation98_spill] sm:$0xff] %v13264_v16 }
 0x2af   : > { %v2183_v23 = vadd.f32 %v12308_v62, %v2014_v3  ;;  %5229 = vmatmul.bf16.gmra.mxu1 %v10118_v18  ;;  %v9581_v62 = vor.u32 %v11145_v45, %v9580_v32 }
 0x2b1   : > { %v2249_v24 = vmax.f32 %v2183_v23, 0.0 }
 0x2b2   : > { %v1256_v55 = vpop.f32.mrf.mxu0 }
 0x2b3   : > { %v13289_v28 = vadd.f32 %v2249_v24, %v1321_v60  ;;  %v1257_v56 = vadd.f32 %v13218_v7, %v1256_v55  ;;  %v1861_v24 = vadd.f32 %v13224_v13, %v12323_v11 }
 0x2b4   : > { %v3364_v5 = vpop.f32.mrf.mxu2  ;;  %v2015_v53 = vpop.f32.mrf.mxu1 }
 0x2b5   : > { %v13285_v18 = vpop.f32.mrf.mxu3  ;;  %v13287_v33 = vadd.f32 %v3364_v5, %v3196_v48  ;;  %v2016_v16 = vadd.f32 %v13224_v13, %v2015_v53  ;;  %v10137_v48 = vld [vmem:[%s13038_s28 + $0x140] sm:$0xf]  ;;  %v1322_v60 = vmax.f32 %v1257_v56, 0.0  ;;  %v1102_v53 = vadd.f32 %v13218_v7, %v12310_v63  ;;  %v9592_v7 = vld [vmem:[%s12226_s0 + $0xc8] sm:$0xf] }
 0x2b6   : > { %v11148_v5 = vld [vmem:[%s12226_s0 + $0xd0] sm:$0xf0]  ;;  %v11161_v13 = vld [vmem:[%s12226_s0 + $0x13c] sm:$0xf] }
 0x2b7   : > { %v2185_v32 = vadd.f32 %v12321_v8, %v2016_v16  ;;  %v10138_v16 = vor.u32 %v11278_v44, %v10137_v48 }
 0x2b9   : > { %3406 = vmatmul.bf16.gmra.mxu2 %v9637_v6  ;;  %v2250_v55 = vmax.f32 %v2185_v32, 0.0  ;;  %v11276_v6 = vld [vmem:[%s13038_s28 + $0x144] sm:$0xf] }
 0x2ba   : > { %v2027_v3 = vpop.f32.mrf.mxu0  ;;  %5398 = vmatmul.bf16.gmra.mxu3 %v10122_v26 }
 0x2bb   : > { %v2028_v23 = vadd.f32 %v2027_v3, %v1859_v47  ;;  %v13307_v46 = vadd.f32 %v2250_v55, %v1322_v60  ;;  %v1260_v47 = vmax.f32 %v1102_v53, 0.0  ;;  %v3201_v3 = vadd.f32 %v13151_v42, %v12459_v19  ;;  %v13325_v19 = vld [vmem:[%s17041_s8 + $0x3] ss:$0 sm:$0xff] }
 0x2bc   : > { %v3367_v8 = vpop.f32.mrf.mxu2  ;;  %v5195_v43 = vpop.f32.mrf.mxu1 }
 0x2bd   : > { %v2187_v49 = vmax.f32 %v2028_v23, 0.0  ;;  %9949 = vmatmul.msk.bf16.gmra.mxu0 %vm3072_vm3, %v9581_v62  ;;  %v13305_v26 = vadd.f32 %v3367_v8, %v3199_v38  ;;  %v9646_v62 = vld [vmem:[%s12226_s0 + $0x144] sm:$0xf0]  ;;  %v10139_v23 = vld [vmem:[%s13038_s28 + $0x154] sm:$0xf0] }
 0x2be   : > { %v9649_v38 = vor.u32 %v11161_v13, %v9646_v62  ;;  %v10142_v53 = vor.u32 %v11276_v6, %v10139_v23  ;;  %v9604_v23 = vld [vmem:[%s12226_s0 + $0xe0] sm:$0xf] }
 0x2bf   : > { %v2251_v45 = vadd.f32 %v2187_v49, %v1259_v1  ;;  %v13303_v49 = vpop.f32.mrf.mxu3  ;;  %5234 = vmatmul.bf16.gmra.mxu1 %v10138_v16  ;;  %v9593_v1 = vor.u32 %v11148_v5, %v9592_v7  ;;  %v11283_v16 = vld [vmem:[%s13038_s28 + $0x178] sm:$0xf0] }
 0x2c2   : > { %v2029_v52 = vpop.f32.mrf.mxu0 }
 0x2c3   : > { %v2030_v41 = vadd.f32 %v2029_v52, %v1861_v24  ;;  %v10157_v52 = vld [vmem:[%s13038_s28 + $0x168] sm:$0xf] }
 0x2c4   : > { %v3369_v56 = vpop.f32.mrf.mxu2  ;;  %v5197_v55 = vpop.f32.mrf.mxu1  ;;  %v10158_v5 = vor.u32 %v11283_v16, %v10157_v52 }
 0x2c5   : > { %v2188_v63 = vmax.f32 %v2030_v41, 0.0  ;;  %v13319_v48 = vadd.f32 %v3369_v56, %v3201_v3  ;;  %v5196_v41 = vadd.f32 %v13325_v19, %v5195_v43  ;;  %v11164_v43 = vld [vmem:[%s12226_s0 + $0x154] sm:$0xf] }
 0x2c7   : > { %v2252_v11 = vadd.f32 %v2188_v63, %v1260_v47  ;;  %v13317_v32 = vpop.f32.mrf.mxu3 }
 0x2c9   : > { %3411 = vmatmul.bf16.gmra.mxu2 %v9649_v38  ;;  %v11281_v38 = vld [vmem:[%s13038_s28 + $0x16c] sm:$0xf] }
 0x2ca   : > { %v3516_v44 = vpop.f32.mrf.mxu0  ;;  %5403 = vmatmul.bf16.gmra.mxu3 %v10142_v53  ;;  %v5198_v53 = vadd.f32 %v13325_v19, %v5197_v55 }
 0x2cb   : > { %v3517_v60 = vadd.f32 %v3516_v44, %v13163_v61  ;;  %v3204_v61 = vadd.f32 %v13151_v42, %v12472_v39  ;;  %v11151_v39 = vld [vmem:[%s12226_s0 + $0xe8] sm:$0xf0]  ;;  %v3206_v44 = vadd.f32 %v13151_v42, %v12486_v31 }
 0x2cc   : > { %v3372_v47 = vpop.f32.mrf.mxu2  ;;  %v5200_v3 = vpop.f32.mrf.mxu1 }
 0x2cd   : > { %v3676_v24 = vmax.f32 %v3517_v60, 0.0  ;;  %9950 = vmatmul.msk.bf16.gmra.mxu0 %vm3072_vm3, %v9593_v1  ;;  %v13335_v63 = vadd.f32 %v3372_v47, %v3204_v61  ;;  %v9658_v1 = vld [vmem:[%s12226_s0 + $0x15c] sm:$0xf0] }
 0x2ce   : > { %v10159_v60 = vld [vmem:[%s13038_s28 + $0x17c] sm:$0xf0] }
 0x2cf   : > { %v13328_v8 = vadd.f32 %v3676_v24, %v2251_v45  ;;  %v5364_v7 = vpop.f32.mrf.mxu3  ;;  %5239 = vmatmul.bf16.gmra.mxu1 %v10158_v5  ;;  %v10177_v5 = vld [vmem:[%s13038_s28 + $0x190] sm:$0xf] }
 0x2d0   : > { %v13337_v13 = vadd.f32 %v5364_v7, %v5196_v41  ;;  %v9661_v41 = vor.u32 %v11164_v43, %v9658_v1 }
 0x2d2   : > { %v3518_v45 = vpop.f32.mrf.mxu0 }
 0x2d3   : > { %v3519_v62 = vadd.f32 %v3518_v45, %v13180_v57  ;;  %v9605_v57 = vor.u32 %v11151_v39, %v9604_v23  ;;  %v10162_v45 = vor.u32 %v11281_v38, %v10159_v60 }
 0x2d4   : > { %v3374_v24 = vpop.f32.mrf.mxu2  ;;  %v5202_v7 = vpop.f32.mrf.mxu1 }
 0x2d5   : > { %v3677_v6 = vmax.f32 %v3519_v62, 0.0  ;;  %v13351_v52 = vadd.f32 %v3374_v24, %v3206_v44  ;;  %v11288_v62 = vld [vmem:[%s13038_s28 + $0x1a0] sm:$0xf0]  ;;  %v9616_v24 = vld [vmem:[%s12226_s0 + $0xf8] sm:$0xf] }
 0x2d6   : > { %v10178_v1 = vor.u32 %v11288_v62, %v10177_v5 }
 0x2d7   : > { %v13342_v56 = vadd.f32 %v3677_v6, %v2252_v11  ;;  %v5366_v16 = vpop.f32.mrf.mxu3  ;;  %v3209_v6 = vadd.f32 %v13151_v42, %v12499_v37  ;;  %v11154_v37 = vld [vmem:[%s12226_s0 + $0x100] sm:$0xf0] }
 0x2d8   : > { %v13353_v11 = vadd.f32 %v5366_v16, %v5198_v53  ;;  %v9670_v16 = vld [vmem:[%s12226_s0 + $0x174] sm:$0xf0] }
 0x2d9   : > { %3416 = vmatmul.bf16.gmra.mxu2 %v9661_v41  ;;  %v11286_v41 = vld [vmem:[%s13038_s28 + $0x194] sm:$0xf] }
 0x2da   : > { %v3521_v61 = vpop.f32.mrf.mxu0  ;;  %5408 = vmatmul.bf16.gmra.mxu3 %v10162_v45  ;;  %v5203_v45 = vadd.f32 %v13325_v19, %v5202_v7 }
 0x2db   : > { %v3522_v47 = vadd.f32 %v3521_v61, %v13194_v9  ;;  %v5201_v9 = vadd.f32 %v13325_v19, %v5200_v3  ;;  %v11167_v3 = vld [vmem:[%s12226_s0 + $0x16c] sm:$0xf]  ;;  %v3211_v61 = vadd.f32 %v13151_v42, %v12513_v21 }
 0x2dc   : > { %v3377_v23 = vpop.f32.mrf.mxu2  ;;  %v5205_v60 = vpop.f32.mrf.mxu1 }
 0x2dd   : > { %v3678_v31 = vmax.f32 %v3522_v47, 0.0  ;;  %9951 = vmatmul.msk.bf16.gmra.mxu0 %vm3072_vm3, %v9605_v57  ;;  %v13365_v39 = vadd.f32 %v3377_v23, %v3209_v6  ;;  %v10179_v47 = vld [vmem:[%s13038_s28 + $0x1a4] sm:$0xf0] }
 0x2df   : > { %v13358_v55 = vadd.f32 %v3678_v31, %v12354_v36  ;;  %v5369_v43 = vpop.f32.mrf.mxu3  ;;  %5244 = vmatmul.bf16.gmra.mxu1 %v10178_v1  ;;  %v10197_v1 = vld [vmem:[%s13038_s28 + $0x1b8] sm:$0xf] }
 0x2e0   : > { %v13367_v44 = vadd.f32 %v5369_v43, %v5201_v9  ;;  %v9673_v9 = vor.u32 %v11167_v3, %v9670_v16 }
 0x2e2   : > { %v3523_v36 = vpop.f32.mrf.mxu0 }
 0x2e3   : > { %v3524_v38 = vadd.f32 %v3523_v36, %v13211_v27  ;;  %v9617_v27 = vor.u32 %v11154_v37, %v9616_v24  ;;  %v10182_v36 = vor.u32 %v11286_v41, %v10179_v47 }
 0x2e4   : > { %v3379_v31 = vpop.f32.mrf.mxu2  ;;  %v5207_v43 = vpop.f32.mrf.mxu1 }
 0x2e5   : > { %v3679_v53 = vmax.f32 %v3524_v38, 0.0  ;;  %v13382_v5 = vadd.f32 %v3379_v31, %v3211_v61  ;;  %v11293_v38 = vld [vmem:[%s13038_s28 + $0x1c8] sm:$0xf0]  ;;  %v9628_v31 = vld [vmem:[%s12226_s0 + $0x110] sm:$0xf] }
 0x2e6   : > { %v10198_v16 = vor.u32 %v11293_v38, %v10197_v1 }
 0x2e7   : > { %v13373_v57 = vadd.f32 %v3679_v53, %v12366_v51  ;;  %v5371_v62 = vpop.f32.mrf.mxu3  ;;  %v3214_v53 = vadd.f32 %v13151_v42, %v12526_v40  ;;  %v11157_v40 = vld [vmem:[%s12226_s0 + $0x118] sm:$0xf0] }
 0x2e8   : > { %v13384_v51 = vadd.f32 %v5371_v62, %v5203_v45  ;;  %v9682_v62 = vld [vmem:[%s12226_s0 + $0x18c] sm:$0xf0] }
 0x2e9   : > { %3421 = vmatmul.bf16.gmra.mxu2 %v9673_v9  ;;  %v11291_v9 = vld [vmem:[%s13038_s28 + $0x1bc] sm:$0xf] }
 0x2ea   : > { %v3526_v6 = vpop.f32.mrf.mxu0  ;;  %5413 = vmatmul.bf16.gmra.mxu3 %v10182_v36  ;;  %v5208_v36 = vadd.f32 %v13325_v19, %v5207_v43 }
 0x2eb   : > { %v3527_v23 = vadd.f32 %v3526_v6, %v13235_v25  ;;  %v5206_v25 = vadd.f32 %v13325_v19, %v5205_v60  ;;  %v11170_v60 = vld [vmem:[%s12226_s0 + $0x184] sm:$0xf]  ;;  %v3216_v6 = vadd.f32 %v13151_v42, %v12540_v30 }
 0x2ec   : > { %v3382_v24 = vpop.f32.mrf.mxu2  ;;  %v5210_v47 = vpop.f32.mrf.mxu1 }
 0x2ed   : > { %v3680_v21 = vmax.f32 %v3527_v23, 0.0  ;;  %9952 = vmatmul.msk.bf16.gmra.mxu0 %vm3072_vm3, %v9617_v27  ;;  %v13396_v37 = vadd.f32 %v3382_v24, %v3214_v53  ;;  %v10199_v23 = vld [vmem:[%s13038_s28 + $0x1cc] sm:$0xf0] }
 0x2ef   : > { %v13389_v7 = vadd.f32 %v3680_v21, %v12380_v12  ;;  %v5374_v3 = vpop.f32.mrf.mxu3  ;;  %5249 = vmatmul.bf16.gmra.mxu1 %v10198_v16  ;;  %v10217_v16 = vld [vmem:[%s13038_s28 + $0x1e0] sm:$0xf] }
 0x2f0   : > { %v13398_v61 = vadd.f32 %v5374_v3, %v5206_v25  ;;  %v9685_v25 = vor.u32 %v11170_v60, %v9682_v62 }
 0x2f2   : > { %v3528_v12 = vpop.f32.mrf.mxu0 }
 0x2f3   : > { %v3529_v41 = vadd.f32 %v3528_v12, %v13252_v0  ;;  %v9629_v0 = vor.u32 %v11157_v40, %v9628_v31  ;;  %v10202_v12 = vor.u32 %v11291_v9, %v10199_v23 }
 0x2f4   : > { %v3384_v21 = vpop.f32.mrf.mxu2  ;;  %v5212_v3 = vpop.f32.mrf.mxu1 }
 0x2f5   : > { %v3681_v45 = vmax.f32 %v3529_v41, 0.0  ;;  %v13413_v1 = vadd.f32 %v3384_v21, %v3216_v6  ;;  %v11298_v41 = vld [vmem:[%s13038_s28 + $0x1f0] sm:$0xf0]  ;;  %v9640_v21 = vld [vmem:[%s12226_s0 + $0x128] sm:$0xf] }
 0x2f6   : > { %v10218_v62 = vor.u32 %v11298_v41, %v10217_v16 }
 0x2f7   : > { %v13404_v27 = vadd.f32 %v3681_v45, %v12393_v29  ;;  %v5376_v38 = vpop.f32.mrf.mxu3  ;;  %v3219_v45 = vadd.f32 %v13151_v42, %v12553_v15  ;;  %v11160_v15 = vld [vmem:[%s12226_s0 + $0x130] sm:$0xf0] }
 0x2f8   : > { %v13415_v29 = vadd.f32 %v5376_v38, %v5208_v36  ;;  %v9694_v38 = vld [vmem:[%s12226_s0 + $0x1a4] sm:$0xf0] }
 0x2f9   : > { %3426 = vmatmul.bf16.gmra.mxu2 %v9685_v25  ;;  %v11296_v25 = vld [vmem:[%s13038_s28 + $0x1e4] sm:$0xf] }
 0x2fa   : > { %v3531_v53 = vpop.f32.mrf.mxu0  ;;  %5418 = vmatmul.bf16.gmra.mxu3 %v10202_v12  ;;  %v5213_v12 = vadd.f32 %v13325_v19, %v5212_v3 }
 0x2fb   : > { %v3532_v24 = vadd.f32 %v3531_v53, %v13266_v4  ;;  %v5211_v4 = vadd.f32 %v13325_v19, %v5210_v47  ;;  %v11173_v47 = vld [vmem:[%s12226_s0 + $0x19c] sm:$0xf]  ;;  %v3221_v53 = vadd.f32 %v13151_v42, %v12567_v58 }
 0x2fc   : > { %v3387_v31 = vpop.f32.mrf.mxu2  ;;  %v5215_v23 = vpop.f32.mrf.mxu1 }
 0x2fd   : > { %v3682_v30 = vmax.f32 %v3532_v24, 0.0  ;;  %9953 = vmatmul.msk.bf16.gmra.mxu0 %vm3072_vm3, %v9629_v0  ;;  %v13427_v40 = vadd.f32 %v3387_v31, %v3219_v45  ;;  %v10219_v24 = vld [vmem:[%s13038_s28 + $0x1f4] sm:$0xf0] }
 0x2ff   : > { %v13420_v43 = vadd.f32 %v3682_v30, %v12407_v50  ;;  %v5379_v60 = vpop.f32.mrf.mxu3  ;;  %5254 = vmatmul.bf16.gmra.mxu1 %v10218_v62  ;;  %v10237_v62 = vld [vmem:[%s13038_s28 + $0x208] sm:$0xf] }
 0x300   : > { %v13429_v6 = vadd.f32 %v5379_v60, %v5211_v4  ;;  %v9697_v4 = vor.u32 %v11173_v47, %v9694_v38 }
 0x302   : > { %v3533_v50 = vpop.f32.mrf.mxu0 }
 0x303   : > { %v3534_v9 = vadd.f32 %v3533_v50, %v13287_v33  ;;  %v9641_v33 = vor.u32 %v11160_v15, %v9640_v21  ;;  %v10222_v50 = vor.u32 %v11296_v25, %v10219_v24 }
 0x304   : > { %v3389_v30 = vpop.f32.mrf.mxu2  ;;  %v5217_v60 = vpop.f32.mrf.mxu1 }
 0x305   : > { %v3683_v36 = vmax.f32 %v3534_v9, 0.0  ;;  %v13444_v16 = vadd.f32 %v3389_v30, %v3221_v53  ;;  %v11303_v9 = vld [vmem:[%s13038_s28 + $0x218] sm:$0xf0]  ;;  %v9652_v30 = vld [vmem:[%s12226_s0 + $0x140] sm:$0xf] }
 0x306   : > { %v10238_v38 = vor.u32 %v11303_v9, %v10237_v62 }
 0x307   : > { %v13435_v0 = vadd.f32 %v3683_v36, %v12420_v10  ;;  %v5381_v41 = vpop.f32.mrf.mxu3  ;;  %v3224_v36 = vadd.f32 %v13151_v42, %v12580_v14  ;;  %v11163_v14 = vld [vmem:[%s12226_s0 + $0x148] sm:$0xf0] }
 0x308   : > { %v13446_v10 = vadd.f32 %v5381_v41, %v5213_v12  ;;  %v9706_v41 = vld [vmem:[%s12226_s0 + $0x1bc] sm:$0xf0] }
 0x309   : > { %3431 = vmatmul.bf16.gmra.mxu2 %v9697_v4  ;;  %v11301_v4 = vld [vmem:[%s13038_s28 + $0x20c] sm:$0xf] }
 0x30a   : > { %v3536_v45 = vpop.f32.mrf.mxu0  ;;  %5423 = vmatmul.bf16.gmra.mxu3 %v10222_v50  ;;  %v5218_v50 = vadd.f32 %v13325_v19, %v5217_v60 }
 0x30b   : > { %v3537_v31 = vadd.f32 %v3536_v45, %v13305_v26  ;;  %v5216_v26 = vadd.f32 %v13325_v19, %v5215_v23  ;;  %v11176_v23 = vld [vmem:[%s12226_s0 + $0x1b4] sm:$0xf]  ;;  %v3226_v45 = vadd.f32 %v13151_v42, %v12594_v2 }
 0x30c   : > { %v3392_v21 = vpop.f32.mrf.mxu2  ;;  %v5220_v24 = vpop.f32.mrf.mxu1 }
 0x30d   : > { %v3684_v58 = vmax.f32 %v3537_v31, 0.0  ;;  %9954 = vmatmul.msk.bf16.gmra.mxu0 %vm3072_vm3, %v9641_v33  ;;  %v13458_v15 = vadd.f32 %v3392_v21, %v3224_v36  ;;  %v10239_v31 = vld [vmem:[%s13038_s28 + $0x21c] sm:$0xf0] }
 0x30f   : > { %v13451_v3 = vadd.f32 %v3684_v58, %v12434_v34  ;;  %v5384_v47 = vpop.f32.mrf.mxu3  ;;  %5259 = vmatmul.bf16.gmra.mxu1 %v10238_v38  ;;  %v10257_v38 = vld [vmem:[%s13038_s28 + $0x230] sm:$0xf] }
 0x310   : > { %v13460_v53 = vadd.f32 %v5384_v47, %v5216_v26  ;;  %v9709_v26 = vor.u32 %v11176_v23, %v9706_v41 }
 0x312   : > { %v3538_v34 = vpop.f32.mrf.mxu0 }
 0x313   : > { %v3539_v25 = vadd.f32 %v3538_v34, %v13319_v48  ;;  %v9653_v48 = vor.u32 %v11163_v14, %v9652_v30  ;;  %v10242_v34 = vor.u32 %v11301_v4, %v10239_v31 }
 0x314   : > { %v3394_v58 = vpop.f32.mrf.mxu2  ;;  %v5222_v47 = vpop.f32.mrf.mxu1 }
 0x315   : > { %v3685_v12 = vmax.f32 %v3539_v25, 0.0  ;;  %v13475_v62 = vadd.f32 %v3394_v58, %v3226_v45  ;;  %v11308_v25 = vld [vmem:[%s13038_s28 + $0x240] sm:$0xf0] }
 0x316   : > { %v10258_v45 = vor.u32 %v11308_v25, %v10257_v38  ;;  %v5223_v38 = vadd.f32 %v13325_v19, %v5222_v47  ;;  %v17221_v47 = vld [vmem:[#allocation13_spill] sm:$0xff] }
 0x317   : > { %v13466_v33 = vadd.f32 %v3685_v12, %v12447_v54  ;;  %v5386_v9 = vpop.f32.mrf.mxu3  ;;  %v17216_v12 = vld [vmem:[#allocation22_spill] sm:$0xff] }
 0x318   : > { %v13477_v54 = vadd.f32 %v5386_v9, %v5218_v50  ;;  %v3229_v30 = vadd.f32 %v13151_v42, %v17216_v12  ;;  %v11166_v9 = vld [vmem:[%s12226_s0 + $0x160] sm:$0xf0]  ;;  %v11306_v12 = vld [vmem:[%s13038_s28 + $0x234] sm:$0xf] }
 0x319   : > { %3436 = vmatmul.bf16.gmra.mxu2 %v9709_v26 }
 0x31a   : > { %v3541_v36 = vpop.f32.mrf.mxu0  ;;  %5428 = vmatmul.bf16.gmra.mxu3 %v10242_v34  ;;  %v17219_v34 = vld [vmem:[#allocation24_spill] sm:$0xff] }
 0x31b   : > { %v3542_v21 = vadd.f32 %v3541_v36, %v13335_v63  ;;  %v5221_v63 = vadd.f32 %v13325_v19, %v5220_v24  ;;  %v17217_v36 = vld [vmem:[#allocation12_spill] sm:$0xff]  ;;  %v11179_v24 = vld [vmem:[%s12226_s0 + $0x1cc] sm:$0xf] }
 0x31c   : > { %v3397_v14 = vpop.f32.mrf.mxu2  ;;  %v5225_v50 = vpop.f32.mrf.mxu1 }
 0x31d   : > { %v3686_v2 = vmax.f32 %v3542_v21, 0.0  ;;  %9955 = vmatmul.msk.bf16.gmra.mxu0 %vm3072_vm3, %v9653_v48  ;;  %v13489_v23 = vadd.f32 %v3397_v14, %v3229_v30  ;;  %v9664_v48 = vld [vmem:[%s12226_s0 + $0x158] sm:$0xf]  ;;  %v10259_v30 = vld [vmem:[%s13038_s28 + $0x244] sm:$0xf0] }
 0x31e   : > { %v9718_v21 = vld [vmem:[%s12226_s0 + $0x1d4] sm:$0xf0] }
 0x31f   : > { %v13482_v60 = vadd.f32 %v3686_v2, %v12461_v22  ;;  %v5389_v41 = vpop.f32.mrf.mxu3  ;;  %5264 = vmatmul.bf16.gmra.mxu1 %v10258_v45  ;;  %v3231_v2 = vadd.f32 %v13151_v42, %v17219_v34 }
 0x320   : > { %v13491_v4 = vadd.f32 %v5389_v41, %v5221_v63 }
 0x321   : > { %17215 = vst [vmem:[#allocation100_spill] sm:$0xff] %v13482_v60  ;;  %v10279_v60 = vld [vmem:[%s13038_s28 + $0x26c] sm:$0xf0] }
 0x322   : > { %v3543_v22 = vpop.f32.mrf.mxu0 }
 0x323   : > { %v3544_v31 = vadd.f32 %v3543_v22, %v13351_v52  ;;  %v9665_v52 = vor.u32 %v11166_v9, %v9664_v48  ;;  %v9721_v22 = vor.u32 %v11179_v24, %v9718_v21  ;;  %v10277_v48 = vld [vmem:[%s13038_s28 + $0x258] sm:$0xf]  ;;  %v11313_v9 = vld [vmem:[%s13038_s28 + $0x268] sm:$0xf0] }
 0x324   : > { %v3399_v25 = vpop.f32.mrf.mxu2 }
 0x325   : > { %v3687_v58 = vmax.f32 %v3544_v31, 0.0  ;;  %v13506_v63 = vadd.f32 %v3399_v25, %v3231_v2  ;;  %v17223_v2 = vld [vmem:[#allocation26_spill] sm:$0xff]  ;;  %v10278_v25 = vor.u32 %v11313_v9, %v10277_v48 }
 0x326   : > { %v3234_v24 = vadd.f32 %v13151_v42, %v17223_v2  ;;  %v9730_v2 = vld [vmem:[%s12226_s0 + $0x1ec] sm:$0xf0] }
 0x327   : > { %v13497_v26 = vadd.f32 %v3687_v58, %v17217_v36  ;;  %v5391_v14 = vpop.f32.mrf.mxu3  ;;  %v5227_v58 = vpop.f32.mrf.mxu1  ;;  %v10262_v36 = vor.u32 %v11306_v12, %v10259_v30 }
 0x328   : > { %v13508_v45 = vadd.f32 %v5391_v14, %v5223_v38  ;;  %v5228_v48 = vadd.f32 %v13325_v19, %v5227_v58  ;;  %v17229_v58 = vld [vmem:[#allocation15_spill] sm:$0xff] }
 0x329   : > { %17218 = vst [vmem:[#allocation22_spill] sm:$0xff] %v13497_v26  ;;  %3441 = vmatmul.bf16.gmra.mxu2 %v9721_v22 }
 0x32a   : > { %v3546_v41 = vpop.f32.mrf.mxu0  ;;  %17220 = vst [vmem:[#allocation12_spill] sm:$0xff] %v13508_v45  ;;  %5433 = vmatmul.bf16.gmra.mxu3 %v10262_v36  ;;  %v11169_v36 = vld [vmem:[%s12226_s0 + $0x178] sm:$0xf0] }
 0x32b   : > { %v3547_v31 = vadd.f32 %v3546_v41, %v13365_v39  ;;  %v5226_v39 = vadd.f32 %v13325_v19, %v5225_v50  ;;  %v11182_v50 = vld [vmem:[%s12226_s0 + $0x1e4] sm:$0xf] }
 0x32c   : > { %v3402_v21 = vpop.f32.mrf.mxu2 }
 0x32d   : > { %v3688_v34 = vmax.f32 %v3547_v31, 0.0  ;;  %9956 = vmatmul.msk.bf16.gmra.mxu0 %vm3072_vm3, %v9665_v52  ;;  %v13520_v12 = vadd.f32 %v3402_v21, %v3234_v24  ;;  %v9676_v31 = vld [vmem:[%s12226_s0 + $0x170] sm:$0xf]  ;;  %v17227_v24 = vld [vmem:[#allocation28_spill] sm:$0xff] }
 0x32e   : > { %v3236_v21 = vadd.f32 %v13151_v42, %v17227_v24 }
 0x32f   : > { %v13513_v26 = vadd.f32 %v3688_v34, %v17221_v47  ;;  %v5394_v30 = vpop.f32.mrf.mxu3  ;;  %v5230_v41 = vpop.f32.mrf.mxu1  ;;  %5269 = vmatmul.bf16.gmra.mxu1 %v10278_v25  ;;  %v17225_v34 = vld [vmem:[#allocation14_spill] sm:$0xff]  ;;  %v9733_v25 = vor.u32 %v11182_v50, %v9730_v2 }
 0x330   : > { %v13522_v52 = vadd.f32 %v5394_v30, %v5226_v39 }
 0x331   : > { %17222 = vst [vmem:[#allocation24_spill] sm:$0xff] %v13513_v26  ;;  %v11311_v26 = vld [vmem:[%s13038_s28 + $0x25c] sm:$0xf] }
 0x332   : > { %v3548_v38 = vpop.f32.mrf.mxu0  ;;  %17224 = vst [vmem:[#allocation13_spill] sm:$0xff] %v13522_v52 }
 0x333   : > { %v3549_v14 = vadd.f32 %v3548_v38, %v13382_v5  ;;  %v9677_v5 = vor.u32 %v11169_v36, %v9676_v31  ;;  %v10297_v31 = vld [vmem:[%s13038_s28 + $0x280] sm:$0xf]  ;;  %v11318_v36 = vld [vmem:[%s13038_s28 + $0x290] sm:$0xf0] }
 0x334   : > { %v3404_v9 = vpop.f32.mrf.mxu2 }
 0x335   : > { %v3689_v22 = vmax.f32 %v3549_v14, 0.0  ;;  %v13537_v39 = vadd.f32 %v3404_v9, %v3236_v21  ;;  %v17231_v21 = vld [vmem:[#allocation30_spill] sm:$0xff]  ;;  %v10298_v9 = vor.u32 %v11318_v36, %v10297_v31 }
 0x336   : > { %v3239_v50 = vadd.f32 %v13151_v42, %v17231_v21  ;;  %v9742_v21 = vld [vmem:[%s12226_s0 + $0x204] sm:$0xf0] }
 0x337   : > { %v13528_v47 = vadd.f32 %v3689_v22, %v17225_v34  ;;  %v5396_v30 = vpop.f32.mrf.mxu3  ;;  %v5232_v34 = vpop.f32.mrf.mxu1 }
 0x338   : > { %v13539_v14 = vadd.f32 %v5396_v30, %v5228_v48  ;;  %v5233_v31 = vadd.f32 %v13325_v19, %v5232_v34  ;;  %v17237_v34 = vld [vmem:[#allocation17_spill] sm:$0xff] }
 0x339   : > { %17226 = vst [vmem:[#allocation26_spill] sm:$0xff] %v13528_v47  ;;  %v10282_v47 = vor.u32 %v11311_v26, %v10279_v60  ;;  %3446 = vmatmul.bf16.gmra.mxu2 %v9733_v25  ;;  %v9688_v25 = vld [vmem:[%s12226_s0 + $0x188] sm:$0xf] }
 0x33a   : > { %v3551_v38 = vpop.f32.mrf.mxu0  ;;  %17228 = vst [vmem:[#allocation14_spill] sm:$0xff] %v13539_v14  ;;  %v10299_v14 = vld [vmem:[%s13038_s28 + $0x294] sm:$0xf0] }
 0x33b   : > { %v3552_v22 = vadd.f32 %v3551_v38, %v13396_v37  ;;  %5438 = vmatmul.bf16.gmra.mxu3 %v10282_v47  ;;  %v5231_v37 = vadd.f32 %v13325_v19, %v5230_v41  ;;  %v11185_v41 = vld [vmem:[%s12226_s0 + $0x1fc] sm:$0xf] }
 0x33c   : > { %v3407_v60 = vpop.f32.mrf.mxu2 }
 0x33d   : > { %v3690_v24 = vmax.f32 %v3552_v22, 0.0  ;;  %9957 = vmatmul.msk.bf16.gmra.mxu0 %vm3072_vm3, %v9677_v5  ;;  %v13551_v26 = vadd.f32 %v3407_v60, %v3239_v50  ;;  %v11172_v22 = vld [vmem:[%s12226_s0 + $0x190] sm:$0xf0]  ;;  %v17235_v50 = vld [vmem:[#allocation32_spill] sm:$0xff] }
 0x33e   : > { %v3241_v60 = vadd.f32 %v13151_v42, %v17235_v50 }
 0x33f   : > { %v13544_v52 = vadd.f32 %v3690_v24, %v17229_v58  ;;  %v5399_v2 = vpop.f32.mrf.mxu3  ;;  %v5235_v30 = vpop.f32.mrf.mxu1  ;;  %5274 = vmatmul.bf16.gmra.mxu1 %v10298_v9  ;;  %v17233_v24 = vld [vmem:[#allocation16_spill] sm:$0xff]  ;;  %v9745_v9 = vor.u32 %v11185_v41, %v9742_v21 }
 0x340   : > { %v13553_v5 = vadd.f32 %v5399_v2, %v5231_v37  ;;  %v13582_v41 = vld [vmem:[%s17041_s8 + $0x2] ss:$0 sm:$0xff] }
 0x341   : > { %17230 = vst [vmem:[#allocation28_spill] sm:$0xff] %v13544_v52  ;;  %v11316_v52 = vld [vmem:[%s13038_s28 + $0x284] sm:$0xf] }
 0x342   : > { %v3553_v48 = vpop.f32.mrf.mxu0  ;;  %17232 = vst [vmem:[#allocation15_spill] sm:$0xff] %v13553_v5  ;;  %v10319_v5 = vld [vmem:[%s13038_s28 + $0x2bc] sm:$0xf0] }
 0x343   : > { %v3554_v47 = vadd.f32 %v3553_v48, %v13413_v1  ;;  %v9689_v1 = vor.u32 %v11172_v22, %v9688_v25  ;;  %v10317_v25 = vld [vmem:[%s13038_s28 + $0x2a8] sm:$0xf]  ;;  %v11323_v22 = vld [vmem:[%s13038_s28 + $0x2b8] sm:$0xf0] }
 0x344   : > { %v3409_v36 = vpop.f32.mrf.mxu2 }
 0x345   : > { %v3691_v38 = vmax.f32 %v3554_v47, 0.0  ;;  %v13568_v37 = vadd.f32 %v3409_v36, %v3241_v60  ;;  %v10318_v36 = vor.u32 %v11323_v22, %v10317_v25 }
 0x347   : > { %v13559_v58 = vadd.f32 %v3691_v38, %v17233_v24  ;;  %v5401_v2 = vpop.f32.mrf.mxu3  ;;  %v5237_v24 = vpop.f32.mrf.mxu1 }
 0x348   : > { %v13570_v47 = vadd.f32 %v5401_v2, %v5233_v31  ;;  %v5238_v25 = vadd.f32 %v13325_v19, %v5237_v24  ;;  %v17245_v24 = vld [vmem:[#allocation19_spill] sm:$0xff] }
 0x349   : > { %17234 = vst [vmem:[#allocation30_spill] sm:$0xff] %v13559_v58  ;;  %v10302_v58 = vor.u32 %v11316_v52, %v10299_v14  ;;  %3451 = vmatmul.bf16.gmra.mxu2 %v9745_v9  ;;  %v5236_v14 = vadd.f32 %v13325_v19, %v5235_v30  ;;  %v11188_v30 = vld [vmem:[%s12226_s0 + $0x214] sm:$0xf] }
 0x34a   : > { %v3556_v48 = vpop.f32.mrf.mxu0  ;;  %17236 = vst [vmem:[#allocation16_spill] sm:$0xff] %v13570_v47  ;;  %v11321_v47 = vld [vmem:[%s13038_s28 + $0x2ac] sm:$0xf] }
 0x34b   : > { %v3557_v38 = vadd.f32 %v3556_v48, %v13427_v40  ;;  %5443 = vmatmul.bf16.gmra.mxu3 %v10302_v58  ;;  %v17239_v40 = vld [vmem:[#allocation34_spill] sm:$0xff] }
 0x34c   : > { %v3244_v52 = vadd.f32 %v13582_v41, %v17239_v40  ;;  %v3412_v21 = vpop.f32.mrf.mxu2 }
 0x34d   : > { %v3692_v42 = vmax.f32 %v3557_v38, 0.0  ;;  %9958 = vmatmul.msk.bf16.gmra.mxu0 %vm3072_vm3, %v9689_v1  ;;  %v9700_v38 = vld [vmem:[%s12226_s0 + $0x1a0] sm:$0xf] }
 0x34e   : > { %v13587_v60 = vadd.f32 %v3412_v21, %v3244_v52  ;;  %v17243_v52 = vld [vmem:[#allocation36_spill] sm:$0xff] }
 0x34f   : > { %v13575_v50 = vadd.f32 %v3692_v42, %v17237_v34  ;;  %v5404_v58 = vpop.f32.mrf.mxu3  ;;  %v5240_v48 = vpop.f32.mrf.mxu1  ;;  %5279 = vmatmul.bf16.gmra.mxu1 %v10318_v36  ;;  %v11175_v42 = vld [vmem:[%s12226_s0 + $0x1a8] sm:$0xf0]  ;;  %v17241_v34 = vld [vmem:[#allocation18_spill] sm:$0xff]  ;;  %v3246_v21 = vadd.f32 %v13582_v41, %v17243_v52 }
 0x350   : > { %v13589_v1 = vadd.f32 %v5404_v58, %v5236_v14 }
 0x351   : > { %17238 = vst [vmem:[#allocation32_spill] sm:$0xff] %v13575_v50  ;;  %v9754_v50 = vld [vmem:[%s12226_s0 + $0x21c] sm:$0xf0] }
 0x352   : > { %v3558_v31 = vpop.f32.mrf.mxu0  ;;  %17240 = vst [vmem:[#allocation17_spill] sm:$0xff] %v13589_v1  ;;  %v9757_v36 = vor.u32 %v11188_v30, %v9754_v50 }
 0x353   : > { %v3559_v2 = vadd.f32 %v3558_v31, %v13444_v16  ;;  %v9701_v16 = vor.u32 %v11175_v42, %v9700_v38  ;;  %v10337_v38 = vld [vmem:[%s13038_s28 + $0x2d0] sm:$0xf]  ;;  %v11328_v42 = vld [vmem:[%s13038_s28 + $0x2e0] sm:$0xf0] }
 0x354   : > { %v3414_v22 = vpop.f32.mrf.mxu2 }
 0x355   : > { %v3693_v9 = vmax.f32 %v3559_v2, 0.0  ;;  %v13604_v14 = vadd.f32 %v3414_v22, %v3246_v21  ;;  %v17247_v21 = vld [vmem:[#allocation38_spill] sm:$0xff]  ;;  %v10338_v22 = vor.u32 %v11328_v42, %v10337_v38 }
 0x356   : > { %v3249_v50 = vadd.f32 %v13582_v41, %v17247_v21  ;;  %v9766_v21 = vld [vmem:[%s12226_s0 + $0x234] sm:$0xf0] }
 0x357   : > { %v13595_v40 = vadd.f32 %v3693_v9, %v17241_v34  ;;  %v5406_v58 = vpop.f32.mrf.mxu3  ;;  %v5242_v34 = vpop.f32.mrf.mxu1 }
 0x358   : > { %v13606_v2 = vadd.f32 %v5406_v58, %v5238_v25  ;;  %v5243_v38 = vadd.f32 %v13325_v19, %v5242_v34 }
 0x359   : > { %17242 = vst [vmem:[#allocation34_spill] sm:$0xff] %v13595_v40  ;;  %v10322_v40 = vor.u32 %v11321_v47, %v10319_v5  ;;  %3456 = vmatmul.bf16.gmra.mxu2 %v9757_v36  ;;  %v9712_v36 = vld [vmem:[%s12226_s0 + $0x1b8] sm:$0xf] }
 0x35a   : > { %v3561_v31 = vpop.f32.mrf.mxu0  ;;  %17244 = vst [vmem:[#allocation18_spill] sm:$0xff] %v13606_v2  ;;  %v10339_v2 = vld [vmem:[%s13038_s28 + $0x2e4] sm:$0xf0] }
 0x35b   : > { %v3562_v9 = vadd.f32 %v3561_v31, %v13458_v15  ;;  %5448 = vmatmul.bf16.gmra.mxu3 %v10322_v40  ;;  %v5241_v15 = vadd.f32 %v13325_v19, %v5240_v48  ;;  %v11191_v48 = vld [vmem:[%s12226_s0 + $0x22c] sm:$0xf] }
 0x35c   : > { %v3417_v5 = vpop.f32.mrf.mxu2 }
 0x35d   : > { %v3694_v52 = vmax.f32 %v3562_v9, 0.0  ;;  %9959 = vmatmul.msk.bf16.gmra.mxu0 %vm3072_vm3, %v9701_v16  ;;  %v13618_v47 = vadd.f32 %v3417_v5, %v3249_v50  ;;  %v11178_v9 = vld [vmem:[%s12226_s0 + $0x1c0] sm:$0xf0] }
 0x35e   : > { %v17251_v50 = vld [vmem:[#allocation40_spill] sm:$0xff] }
 0x35f   : > { %v13611_v1 = vadd.f32 %v3694_v52, %v17245_v24  ;;  %v5409_v30 = vpop.f32.mrf.mxu3  ;;  %v5245_v58 = vpop.f32.mrf.mxu1  ;;  %5284 = vmatmul.bf16.gmra.mxu1 %v10338_v22  ;;  %v17249_v52 = vld [vmem:[#allocation20_spill] sm:$0xff]  ;;  %v3251_v5 = vadd.f32 %v13582_v41, %v17251_v50  ;;  %v9769_v22 = vor.u32 %v11191_v48, %v9766_v21  ;;  %v11419_v50 = vld [vmem:[%s17040_s7 + $0xb8] sm:$0xff]  ;;  %v11333_v21 = vld [vmem:[%s13038_s28 + $0x308] sm:$0xf0] }
 0x360   : > { %v13620_v16 = vadd.f32 %v5409_v30, %v5241_v15  ;;  %v9713_v15 = vor.u32 %v11178_v9, %v9712_v36  ;;  %5524 = vmatpush.bf16.msra.mxu2 %v11419_v50  ;;  %v17253_v36 = vld [vmem:[#allocation21_spill] sm:$0xff]  ;;  %v10357_v48 = vld [vmem:[%s13038_s28 + $0x2f8] sm:$0xf]  ;;  %v9724_v50 = vld [vmem:[%s12226_s0 + $0x1d0] sm:$0xf] }
 0x361   : > { %17246 = vst [vmem:[#allocation36_spill] sm:$0xff] %v13611_v1  ;;  %v11326_v1 = vld [vmem:[%s13038_s28 + $0x2d4] sm:$0xf] }
 0x362   : > { %v3563_v25 = vpop.f32.mrf.mxu0  ;;  %17248 = vst [vmem:[#allocation19_spill] sm:$0xff] %v13620_v16 }
 0x363   : > { %v3564_v40 = vadd.f32 %v3563_v25, %v13475_v62 }
 0x364   : > { %v3419_v42 = vpop.f32.mrf.mxu2 }
 0x365   : > { %v3695_v31 = vmax.f32 %v3564_v40, 0.0  ;;  %v13635_v62 = vadd.f32 %v3419_v42, %v3251_v5  ;;  %v17255_v5 = vld [vmem:[#allocation42_spill] sm:$0xff] }
 0x367   : > { %v13626_v24 = vadd.f32 %v3695_v31, %v17249_v52  ;;  %v5411_v30 = vpop.f32.mrf.mxu3  ;;  %v5247_v52 = vpop.f32.mrf.mxu1 }
 0x368   : > { %v13637_v40 = vadd.f32 %v5411_v30, %v5243_v38  ;;  %v10358_v30 = vor.u32 %v11333_v21, %v10357_v48  ;;  %v9778_v48 = vld [vmem:[%s12226_s0 + $0x24c] sm:$0xf0]  ;;  %v11431_v21 = vld [vmem:[%s17040_s7 + $0x118] sm:$0xff] }
 0x369   : > { %17250 = vst [vmem:[#allocation38_spill] sm:$0xff] %v13626_v24  ;;  %v10342_v24 = vor.u32 %v11326_v1, %v10339_v2  ;;  %3461 = vmatmul.bf16.gmra.mxu2 %v9769_v22  ;;  %v5246_v1 = vadd.f32 %v13325_v19, %v5245_v58  ;;  %5866 = vmatpush.bf16.msra.mxu1 %v11431_v21  ;;  %v17263_v21 = vld [vmem:[#allocation46_spill] sm:$0xff] }
 0x36a   : > { %v3566_v25 = vpop.f32.mrf.mxu0  ;;  %17252 = vst [vmem:[#allocation20_spill] sm:$0xff] %v13637_v40 }
 0x36b   : > { %v3567_v31 = vadd.f32 %v3566_v25, %v13489_v23  ;;  %5453 = vmatmul.bf16.gmra.mxu3 %v10342_v24  ;;  %v3254_v23 = vadd.f32 %v13582_v41, %v17255_v5 }
 0x36c   : > { %v3422_v2 = vpop.f32.mrf.mxu2 }
 0x36d   : > { %v3696_v34 = vmax.f32 %v3567_v31, 0.0  ;;  %9960 = vmatmul.msk.bf16.gmra.mxu0 %vm3072_vm3, %v9713_v15  ;;  %v13652_v38 = vadd.f32 %v3422_v2, %v3254_v23  ;;  %v11427_v31 = vld [vmem:[%s17040_s7 + $0xf8] sm:$0xff]  ;;  %v11194_v23 = vld [vmem:[%s12226_s0 + $0x244] sm:$0xf] }
 0x36e   : > { %5693 = vmatpush.bf16.msrb.mxu0 %v11427_v31  ;;  %v11331_v2 = vld [vmem:[%s13038_s28 + $0x2fc] sm:$0xf] }
 0x36f   : > { %v13645_v9 = vadd.f32 %v3696_v34, %v17253_v36  ;;  %v5414_v42 = vpop.f32.mrf.mxu3  ;;  %v5250_v22 = vpop.f32.mrf.mxu1  ;;  %5289 = vmatmul.bf16.gmra.mxu1 %v10358_v30  ;;  %v11181_v34 = vld [vmem:[%s12226_s0 + $0x1d8] sm:$0xf0] }
 0x370   : > { %v13654_v24 = vadd.f32 %v5414_v42, %v5246_v1  ;;  %v17257_v36 = vld [vmem:[#allocation23_spill] sm:$0xff]  ;;  %v10359_v42 = vld [vmem:[%s13038_s28 + $0x30c] sm:$0xf0]  ;;  %v9725_v30 = vor.u32 %v11181_v34, %v9724_v50  ;;  %v10377_v50 = vld [vmem:[%s13038_s28 + $0x320] sm:$0xf] }
 0x371   : > { %17254 = vst [vmem:[#allocation40_spill] sm:$0xff] %v13645_v9  ;;  %v11338_v34 = vld [vmem:[%s13038_s28 + $0x330] sm:$0xf0] }
 0x372   : > { %v3568_v15 = vpop.f32.mrf.mxu0  ;;  %17256 = vst [vmem:[#allocation21_spill] sm:$0xff] %v13654_v24 }
 0x373   : > { %v3569_v25 = vadd.f32 %v3568_v15, %v13506_v63  ;;  %v17259_v63 = vld [vmem:[#allocation44_spill] sm:$0xff]  ;;  %v5248_v15 = vadd.f32 %v13325_v19, %v5247_v52  ;;  %v17261_v52 = vld [vmem:[#allocation25_spill] sm:$0xff] }
 0x374   : > { %v3256_v1 = vadd.f32 %v13582_v41, %v17259_v63  ;;  %v10362_v63 = vor.u32 %v11331_v2, %v10359_v42 }
 0x375   : > { %v3697_v58 = vmax.f32 %v3569_v25, 0.0  ;;  %v3424_v25 = vpop.f32.mrf.mxu2 }
 0x376   : > { %v13675_v31 = vadd.f32 %v3424_v25, %v3256_v1  ;;  %v10378_v1 = vor.u32 %v11338_v34, %v10377_v50 }
 0x377   : > { %v13663_v5 = vadd.f32 %v3697_v58, %v17257_v36  ;;  %v5416_v58 = vpop.f32.mrf.mxu3  ;;  %v5252_v40 = vpop.f32.mrf.mxu1 }
 0x378   : > { %v13677_v9 = vadd.f32 %v5416_v58, %v5248_v15  ;;  %v11184_v58 = vld [vmem:[%s12226_s0 + $0x1f0] sm:$0xf0]  ;;  %v5253_v50 = vadd.f32 %v13325_v19, %v5252_v40  ;;  %v17269_v40 = vld [vmem:[#allocation29_spill] sm:$0xff] }
 0x379   : > { %17258 = vst [vmem:[#allocation42_spill] sm:$0xff] %v13663_v5  ;;  %v9781_v5 = vor.u32 %v11194_v23, %v9778_v48  ;;  %v3259_v23 = vadd.f32 %v13582_v41, %v17263_v21  ;;  %v17267_v21 = vld [vmem:[#allocation48_spill] sm:$0xff] }
 0x37a   : > { %v3571_v36 = vpop.f32.mrf.mxu0  ;;  %17260 = vst [vmem:[#allocation23_spill] sm:$0xff] %v13677_v9 }
 0x37b   : > { %v3572_v24 = vadd.f32 %v3571_v36, %v13520_v12  ;;  %3466 = vmatmul.bf16.gmra.mxu2 %v9781_v5  ;;  %5458 = vmatmul.bf16.gmra.mxu3 %v10362_v63  ;;  %v5251_v12 = vadd.f32 %v13325_v19, %v5250_v22  ;;  %v17265_v36 = vld [vmem:[#allocation27_spill] sm:$0xff] }
 0x37c   : > { %v11197_v22 = vld [vmem:[%s12226_s0 + $0x25c] sm:$0xf] }
 0x37d   : > { %v3698_v16 = vmax.f32 %v3572_v24, 0.0  ;;  %9961 = vmatmul.msk.bf16.gmra.mxu0 %vm3072_vm3, %v9725_v30  ;;  %v3427_v48 = vpop.f32.mrf.mxu2  ;;  %v9736_v30 = vld [vmem:[%s12226_s0 + $0x1e8] sm:$0xf] }
 0x37e   : > { %v13689_v24 = vadd.f32 %v3427_v48, %v3259_v23  ;;  %v3261_v23 = vadd.f32 %v13582_v41, %v17267_v21  ;;  %v11336_v48 = vld [vmem:[%s13038_s28 + $0x324] sm:$0xf] }
 0x37f   : > { %v13682_v45 = vadd.f32 %v3698_v16, %v17261_v52  ;;  %v5419_v5 = vpop.f32.mrf.mxu3  ;;  %v5255_v15 = vpop.f32.mrf.mxu1  ;;  %5294 = vmatmul.bf16.gmra.mxu1 %v10378_v1  ;;  %v9790_v52 = vld [vmem:[%s12226_s0 + $0x264] sm:$0xf0] }
 0x380   : > { %v13691_v2 = vadd.f32 %v5419_v5, %v5251_v12  ;;  %v9793_v1 = vor.u32 %v11197_v22, %v9790_v52 }
 0x381   : > { %17262 = vst [vmem:[#allocation44_spill] sm:$0xff] %v13682_v45  ;;  %v10379_v45 = vld [vmem:[%s13038_s28 + $0x334] sm:$0xf0] }
 0x382   : > { %v3573_v16 = vpop.f32.mrf.mxu0  ;;  %17264 = vst [vmem:[#allocation25_spill] sm:$0xff] %v13691_v2 }
 0x383   : > { %v3574_v42 = vadd.f32 %v3573_v16, %v13537_v39  ;;  %v9737_v39 = vor.u32 %v11184_v58, %v9736_v30  ;;  %v10397_v30 = vld [vmem:[%s13038_s28 + $0x348] sm:$0xf]  ;;  %v11343_v58 = vld [vmem:[%s13038_s28 + $0x358] sm:$0xf0] }
 0x385   : > { %v3699_v25 = vmax.f32 %v3574_v42, 0.0  ;;  %v3429_v34 = vpop.f32.mrf.mxu2 }
 0x386   : > { %v13706_v12 = vadd.f32 %v3429_v34, %v3261_v23  ;;  %v17271_v23 = vld [vmem:[#allocation50_spill] sm:$0xff]  ;;  %v10398_v34 = vor.u32 %v11343_v58, %v10397_v30 }
 0x387   : > { %v13697_v63 = vadd.f32 %v3699_v25, %v17265_v36  ;;  %v5421_v5 = vpop.f32.mrf.mxu3  ;;  %v5257_v36 = vpop.f32.mrf.mxu1  ;;  %v3264_v22 = vadd.f32 %v13582_v41, %v17271_v23  ;;  %v9802_v23 = vld [vmem:[%s12226_s0 + $0x27c] sm:$0xf0] }
 0x388   : > { %v13708_v42 = vadd.f32 %v5421_v5, %v5253_v50  ;;  %v5258_v30 = vadd.f32 %v13325_v19, %v5257_v36  ;;  %v17277_v36 = vld [vmem:[#allocation33_spill] sm:$0xff] }
 0x389   : > { %17266 = vst [vmem:[#allocation46_spill] sm:$0xff] %v13697_v63  ;;  %v10382_v63 = vor.u32 %v11336_v48, %v10379_v45 }
 0x38a   : > { %v3576_v16 = vpop.f32.mrf.mxu0  ;;  %17268 = vst [vmem:[#allocation27_spill] sm:$0xff] %v13708_v42  ;;  %v10399_v42 = vld [vmem:[%s13038_s28 + $0x35c] sm:$0xf0] }
 0x38b   : > { %v3577_v25 = vadd.f32 %v3576_v16, %v13551_v26  ;;  %3471 = vmatmul.bf16.gmra.mxu2 %v9793_v1  ;;  %5463 = vmatmul.bf16.gmra.mxu3 %v10382_v63  ;;  %v5256_v26 = vadd.f32 %v13325_v19, %v5255_v15  ;;  %v9748_v1 = vld [vmem:[%s12226_s0 + $0x200] sm:$0xf]  ;;  %v11200_v15 = vld [vmem:[%s12226_s0 + $0x274] sm:$0xf] }
 0x38d   : > { %v3700_v21 = vmax.f32 %v3577_v25, 0.0  ;;  %9962 = vmatmul.msk.bf16.gmra.mxu0 %vm3072_vm3, %v9737_v39  ;;  %v3432_v45 = vpop.f32.mrf.mxu2  ;;  %v11187_v25 = vld [vmem:[%s12226_s0 + $0x208] sm:$0xf0] }
 0x38e   : > { %v13720_v52 = vadd.f32 %v3432_v45, %v3264_v22  ;;  %v17275_v22 = vld [vmem:[#allocation52_spill] sm:$0xff] }
 0x38f   : > { %v13713_v2 = vadd.f32 %v3700_v21, %v17269_v40  ;;  %v5424_v48 = vpop.f32.mrf.mxu3  ;;  %v5260_v5 = vpop.f32.mrf.mxu1  ;;  %5299 = vmatmul.bf16.gmra.mxu1 %v10398_v34  ;;  %v17273_v21 = vld [vmem:[#allocation31_spill] sm:$0xff]  ;;  %v3266_v45 = vadd.f32 %v13582_v41, %v17275_v22  ;;  %v9805_v34 = vor.u32 %v11200_v15, %v9802_v23 }
 0x390   : > { %v13722_v39 = vadd.f32 %v5424_v48, %v5256_v26 }
 0x391   : > { %17270 = vst [vmem:[#allocation48_spill] sm:$0xff] %v13713_v2  ;;  %v11341_v2 = vld [vmem:[%s13038_s28 + $0x34c] sm:$0xf] }
 0x392   : > { %v3578_v50 = vpop.f32.mrf.mxu0  ;;  %17272 = vst [vmem:[#allocation29_spill] sm:$0xff] %v13722_v39 }
 0x393   : > { %v3579_v63 = vadd.f32 %v3578_v50, %v13568_v37  ;;  %v9749_v37 = vor.u32 %v11187_v25, %v9748_v1  ;;  %v10417_v1 = vld [vmem:[%s13038_s28 + $0x370] sm:$0xf]  ;;  %v11348_v25 = vld [vmem:[%s13038_s28 + $0x380] sm:$0xf0] }
 0x395   : > { %v3701_v16 = vmax.f32 %v3579_v63, 0.0  ;;  %v3434_v58 = vpop.f32.mrf.mxu2 }
 0x396   : > { %v13737_v26 = vadd.f32 %v3434_v58, %v3266_v45  ;;  %v17279_v45 = vld [vmem:[#allocation54_spill] sm:$0xff]  ;;  %v10418_v58 = vor.u32 %v11348_v25, %v10417_v1  ;;  %v13770_v1 = vld [vmem:[%s17041_s8 + $0x3] ss:$0 sm:$0xff] }
 0x397   : > { %v13728_v40 = vadd.f32 %v3701_v16, %v17273_v21  ;;  %v5426_v48 = vpop.f32.mrf.mxu3  ;;  %v5262_v21 = vpop.f32.mrf.mxu1  ;;  %v3269_v15 = vadd.f32 %v13582_v41, %v17279_v45  ;;  %v17283_v45 = vld [vmem:[#allocation56_spill] sm:$0xff] }
 0x398   : > { %v13739_v63 = vadd.f32 %v5426_v48, %v5258_v30 }
 0x399   : > { %17274 = vst [vmem:[#allocation50_spill] sm:$0xff] %v13728_v40  ;;  %v10402_v40 = vor.u32 %v11341_v2, %v10399_v42 }
 0x39a   : > { %v3581_v50 = vpop.f32.mrf.mxu0  ;;  %17276 = vst [vmem:[#allocation31_spill] sm:$0xff] %v13739_v63 }
 0x39b   : > { %v3582_v16 = vadd.f32 %v3581_v50, %v13587_v60  ;;  %3476 = vmatmul.bf16.gmra.mxu2 %v9805_v34  ;;  %5468 = vmatmul.bf16.gmra.mxu3 %v10402_v40  ;;  %v5261_v60 = vadd.f32 %v13325_v19, %v5260_v5  ;;  %v9760_v34 = vld [vmem:[%s12226_s0 + $0x218] sm:$0xf]  ;;  %v11203_v19 = vld [vmem:[%s12226_s0 + $0x28c] sm:$0xf] }
 0x39c   : > { %v9814_v5 = vld [vmem:[%s12226_s0 + $0x294] sm:$0xf0] }
 0x39d   : > { %v3702_v22 = vmax.f32 %v3582_v16, 0.0  ;;  %9963 = vmatmul.msk.bf16.gmra.mxu0 %vm3072_vm3, %v9749_v37  ;;  %v3437_v2 = vpop.f32.mrf.mxu2  ;;  %v11190_v16 = vld [vmem:[%s12226_s0 + $0x220] sm:$0xf0] }
 0x39e   : > { %v13751_v42 = vadd.f32 %v3437_v2, %v3269_v15  ;;  %v3271_v15 = vadd.f32 %v13582_v41, %v17283_v45  ;;  %v11346_v2 = vld [vmem:[%s13038_s28 + $0x374] sm:$0xf] }
 0x39f   : > { %v13744_v39 = vadd.f32 %v3702_v22, %v17277_v36  ;;  %v5429_v23 = vpop.f32.mrf.mxu3  ;;  %v5265_v48 = vpop.f32.mrf.mxu1  ;;  %5304 = vmatmul.bf16.gmra.mxu1 %v10418_v58  ;;  %v17281_v22 = vld [vmem:[#allocation35_spill] sm:$0xff] }
 0x3a0   : > { %v13753_v37 = vadd.f32 %v5429_v23, %v5261_v60  ;;  %v9761_v60 = vor.u32 %v11190_v16, %v9760_v34  ;;  %v17285_v34 = vld [vmem:[#allocation37_spill] sm:$0xff] }
 0x3a1   : > { %17278 = vst [vmem:[#allocation52_spill] sm:$0xff] %v13744_v39  ;;  %v10419_v39 = vld [vmem:[%s13038_s28 + $0x384] sm:$0xf0] }
 0x3a2   : > { %v3583_v30 = vpop.f32.mrf.mxu0  ;;  %17280 = vst [vmem:[#allocation33_spill] sm:$0xff] %v13753_v37  ;;  %v11418_v37 = vld [vmem:[%s17040_s7 + $0xb0] sm:$0xff] }
 0x3a3   : > { %v3584_v40 = vadd.f32 %v3583_v30, %v13604_v14  ;;  %v5263_v14 = vadd.f32 %v13770_v1, %v5262_v21  ;;  %5525 = vmatpush.bf16.msra.mxu2 %v11418_v37 }
 0x3a5   : > { %v3703_v50 = vmax.f32 %v3584_v40, 0.0  ;;  %v3439_v25 = vpop.f32.mrf.mxu2  ;;  %v9817_v40 = vor.u32 %v11203_v19, %v9814_v5  ;;  %v10437_v19 = vld [vmem:[%s13038_s28 + $0x398] sm:$0xf]  ;;  %v11353_v5 = vld [vmem:[%s13038_s28 + $0x3a8] sm:$0xf0] }
 0x3a6   : > { %v13773_v23 = vadd.f32 %v3439_v25, %v3271_v15  ;;  %v17287_v15 = vld [vmem:[#allocation58_spill] sm:$0xff] }
 0x3a7   : > { %v13759_v36 = vadd.f32 %v3703_v50, %v17281_v22  ;;  %v5431_v30 = vpop.f32.mrf.mxu3  ;;  %v5267_v45 = vpop.f32.mrf.mxu1 }
 0x3a8   : > { %v13775_v50 = vadd.f32 %v5431_v30, %v5263_v14 }
 0x3a9   : > { %17282 = vst [vmem:[#allocation54_spill] sm:$0xff] %v13759_v36  ;;  %v10422_v36 = vor.u32 %v11346_v2, %v10419_v39  ;;  %v5266_v39 = vadd.f32 %v13770_v1, %v5265_v48 }
 0x3aa   : > { %v3586_v58 = vpop.f32.mrf.mxu0  ;;  %17284 = vst [vmem:[#allocation35_spill] sm:$0xff] %v13775_v50 }
 0x3ab   : > { %v3587_v22 = vadd.f32 %v3586_v58, %v13618_v47  ;;  %3481 = vmatmul.bf16.gmra.mxu2 %v9817_v40  ;;  %5473 = vmatmul.bf16.gmra.mxu3 %v10422_v36  ;;  %v3274_v47 = vadd.f32 %v13582_v41, %v17287_v15  ;;  %v11426_v40 = vld [vmem:[%s17040_s7 + $0xf0] sm:$0xff] }
 0x3ac   : > { %5694 = vmatpush.bf16.msrb.mxu0 %v11426_v40 }
 0x3ad   : > { %v3704_v21 = vmax.f32 %v3587_v22, 0.0  ;;  %9964 = vmatmul.msk.bf16.gmra.mxu0 %vm3072_vm3, %v9761_v60  ;;  %v3442_v2 = vpop.f32.mrf.mxu2  ;;  %v10438_v60 = vor.u32 %v11353_v5, %v10437_v19  ;;  %v9772_v22 = vld [vmem:[%s12226_s0 + $0x230] sm:$0xf]  ;;  %v17291_v19 = vld [vmem:[#allocation60_spill] sm:$0xff] }
 0x3ae   : > { %v13790_v14 = vadd.f32 %v3442_v2, %v3274_v47  ;;  %v11206_v47 = vld [vmem:[%s12226_s0 + $0x2a4] sm:$0xf]  ;;  %v9826_v2 = vld [vmem:[%s12226_s0 + $0x2ac] sm:$0xf0]  ;;  %v3276_v5 = vadd.f32 %v13582_v41, %v17291_v19 }
 0x3af   : > { %v13783_v16 = vadd.f32 %v3704_v21, %v17285_v34  ;;  %v5434_v37 = vpop.f32.mrf.mxu3  ;;  %v5270_v58 = vpop.f32.mrf.mxu1  ;;  %5309 = vmatmul.bf16.gmra.mxu1 %v10438_v60  ;;  %v11193_v21 = vld [vmem:[%s12226_s0 + $0x238] sm:$0xf0] }
 0x3b0   : > { %v13792_v36 = vadd.f32 %v5434_v37, %v5266_v39  ;;  %v17289_v34 = vld [vmem:[#allocation39_spill] sm:$0xff]  ;;  %v5268_v37 = vadd.f32 %v13770_v1, %v5267_v45  ;;  %v17293_v45 = vld [vmem:[#allocation41_spill] sm:$0xff] }
 0x3b1   : > { %17286 = vst [vmem:[#allocation56_spill] sm:$0xff] %v13783_v16  ;;  %v11351_v39 = vld [vmem:[%s13038_s28 + $0x39c] sm:$0xf] }
 0x3b2   : > { %v3588_v25 = vpop.f32.mrf.mxu0  ;;  %17288 = vst [vmem:[#allocation37_spill] sm:$0xff] %v13792_v36  ;;  %v9829_v36 = vor.u32 %v11206_v47, %v9826_v2 }
 0x3b3   : > { %v3589_v30 = vadd.f32 %v3588_v25, %v13635_v62  ;;  %v10439_v62 = vld [vmem:[%s13038_s28 + $0x3ac] sm:$0xf0] }
 0x3b4   : > { %v10442_v50 = vor.u32 %v11351_v39, %v10439_v62 }
 0x3b5   : > { %v3705_v48 = vmax.f32 %v3589_v30, 0.0  ;;  %v3444_v25 = vpop.f32.mrf.mxu2  ;;  %v9773_v30 = vor.u32 %v11193_v21, %v9772_v22  ;;  %v10457_v22 = vld [vmem:[%s13038_s28 + $0x3c0] sm:$0xf]  ;;  %v11358_v21 = vld [vmem:[%s13038_s28 + $0x3d0] sm:$0xf0] }
 0x3b6   : > { %v13810_v40 = vadd.f32 %v3444_v25, %v3276_v5  ;;  %v17295_v5 = vld [vmem:[#allocation62_spill] sm:$0xff]  ;;  %v10458_v62 = vor.u32 %v11358_v21, %v10457_v22  ;;  %v11356_v21 = vld [vmem:[%s13038_s28 + $0x3c4] sm:$0xf] }
 0x3b7   : > { %v13801_v15 = vadd.f32 %v3705_v48, %v17289_v34  ;;  %v5436_v60 = vpop.f32.mrf.mxu3  ;;  %v3279_v47 = vadd.f32 %v13582_v41, %v17295_v5  ;;  %v11209_v5 = vld [vmem:[%s12226_s0 + $0x2bc] sm:$0xf] }
 0x3b8   : > { %v13812_v48 = vadd.f32 %v5436_v60, %v5268_v37  ;;  %v9784_v60 = vld [vmem:[%s12226_s0 + $0x248] sm:$0xf] }
 0x3b9   : > { %17290 = vst [vmem:[#allocation58_spill] sm:$0xff] %v13801_v15  ;;  %v5272_v15 = vpop.f32.mrf.mxu1 }
 0x3ba   : > { %v3591_v16 = vpop.f32.mrf.mxu0  ;;  %17292 = vst [vmem:[#allocation39_spill] sm:$0xff] %v13812_v48  ;;  %v10499_v48 = vld [vmem:[%s13038_s28 + $0x424] sm:$0xf0] }
 0x3bb   : > { %v3592_v34 = vadd.f32 %v3591_v16, %v13652_v38  ;;  %3486 = vmatmul.bf16.gmra.mxu2 %v9829_v36  ;;  %5478 = vmatmul.bf16.gmra.mxu3 %v10442_v50  ;;  %v5271_v38 = vadd.f32 %v13770_v1, %v5270_v58  ;;  %v11417_v58 = vld [vmem:[%s17040_s7 + $0xa8] sm:$0xff] }
 0x3bc   : > { %5526 = vmatpush.bf16.msra.mxu2 %v11417_v58 }
 0x3bd   : > { %v3706_v19 = vmax.f32 %v3592_v34, 0.0  ;;  %9965 = vmatmul.msk.bf16.gmra.mxu0 %vm3072_vm3, %v9773_v30  ;;  %v3447_v16 = vpop.f32.mrf.mxu2  ;;  %v11196_v34 = vld [vmem:[%s12226_s0 + $0x250] sm:$0xf0] }
 0x3be   : > { %v13824_v2 = vadd.f32 %v3447_v16, %v3279_v47  ;;  %v9838_v47 = vld [vmem:[%s12226_s0 + $0x2c4] sm:$0xf0]  ;;  %v17299_v16 = vld [vmem:[#allocation64_spill] sm:$0xff] }
 0x3bf   : > { %v13817_v63 = vadd.f32 %v3706_v19, %v17293_v45  ;;  %v5439_v36 = vpop.f32.mrf.mxu3  ;;  %5314 = vmatmul.bf16.gmra.mxu1 %v10458_v62  ;;  %v17297_v19 = vld [vmem:[#allocation43_spill] sm:$0xff]  ;;  %v3281_v22 = vadd.f32 %v13582_v41, %v17299_v16 }
 0x3c0   : > { %v13826_v37 = vadd.f32 %v5439_v36, %v5271_v38  ;;  %v10459_v38 = vld [vmem:[%s13038_s28 + $0x3d4] sm:$0xf0] }
 0x3c1   : > { %17294 = vst [vmem:[#allocation60_spill] sm:$0xff] %v13817_v63  ;;  %v5275_v25 = vpop.f32.mrf.mxu1 }
 0x3c2   : > { %v3593_v39 = vpop.f32.mrf.mxu0  ;;  %17296 = vst [vmem:[#allocation41_spill] sm:$0xff] %v13826_v37  ;;  %v10462_v37 = vor.u32 %v11356_v21, %v10459_v38 }
 0x3c3   : > { %v3594_v50 = vadd.f32 %v3593_v39, %v13675_v31  ;;  %v5273_v31 = vadd.f32 %v13770_v1, %v5272_v15  ;;  %v9785_v39 = vor.u32 %v11196_v34, %v9784_v60  ;;  %v11415_v60 = vld [vmem:[%s17040_s7 + $0x98] sm:$0xff]  ;;  %v17301_v34 = vld [vmem:[#allocation45_spill] sm:$0xff] }
 0x3c5   : > { %v3707_v30 = vmax.f32 %v3594_v50, 0.0  ;;  %v3449_v36 = vpop.f32.mrf.mxu2 }
 0x3c6   : > { %v13844_v62 = vadd.f32 %v3449_v36, %v3281_v22  ;;  %v11363_v22 = vld [vmem:[%s13038_s28 + $0x3f8] sm:$0xf0] }
 0x3c7   : > { %v13835_v45 = vadd.f32 %v3707_v30, %v17297_v19  ;;  %v5441_v50 = vpop.f32.mrf.mxu3  ;;  %v9841_v30 = vor.u32 %v11209_v5, %v9838_v47  ;;  %v11416_v19 = vld [vmem:[%s17040_s7 + $0xa0] sm:$0xff]  ;;  %v10477_v47 = vld [vmem:[%s13038_s28 + $0x3e8] sm:$0xf] }
 0x3c8   : > { %5527 = vmatpush.bf16.msra.mxu2 %v11416_v19 }
 0x3c9   : > { %17298 = vst [vmem:[#allocation62_spill] sm:$0xff] %v13835_v45  ;;  %v13849_v45 = vadd.f32 %v5441_v50, %v5273_v31  ;;  %v5277_v58 = vpop.f32.mrf.mxu1  ;;  %v17303_v31 = vld [vmem:[#allocation66_spill] sm:$0xff]  ;;  %v10478_v50 = vor.u32 %v11363_v22, %v10477_v47  ;;  %v17305_v47 = vld [vmem:[#allocation47_spill] sm:$0xff] }
 0x3ca   : > { %v3596_v63 = vpop.f32.mrf.mxu0 }
 0x3cb   : > { %17300 = vst [vmem:[#allocation43_spill] sm:$0xff] %v13849_v45  ;;  %v3597_v16 = vadd.f32 %v3596_v63, %v13689_v24  ;;  %3491 = vmatmul.bf16.gmra.mxu2 %v9841_v30  ;;  %5483 = vmatmul.bf16.gmra.mxu3 %v10462_v37  ;;  %v3284_v24 = vadd.f32 %v13582_v41, %v17303_v31  ;;  %v11414_v37 = vld [vmem:[%s17040_s7 + $0x90] sm:$0xff] }
 0x3cc   : > { %5528 = vmatpush.bf16.msra.mxu2 %v11415_v60  ;;  %v5276_v63 = vadd.f32 %v13770_v1, %v5275_v25  ;;  %v11199_v60 = vld [vmem:[%s12226_s0 + $0x268] sm:$0xf0]  ;;  %v11212_v31 = vld [vmem:[%s12226_s0 + $0x2d4] sm:$0xf] }
 0x3cd   : > { %v3708_v15 = vmax.f32 %v3597_v16, 0.0  ;;  %9966 = vmatmul.msk.bf16.gmra.mxu0 %vm3072_vm3, %v9785_v39  ;;  %v3452_v21 = vpop.f32.mrf.mxu2 }
 0x3ce   : > { %v13864_v38 = vadd.f32 %v3452_v21, %v3284_v24  ;;  %v9850_v24 = vld [vmem:[%s12226_s0 + $0x2dc] sm:$0xf0] }
 0x3cf   : > { %v13857_v5 = vadd.f32 %v3708_v15, %v17301_v34  ;;  %v5444_v36 = vpop.f32.mrf.mxu3  ;;  %5319 = vmatmul.bf16.gmra.mxu1 %v10478_v50  ;;  %v9796_v15 = vld [vmem:[%s12226_s0 + $0x260] sm:$0xf]  ;;  %v11413_v34 = vld [vmem:[%s17040_s7 + $0x88] sm:$0xff] }
 0x3d0   : > { %v13869_v30 = vadd.f32 %v5444_v36, %v5276_v63  ;;  %5529 = vmatpush.bf16.msra.mxu2 %v11414_v37  ;;  %v17307_v21 = vld [vmem:[#allocation68_spill] sm:$0xff]  ;;  %v11361_v36 = vld [vmem:[%s13038_s28 + $0x3ec] sm:$0xf]  ;;  %v9797_v37 = vor.u32 %v11199_v60, %v9796_v15 }
 0x3d1   : > { %17302 = vst [vmem:[#allocation64_spill] sm:$0xff] %v13857_v5  ;;  %v5280_v16 = vpop.f32.mrf.mxu1  ;;  %v3286_v63 = vadd.f32 %v13582_v41, %v17307_v21  ;;  %v17309_v15 = vld [vmem:[#allocation49_spill] sm:$0xff] }
 0x3d2   : > { %v3598_v39 = vpop.f32.mrf.mxu0  ;;  %17304 = vst [vmem:[#allocation45_spill] sm:$0xff] %v13869_v30 }
 0x3d3   : > { %v3599_v19 = vadd.f32 %v3598_v39, %v13706_v12  ;;  %v10479_v12 = vld [vmem:[%s13038_s28 + $0x3fc] sm:$0xf0]  ;;  %v5278_v39 = vadd.f32 %v13770_v1, %v5277_v58 }
 0x3d4   : > { %5530 = vmatpush.bf16.msra.mxu2 %v11413_v34  ;;  %v10482_v45 = vor.u32 %v11361_v36, %v10479_v12 }
 0x3d5   : > { %v3709_v25 = vmax.f32 %v3599_v19, 0.0  ;;  %v3454_v50 = vpop.f32.mrf.mxu2 }
 0x3d6   : > { %v13887_v19 = vadd.f32 %v3454_v50, %v3286_v63  ;;  %v17311_v63 = vld [vmem:[#allocation70_spill] sm:$0xff] }
 0x3d7   : > { %v13878_v22 = vadd.f32 %v3709_v25, %v17305_v47  ;;  %v5446_v5 = vpop.f32.mrf.mxu3  ;;  %v9853_v25 = vor.u32 %v11212_v31, %v9850_v24  ;;  %v11412_v47 = vld [vmem:[%s17040_s7 + $0x80] sm:$0xff]  ;;  %v10497_v31 = vld [vmem:[%s13038_s28 + $0x410] sm:$0xf] }
 0x3d8   : > { %5531 = vmatpush.bf16.msra.mxu2 %v11412_v47  ;;  %v11368_v24 = vld [vmem:[%s13038_s28 + $0x420] sm:$0xf0] }
 0x3d9   : > { %17306 = vst [vmem:[#allocation66_spill] sm:$0xff] %v13878_v22  ;;  %v13892_v22 = vadd.f32 %v5446_v5, %v5278_v39  ;;  %v5282_v34 = vpop.f32.mrf.mxu1  ;;  %v3289_v5 = vadd.f32 %v13582_v41, %v17311_v63  ;;  %v10498_v50 = vor.u32 %v11368_v24, %v10497_v31 }
 0x3da   : > { %v3601_v30 = vpop.f32.mrf.mxu0  ;;  %v5283_v31 = vadd.f32 %v13770_v1, %v5282_v34  ;;  %v17317_v34 = vld [vmem:[#allocation53_spill] sm:$0xff] }
 0x3db   : > { %17308 = vst [vmem:[#allocation47_spill] sm:$0xff] %v13892_v22  ;;  %v3602_v21 = vadd.f32 %v3601_v30, %v13720_v52  ;;  %3496 = vmatmul.bf16.gmra.mxu2 %v9853_v25  ;;  %5488 = vmatmul.bf16.gmra.mxu3 %v10482_v45  ;;  %v5281_v52 = vadd.f32 %v13770_v1, %v5280_v16  ;;  %v11215_v16 = vld [vmem:[%s12226_s0 + $0x2ec] sm:$0xf]  ;;  %v11366_v22 = vld [vmem:[%s13038_s28 + $0x414] sm:$0xf] }
 0x3dd   : > { %v3710_v58 = vmax.f32 %v3602_v21, 0.0  ;;  %9967 = vmatmul.msk.bf16.gmra.mxu0 %vm3072_vm3, %v9797_v37  ;;  %v3457_v30 = vpop.f32.mrf.mxu2  ;;  %v9808_v21 = vld [vmem:[%s12226_s0 + $0x278] sm:$0xf] }
 0x3de   : > { %v13904_v36 = vadd.f32 %v3457_v30, %v3289_v5  ;;  %v17315_v5 = vld [vmem:[#allocation72_spill] sm:$0xff] }
 0x3df   : > { %v13897_v60 = vadd.f32 %v3710_v58, %v17309_v15  ;;  %v5449_v12 = vpop.f32.mrf.mxu3  ;;  %5324 = vmatmul.bf16.gmra.mxu1 %v10498_v50  ;;  %v11202_v58 = vld [vmem:[%s12226_s0 + $0x280] sm:$0xf0]  ;;  %v17313_v15 = vld [vmem:[#allocation51_spill] sm:$0xff]  ;;  %v3291_v30 = vadd.f32 %v13582_v41, %v17315_v5 }
 0x3e0   : > { %v13906_v37 = vadd.f32 %v5449_v12, %v5281_v52 }
 0x3e1   : > { %17310 = vst [vmem:[#allocation68_spill] sm:$0xff] %v13897_v60  ;;  %v5285_v25 = vpop.f32.mrf.mxu1  ;;  %v9862_v60 = vld [vmem:[%s12226_s0 + $0x2f4] sm:$0xf0] }
 0x3e2   : > { %v3603_v39 = vpop.f32.mrf.mxu0  ;;  %17312 = vst [vmem:[#allocation49_spill] sm:$0xff] %v13906_v37  ;;  %v9865_v50 = vor.u32 %v11215_v16, %v9862_v60  ;;  %v5286_v16 = vadd.f32 %v13770_v1, %v5285_v25 }
 0x3e3   : > { %v3604_v45 = vadd.f32 %v3603_v39, %v13737_v26  ;;  %v9809_v26 = vor.u32 %v11202_v58, %v9808_v21  ;;  %v10517_v21 = vld [vmem:[%s13038_s28 + $0x438] sm:$0xf]  ;;  %v11373_v58 = vld [vmem:[%s13038_s28 + $0x448] sm:$0xf0] }
 0x3e5   : > { %v3711_v47 = vmax.f32 %v3604_v45, 0.0  ;;  %v3459_v24 = vpop.f32.mrf.mxu2 }
 0x3e6   : > { %v13921_v52 = vadd.f32 %v3459_v24, %v3291_v30  ;;  %v17319_v30 = vld [vmem:[#allocation74_spill] sm:$0xff]  ;;  %v10518_v24 = vor.u32 %v11373_v58, %v10517_v21  ;;  %v11239_v21 = vld [vmem:[%s13038_s28 + $0x18] sm:$0xf0] }
 0x3e7   : > { %v13912_v63 = vadd.f32 %v3711_v47, %v17313_v15  ;;  %v5451_v12 = vpop.f32.mrf.mxu3  ;;  %v3294_v60 = vadd.f32 %v13582_v41, %v17319_v30  ;;  %v9985_v30 = vld [vmem:[%s13038_s28 + $0x8] sm:$0xf]  ;;  %v11430_v58 = vld [vmem:[%s17040_s7 + $0x110] sm:$0xff] }
 0x3e8   : > { %v13923_v45 = vadd.f32 %v5451_v12, %v5283_v31  ;;  %5867 = vmatpush.bf16.msra.mxu1 %v11430_v58  ;;  %v17326_v58 = vld [vmem:[#allocation78_spill] sm:$0xff] }
 0x3e9   : > { %17314 = vst [vmem:[#allocation70_spill] sm:$0xff] %v13912_v63  ;;  %v5287_v15 = vpop.f32.mrf.mxu1  ;;  %v10502_v63 = vor.u32 %v11366_v22, %v10499_v48 }
 0x3ea   : > { %v3606_v39 = vpop.f32.mrf.mxu0  ;;  %17316 = vst [vmem:[#allocation51_spill] sm:$0xff] %v13923_v45 }
 0x3eb   : > { %v3607_v47 = vadd.f32 %v3606_v39, %v13751_v42  ;;  %3501 = vmatmul.bf16.gmra.mxu2 %v9865_v50  ;;  %5493 = vmatmul.bf16.gmra.mxu3 %v10502_v63  ;;  %v11425_v39 = vld [vmem:[%s17040_s7 + $0xe8] sm:$0xff]  ;;  %v9820_v50 = vld [vmem:[%s12226_s0 + $0x290] sm:$0xf] }
 0x3ec   : > { %5695 = vmatpush.bf16.msrb.mxu0 %v11425_v39 }
 0x3ed   : > { %v3712_v5 = vmax.f32 %v3607_v47, 0.0  ;;  %9968 = vmatmul.msk.bf16.gmra.mxu0 %vm3072_vm3, %v9809_v26  ;;  %v3462_v42 = vpop.f32.mrf.mxu2  ;;  %v11205_v47 = vld [vmem:[%s12226_s0 + $0x298] sm:$0xf0] }
 0x3ee   : > { %v13935_v48 = vadd.f32 %v3462_v42, %v3294_v60  ;;  %v10519_v42 = vld [vmem:[%s13038_s28 + $0x44c] sm:$0xf0] }
 0x3ef   : > { %v13928_v37 = vadd.f32 %v3712_v5, %v17317_v34  ;;  %v5454_v22 = vpop.f32.mrf.mxu3  ;;  %5329 = vmatmul.bf16.gmra.mxu1 %v10518_v24  ;;  %v17321_v5 = vld [vmem:[#allocation55_spill] sm:$0xff]  ;;  %v9821_v24 = vor.u32 %v11205_v47, %v9820_v50  ;;  %v10537_v50 = vld [vmem:[%s13038_s28 + $0x460] sm:$0xf]  ;;  %v11378_v47 = vld [vmem:[%s13038_s28 + $0x470] sm:$0xf0] }
 0x3f0   : > { %v13937_v63 = vadd.f32 %v5454_v22, %v5286_v16  ;;  %v11371_v16 = vld [vmem:[%s13038_s28 + $0x43c] sm:$0xf]  ;;  %v5288_v22 = vadd.f32 %v13770_v1, %v5287_v15  ;;  %v17324_v15 = vld [vmem:[#allocation57_spill] sm:$0xff] }
 0x3f1   : > { %17318 = vst [vmem:[#allocation72_spill] sm:$0xff] %v13928_v37  ;;  %v5290_v12 = vpop.f32.mrf.mxu1 }
 0x3f2   : > { %v3608_v31 = vpop.f32.mrf.mxu0  ;;  %17320 = vst [vmem:[#allocation53_spill] sm:$0xff] %v13937_v63 }
 0x3f3   : > { %v3609_v26 = vadd.f32 %v3608_v31, %v13773_v23  ;;  %v17323_v23 = vld [vmem:[#allocation76_spill] sm:$0xff] }
 0x3f4   : > { %v3296_v60 = vadd.f32 %v13582_v41, %v17323_v23  ;;  %v10522_v23 = vor.u32 %v11371_v16, %v10519_v42 }
 0x3f5   : > { %v3713_v25 = vmax.f32 %v3609_v26, 0.0  ;;  %v3464_v31 = vpop.f32.mrf.mxu2 }
 0x3f6   : > { %v13958_v26 = vadd.f32 %v3464_v31, %v3296_v60 }
 0x3f7   : > { %v13946_v34 = vadd.f32 %v3713_v25, %v17321_v5  ;;  %v5456_v39 = vpop.f32.mrf.mxu3  ;;  %v9986_v5 = vor.u32 %v11239_v21, %v9985_v30  ;;  %v3299_v30 = vadd.f32 %v13582_v41, %v17326_v58  ;;  %v5291_v21 = vadd.f32 %v13770_v1, %v5290_v12  ;;  %v11244_v58 = vld [vmem:[%s13038_s28 + $0x40] sm:$0xf0] }
 0x3f9   : > { %17322 = vst [vmem:[#allocation74_spill] sm:$0xff] %v13946_v34  ;;  %v13960_v34 = vadd.f32 %v5456_v39, %v5288_v22  ;;  %v5292_v63 = vpop.f32.mrf.mxu1  ;;  %v9832_v39 = vld [vmem:[%s12226_s0 + $0x2a8] sm:$0xf] }
 0x3fa   : > { %v3611_v25 = vpop.f32.mrf.mxu0 }
 0x3fb   : > { %v3612_v37 = vadd.f32 %v3611_v25, %v13790_v14  ;;  %5532 = vmatmul.bf16.vlgmr.msra.gmra.mxu2 %v9986_v5  ;;  %5498 = vmatmul.bf16.gmra.mxu3 %v10522_v23  ;;  %v11208_v25 = vld [vmem:[%s12226_s0 + $0x2b0] sm:$0xf0]  ;;  %v17328_v5 = vld [vmem:[#allocation59_spill] sm:$0xff] }
 0x3fd   : > { %v3714_v45 = vmax.f32 %v3612_v37, 0.0  ;;  %9969 = vmatmul.msk.bf16.gmra.mxu0 %vm3072_vm3, %v9821_v24  ;;  %v11433_v24 = vld [vmem:[%s17043_s10 + $0x8] sm:$0xff] }
 0x3fe   : > { %v3467_v14 = vpop.f32.mrf.mxu2  ;;  %6313 = vmatpush.bf16.msrb.mxu3 %v11433_v24 }
 0x3ff   : > { %v13965_v9 = vadd.f32 %v3714_v45, %v17324_v15  ;;  %v13972_v37 = vadd.f32 %v3467_v14, %v3299_v30  ;;  %v5459_v60 = vpop.f32.mrf.mxu3  ;;  %v10538_v45 = vor.u32 %v11378_v47, %v10537_v50  ;;  %v10005_v15 = vld [vmem:[%s13038_s28 + $0x30] sm:$0xf]  ;;  %v17330_v50 = vld [vmem:[#allocation80_spill] sm:$0xff] }
 0x400   : > { %v13974_v42 = vadd.f32 %v5459_v60, %v5291_v21  ;;  %v3301_v47 = vadd.f32 %v13582_v41, %v17330_v50  ;;  %v11376_v30 = vld [vmem:[%s13038_s28 + $0x464] sm:$0xf]  ;;  %v5293_v21 = vadd.f32 %v13770_v1, %v5292_v63  ;;  %v9833_v60 = vor.u32 %v11208_v25, %v9832_v39  ;;  %v17332_v63 = vld [vmem:[#allocation61_spill] sm:$0xff]  ;;  %v11383_v25 = vld [vmem:[%s13038_s28 + $0x498] sm:$0xf0] }
 0x401   : > { %17325 = vst [vmem:[#allocation55_spill] sm:$0xff] %v13965_v9  ;;  %v5295_v31 = vpop.f32.mrf.mxu1  ;;  %5334 = vmatmul.bf16.gmra.mxu1 %v10538_v45  ;;  %v10006_v24 = vor.u32 %v11244_v58, %v10005_v15  ;;  %v10557_v39 = vld [vmem:[%s13038_s28 + $0x488] sm:$0xf]  ;;  %v17334_v15 = vld [vmem:[#allocation82_spill] sm:$0xff] }
 0x402   : > { %v3613_v16 = vpop.f32.mrf.mxu0  ;;  %17327 = vst [vmem:[#allocation76_spill] sm:$0xff] %v13974_v42  ;;  %v3304_v58 = vadd.f32 %v13582_v41, %v17334_v15  ;;  %v11249_v15 = vld [vmem:[%s13038_s28 + $0x68] sm:$0xf0] }
 0x403   : > { %v3614_v22 = vadd.f32 %v3613_v16, %v13810_v40  ;;  %v10539_v40 = vld [vmem:[%s13038_s28 + $0x474] sm:$0xf0] }
 0x404   : > { %v10542_v50 = vor.u32 %v11376_v30, %v10539_v40 }
 0x405   : > { %v3715_v12 = vmax.f32 %v3614_v22, 0.0 }
 0x406   : > { %v3469_v14 = vpop.f32.mrf.mxu2 }
 0x407   : > { %v13983_v23 = vadd.f32 %v3715_v12, %v17328_v5  ;;  %v13992_v16 = vadd.f32 %v3469_v14, %v3301_v47  ;;  %v5461_v45 = vpop.f32.mrf.mxu3 }
 0x408   : > { %v13994_v12 = vadd.f32 %v5461_v45, %v5293_v21  ;;  %v10558_v21 = vor.u32 %v11383_v25, %v10557_v39 }
 0x409   : > { %17329 = vst [vmem:[#allocation57_spill] sm:$0xff] %v13983_v23  ;;  %v13997_v23 = vpop.f32.mrf.mxu1 }
 0x40a   : > { %v3616_v22 = vpop.f32.mrf.mxu0  ;;  %17331 = vst [vmem:[#allocation78_spill] sm:$0xff] %v13997_v23  ;;  %v10559_v23 = vld [vmem:[%s13038_s28 + $0x49c] sm:$0xf0] }
 0x40b   : > { %v3617_v5 = vadd.f32 %v3616_v22, %v13824_v2  ;;  %5537 = vmatmul.bf16.gmra.mxu2 %v10006_v24  ;;  %5503 = vmatmul.bf16.gmra.mxu3 %v10542_v50  ;;  %v5296_v2 = vadd.f32 %v13770_v1, %v5295_v31  ;;  %v9844_v24 = vld [vmem:[%s12226_s0 + $0x2c0] sm:$0xf]  ;;  %v17335_v50 = vld [vmem:[#allocation63_spill] sm:$0xff] }
 0x40c   : > { %v10025_v31 = vld [vmem:[%s13038_s28 + $0x58] sm:$0xf] }
 0x40d   : > { %v3716_v9 = vmax.f32 %v3617_v5, 0.0  ;;  %9970 = vmatmul.msk.bf16.gmra.mxu0 %vm3072_vm3, %v9833_v60  ;;  %v11211_v5 = vld [vmem:[%s12226_s0 + $0x2c8] sm:$0xf0] }
 0x40e   : > { %v3472_v47 = vpop.f32.mrf.mxu2  ;;  %v9845_v25 = vor.u32 %v11211_v5, %v9844_v24  ;;  %v11423_v24 = vld [vmem:[%s17040_s7 + $0xd8] sm:$0xff]  ;;  %v17339_v5 = vld [vmem:[#allocation65_spill] sm:$0xff] }
 0x40f   : > { %v14001_v42 = vadd.f32 %v3716_v9, %v17332_v63  ;;  %v14008_v30 = vadd.f32 %v3472_v47, %v3304_v58  ;;  %v5464_v40 = vpop.f32.mrf.mxu3  ;;  %v17337_v58 = vld [vmem:[#allocation84_spill] sm:$0xff] }
 0x410   : > { %v14010_v14 = vadd.f32 %v5464_v40, %v5296_v2  ;;  %v3306_v47 = vadd.f32 %v13582_v41, %v17337_v58 }
 0x411   : > { %17333 = vst [vmem:[#allocation59_spill] sm:$0xff] %v14001_v42  ;;  %v5300_v45 = vpop.f32.mrf.mxu1  ;;  %5339 = vmatmul.bf16.gmra.mxu1 %v10558_v21  ;;  %v11381_v42 = vld [vmem:[%s13038_s28 + $0x48c] sm:$0xf]  ;;  %v10026_v21 = vor.u32 %v11249_v15, %v10025_v31  ;;  %v11388_v31 = vld [vmem:[%s13038_s28 + $0x4c0] sm:$0xf0] }
 0x412   : > { %v3618_v9 = vpop.f32.mrf.mxu0  ;;  %v10562_v41 = vor.u32 %v11381_v42, %v10559_v23  ;;  %v14049_v42 = vld [vmem:[%s17041_s8 + $0x2] ss:$0 sm:$0xff]  ;;  %v17341_v23 = vld [vmem:[#allocation86_spill] sm:$0xff] }
 0x413   : > { %v3619_v60 = vadd.f32 %v3618_v9, %v13844_v62  ;;  %v11424_v62 = vld [vmem:[%s17040_s7 + $0xe0] sm:$0xff]  ;;  %v3309_v15 = vadd.f32 %v14049_v42, %v17341_v23  ;;  %v11421_v23 = vld [vmem:[%s17040_s7 + $0xc8] sm:$0xff] }
 0x414   : > { %5696 = vmatpush.bf16.msrb.mxu0 %v11424_v62  ;;  %v11422_v62 = vld [vmem:[%s17040_s7 + $0xd0] sm:$0xff] }
 0x415   : > { %v3717_v22 = vmax.f32 %v3619_v60, 0.0 }
 0x416   : > { %v3474_v39 = vpop.f32.mrf.mxu2 }
 0x417   : > { %v14016_v63 = vadd.f32 %v3717_v22, %v17335_v50  ;;  %v14027_v2 = vadd.f32 %v3474_v39, %v3306_v47  ;;  %v14029_v40 = vpop.f32.mrf.mxu3  ;;  %v10577_v47 = vld [vmem:[%s13038_s28 + $0x4b0] sm:$0xf]  ;;  %v5301_v39 = vadd.f32 %v13770_v1, %v5300_v45 }
 0x418   : > { %5697 = vmatpush.bf16.msrb.mxu0 %v11423_v24 }
 0x419   : > { %17336 = vst [vmem:[#allocation80_spill] sm:$0xff] %v14016_v63  ;;  %v14032_v22 = vpop.f32.mrf.mxu1 }
 0x41a   : > { %v3621_v9 = vpop.f32.mrf.mxu0  ;;  %17338 = vst [vmem:[#allocation61_spill] sm:$0xff] %v14032_v22 }
 0x41b   : > { %v3622_v60 = vadd.f32 %v3621_v9, %v13864_v38  ;;  %5542 = vmatmul.bf16.gmra.mxu2 %v10026_v21  ;;  %5508 = vmatmul.bf16.gmra.mxu3 %v10562_v41  ;;  %v11429_v38 = vld [vmem:[%s17040_s7 + $0x108] sm:$0xff]  ;;  %v10578_v41 = vor.u32 %v11388_v31, %v10577_v47  ;;  %v9856_v47 = vld [vmem:[%s12226_s0 + $0x2d8] sm:$0xf]  ;;  %v11214_v31 = vld [vmem:[%s12226_s0 + $0x2e0] sm:$0xf0] }
 0x41c   : > { %5868 = vmatpush.bf16.msra.mxu1 %v11429_v38  ;;  %5698 = vmatpush.bf16.msrb.mxu0 %v11422_v62  ;;  %v17345_v62 = vld [vmem:[#allocation88_spill] sm:$0xff] }
 0x41d   : > { %v3718_v50 = vmax.f32 %v3622_v60, 0.0  ;;  %9971 = vmatmul.msk.bf16.gmra.mxu0 %vm3072_vm3, %v9845_v25 }
 0x41e   : > { %v3477_v25 = vpop.f32.mrf.mxu2 }
 0x41f   : > { %v14039_v58 = vadd.f32 %v3718_v50, %v17339_v5  ;;  %v14057_v9 = vadd.f32 %v3477_v25, %v3309_v15  ;;  %v5469_v21 = vpop.f32.mrf.mxu3  ;;  %v11428_v5 = vld [vmem:[%s17040_s7 + $0x100] sm:$0xff]  ;;  %v17343_v15 = vld [vmem:[#allocation67_spill] sm:$0xff]  ;;  %v11254_v25 = vld [vmem:[%s13038_s28 + $0x90] sm:$0xf0] }
 0x420   : > { %v14059_v50 = vadd.f32 %v5469_v21, %v5301_v39  ;;  %5869 = vmatpush.bf16.msra.mxu1 %v11428_v5  ;;  %5699 = vmatpush.bf16.msrb.mxu0 %v11421_v23  ;;  %v3311_v21 = vadd.f32 %v14049_v42, %v17345_v62  ;;  %v9857_v5 = vor.u32 %v11214_v31, %v9856_v47  ;;  %v17348_v47 = vld [vmem:[#allocation69_spill] sm:$0xff] }
 0x421   : > { %17340 = vst [vmem:[#allocation82_spill] sm:$0xff] %v14039_v58  ;;  %v5305_v24 = vpop.f32.mrf.mxu1  ;;  %5344 = vmatmul.bf16.gmra.mxu1 %v10578_v41  ;;  %v10579_v58 = vld [vmem:[%s13038_s28 + $0x4c4] sm:$0xf0]  ;;  %v11420_v41 = vld [vmem:[%s17040_s7 + $0xc0] sm:$0xff] }
 0x422   : > { %v3623_v60 = vpop.f32.mrf.mxu0  ;;  %17342 = vst [vmem:[#allocation63_spill] sm:$0xff] %v14059_v50 }
 0x423   : > { %v3624_v45 = vadd.f32 %v3623_v60, %v13887_v19  ;;  %v10045_v19 = vld [vmem:[%s13038_s28 + $0x80] sm:$0xf]  ;;  %v11386_v60 = vld [vmem:[%s13038_s28 + $0x4b4] sm:$0xf] }
 0x424   : > { %v10582_v62 = vor.u32 %v11386_v60, %v10579_v58  ;;  %5700 = vmatpush.bf16.msrb.mxu0 %v11420_v41  ;;  %v5306_v58 = vadd.f32 %v13770_v1, %v5305_v24  ;;  %v10065_v24 = vld [vmem:[%s13038_s28 + $0xa8] sm:$0xf] }
 0x425   : > { %v3719_v38 = vmax.f32 %v3624_v45, 0.0 }
 0x426   : > { %v3479_v45 = vpop.f32.mrf.mxu2 }
 0x427   : > { %v14071_v39 = vadd.f32 %v3719_v38, %v17343_v15  ;;  %v14082_v22 = vadd.f32 %v3479_v45, %v3311_v21  ;;  %v14084_v38 = vpop.f32.mrf.mxu3  ;;  %v10597_v21 = vld [vmem:[%s13038_s28 + $0x4d8] sm:$0xf]  ;;  %v11393_v45 = vld [vmem:[%s13038_s28 + $0x4e8] sm:$0xf0] }
 0x428   : > { %17346 = vst [vmem:[#allocation65_spill] sm:$0xff] %v14084_v38  ;;  %v17350_v38 = vld [vmem:[#allocation90_spill] sm:$0xff]  ;;  %v10598_v60 = vor.u32 %v11393_v45, %v10597_v21 }
 0x429   : > { %17344 = vst [vmem:[#allocation84_spill] sm:$0xff] %v14071_v39  ;;  %v10046_v39 = vor.u32 %v11254_v25, %v10045_v19  ;;  %v14087_v63 = vpop.f32.mrf.mxu1  ;;  %v10599_v21 = vld [vmem:[%s13038_s28 + $0x4ec] sm:$0xf0] }
 0x42a   : > { %v3626_v15 = vpop.f32.mrf.mxu0  ;;  %17347 = vst [vmem:[#allocation86_spill] sm:$0xff] %v14087_v63  ;;  %v11259_v63 = vld [vmem:[%s13038_s28 + $0xb8] sm:$0xf0] }
 0x42b   : > { %v3627_v23 = vadd.f32 %v3626_v15, %v13904_v36  ;;  %5547 = vmatmul.bf16.gmra.mxu2 %v10046_v39  ;;  %5513 = vmatmul.bf16.gmra.mxu3 %v10582_v62  ;;  %v3314_v36 = vadd.f32 %v14049_v42, %v17350_v38  ;;  %v9868_v62 = vld [vmem:[%s12226_s0 + $0x2f0] sm:$0xf]  ;;  %v11217_v38 = vld [vmem:[%s12226_s0 + $0x2f8] sm:$0xf0]  ;;  %s8807_s0 = scalar_lea.sflag [#allocation4], %s678_s20 }
 0x42d   : > { %v3720_v50 = vmax.f32 %v3627_v23, 0.0  ;;  %9972 = vmatmul.msk.bf16.gmra.mxu0 %vm3072_vm3, %v9857_v5 }
 0x42e   : > { %v3482_v19 = vpop.f32.mrf.mxu2 }
 0x42f   : > { %v14091_v31 = vadd.f32 %v3720_v50, %v17348_v47  ;;  %v14098_v25 = vadd.f32 %v3482_v19, %v3314_v36  ;;  %v5474_v39 = vpop.f32.mrf.mxu3  ;;  %v17352_v47 = vld [vmem:[#allocation71_spill] sm:$0xff]  ;;  %v3316_v36 = vadd.f32 %v14049_v42, %v13178_v20  ;;  %v17354_v20 = vld [vmem:[#allocation73_spill] sm:$0xff] }
 0x430   : > { %v14100_v5 = vadd.f32 %v5474_v39, %v5306_v58  ;;  %v11391_v19 = vld [vmem:[%s13038_s28 + $0x4dc] sm:$0xf]  ;;  %v9869_v58 = vor.u32 %v11217_v38, %v9868_v62  ;;  %v9993_v62 = vld [vmem:[%s13038_s28 + $0x10] sm:$0xf]  ;;  %v11240_v38 = vld [vmem:[%s13038_s28 + $0x20] sm:$0xf0] }
 0x431   : > { %17349 = vst [vmem:[#allocation67_spill] sm:$0xff] %v14091_v31  ;;  %v5310_v15 = vpop.f32.mrf.mxu1  ;;  %5349 = vmatmul.bf16.gmra.mxu1 %v10598_v60  ;;  %v10066_v60 = vor.u32 %v11259_v63, %v10065_v24  ;;  %v3319_v63 = vadd.f32 %v14049_v42, %v13192_v59  ;;  %v11237_v59 = vld [vmem:[%s13038_s28 + $0xc] sm:$0xf] }
 0x432   : > { %v3628_v50 = vpop.f32.mrf.mxu0  ;;  %17351 = vst [vmem:[#allocation88_spill] sm:$0xff] %v14100_v5 }
 0x433   : > { %v3629_v41 = vadd.f32 %v3628_v50, %v13921_v52 }
 0x435   : > { %v3721_v23 = vmax.f32 %v3629_v41, 0.0 }
 0x436   : > { %v3484_v45 = vpop.f32.mrf.mxu2 }
 0x437   : > { %v14106_v31 = vadd.f32 %v3721_v23, %v17352_v47  ;;  %v14114_v52 = vadd.f32 %v3484_v45, %v3316_v36  ;;  %v14116_v39 = vpop.f32.mrf.mxu3  ;;  %v10602_v47 = vor.u32 %v11391_v19, %v10599_v21  ;;  %v9994_v45 = vor.u32 %v11240_v38, %v9993_v62 }
 0x438   : > { %v3321_v62 = vadd.f32 %v14049_v42, %v13209_v35  ;;  %v10013_v35 = vld [vmem:[%s13038_s28 + $0x38] sm:$0xf] }
 0x439   : > { %17353 = vst [vmem:[#allocation69_spill] sm:$0xff] %v14106_v31  ;;  %v14119_v23 = vpop.f32.mrf.mxu1 }
 0x43a   : > { %v3631_v50 = vpop.f32.mrf.mxu0 }
 0x43b   : > { %v3632_v41 = vadd.f32 %v3631_v50, %v13935_v48  ;;  %5552 = vmatmul.bf16.gmra.mxu2 %v10066_v60  ;;  %5518 = vmatmul.bf16.gmra.mxu3 %v10602_v47  ;;  %v5311_v48 = vadd.f32 %v13770_v1, %v5310_v15  ;;  %v17355_v47 = vld [vmem:[#allocation75_spill] sm:$0xff] }
 0x43d   : > { %v3722_v31 = vmax.f32 %v3632_v41, 0.0  ;;  %9973 = vmatmul.msk.bf16.gmra.mxu0 %vm3072_vm3, %v9869_v58  ;;  %v9987_v41 = vld [vmem:[%s13038_s28 + $0x1c] sm:$0xf0] }
 0x43e   : > { %v3487_v24 = vpop.f32.mrf.mxu2 }
 0x43f   : > { %v14123_v5 = vadd.f32 %v3722_v31, %v17354_v20  ;;  %v14130_v36 = vadd.f32 %v3487_v24, %v3319_v63  ;;  %v5479_v19 = vpop.f32.mrf.mxu3  ;;  %v10085_v20 = vld [vmem:[%s13038_s28 + $0xd0] sm:$0xf]  ;;  %v11264_v63 = vld [vmem:[%s13038_s28 + $0xe0] sm:$0xf0] }
 0x440   : > { %v14132_v31 = vadd.f32 %v5479_v19, %v5311_v48  ;;  %v9990_v48 = vor.u32 %v11237_v59, %v9987_v41  ;;  %v11245_v59 = vld [vmem:[%s13038_s28 + $0x48] sm:$0xf0]  ;;  %v3324_v41 = vadd.f32 %v14049_v42, %v13233_v17  ;;  %v17361_v17 = vld [vmem:[#allocation79_spill] sm:$0xff] }
 0x441   : > { %v5315_v50 = vpop.f32.mrf.mxu1  ;;  %10759 = vmatmul.msk.bf16.vlgmr.msra.gmra.mxu1 %vm5089_vm4, %v9994_v45 }
 0x442   : > { %v3633_v21 = vpop.f32.mrf.mxu0 }
 0x443   : > { %v3634_v58 = vadd.f32 %v3633_v21, %v13958_v26  ;;  %v10086_v21 = vor.u32 %v11264_v63, %v10085_v20  ;;  %v5316_v20 = vadd.f32 %v13770_v1, %v5315_v50  ;;  %v10105_v50 = vld [vmem:[%s13038_s28 + $0xf8] sm:$0xf] }
 0x445   : > { %v3723_v60 = vmax.f32 %v3634_v58, 0.0 }
 0x446   : > { %v3489_v38 = vpop.f32.mrf.mxu2 }
 0x447   : > { %v14139_v15 = vadd.f32 %v3723_v60, %v17355_v47  ;;  %v14145_v26 = vadd.f32 %v3489_v38, %v3321_v62  ;;  %v14147_v24 = vpop.f32.mrf.mxu3  ;;  %v17358_v47 = vld [vmem:[#allocation77_spill] sm:$0xff] }
 0x449   : > { %17356 = vst [vmem:[#allocation90_spill] sm:$0xff] %v14139_v15  ;;  %v14150_v58 = vpop.f32.mrf.mxu1 }
 0x44a   : > { %v3636_v19 = vpop.f32.mrf.mxu0  ;;  %17357 = vst [vmem:[#allocation71_spill] sm:$0xff] %v14150_v58 }
 0x44b   : > { %v3637_v45 = vadd.f32 %v3636_v19, %v13972_v37  ;;  %5557 = vmatmul.bf16.gmra.mxu2 %v10086_v21 }
 0x44d   : > { %v3724_v60 = vmax.f32 %v3637_v45, 0.0  ;;  %5701 = vmatmul.bf16.vlgmr.msrb.gmra.mxu0 %v9990_v48  ;;  %v10014_v48 = vor.u32 %v11245_v59, %v10013_v35 }
 0x44e   : > { %v3492_v37 = vpop.f32.mrf.mxu2 }
 0x44f   : > { %v14153_v15 = vadd.f32 %v3724_v60, %v17358_v47  ;;  %v14160_v63 = vadd.f32 %v3492_v37, %v3324_v41  ;;  %v5484_v62 = vpop.f32.mrf.mxu3  ;;  %v11242_v47 = vld [vmem:[%s13038_s28 + $0x34] sm:$0xf]  ;;  %v11269_v41 = vld [vmem:[%s13038_s28 + $0x108] sm:$0xf0]  ;;  %v17363_v37 = vld [vmem:[#allocation96_spill] sm:$0xff] }
 0x450   : > { %v14162_v19 = vadd.f32 %v5484_v62, %v5316_v20  ;;  %v3326_v35 = vadd.f32 %v14049_v42, %v17363_v37  ;;  %v10033_v37 = vld [vmem:[%s13038_s28 + $0x60] sm:$0xf] }
 0x451   : > { %17359 = vst [vmem:[#allocation73_spill] sm:$0xff] %v14153_v15  ;;  %v5320_v45 = vpop.f32.mrf.mxu1  ;;  %10760 = vmatmul.msk.bf16.gmra.mxu1 %vm5089_vm4, %v10014_v48  ;;  %v10007_v15 = vld [vmem:[%s13038_s28 + $0x44] sm:$0xf0]  ;;  %v10106_v48 = vor.u32 %v11269_v41, %v10105_v50 }
 0x452   : > { %v3638_v38 = vpop.f32.mrf.mxu0  ;;  %17360 = vst [vmem:[#allocation75_spill] sm:$0xff] %v14162_v19  ;;  %v10010_v20 = vor.u32 %v11242_v47, %v10007_v15  ;;  %v11250_v15 = vld [vmem:[%s13038_s28 + $0x70] sm:$0xf0]  ;;  %v5321_v50 = vadd.f32 %v13770_v1, %v5320_v45  ;;  %v10125_v45 = vld [vmem:[%s13038_s28 + $0x120] sm:$0xf] }
 0x453   : > { %v3639_v21 = vadd.f32 %v3638_v38, %v13992_v16  ;;  %v17368_v47 = vld [vmem:[#allocation98_spill] sm:$0xff] }
 0x455   : > { %v3725_v60 = vmax.f32 %v3639_v21, 0.0 }
 0x456   : > { %v3494_v59 = vpop.f32.mrf.mxu2 }
 0x457   : > { %v14169_v58 = vadd.f32 %v3725_v60, %v17361_v17  ;;  %v14175_v62 = vadd.f32 %v3494_v59, %v3326_v35  ;;  %v14177_v16 = vpop.f32.mrf.mxu3  ;;  %v17366_v17 = vld [vmem:[#allocation81_spill] sm:$0xff]  ;;  %v3329_v35 = vadd.f32 %v14049_v42, %v17368_v47  ;;  %v17369_v47 = vld [vmem:[#allocation83_spill] sm:$0xff] }
 0x458   : > { %17364 = vst [vmem:[#allocation79_spill] sm:$0xff] %v14177_v16 }
 0x459   : > { %17362 = vst [vmem:[#allocation77_spill] sm:$0xff] %v14169_v58  ;;  %v14180_v19 = vpop.f32.mrf.mxu1 }
 0x45a   : > { %v3641_v38 = vpop.f32.mrf.mxu0  ;;  %17365 = vst [vmem:[#allocation96_spill] sm:$0xff] %v14180_v19  ;;  %v10027_v19 = vld [vmem:[%s13038_s28 + $0x6c] sm:$0xf0] }
 0x45b   : > { %v3642_v21 = vadd.f32 %v3641_v38, %v14008_v30  ;;  %5562 = vmatmul.bf16.gmra.mxu2 %v10106_v48  ;;  %v10034_v38 = vor.u32 %v11250_v15, %v10033_v37  ;;  %v3331_v37 = vadd.f32 %v14049_v42, %v13285_v18  ;;  %v10053_v18 = vld [vmem:[%s13038_s28 + $0x88] sm:$0xf] }
 0x45d   : > { %v3726_v60 = vmax.f32 %v3642_v21, 0.0  ;;  %5706 = vmatmul.bf16.gmra.mxu0 %v10010_v20 }
 0x45e   : > { %v3497_v30 = vpop.f32.mrf.mxu2 }
 0x45f   : > { %v14183_v58 = vadd.f32 %v3726_v60, %v17366_v17  ;;  %v14190_v41 = vadd.f32 %v3497_v30, %v3329_v35  ;;  %v5489_v59 = vpop.f32.mrf.mxu3  ;;  %v11274_v35 = vld [vmem:[%s13038_s28 + $0x130] sm:$0xf0] }
 0x460   : > { %v14192_v48 = vadd.f32 %v5489_v59, %v5321_v50 }
 0x461   : > { %17367 = vst [vmem:[#allocation81_spill] sm:$0xff] %v14183_v58  ;;  %v5325_v60 = vpop.f32.mrf.mxu1  ;;  %10761 = vmatmul.msk.bf16.gmra.mxu1 %vm5089_vm4, %v10034_v38  ;;  %v11247_v58 = vld [vmem:[%s13038_s28 + $0x5c] sm:$0xf] }
 0x462   : > { %v3643_v20 = vpop.f32.mrf.mxu0  ;;  %v10030_v50 = vor.u32 %v11247_v58, %v10027_v19  ;;  %v11255_v58 = vld [vmem:[%s13038_s28 + $0x98] sm:$0xf0]  ;;  %v3334_v19 = vadd.f32 %v14049_v42, %v13303_v49 }
 0x463   : > { %v3644_v21 = vadd.f32 %v3643_v20, %v14027_v2  ;;  %v10126_v20 = vor.u32 %v11274_v35, %v10125_v45  ;;  %v5326_v45 = vadd.f32 %v13770_v1, %v5325_v60  ;;  %v17374_v49 = vld [vmem:[#allocation87_spill] sm:$0xff]  ;;  %v10145_v1 = vld [vmem:[%s13038_s28 + $0x148] sm:$0xf] }
 0x464   : > { %v11279_v60 = vld [vmem:[%s13038_s28 + $0x158] sm:$0xf0] }
 0x465   : > { %v3727_v17 = vmax.f32 %v3644_v21, 0.0 }
 0x466   : > { %v3499_v15 = vpop.f32.mrf.mxu2 }
 0x467   : > { %v14199_v16 = vadd.f32 %v3727_v17, %v17369_v47  ;;  %v14205_v30 = vadd.f32 %v3499_v15, %v3331_v37  ;;  %v14207_v2 = vpop.f32.mrf.mxu3  ;;  %v17372_v47 = vld [vmem:[#allocation85_spill] sm:$0xff] }
 0x469   : > { %17370 = vst [vmem:[#allocation98_spill] sm:$0xff] %v14199_v16  ;;  %v14210_v21 = vpop.f32.mrf.mxu1 }
 0x46a   : > { %v3646_v59 = vpop.f32.mrf.mxu0  ;;  %17371 = vst [vmem:[#allocation83_spill] sm:$0xff] %v14210_v21 }
 0x46b   : > { %v3647_v38 = vadd.f32 %v3646_v59, %v14057_v9  ;;  %5567 = vmatmul.bf16.gmra.mxu2 %v10126_v20 }
 0x46d   : > { %v3728_v17 = vmax.f32 %v3647_v38, 0.0  ;;  %5711 = vmatmul.bf16.gmra.mxu0 %v10030_v50  ;;  %v10054_v50 = vor.u32 %v11255_v58, %v10053_v18  ;;  %v3336_v18 = vadd.f32 %v14049_v42, %v13317_v32  ;;  %v10073_v32 = vld [vmem:[%s13038_s28 + $0xb0] sm:$0xf]  ;;  %v11260_v42 = vld [vmem:[%s13038_s28 + $0xc0] sm:$0xf0] }
 0x46e   : > { %v3502_v9 = vpop.f32.mrf.mxu2 }
 0x46f   : > { %v14213_v16 = vadd.f32 %v3728_v17, %v17372_v47  ;;  %v14220_v35 = vadd.f32 %v3502_v9, %v3334_v19  ;;  %v5494_v37 = vpop.f32.mrf.mxu3  ;;  %v11252_v47 = vld [vmem:[%s13038_s28 + $0x84] sm:$0xf] }
 0x470   : > { %v14222_v59 = vadd.f32 %v5494_v37, %v5326_v45  ;;  %v10146_v37 = vor.u32 %v11279_v60, %v10145_v1 }
 0x471   : > { %17373 = vst [vmem:[#allocation85_spill] sm:$0xff] %v14213_v16  ;;  %v5330_v38 = vpop.f32.mrf.mxu1  ;;  %10762 = vmatmul.msk.bf16.gmra.mxu1 %vm5089_vm4, %v10054_v50  ;;  %v10047_v16 = vld [vmem:[%s13038_s28 + $0x94] sm:$0xf0] }
 0x472   : > { %v3648_v15 = vpop.f32.mrf.mxu0  ;;  %v10050_v19 = vor.u32 %v11252_v47, %v10047_v16  ;;  %v14250_v16 = vld [vmem:[%s17041_s8 + $0x3] ss:$0 sm:$0xff] }
 0x473   : > { %v3649_v20 = vadd.f32 %v3648_v15, %v14082_v22 }
 0x475   : > { %v3729_v17 = vmax.f32 %v3649_v20, 0.0 }
 0x476   : > { %v3504_v58 = vpop.f32.mrf.mxu2 }
 0x477   : > { %v14229_v21 = vadd.f32 %v3729_v17, %v17374_v49  ;;  %v14235_v45 = vadd.f32 %v3504_v58, %v3336_v18  ;;  %v14237_v22 = vpop.f32.mrf.mxu3  ;;  %v17377_v17 = vld [vmem:[#allocation89_spill] sm:$0xff]  ;;  %v10074_v18 = vor.u32 %v11260_v42, %v10073_v32 }
 0x479   : > { %17375 = vst [vmem:[#allocation87_spill] sm:$0xff] %v14229_v21  ;;  %v14240_v50 = vpop.f32.mrf.mxu1 }
 0x47a   : > { %v3651_v9 = vpop.f32.mrf.mxu0  ;;  %17376 = vst [vmem:[#allocation101_spill] sm:$0xff] %v14240_v50  ;;  %v11284_v50 = vld [vmem:[%s13038_s28 + $0x180] sm:$0xf0] }
 0x47b   : > { %v3652_v15 = vadd.f32 %v3651_v9, %v14098_v25  ;;  %5572 = vmatmul.bf16.gmra.mxu2 %v10146_v37  ;;  %v5331_v25 = vadd.f32 %v14250_v16, %v5330_v38  ;;  %v10165_v38 = vld [vmem:[%s13038_s28 + $0x170] sm:$0xf] }
 0x47d   : > { %v3730_v20 = vmax.f32 %v3652_v15, 0.0  ;;  %5716 = vmatmul.bf16.gmra.mxu0 %v10050_v19  ;;  %v11257_v15 = vld [vmem:[%s13038_s28 + $0xac] sm:$0xf] }
 0x47e   : > { %v14253_v47 = vpop.f32.mrf.mxu2 }
 0x47f   : > { %v14243_v49 = vadd.f32 %v3730_v20, %v17377_v17  ;;  %v5499_v1 = vpop.f32.mrf.mxu3  ;;  %v10067_v20 = vld [vmem:[%s13038_s28 + $0xbc] sm:$0xf0]  ;;  %v17380_v17 = vld [vmem:[#allocation91_spill] sm:$0xff] }
 0x480   : > { %v14255_v58 = vadd.f32 %v5499_v1, %v5331_v25  ;;  %v10070_v32 = vor.u32 %v11257_v15, %v10067_v20  ;;  %v11265_v15 = vld [vmem:[%s13038_s28 + $0xe8] sm:$0xf0] }
 0x481   : > { %17378 = vst [vmem:[#allocation89_spill] sm:$0xff] %v14243_v49  ;;  %v5335_v9 = vpop.f32.mrf.mxu1  ;;  %10763 = vmatmul.msk.bf16.gmra.mxu1 %vm5089_vm4, %v10074_v18 }
 0x482   : > { %v3653_v60 = vpop.f32.mrf.mxu0  ;;  %17379 = vst [vmem:[#allocation102_spill] sm:$0xff] %v14255_v58  ;;  %v5336_v20 = vadd.f32 %v14250_v16, %v5335_v9  ;;  %v10185_v9 = vld [vmem:[%s13038_s28 + $0x198] sm:$0xf] }
 0x483   : > { %v3654_v19 = vadd.f32 %v3653_v60, %v14114_v52  ;;  %v10166_v52 = vor.u32 %v11284_v50, %v10165_v38 }
 0x485   : > { %v3731_v37 = vmax.f32 %v3654_v19, 0.0  ;;  %v17384_v19 = vld [vmem:[#allocation92_spill] sm:$0xff] }
 0x486   : > { %v14266_v21 = vpop.f32.mrf.mxu2 }
 0x487   : > { %v14262_v49 = vadd.f32 %v3731_v37, %v17380_v17  ;;  %v14268_v42 = vpop.f32.mrf.mxu3  ;;  %v10093_v17 = vld [vmem:[%s13038_s28 + $0xd8] sm:$0xf] }
 0x488   : > { %17382 = vst [vmem:[#allocation103_spill] sm:$0xff] %v14268_v42  ;;  %v10094_v38 = vor.u32 %v11265_v15, %v10093_v17  ;;  %v11289_v42 = vld [vmem:[%s13038_s28 + $0x1a8] sm:$0xf0] }
 0x489   : > { %17381 = vst [vmem:[#allocation91_spill] sm:$0xff] %v14262_v49  ;;  %v14271_v60 = vpop.f32.mrf.mxu1 }
 0x48a   : > { %v3656_v25 = vpop.f32.mrf.mxu0  ;;  %17383 = vst [vmem:[#allocation104_spill] sm:$0xff] %v14271_v60 }
 0x48b   : > { %v3657_v1 = vadd.f32 %v3656_v25, %v14130_v36  ;;  %5577 = vmatmul.bf16.gmra.mxu2 %v10166_v52 }
 0x48d   : > { %v3732_v18 = vmax.f32 %v3657_v1, 0.0  ;;  %5721 = vmatmul.bf16.gmra.mxu0 %v10070_v32 }
 0x48e   : > { %v14279_v49 = vpop.f32.mrf.mxu2 }
 0x48f   : > { %v14274_v37 = vadd.f32 %v3732_v18, %v17384_v19  ;;  %v5504_v50 = vpop.f32.mrf.mxu3  ;;  %v11262_v18 = vld [vmem:[%s13038_s28 + $0xd4] sm:$0xf]  ;;  %v10087_v19 = vld [vmem:[%s13038_s28 + $0xe4] sm:$0xf0] }
 0x490   : > { %v14281_v25 = vadd.f32 %v5504_v50, %v5336_v20  ;;  %v10090_v17 = vor.u32 %v11262_v18, %v10087_v19  ;;  %v11270_v18 = vld [vmem:[%s13038_s28 + $0x110] sm:$0xf0] }
 0x491   : > { %17385 = vst [vmem:[#allocation92_spill] sm:$0xff] %v14274_v37  ;;  %v5340_v1 = vpop.f32.mrf.mxu1  ;;  %10764 = vmatmul.msk.bf16.gmra.mxu1 %vm5089_vm4, %v10094_v38  ;;  %v17387_v37 = vld [vmem:[#allocation93_spill] sm:$0xff] }
 0x492   : > { %v3658_v36 = vpop.f32.mrf.mxu0  ;;  %17386 = vst [vmem:[#allocation105_spill] sm:$0xff] %v14281_v25  ;;  %v5341_v19 = vadd.f32 %v14250_v16, %v5340_v1  ;;  %v10205_v1 = vld [vmem:[%s13038_s28 + $0x1c0] sm:$0xf] }
 0x493   : > { %v3659_v32 = vadd.f32 %v3658_v36, %v14145_v26  ;;  %v10186_v26 = vor.u32 %v11289_v42, %v10185_v9 }
 0x495   : > { %v3733_v52 = vmax.f32 %v3659_v32, 0.0 }
 0x496   : > { %v14292_v58 = vpop.f32.mrf.mxu2 }
 0x497   : > { %v14288_v60 = vadd.f32 %v3733_v52, %v17387_v37  ;;  %v14294_v15 = vpop.f32.mrf.mxu3  ;;  %v17391_v37 = vld [vmem:[#allocation94_spill] sm:$0xff]  ;;  %v10113_v52 = vld [vmem:[%s13038_s28 + $0x100] sm:$0xf] }
 0x498   : > { %17389 = vst [vmem:[#allocation106_spill] sm:$0xff] %v14294_v15  ;;  %v10114_v9 = vor.u32 %v11270_v18, %v10113_v52  ;;  %v11294_v15 = vld [vmem:[%s13038_s28 + $0x1d0] sm:$0xf0] }
 0x499   : > { %17388 = vst [vmem:[#allocation93_spill] sm:$0xff] %v14288_v60  ;;  %v14297_v36 = vpop.f32.mrf.mxu1 }
 0x49a   : > { %v3661_v20 = vpop.f32.mrf.mxu0  ;;  %17390 = vst [vmem:[#allocation107_spill] sm:$0xff] %v14297_v36 }
 0x49b   : > { %v3662_v50 = vadd.f32 %v3661_v20, %v14160_v63  ;;  %5582 = vmatmul.bf16.gmra.mxu2 %v10186_v26 }
 0x49d   : > { %v3734_v38 = vmax.f32 %v3662_v50, 0.0  ;;  %5726 = vmatmul.bf16.gmra.mxu0 %v10090_v17 }
 0x49e   : > { %v14305_v60 = vpop.f32.mrf.mxu2 }
 0x49f   : > { %v14300_v32 = vadd.f32 %v3734_v38, %v17391_v37  ;;  %v5509_v42 = vpop.f32.mrf.mxu3  ;;  %v11267_v38 = vld [vmem:[%s13038_s28 + $0xfc] sm:$0xf]  ;;  %v10107_v37 = vld [vmem:[%s13038_s28 + $0x10c] sm:$0xf0] }
 0x4a0   : > { %v14307_v20 = vadd.f32 %v5509_v42, %v5341_v19  ;;  %v10110_v52 = vor.u32 %v11267_v38, %v10107_v37  ;;  %v11275_v38 = vld [vmem:[%s13038_s28 + $0x138] sm:$0xf0] }
 0x4a1   : > { %17392 = vst [vmem:[#allocation94_spill] sm:$0xff] %v14300_v32  ;;  %v5345_v50 = vpop.f32.mrf.mxu1  ;;  %10765 = vmatmul.msk.bf16.gmra.mxu1 %vm5089_vm4, %v10114_v9  ;;  %v17394_v32 = vld [vmem:[#allocation95_spill] sm:$0xff] }
 0x4a2   : > { %v3663_v63 = vpop.f32.mrf.mxu0  ;;  %17393 = vst [vmem:[#allocation108_spill] sm:$0xff] %v14307_v20  ;;  %v5346_v37 = vadd.f32 %v14250_v16, %v5345_v50  ;;  %v10225_v50 = vld [vmem:[%s13038_s28 + $0x1e8] sm:$0xf] }
 0x4a3   : > { %v3664_v17 = vadd.f32 %v3663_v63, %v14175_v62  ;;  %v10206_v62 = vor.u32 %v11294_v15, %v10205_v1 }
 0x4a5   : > { %v3735_v26 = vmax.f32 %v3664_v17, 0.0 }
 0x4a6   : > { %v14318_v25 = vpop.f32.mrf.mxu2 }
 0x4a7   : > { %v14314_v36 = vadd.f32 %v3735_v26, %v17394_v32  ;;  %v14320_v18 = vpop.f32.mrf.mxu3  ;;  %v17398_v32 = vld [vmem:[#allocation97_spill] sm:$0xff] }
 0x4a8   : > { %17396 = vst [vmem:[#allocation109_spill] sm:$0xff] %v14320_v18  ;;  %v10133_v26 = vld [vmem:[%s13038_s28 + $0x128] sm:$0xf]  ;;  %v11299_v18 = vld [vmem:[%s13038_s28 + $0x1f8] sm:$0xf0] }
 0x4a9   : > { %17395 = vst [vmem:[#allocation95_spill] sm:$0xff] %v14314_v36  ;;  %v14323_v63 = vpop.f32.mrf.mxu1  ;;  %v10134_v1 = vor.u32 %v11275_v38, %v10133_v26 }
 0x4aa   : > { %v3666_v19 = vpop.f32.mrf.mxu0  ;;  %17397 = vst [vmem:[#allocation110_spill] sm:$0xff] %v14323_v63 }
 0x4ab   : > { %v3667_v42 = vadd.f32 %v3666_v19, %v14190_v41  ;;  %5587 = vmatmul.bf16.gmra.mxu2 %v10206_v62 }
 0x4ad   : > { %v3736_v9 = vmax.f32 %v3667_v42, 0.0  ;;  %5731 = vmatmul.bf16.gmra.mxu0 %v10110_v52 }
 0x4ae   : > { %v14331_v36 = vpop.f32.mrf.mxu2 }
 0x4af   : > { %v14326_v17 = vadd.f32 %v3736_v9, %v17398_v32  ;;  %v5514_v15 = vpop.f32.mrf.mxu3  ;;  %v11272_v9 = vld [vmem:[%s13038_s28 + $0x124] sm:$0xf]  ;;  %v10127_v32 = vld [vmem:[%s13038_s28 + $0x134] sm:$0xf0] }
 0x4b0   : > { %v14333_v19 = vadd.f32 %v5514_v15, %v5346_v37  ;;  %v10130_v26 = vor.u32 %v11272_v9, %v10127_v32  ;;  %v10226_v15 = vor.u32 %v11299_v18, %v10225_v50  ;;  %v11280_v9 = vld [vmem:[%s13038_s28 + $0x160] sm:$0xf0] }
 0x4b1   : > { %17399 = vst [vmem:[#allocation97_spill] sm:$0xff] %v14326_v17  ;;  %v5350_v42 = vpop.f32.mrf.mxu1  ;;  %10766 = vmatmul.msk.bf16.gmra.mxu1 %vm5089_vm4, %v10134_v1  ;;  %v17400_v17 = vld [vmem:[#allocation99_spill] sm:$0xff] }
 0x4b2   : > { %v3668_v41 = vpop.f32.mrf.mxu0  ;;  %v5351_v32 = vadd.f32 %v14250_v16, %v5350_v42  ;;  %v10245_v16 = vld [vmem:[%s13038_s28 + $0x210] sm:$0xf]  ;;  %v11304_v42 = vld [vmem:[%s13038_s28 + $0x220] sm:$0xf0] }
 0x4b3   : > { %v3669_v52 = vadd.f32 %v3668_v41, %v14205_v30  ;;  %v11432_v30 = vld [vmem:[%s17043_s10] sm:$0xff] }
 0x4b4   : > { %6314 = vmatpush.bf16.msrb.mxu3 %v11432_v30 }
 0x4b5   : > { %v3737_v62 = vmax.f32 %v3669_v52, 0.0 }
 0x4b6   : > { %v14344_v20 = vpop.f32.mrf.mxu2 }
 0x4b7   : > { %v14340_v63 = vadd.f32 %v3737_v62, %v17400_v17  ;;  %v14349_v38 = vpop.f32.mrf.mxu3  ;;  %v10153_v62 = vld [vmem:[%s13038_s28 + $0x150] sm:$0xf] }
 0x4b9   : > { %v14352_v1 = vpop.f32.mrf.mxu1 }
 0x4ba   : > { %v3671_v37 = vpop.f32.mrf.mxu0 }
 0x4bb   : > { %v3672_v41 = vadd.f32 %v3671_v37, %v14220_v35  ;;  %5592 = vmatmul.bf16.gmra.mxu2 %v10226_v15  ;;  %v10154_v37 = vor.u32 %v11280_v9, %v10153_v62  ;;  %v5534_v62 = vadd.f32 %v14253_v47, %v13337_v13  ;;  %v5536_v13 = vadd.f32 %v14266_v21, %v13353_v11 }
 0x4bc   : > { %v5539_v11 = vadd.f32 %v14279_v49, %v13367_v44  ;;  %v10193_v44 = vld [vmem:[%s13038_s28 + $0x1a0] sm:$0xf]  ;;  %v5541_v49 = vadd.f32 %v14292_v58, %v13384_v51  ;;  %v5544_v51 = vadd.f32 %v14305_v60, %v13398_v61  ;;  %v10213_v61 = vld [vmem:[%s13038_s28 + $0x1c8] sm:$0xf]  ;;  %v5546_v60 = vadd.f32 %v14318_v25, %v13415_v29 }
 0x4bd   : > { %v3738_v17 = vmax.f32 %v3672_v41, 0.0  ;;  %5736 = vmatmul.bf16.gmra.mxu0 %v10130_v26  ;;  %v5549_v29 = vadd.f32 %v14331_v36, %v13429_v6  ;;  %v10233_v6 = vld [vmem:[%s13038_s28 + $0x1f0] sm:$0xf]  ;;  %v5551_v36 = vadd.f32 %v14344_v20, %v13446_v10 }
 0x4be   : > { %v14360_v18 = vpop.f32.mrf.mxu2 }
 0x4bf   : > { %v14355_v52 = vadd.f32 %v3738_v17, %v13289_v28  ;;  %v5519_v35 = vpop.f32.mrf.mxu3  ;;  %v11277_v28 = vld [vmem:[%s13038_s28 + $0x14c] sm:$0xf]  ;;  %v10147_v17 = vld [vmem:[%s13038_s28 + $0x15c] sm:$0xf0]  ;;  %v5554_v10 = vadd.f32 %v14360_v18, %v13460_v53  ;;  %v10253_v53 = vld [vmem:[%s13038_s28 + $0x218] sm:$0xf] }
 0x4c0   : > { %v14362_v30 = vadd.f32 %v5519_v35, %v5351_v32  ;;  %v10150_v32 = vor.u32 %v11277_v28, %v10147_v17  ;;  %v10246_v35 = vor.u32 %v11304_v42, %v10245_v16 }
 0x4c1   : > { %17401 = vst [vmem:[#allocation99_spill] sm:$0xff] %v14355_v52  ;;  %v5871_v41 = vpop.f32.mrf.mxu1  ;;  %10767 = vmatmul.msk.bf16.gmra.mxu1 %vm5089_vm4, %v10154_v37 }
 0x4c2   : > { %v3673_v50 = vpop.f32.mrf.mxu0 }
 0x4c3   : > { %v3674_v26 = vadd.f32 %v3673_v50, %v14235_v45 }
 0x4c5   : > { %v3739_v15 = vmax.f32 %v3674_v26, 0.0 }
 0x4c6   : > { %v14375_v9 = vpop.f32.mrf.mxu2 }
 0x4c7   : > { %v14369_v52 = vadd.f32 %v3739_v15, %v13307_v46  ;;  %v10173_v15 = vld [vmem:[%s13038_s28 + $0x178] sm:$0xf]  ;;  %v5556_v18 = vadd.f32 %v14375_v9, %v13477_v54 }
 0x4c9   : > { %17402 = vst [vmem:[#allocation111_spill] sm:$0xff] %v14369_v52  ;;  %v5873_v26 = vpop.f32.mrf.mxu1  ;;  %v11285_v52 = vld [vmem:[%s13038_s28 + $0x188] sm:$0xf0] }
 0x4ca   : > { %v5702_v45 = vpop.f32.mrf.mxu0  ;;  %v10174_v16 = vor.u32 %v11285_v52, %v10173_v15 }
 0x4cb   : > { %v5703_v50 = vadd.f32 %v5702_v45, %v5534_v62  ;;  %5597 = vmatmul.bf16.gmra.mxu2 %v10246_v35  ;;  %v10167_v45 = vld [vmem:[%s13038_s28 + $0x184] sm:$0xf0] }
 0x4cd   : > { %v5872_v37 = vadd.f32 %v5871_v41, %v5703_v50  ;;  %5741 = vmatmul.bf16.gmra.mxu0 %v10150_v32  ;;  %v11282_v32 = vld [vmem:[%s13038_s28 + $0x174] sm:$0xf]  ;;  %v10265_v50 = vld [vmem:[%s13038_s28 + $0x238] sm:$0xf] }
 0x4ce   : > { %v14382_v28 = vpop.f32.mrf.mxu2  ;;  %v10170_v52 = vor.u32 %v11282_v32, %v10167_v45 }
 0x4cf   : > { %v6031_v46 = vmax.f32 %v5872_v37, 0.0  ;;  %v11309_v37 = vld [vmem:[%s13038_s28 + $0x248] sm:$0xf0]  ;;  %v5559_v54 = vadd.f32 %v14382_v28, %v13491_v4  ;;  %v10273_v4 = vld [vmem:[%s13038_s28 + $0x240] sm:$0xf] }
 0x4d0   : > { %v10266_v15 = vor.u32 %v11309_v37, %v10265_v50  ;;  %v11287_v37 = vld [vmem:[%s13038_s28 + $0x19c] sm:$0xf]  ;;  %v17403_v28 = vld [vmem:[#allocation12_spill] sm:$0xff] }
 0x4d1   : > { %v6095_v47 = vadd.f32 %v6031_v46, %v13328_v8  ;;  %v5876_v62 = vpop.f32.mrf.mxu1  ;;  %10768 = vmatmul.msk.bf16.gmra.mxu1 %vm5089_vm4, %v10174_v16 }
 0x4d2   : > { %v5704_v17 = vpop.f32.mrf.mxu0 }
 0x4d3   : > { %v5705_v42 = vadd.f32 %v5704_v17, %v5536_v13 }
 0x4d5   : > { %v5874_v41 = vadd.f32 %v5873_v26, %v5705_v42 }
 0x4d6   : > { %v14392_v21 = vpop.f32.mrf.mxu2 }
 0x4d7   : > { %v6032_v35 = vmax.f32 %v5874_v41, 0.0 }
 0x4d9   : > { %v6096_v8 = vadd.f32 %v6032_v35, %v13342_v56  ;;  %v5878_v17 = vpop.f32.mrf.mxu1  ;;  %v11290_v56 = vld [vmem:[%s13038_s28 + $0x1b0] sm:$0xf0] }
 0x4da   : > { %v5707_v46 = vpop.f32.mrf.mxu0 }
 0x4db   : > { %v6159_v26 = vpack.c.bf16 %v6096_v8, %v6095_v47  ;;  %v5708_v13 = vadd.f32 %v5707_v46, %v5539_v11  ;;  %5602 = vmatmul.bf16.gmra.mxu2 %v10266_v15  ;;  %v10187_v11 = vld [vmem:[%s13038_s28 + $0x1ac] sm:$0xf0]  ;;  %v11314_v46 = vld [vmem:[%s13038_s28 + $0x270] sm:$0xf0] }
 0x4dc   : > { %v10190_v15 = vor.u32 %v11287_v37, %v10187_v11  ;;  %v11292_v37 = vld [vmem:[%s13038_s28 + $0x1c4] sm:$0xf]  ;;  %v10207_v11 = vld [vmem:[%s13038_s28 + $0x1d4] sm:$0xf0] }
 0x4dd   : > { %v5877_v16 = vadd.f32 %v5876_v62, %v5708_v13  ;;  %5746 = vmatmul.bf16.gmra.mxu0 %v10170_v52  ;;  %10799 = vmatmul.msk.bf16.vlgmr.msrb.gmra.mxu3 %vm3072_vm3, %v6159_v26  ;;  %v10194_v62 = vor.u32 %v11290_v56, %v10193_v44  ;;  %v10285_v52 = vld [vmem:[%s13038_s28 + $0x260] sm:$0xf] }
 0x4de   : > { %v14400_v47 = vpop.f32.mrf.mxu2  ;;  %v10286_v13 = vor.u32 %v11314_v46, %v10285_v52  ;;  %v10305_v52 = vld [vmem:[%s13038_s28 + $0x288] sm:$0xf]  ;;  %v11319_v46 = vld [vmem:[%s13038_s28 + $0x298] sm:$0xf0] }
 0x4df   : > { %v6033_v42 = vmax.f32 %v5877_v16, 0.0 }
 0x4e1   : > { %v6097_v41 = vadd.f32 %v6033_v42, %v13358_v55  ;;  %v5881_v35 = vpop.f32.mrf.mxu1  ;;  %10769 = vmatmul.msk.bf16.gmra.mxu1 %vm5089_vm4, %v10194_v62 }
 0x4e2   : > { %v5709_v32 = vpop.f32.mrf.mxu0 }
 0x4e3   : > { %v5710_v45 = vadd.f32 %v5709_v32, %v5541_v49 }
 0x4e5   : > { %v5879_v50 = vadd.f32 %v5878_v17, %v5710_v45 }
 0x4e6   : > { %v14410_v58 = vpop.f32.mrf.mxu2 }
 0x4e7   : > { %v6034_v8 = vmax.f32 %v5879_v50, 0.0 }
 0x4e9   : > { %v6098_v55 = vadd.f32 %v6034_v8, %v13373_v57  ;;  %v5883_v16 = vpop.f32.mrf.mxu1  ;;  %v11295_v57 = vld [vmem:[%s13038_s28 + $0x1d8] sm:$0xf0] }
 0x4ea   : > { %v5712_v26 = vpop.f32.mrf.mxu0  ;;  %v10214_v62 = vor.u32 %v11295_v57, %v10213_v61 }
 0x4eb   : > { %v5713_v17 = vadd.f32 %v5712_v26, %v5544_v51  ;;  %v6160_v42 = vpack.c.bf16 %v6098_v55, %v6097_v41  ;;  %5607 = vmatmul.bf16.gmra.mxu2 %v10286_v13  ;;  %v10210_v51 = vor.u32 %v11292_v37, %v10207_v11  ;;  %v11324_v37 = vld [vmem:[%s13038_s28 + $0x2c0] sm:$0xf0] }
 0x4ed   : > { %v5882_v44 = vadd.f32 %v5881_v35, %v5713_v17  ;;  %5751 = vmatmul.bf16.gmra.mxu0 %v10190_v15  ;;  %10800 = vmatmul.msk.bf16.gmra.mxu3 %vm3072_vm3, %v6160_v42  ;;  %v10306_v15 = vor.u32 %v11319_v46, %v10305_v52 }
 0x4ee   : > { %v14418_v32 = vpop.f32.mrf.mxu2 }
 0x4ef   : > { %v6035_v56 = vmax.f32 %v5882_v44, 0.0 }
 0x4f1   : > { %v6099_v49 = vadd.f32 %v6035_v56, %v13389_v7  ;;  %v5886_v35 = vpop.f32.mrf.mxu1  ;;  %10770 = vmatmul.msk.bf16.gmra.mxu1 %vm5089_vm4, %v10214_v62  ;;  %v11297_v62 = vld [vmem:[%s13038_s28 + $0x1ec] sm:$0xf] }
 0x4f2   : > { %v5714_v41 = vpop.f32.mrf.mxu0 }
 0x4f3   : > { %v5715_v45 = vadd.f32 %v5714_v41, %v5546_v60 }
 0x4f5   : > { %v5884_v50 = vadd.f32 %v5883_v16, %v5715_v45  ;;  %v10227_v45 = vld [vmem:[%s13038_s28 + $0x1fc] sm:$0xf0] }
 0x4f6   : > { %v14428_v25 = vpop.f32.mrf.mxu2  ;;  %v10230_v11 = vor.u32 %v11297_v62, %v10227_v45 }
 0x4f7   : > { %v6036_v8 = vmax.f32 %v5884_v50, 0.0  ;;  %v10325_v50 = vld [vmem:[%s13038_s28 + $0x2b0] sm:$0xf] }
 0x4f8   : > { %v10326_v52 = vor.u32 %v11324_v37, %v10325_v50 }
 0x4f9   : > { %v6100_v7 = vadd.f32 %v6036_v8, %v13404_v27  ;;  %v5888_v13 = vpop.f32.mrf.mxu1  ;;  %v11300_v27 = vld [vmem:[%s13038_s28 + $0x200] sm:$0xf0] }
 0x4fa   : > { %v5717_v55 = vpop.f32.mrf.mxu0  ;;  %v10234_v57 = vor.u32 %v11300_v27, %v10233_v6  ;;  %v11302_v27 = vld [vmem:[%s13038_s28 + $0x214] sm:$0xf] }
 0x4fb   : > { %v5718_v26 = vadd.f32 %v5717_v55, %v5549_v29  ;;  %v6161_v17 = vpack.c.bf16 %v6100_v7, %v6099_v49  ;;  %5612 = vmatmul.bf16.gmra.mxu2 %v10306_v15 }
 0x4fd   : > { %v5887_v16 = vadd.f32 %v5886_v35, %v5718_v26  ;;  %5756 = vmatmul.bf16.gmra.mxu0 %v10210_v51  ;;  %10801 = vmatmul.msk.bf16.gmra.mxu3 %vm3072_vm3, %v6161_v17 }
 0x4fe   : > { %v14436_v56 = vpop.f32.mrf.mxu2 }
 0x4ff   : > { %v6037_v42 = vmax.f32 %v5887_v16, 0.0 }
 0x501   : > { %v6101_v44 = vadd.f32 %v6037_v42, %v13420_v43  ;;  %v5891_v49 = vpop.f32.mrf.mxu1  ;;  %10771 = vmatmul.msk.bf16.gmra.mxu1 %vm5089_vm4, %v10234_v57  ;;  %v11329_v57 = vld [vmem:[%s13038_s28 + $0x2e8] sm:$0xf0] }
 0x502   : > { %v5719_v61 = vpop.f32.mrf.mxu0 }
 0x503   : > { %v5720_v60 = vadd.f32 %v5719_v61, %v5551_v36  ;;  %v10247_v36 = vld [vmem:[%s13038_s28 + $0x224] sm:$0xf0]  ;;  %v10345_v61 = vld [vmem:[%s13038_s28 + $0x2d8] sm:$0xf] }
 0x505   : > { %v5889_v41 = vadd.f32 %v5888_v13, %v5720_v60  ;;  %v10250_v60 = vor.u32 %v11302_v27, %v10247_v36 }
 0x506   : > { %v14446_v20 = vpop.f32.mrf.mxu2 }
 0x507   : > { %v6038_v35 = vmax.f32 %v5889_v41, 0.0  ;;  %v10346_v41 = vor.u32 %v11329_v57, %v10345_v61 }
 0x509   : > { %v6102_v43 = vadd.f32 %v6038_v35, %v13435_v0  ;;  %v5893_v29 = vpop.f32.mrf.mxu1  ;;  %v11305_v0 = vld [vmem:[%s13038_s28 + $0x228] sm:$0xf0] }
 0x50a   : > { %v5722_v8 = vpop.f32.mrf.mxu0  ;;  %v10254_v17 = vor.u32 %v11305_v0, %v10253_v53  ;;  %v10267_v53 = vld [vmem:[%s13038_s28 + $0x24c] sm:$0xf0] }
 0x50b   : > { %v5723_v46 = vadd.f32 %v5722_v8, %v5554_v10  ;;  %v6162_v7 = vpack.c.bf16 %v6102_v43, %v6101_v44  ;;  %5617 = vmatmul.bf16.gmra.mxu2 %v10326_v52  ;;  %v5561_v10 = vadd.f32 %v14392_v21, %v17403_v28  ;;  %v17404_v43 = vld [vmem:[#allocation100_spill] sm:$0xff] }
 0x50d   : > { %v5892_v51 = vadd.f32 %v5891_v49, %v5723_v46  ;;  %5761 = vmatmul.bf16.gmra.mxu0 %v10230_v11  ;;  %10802 = vmatmul.msk.bf16.gmra.mxu3 %vm3072_vm3, %v6162_v7 }
 0x50e   : > { %v14454_v26 = vpop.f32.mrf.mxu2 }
 0x50f   : > { %v6039_v55 = vmax.f32 %v5892_v51, 0.0 }
 0x511   : > { %v6103_v15 = vadd.f32 %v6039_v55, %v13451_v3  ;;  %v5896_v42 = vpop.f32.mrf.mxu1  ;;  %10772 = vmatmul.msk.bf16.gmra.mxu1 %vm5089_vm4, %v10254_v17  ;;  %v11307_v55 = vld [vmem:[%s13038_s28 + $0x23c] sm:$0xf]  ;;  %v17406_v17 = vld [vmem:[#allocation22_spill] sm:$0xff] }
 0x512   : > { %v5724_v13 = vpop.f32.mrf.mxu0 }
 0x513   : > { %v5725_v16 = vadd.f32 %v5724_v13, %v5556_v18  ;;  %v10365_v18 = vld [vmem:[%s13038_s28 + $0x300] sm:$0xf]  ;;  %v17405_v13 = vld [vmem:[#allocation13_spill] sm:$0xff] }
 0x514   : > { %v5564_v21 = vadd.f32 %v14400_v47, %v17405_v13  ;;  %v10293_v47 = vld [vmem:[%s13038_s28 + $0x268] sm:$0xf] }
 0x515   : > { %v5894_v6 = vadd.f32 %v5893_v29, %v5725_v16 }
 0x516   : > { %v14464_v9 = vpop.f32.mrf.mxu2 }
 0x517   : > { %v6040_v44 = vmax.f32 %v5894_v6, 0.0  ;;  %v10270_v6 = vor.u32 %v11307_v55, %v10267_v53 }
 0x519   : > { %v6104_v3 = vadd.f32 %v6040_v44, %v13466_v33  ;;  %v5898_v45 = vpop.f32.mrf.mxu1  ;;  %v11310_v33 = vld [vmem:[%s13038_s28 + $0x250] sm:$0xf0] }
 0x51a   : > { %v5727_v49 = vpop.f32.mrf.mxu0  ;;  %v10274_v46 = vor.u32 %v11310_v33, %v10273_v4 }
 0x51b   : > { %v5728_v62 = vadd.f32 %v5727_v49, %v5559_v54  ;;  %v6163_v35 = vpack.c.bf16 %v6104_v3, %v6103_v15  ;;  %5622 = vmatmul.bf16.gmra.mxu2 %v10346_v41  ;;  %v11334_v15 = vld [vmem:[%s13038_s28 + $0x310] sm:$0xf0] }
 0x51c   : > { %v10366_v36 = vor.u32 %v11334_v15, %v10365_v18  ;;  %v17407_v49 = vld [vmem:[#allocation14_spill] sm:$0xff] }
 0x51d   : > { %v5897_v50 = vadd.f32 %v5896_v42, %v5728_v62  ;;  %5766 = vmatmul.bf16.gmra.mxu0 %v10250_v60  ;;  %10803 = vmatmul.msk.bf16.gmra.mxu3 %vm3072_vm3, %v6163_v35  ;;  %v11315_v60 = vld [vmem:[%s13038_s28 + $0x278] sm:$0xf0]  ;;  %v5566_v41 = vadd.f32 %v14410_v58, %v17407_v49  ;;  %v17408_v62 = vld [vmem:[#allocation24_spill] sm:$0xff] }
 0x51e   : > { %v14472_v8 = vpop.f32.mrf.mxu2 }
 0x51f   : > { %v6041_v37 = vmax.f32 %v5897_v50, 0.0 }
 0x521   : > { %v6105_v11 = vadd.f32 %v6041_v37, %v17404_v43  ;;  %v5901_v7 = vpop.f32.mrf.mxu1  ;;  %10773 = vmatmul.msk.bf16.gmra.mxu1 %vm5089_vm4, %v10274_v46  ;;  %v10294_v37 = vor.u32 %v11315_v60, %v10293_v47  ;;  %v10287_v43 = vld [vmem:[%s13038_s28 + $0x274] sm:$0xf0]  ;;  %v11339_v46 = vld [vmem:[%s13038_s28 + $0x338] sm:$0xf0] }
 0x522   : > { %v5729_v52 = vpop.f32.mrf.mxu0 }
 0x523   : > { %v5730_v29 = vadd.f32 %v5729_v52, %v5561_v10  ;;  %v11312_v10 = vld [vmem:[%s13038_s28 + $0x264] sm:$0xf]  ;;  %v10385_v52 = vld [vmem:[%s13038_s28 + $0x328] sm:$0xf] }
 0x524   : > { %v10290_v53 = vor.u32 %v11312_v10, %v10287_v43  ;;  %v10386_v18 = vor.u32 %v11339_v46, %v10385_v52 }
 0x525   : > { %v5899_v51 = vadd.f32 %v5898_v45, %v5730_v29  ;;  %v17409_v29 = vld [vmem:[#allocation15_spill] sm:$0xff] }
 0x526   : > { %v14482_v42 = vpop.f32.mrf.mxu2  ;;  %v5569_v58 = vadd.f32 %v14418_v32, %v17409_v29  ;;  %v10313_v32 = vld [vmem:[%s13038_s28 + $0x290] sm:$0xf] }
 0x527   : > { %v6042_v0 = vmax.f32 %v5899_v51, 0.0 }
 0x529   : > { %v6106_v16 = vadd.f32 %v6042_v0, %v17406_v17  ;;  %v5903_v61 = vpop.f32.mrf.mxu1 }
 0x52a   : > { %v5732_v27 = vpop.f32.mrf.mxu0 }
 0x52b   : > { %v5733_v44 = vadd.f32 %v5732_v27, %v5564_v21  ;;  %v6164_v57 = vpack.c.bf16 %v6106_v16, %v6105_v11  ;;  %5627 = vmatmul.bf16.gmra.mxu2 %v10366_v36  ;;  %v17411_v27 = vld [vmem:[#allocation16_spill] sm:$0xff] }
 0x52c   : > { %v5571_v36 = vadd.f32 %v14428_v25, %v17411_v27 }
 0x52d   : > { %v5902_v54 = vadd.f32 %v5901_v7, %v5733_v44  ;;  %5771 = vmatmul.bf16.gmra.mxu0 %v10270_v6  ;;  %10804 = vmatmul.msk.bf16.gmra.mxu3 %vm3072_vm3, %v6164_v57  ;;  %v17410_v7 = vld [vmem:[#allocation26_spill] sm:$0xff]  ;;  %v11320_v6 = vld [vmem:[%s13038_s28 + $0x2a0] sm:$0xf0] }
 0x52e   : > { %v14490_v35 = vpop.f32.mrf.mxu2  ;;  %v17412_v44 = vld [vmem:[#allocation28_spill] sm:$0xff] }
 0x52f   : > { %v6043_v3 = vmax.f32 %v5902_v54, 0.0 }
 0x531   : > { %v6107_v45 = vadd.f32 %v6043_v3, %v17408_v62  ;;  %v5906_v33 = vpop.f32.mrf.mxu1  ;;  %10774 = vmatmul.msk.bf16.gmra.mxu1 %vm5089_vm4, %v10294_v37  ;;  %v10314_v3 = vor.u32 %v11320_v6, %v10313_v32  ;;  %v10307_v62 = vld [vmem:[%s13038_s28 + $0x29c] sm:$0xf0]  ;;  %v11344_v37 = vld [vmem:[%s13038_s28 + $0x360] sm:$0xf0] }
 0x532   : > { %v5734_v50 = vpop.f32.mrf.mxu0 }
 0x533   : > { %v5735_v4 = vadd.f32 %v5734_v50, %v5566_v41  ;;  %v11317_v41 = vld [vmem:[%s13038_s28 + $0x28c] sm:$0xf]  ;;  %v10405_v50 = vld [vmem:[%s13038_s28 + $0x350] sm:$0xf] }
 0x534   : > { %v10310_v43 = vor.u32 %v11317_v41, %v10307_v62  ;;  %v10406_v52 = vor.u32 %v11344_v37, %v10405_v50 }
 0x535   : > { %v5904_v28 = vadd.f32 %v5903_v61, %v5735_v4  ;;  %v17413_v4 = vld [vmem:[#allocation17_spill] sm:$0xff] }
 0x536   : > { %v14500_v55 = vpop.f32.mrf.mxu2  ;;  %v5574_v25 = vadd.f32 %v14436_v56, %v17413_v4  ;;  %v10333_v56 = vld [vmem:[%s13038_s28 + $0x2b8] sm:$0xf] }
 0x537   : > { %v6044_v11 = vmax.f32 %v5904_v28, 0.0 }
 0x539   : > { %v6108_v51 = vadd.f32 %v6044_v11, %v17410_v7  ;;  %v5908_v13 = vpop.f32.mrf.mxu1 }
 0x53a   : > { %v5737_v0 = vpop.f32.mrf.mxu0 }
 0x53b   : > { %v5738_v15 = vadd.f32 %v5737_v0, %v5569_v58  ;;  %v6165_v21 = vpack.c.bf16 %v6108_v51, %v6107_v45  ;;  %5632 = vmatmul.bf16.gmra.mxu2 %v10386_v18  ;;  %v17415_v0 = vld [vmem:[#allocation18_spill] sm:$0xff] }
 0x53c   : > { %v5576_v18 = vadd.f32 %v14446_v20, %v17415_v0  ;;  %v17417_v20 = vld [vmem:[#allocation19_spill] sm:$0xff] }
 0x53d   : > { %v5907_v17 = vadd.f32 %v5906_v33, %v5738_v15  ;;  %5776 = vmatmul.bf16.gmra.mxu0 %v10290_v53  ;;  %10805 = vmatmul.msk.bf16.gmra.mxu3 %vm3072_vm3, %v6165_v21  ;;  %v17414_v33 = vld [vmem:[#allocation30_spill] sm:$0xff]  ;;  %v11325_v53 = vld [vmem:[%s13038_s28 + $0x2c8] sm:$0xf0]  ;;  %v17416_v15 = vld [vmem:[#allocation32_spill] sm:$0xff] }
 0x53e   : > { %v14508_v57 = vpop.f32.mrf.mxu2 }
 0x53f   : > { %v6045_v16 = vmax.f32 %v5907_v17, 0.0 }
 0x541   : > { %v6109_v61 = vadd.f32 %v6045_v16, %v17412_v44  ;;  %v5911_v60 = vpop.f32.mrf.mxu1  ;;  %10775 = vmatmul.msk.bf16.gmra.mxu1 %vm5089_vm4, %v10314_v3  ;;  %v10334_v16 = vor.u32 %v11325_v53, %v10333_v56  ;;  %v10327_v44 = vld [vmem:[%s13038_s28 + $0x2c4] sm:$0xf0]  ;;  %v11349_v3 = vld [vmem:[%s13038_s28 + $0x388] sm:$0xf0] }
 0x542   : > { %v5739_v54 = vpop.f32.mrf.mxu0 }
 0x543   : > { %v5740_v47 = vadd.f32 %v5739_v54, %v5571_v36  ;;  %v11322_v36 = vld [vmem:[%s13038_s28 + $0x2b4] sm:$0xf]  ;;  %v10425_v54 = vld [vmem:[%s13038_s28 + $0x378] sm:$0xf] }
 0x544   : > { %v10426_v37 = vor.u32 %v11349_v3, %v10425_v54  ;;  %v17422_v3 = vld [vmem:[#allocation38_spill] sm:$0xff] }
 0x545   : > { %v5909_v49 = vadd.f32 %v5908_v13, %v5740_v47  ;;  %v14533_v47 = vpop.f32.mrf.mxu3 }
 0x546   : > { %v14518_v10 = vpop.f32.mrf.mxu2 }
 0x547   : > { %v6046_v45 = vmax.f32 %v5909_v49, 0.0  ;;  %v17418_v49 = vld [vmem:[#allocation34_spill] sm:$0xff] }
 0x549   : > { %v6110_v28 = vadd.f32 %v6046_v45, %v17414_v33  ;;  %v5913_v29 = vpop.f32.mrf.mxu1  ;;  %v10330_v45 = vor.u32 %v11322_v36, %v10327_v44  ;;  %v17421_v36 = vld [vmem:[#allocation21_spill] sm:$0xff] }
 0x54a   : > { %v5742_v11 = vpop.f32.mrf.mxu0  ;;  %v5584_v44 = vadd.f32 %v14472_v8, %v17421_v36 }
 0x54b   : > { %v5743_v46 = vadd.f32 %v5742_v11, %v5574_v25  ;;  %v6166_v58 = vpack.c.bf16 %v6110_v28, %v6109_v61  ;;  %5637 = vmatmul.bf16.gmra.mxu2 %v10406_v52  ;;  %v10353_v11 = vld [vmem:[%s13038_s28 + $0x2e0] sm:$0xf] }
 0x54d   : > { %v5912_v7 = vadd.f32 %v5911_v60, %v5743_v46  ;;  %5781 = vmatmul.bf16.gmra.mxu0 %v10310_v43  ;;  %10806 = vmatmul.msk.bf16.gmra.mxu3 %vm3072_vm3, %v6166_v58  ;;  %v5579_v60 = vadd.f32 %v14454_v26, %v17417_v20  ;;  %v11330_v26 = vld [vmem:[%s13038_s28 + $0x2f0] sm:$0xf0]  ;;  %v17419_v46 = vld [vmem:[#allocation20_spill] sm:$0xff] }
 0x54e   : > { %v14526_v21 = vpop.f32.mrf.mxu2  ;;  %v17420_v58 = vld [vmem:[#allocation36_spill] sm:$0xff]  ;;  %v10354_v0 = vor.u32 %v11330_v26, %v10353_v11 }
 0x54f   : > { %v6047_v51 = vmax.f32 %v5912_v7, 0.0 }
 0x551   : > { %v6111_v13 = vadd.f32 %v6047_v51, %v17416_v15  ;;  %v5916_v6 = vpop.f32.mrf.mxu1  ;;  %10776 = vmatmul.msk.bf16.gmra.mxu1 %vm5089_vm4, %v10334_v16  ;;  %v14549_v51 = vld [vmem:[%s17044_s11] ss:$0 sm:$0xff]  ;;  %v11327_v16 = vld [vmem:[%s13038_s28 + $0x2dc] sm:$0xf] }
 0x552   : > { %v5744_v17 = vpop.f32.mrf.mxu0 }
 0x553   : > { %v5745_v32 = vadd.f32 %v5744_v17, %v5576_v18 }
 0x555   : > { %v5914_v27 = vadd.f32 %v5913_v29, %v5745_v32  ;;  %v5581_v29 = vadd.f32 %v14464_v9, %v17419_v46  ;;  %v10347_v9 = vld [vmem:[%s13038_s28 + $0x2ec] sm:$0xf0]  ;;  %v11335_v46 = vld [vmem:[%s13038_s28 + $0x318] sm:$0xf0] }
 0x556   : > { %v14538_v62 = vpop.f32.mrf.mxu2 }
 0x557   : > { %v6048_v61 = vmax.f32 %v5914_v27, 0.0  ;;  %v11354_v27 = vld [vmem:[%s13038_s28 + $0x3b0] sm:$0xf0] }
 0x559   : > { %v6112_v41 = vadd.f32 %v6048_v61, %v17418_v49  ;;  %v5918_v25 = vpop.f32.mrf.mxu1  ;;  %v10350_v49 = vor.u32 %v11327_v16, %v10347_v9 }
 0x55a   : > { %v5747_v50 = vpop.f32.mrf.mxu0 }
 0x55b   : > { %v5748_v4 = vadd.f32 %v5747_v50, %v5579_v60  ;;  %v6167_v33 = vpack.c.bf16 %v6112_v41, %v6111_v13  ;;  %5642 = vmatmul.bf16.gmra.mxu2 %v10426_v37 }
 0x55d   : > { %v5917_v28 = vadd.f32 %v5916_v6, %v5748_v4  ;;  %5786 = vmatmul.bf16.gmra.mxu0 %v10330_v45  ;;  %10807 = vmatmul.msk.bf16.gmra.mxu3 %vm3072_vm3, %v6167_v33  ;;  %v10445_v6 = vld [vmem:[%s13038_s28 + $0x3a0] sm:$0xf] }
 0x55e   : > { %v14551_v56 = vpop.f32.mrf.mxu2  ;;  %v10446_v50 = vor.u32 %v11354_v27, %v10445_v6  ;;  %v11332_v6 = vld [vmem:[%s13038_s28 + $0x304] sm:$0xf]  ;;  %v10367_v27 = vld [vmem:[%s13038_s28 + $0x314] sm:$0xf0] }
 0x55f   : > { %v6049_v43 = vmax.f32 %v5917_v28, 0.0 }
 0x560   : > { %v6316_v52 = vpop.f32.mrf.mxu3 }
 0x561   : > { %v6113_v7 = vadd.f32 %v6049_v43, %v17420_v58  ;;  %v5921_v15 = vpop.f32.mrf.mxu1  ;;  %v6317_v13 = vadd.f32 %v14549_v51, %v6316_v52  ;;  %10777 = vmatmul.msk.bf16.gmra.mxu1 %vm5089_vm4, %v10354_v0  ;;  %v10373_v52 = vld [vmem:[%s13038_s28 + $0x308] sm:$0xf]  ;;  %v17423_v58 = vld [vmem:[#allocation23_spill] sm:$0xff] }
 0x562   : > { %v5749_v53 = vpop.f32.mrf.mxu0 }
 0x563   : > { %v5750_v18 = vadd.f32 %v5749_v53, %v5581_v29  ;;  %v6476_v54 = vpack.c.bf16 %v6317_v13, %v6317_v13  ;;  %v17424_v53 = vld [vmem:[#allocation40_spill] sm:$0xff] }
 0x565   : > { %v5919_v17 = vadd.f32 %v5918_v25, %v5750_v18  ;;  %v6709_v28 = vunpack.c.l.b16 %v6476_v54  ;;  %v17425_v54 = vld [vmem:[#allocation25_spill] sm:$0xff] }
 0x566   : > { %v14563_v41 = vpop.f32.mrf.mxu2 }
 0x567   : > { %v6050_v32 = vmax.f32 %v5919_v17, 0.0 }
 0x568   : > { %v6318_v61 = vpop.f32.mrf.mxu3 }
 0x569   : > { %v6114_v20 = vadd.f32 %v6050_v32, %v17422_v3  ;;  %v6319_v60 = vadd.f32 %v14549_v51, %v6318_v61  ;;  %v5923_v25 = vpop.f32.mrf.mxu1  ;;  %v11359_v61 = vld [vmem:[%s13038_s28 + $0x3d8] sm:$0xf0] }
 0x56a   : > { %v5752_v45 = vpop.f32.mrf.mxu0 }
 0x56b   : > { %v6477_v37 = vpack.c.bf16 %v6319_v60, %v6319_v60  ;;  %v5753_v4 = vadd.f32 %v5752_v45, %v5584_v44  ;;  %v6168_v33 = vpack.c.bf16 %v6114_v20, %v6113_v7  ;;  %5647 = vmatmul.bf16.gmra.mxu2 %v10446_v50  ;;  %v5586_v7 = vadd.f32 %v14482_v42, %v17423_v58  ;;  %v10465_v44 = vld [vmem:[%s13038_s28 + $0x3c8] sm:$0xf]  ;;  %v17426_v60 = vld [vmem:[#allocation42_spill] sm:$0xff] }
 0x56c   : > { %v5589_v42 = vadd.f32 %v14490_v35, %v17425_v54  ;;  %v10370_v50 = vor.u32 %v11332_v6, %v10367_v27  ;;  %v10393_v58 = vld [vmem:[%s13038_s28 + $0x330] sm:$0xf] }
 0x56d   : > { %v6710_v43 = vunpack.c.l.b16 %v6477_v37  ;;  %v5922_v8 = vadd.f32 %v5921_v15, %v5753_v4  ;;  %5791 = vmatmul.bf16.gmra.mxu0 %v10350_v49  ;;  %10808 = vmatmul.msk.bf16.gmra.mxu3 %vm3072_vm3, %v6168_v33  ;;  %v10374_v15 = vor.u32 %v11335_v46, %v10373_v52  ;;  %v10466_v4 = vor.u32 %v11359_v61, %v10465_v44  ;;  %v11337_v44 = vld [vmem:[%s13038_s28 + $0x32c] sm:$0xf]  ;;  %v10387_v61 = vld [vmem:[%s13038_s28 + $0x33c] sm:$0xf0] }
 0x56e   : > { %v14573_v16 = vpop.f32.mrf.mxu2 }
 0x56f   : > { %v14566_v11 = vpack.c.b16 %v6710_v43, %v6709_v28  ;;  %v6051_v26 = vmax.f32 %v5922_v8, 0.0 }
 0x570   : > { %v6321_v29 = vpop.f32.mrf.mxu3 }
 0x571   : > { %v6115_v0 = vadd.f32 %v6051_v26, %v17424_v53  ;;  %v5926_v17 = vpop.f32.mrf.mxu1  ;;  %v6322_v9 = vadd.f32 %v14549_v51, %v6321_v29  ;;  %10778 = vmatmul.msk.bf16.gmra.mxu1 %vm5089_vm4, %v10374_v15  ;;  %v17428_v15 = vld [vmem:[#allocation44_spill] sm:$0xff] }
 0x572   : > { %v5754_v18 = vpop.f32.mrf.mxu0 }
 0x573   : > { %v5755_v13 = vadd.f32 %v5754_v18, %v5586_v7  ;;  %v6478_v20 = vpack.c.bf16 %v6322_v9, %v6322_v9  ;;  %v11340_v7 = vld [vmem:[%s13038_s28 + $0x340] sm:$0xf0] }
 0x574   : > { %v10394_v9 = vor.u32 %v11340_v7, %v10393_v58 }
 0x575   : > { %v5924_v32 = vadd.f32 %v5923_v25, %v5755_v13  ;;  %v6711_v8 = vunpack.c.l.b16 %v6478_v20  ;;  %v17429_v20 = vld [vmem:[#allocation29_spill] sm:$0xff] }
 0x576   : > { %v14586_v35 = vpop.f32.mrf.mxu2 }
 0x577   : > { %v6052_v36 = vmax.f32 %v5924_v32, 0.0 }
 0x578   : > { %v6323_v3 = vpop.f32.mrf.mxu3 }
 0x579   : > { %v6116_v49 = vadd.f32 %v6052_v36, %v17426_v60  ;;  %v6324_v45 = vadd.f32 %v14549_v51, %v6323_v3  ;;  %v5928_v28 = vpop.f32.mrf.mxu1  ;;  %v11364_v3 = vld [vmem:[%s13038_s28 + $0x400] sm:$0xf0] }
 0x57a   : > { %v5757_v37 = vpop.f32.mrf.mxu0 }
 0x57b   : > { %v6479_v25 = vpack.c.bf16 %v6324_v45, %v6324_v45  ;;  %v5758_v33 = vadd.f32 %v5757_v37, %v5589_v42  ;;  %v6169_v43 = vpack.c.bf16 %v6116_v49, %v6115_v0  ;;  %5652 = vmatmul.bf16.gmra.mxu2 %v10466_v4  ;;  %v17427_v0 = vld [vmem:[#allocation27_spill] sm:$0xff]  ;;  %v10485_v42 = vld [vmem:[%s13038_s28 + $0x3f0] sm:$0xf] }
 0x57c   : > { %v5591_v18 = vadd.f32 %v14500_v55, %v17427_v0  ;;  %v5594_v55 = vadd.f32 %v14508_v57, %v17429_v20  ;;  %v10413_v0 = vld [vmem:[%s13038_s28 + $0x358] sm:$0xf] }
 0x57d   : > { %v6712_v26 = vunpack.c.l.b16 %v6479_v25  ;;  %v5927_v52 = vadd.f32 %v5926_v17, %v5758_v33  ;;  %5796 = vmatmul.bf16.gmra.mxu0 %v10370_v50  ;;  %10809 = vmatmul.msk.bf16.gmra.mxu3 %vm3072_vm3, %v6169_v43  ;;  %v17430_v50 = vld [vmem:[#allocation46_spill] sm:$0xff]  ;;  %v10390_v25 = vor.u32 %v11337_v44, %v10387_v61 }
 0x57e   : > { %v14603_v60 = vpop.f32.mrf.mxu2 }
 0x57f   : > { %v14588_v46 = vpack.c.b16 %v6712_v26, %v6711_v8  ;;  %v6053_v29 = vmax.f32 %v5927_v52, 0.0 }
 0x580   : > { %v6326_v53 = vpop.f32.mrf.mxu3 }
 0x581   : > { %v6117_v13 = vadd.f32 %v6053_v29, %v17428_v15  ;;  %v5931_v6 = vpop.f32.mrf.mxu1  ;;  %v6327_v27 = vadd.f32 %v14549_v51, %v6326_v53  ;;  %10779 = vmatmul.msk.bf16.gmra.mxu1 %vm5089_vm4, %v10394_v9  ;;  %v17432_v9 = vld [vmem:[#allocation48_spill] sm:$0xff] }
 0x582   : > { %v5759_v17 = vpop.f32.mrf.mxu0 }
 0x583   : > { %v5760_v32 = vadd.f32 %v5759_v17, %v5591_v18  ;;  %v6480_v45 = vpack.c.bf16 %v6327_v27, %v6327_v27  ;;  %v11345_v18 = vld [vmem:[%s13038_s28 + $0x368] sm:$0xf0]  ;;  %v6549_v27 = vld [vmem:[%s14614_s25 + $0x30] sm:$0xff] }
 0x584   : > { %v10414_v61 = vor.u32 %v11345_v18, %v10413_v0 }
 0x585   : > { %v5929_v36 = vadd.f32 %v5928_v28, %v5760_v32  ;;  %v10486_v28 = vor.u32 %v11364_v3, %v10485_v42  ;;  %v6713_v57 = vunpack.c.l.b16 %v6480_v45 }
 0x587   : > { %v6054_v54 = vmax.f32 %v5929_v36, 0.0  ;;  %v14625_v36 = vpop.f32.mrf.mxu2 }
 0x588   : > { %v6328_v49 = vpop.f32.mrf.mxu3 }
 0x589   : > { %v6118_v37 = vadd.f32 %v6054_v54, %v17430_v50  ;;  %v6329_v4 = vadd.f32 %v14549_v51, %v6328_v49  ;;  %v5933_v26 = vpop.f32.mrf.mxu1  ;;  %v10407_v49 = vld [vmem:[%s13038_s28 + $0x364] sm:$0xf0]  ;;  %v10505_v50 = vld [vmem:[%s13038_s28 + $0x418] sm:$0xf] }
 0x58a   : > { %v5762_v33 = vpop.f32.mrf.mxu0 }
 0x58b   : > { %v6481_v43 = vpack.c.bf16 %v6329_v4, %v6329_v4  ;;  %v5763_v8 = vadd.f32 %v5762_v33, %v5594_v55  ;;  %v6170_v52 = vpack.c.bf16 %v6118_v37, %v6117_v13  ;;  %5657 = vmatmul.bf16.gmra.mxu2 %v10486_v28  ;;  %v17431_v13 = vld [vmem:[#allocation31_spill] sm:$0xff]  ;;  %v11369_v37 = vld [vmem:[%s13038_s28 + $0x428] sm:$0xf0] }
 0x58c   : > { %v5596_v17 = vadd.f32 %v14518_v10, %v17431_v13  ;;  %v11342_v10 = vld [vmem:[%s13038_s28 + $0x354] sm:$0xf]  ;;  %v17433_v4 = vld [vmem:[#allocation33_spill] sm:$0xff] }
 0x58d   : > { %v6714_v29 = vunpack.c.l.b16 %v6481_v43  ;;  %v5932_v58 = vadd.f32 %v5931_v6, %v5763_v8  ;;  %5801 = vmatmul.bf16.gmra.mxu0 %v10390_v25  ;;  %10810 = vmatmul.msk.bf16.gmra.mxu3 %vm3072_vm3, %v6170_v52  ;;  %v6547_v6 = vld [vmem:[%s14614_s25 + $0x20] sm:$0xff]  ;;  %v5599_v25 = vadd.f32 %v14526_v21, %v17433_v4  ;;  %v17434_v43 = vld [vmem:[#allocation50_spill] sm:$0xff]  ;;  %v11347_v4 = vld [vmem:[%s13038_s28 + $0x37c] sm:$0xf] }
 0x58e   : > { %v6553_v54 = vpack.c.bf16 %v6549_v27, %v6547_v6  ;;  %v10433_v27 = vld [vmem:[%s13038_s28 + $0x380] sm:$0xf] }
 0x58f   : > { %v14616_v7 = vpack.c.b16 %v6714_v29, %v6713_v57  ;;  %v6055_v53 = vmax.f32 %v5932_v58, 0.0  ;;  %v10410_v57 = vor.u32 %v11342_v10, %v10407_v49 }
 0x590   : > { %v6331_v15 = vpop.f32.mrf.mxu3  ;;  %6571 = vmatpush.bf16.msra.mxu0 %v6553_v54  ;;  %6641 = vmatpush.bf16.msrb.mxu2 %v6553_v54 }
 0x591   : > { %v6119_v32 = vadd.f32 %v6055_v53, %v17432_v9  ;;  %v5936_v3 = vpop.f32.mrf.mxu1  ;;  %v6332_v20 = vadd.f32 %v14549_v51, %v6331_v15  ;;  %10780 = vmatmul.msk.bf16.gmra.mxu1 %vm5089_vm4, %v10414_v61  ;;  %v14637_v15 = vpop.f32.mrf.mxu2 }
 0x592   : > { %v5764_v44 = vpop.f32.mrf.mxu0 }
 0x593   : > { %v5765_v42 = vadd.f32 %v5764_v44, %v5596_v17  ;;  %v6482_v28 = vpack.c.bf16 %v6332_v20, %v6332_v20  ;;  %v11350_v44 = vld [vmem:[%s13038_s28 + $0x390] sm:$0xf0] }
 0x595   : > { %v5934_v55 = vadd.f32 %v5933_v26, %v5765_v42  ;;  %v10506_v26 = vor.u32 %v11369_v37, %v10505_v50  ;;  %v6715_v13 = vunpack.c.l.b16 %v6482_v28  ;;  %v17436_v42 = vld [vmem:[#allocation52_spill] sm:$0xff] }
 0x596   : > { %v10525_v28 = vld [vmem:[%s13038_s28 + $0x440] sm:$0xf] }
 0x597   : > { %v6056_v45 = vmax.f32 %v5934_v55, 0.0  ;;  %v10434_v55 = vor.u32 %v11350_v44, %v10433_v27 }
 0x598   : > { %v6333_v33 = vpop.f32.mrf.mxu3 }
 0x599   : > { %v6120_v8 = vadd.f32 %v6056_v45, %v17434_v43  ;;  %v6334_v52 = vadd.f32 %v14549_v51, %v6333_v33  ;;  %v5938_v0 = vpop.f32.mrf.mxu1  ;;  %v14648_v37 = vpop.f32.mrf.mxu2  ;;  %v11374_v43 = vld [vmem:[%s13038_s28 + $0x450] sm:$0xf0] }
 0x59a   : > { %v5767_v29 = vpop.f32.mrf.mxu0 }
 0x59b   : > { %v6483_v58 = vpack.c.bf16 %v6334_v52, %v6334_v52  ;;  %v5768_v53 = vadd.f32 %v5767_v29, %v5599_v25  ;;  %v6171_v18 = vpack.c.bf16 %v6120_v8, %v6119_v32  ;;  %5662 = vmatmul.bf16.gmra.mxu2 %v10506_v26  ;;  %v17435_v32 = vld [vmem:[#allocation35_spill] sm:$0xff]  ;;  %v10427_v25 = vld [vmem:[%s13038_s28 + $0x38c] sm:$0xf0]  ;;  %v17437_v8 = vld [vmem:[#allocation37_spill] sm:$0xff] }
 0x59c   : > { %v5601_v54 = vadd.f32 %v14538_v62, %v17435_v32  ;;  %v5604_v62 = vadd.f32 %v14551_v56, %v17437_v8  ;;  %v17438_v29 = vld [vmem:[#allocation54_spill] sm:$0xff]  ;;  %v11352_v8 = vld [vmem:[%s13038_s28 + $0x3a4] sm:$0xf] }
 0x59d   : > { %v6716_v17 = vunpack.c.l.b16 %v6483_v58  ;;  %v5937_v21 = vadd.f32 %v5936_v3, %v5768_v53  ;;  %5806 = vmatmul.bf16.gmra.mxu0 %v10410_v57  ;;  %10811 = vmatmul.msk.bf16.gmra.mxu3 %vm3072_vm3, %v6171_v18  ;;  %v10430_v53 = vor.u32 %v11347_v4, %v10427_v25  ;;  %v10526_v18 = vor.u32 %v11374_v43, %v10525_v28 }
 0x59f   : > { %v14640_v9 = vpack.c.b16 %v6716_v17, %v6715_v13  ;;  %v6057_v6 = vmax.f32 %v5937_v21, 0.0 }
 0x5a0   : > { %v6336_v61 = vpop.f32.mrf.mxu3 }
 0x5a1   : > { %v6121_v20 = vadd.f32 %v6057_v6, %v17436_v42  ;;  %v5941_v49 = vpop.f32.mrf.mxu1  ;;  %v6337_v45 = vadd.f32 %v14549_v51, %v6336_v61  ;;  %10781 = vmatmul.msk.bf16.gmra.mxu1 %vm5089_vm4, %v10434_v55  ;;  %v11355_v42 = vld [vmem:[%s13038_s28 + $0x3b8] sm:$0xf0] }
 0x5a2   : > { %v5769_v3 = vpop.f32.mrf.mxu0 }
 0x5a3   : > { %v5770_v10 = vadd.f32 %v5769_v3, %v5601_v54  ;;  %v6484_v57 = vpack.c.bf16 %v6337_v45, %v6337_v45  ;;  %v10453_v54 = vld [vmem:[%s13038_s28 + $0x3a8] sm:$0xf]  ;;  %v14664_v3 = vpop.f32.mrf.mxu2 }
 0x5a4   : > { %v10454_v4 = vor.u32 %v11355_v42, %v10453_v54 }
 0x5a5   : > { %v5939_v50 = vadd.f32 %v5938_v0, %v5770_v10  ;;  %v6717_v27 = vunpack.c.l.b16 %v6484_v57  ;;  %v10545_v57 = vld [vmem:[%s13038_s28 + $0x468] sm:$0xf] }
 0x5a7   : > { %v6058_v33 = vmax.f32 %v5939_v50, 0.0 }
 0x5a8   : > { %v6338_v52 = vpop.f32.mrf.mxu3 }
 0x5a9   : > { %v6122_v26 = vadd.f32 %v6058_v33, %v17438_v29  ;;  %v6339_v58 = vadd.f32 %v14549_v51, %v6338_v52  ;;  %v5943_v21 = vpop.f32.mrf.mxu1  ;;  %v11379_v29 = vld [vmem:[%s13038_s28 + $0x478] sm:$0xf0] }
 0x5aa   : > { %v5772_v0 = vpop.f32.mrf.mxu0 }
 0x5ab   : > { %v6485_v13 = vpack.c.bf16 %v6339_v58, %v6339_v58  ;;  %v5773_v17 = vadd.f32 %v5772_v0, %v5604_v62  ;;  %v6172_v6 = vpack.c.bf16 %v6122_v26, %v6121_v20  ;;  %5667 = vmatmul.bf16.gmra.mxu2 %v10526_v18  ;;  %v17439_v20 = vld [vmem:[#allocation39_spill] sm:$0xff]  ;;  %v17441_v26 = vld [vmem:[#allocation41_spill] sm:$0xff]  ;;  %v17442_v0 = vld [vmem:[#allocation58_spill] sm:$0xff] }
 0x5ac   : > { %v5606_v10 = vadd.f32 %v14563_v41, %v17439_v20  ;;  %v10447_v62 = vld [vmem:[%s13038_s28 + $0x3b4] sm:$0xf0]  ;;  %v5609_v58 = vadd.f32 %v14573_v16, %v17441_v26 }
 0x5ad   : > { %v6718_v44 = vunpack.c.l.b16 %v6485_v13  ;;  %v5942_v61 = vadd.f32 %v5941_v49, %v5773_v17  ;;  %5811 = vmatmul.bf16.gmra.mxu0 %v10430_v53  ;;  %10812 = vmatmul.msk.bf16.gmra.mxu3 %vm3072_vm3, %v6172_v6  ;;  %v17440_v49 = vld [vmem:[#allocation56_spill] sm:$0xff]  ;;  %v10450_v17 = vor.u32 %v11352_v8, %v10447_v62  ;;  %v14679_v6 = vpop.f32.mrf.mxu2 }
 0x5af   : > { %v14660_v56 = vpack.c.b16 %v6718_v44, %v6717_v27  ;;  %v6059_v32 = vmax.f32 %v5942_v61, 0.0  ;;  %v10546_v27 = vor.u32 %v11379_v29, %v10545_v57 }
 0x5b0   : > { %v6341_v55 = vpop.f32.mrf.mxu3 }
 0x5b1   : > { %v6123_v45 = vadd.f32 %v6059_v32, %v17440_v49  ;;  %v5946_v33 = vpop.f32.mrf.mxu1  ;;  %v6342_v28 = vadd.f32 %v14549_v51, %v6341_v55  ;;  %10782 = vmatmul.msk.bf16.gmra.mxu1 %vm5089_vm4, %v10454_v4  ;;  %v10473_v49 = vld [vmem:[%s13038_s28 + $0x3d0] sm:$0xf] }
 0x5b2   : > { %v5774_v50 = vpop.f32.mrf.mxu0 }
 0x5b3   : > { %v5775_v25 = vadd.f32 %v5774_v50, %v5606_v10  ;;  %v6486_v53 = vpack.c.bf16 %v6342_v28, %v6342_v28  ;;  %v11360_v50 = vld [vmem:[%s13038_s28 + $0x3e0] sm:$0xf0] }
 0x5b4   : > { %v17444_v28 = vld [vmem:[#allocation60_spill] sm:$0xff]  ;;  %v10474_v8 = vor.u32 %v11360_v50, %v10473_v49 }
 0x5b5   : > { %v5944_v43 = vadd.f32 %v5943_v21, %v5775_v25  ;;  %v6719_v42 = vunpack.c.l.b16 %v6486_v53  ;;  %v17443_v25 = vld [vmem:[#allocation43_spill] sm:$0xff]  ;;  %v14689_v57 = vpop.f32.mrf.mxu2 }
 0x5b7   : > { %v6060_v52 = vmax.f32 %v5944_v43, 0.0 }
 0x5b8   : > { %v6343_v41 = vpop.f32.mrf.mxu3 }
 0x5b9   : > { %v6124_v18 = vadd.f32 %v6060_v52, %v17442_v0  ;;  %v6344_v13 = vadd.f32 %v14549_v51, %v6343_v41  ;;  %v5948_v32 = vpop.f32.mrf.mxu1  ;;  %v10467_v41 = vld [vmem:[%s13038_s28 + $0x3dc] sm:$0xf0]  ;;  %v10565_v0 = vld [vmem:[%s13038_s28 + $0x490] sm:$0xf] }
 0x5ba   : > { %v5777_v21 = vpop.f32.mrf.mxu0 }
 0x5bb   : > { %v6487_v44 = vpack.c.bf16 %v6344_v13, %v6344_v13  ;;  %v5778_v61 = vadd.f32 %v5777_v21, %v5609_v58  ;;  %v6173_v54 = vpack.c.bf16 %v6124_v18, %v6123_v45  ;;  %5672 = vmatmul.bf16.gmra.mxu2 %v10546_v27  ;;  %v5611_v45 = vadd.f32 %v14586_v35, %v17443_v25  ;;  %v11357_v58 = vld [vmem:[%s13038_s28 + $0x3cc] sm:$0xf]  ;;  %v11384_v18 = vld [vmem:[%s13038_s28 + $0x4a0] sm:$0xf0]  ;;  %v17446_v27 = vld [vmem:[#allocation62_spill] sm:$0xff] }
 0x5bc   : > { %v17445_v13 = vld [vmem:[#allocation45_spill] sm:$0xff] }
 0x5bd   : > { %v6720_v55 = vunpack.c.l.b16 %v6487_v44  ;;  %v5947_v16 = vadd.f32 %v5946_v33, %v5778_v61  ;;  %5816 = vmatmul.bf16.gmra.mxu0 %v10450_v17  ;;  %10813 = vmatmul.msk.bf16.gmra.mxu3 %vm3072_vm3, %v6173_v54  ;;  %v5614_v35 = vadd.f32 %v14603_v60, %v17445_v13  ;;  %v10470_v54 = vor.u32 %v11357_v58, %v10467_v41  ;;  %v14702_v60 = vpop.f32.mrf.mxu2 }
 0x5bf   : > { %v14682_v20 = vpack.c.b16 %v6720_v55, %v6719_v42  ;;  %v6061_v10 = vmax.f32 %v5947_v16, 0.0 }
 0x5c0   : > { %v6346_v4 = vpop.f32.mrf.mxu3 }
 0x5c1   : > { %v6125_v43 = vadd.f32 %v6061_v10, %v17444_v28  ;;  %v5951_v52 = vpop.f32.mrf.mxu1  ;;  %v6347_v29 = vadd.f32 %v14549_v51, %v6346_v4  ;;  %10783 = vmatmul.msk.bf16.gmra.mxu1 %vm5089_vm4, %v10474_v8  ;;  %v11365_v8 = vld [vmem:[%s13038_s28 + $0x408] sm:$0xf0] }
 0x5c2   : > { %v5779_v33 = vpop.f32.mrf.mxu0 }
 0x5c3   : > { %v5780_v62 = vadd.f32 %v5779_v33, %v5611_v45  ;;  %v6488_v21 = vpack.c.bf16 %v6347_v29, %v6347_v29  ;;  %v10493_v33 = vld [vmem:[%s13038_s28 + $0x3f8] sm:$0xf] }
 0x5c4   : > { %v10494_v41 = vor.u32 %v11365_v8, %v10493_v33 }
 0x5c5   : > { %v5949_v26 = vadd.f32 %v5948_v32, %v5780_v62  ;;  %v10566_v32 = vor.u32 %v11384_v18, %v10565_v0  ;;  %v6721_v50 = vunpack.c.l.b16 %v6488_v21 }
 0x5c7   : > { %v6062_v53 = vmax.f32 %v5949_v26, 0.0 }
 0x5c8   : > { %v6348_v17 = vpop.f32.mrf.mxu3 }
 0x5c9   : > { %v6126_v44 = vadd.f32 %v6062_v53, %v17446_v27  ;;  %v6349_v61 = vadd.f32 %v14549_v51, %v6348_v17  ;;  %v5953_v10 = vpop.f32.mrf.mxu1  ;;  %v10487_v17 = vld [vmem:[%s13038_s28 + $0x404] sm:$0xf0]  ;;  %v10585_v27 = vld [vmem:[%s13038_s28 + $0x4b8] sm:$0xf] }
 0x5ca   : > { %v5782_v42 = vpop.f32.mrf.mxu0 }
 0x5cb   : > { %v6489_v55 = vpack.c.bf16 %v6349_v61, %v6349_v61  ;;  %v5783_v16 = vadd.f32 %v5782_v42, %v5614_v35  ;;  %v6174_v49 = vpack.c.bf16 %v6126_v44, %v6125_v43  ;;  %5677 = vmatmul.bf16.gmra.mxu2 %v10566_v32  ;;  %v17447_v43 = vld [vmem:[#allocation47_spill] sm:$0xff]  ;;  %v11362_v35 = vld [vmem:[%s13038_s28 + $0x3f4] sm:$0xf]  ;;  %v11389_v44 = vld [vmem:[%s13038_s28 + $0x4c8] sm:$0xf0] }
 0x5cc   : > { %v5616_v29 = vadd.f32 %v14625_v36, %v17447_v43  ;;  %v17449_v61 = vld [vmem:[#allocation49_spill] sm:$0xff]  ;;  %v14719_v36 = vpop.f32.mrf.mxu2 }
 0x5cd   : > { %v6722_v4 = vunpack.c.l.b16 %v6489_v55  ;;  %v5952_v25 = vadd.f32 %v5951_v52, %v5783_v16  ;;  %5821 = vmatmul.bf16.gmra.mxu0 %v10470_v54  ;;  %10814 = vmatmul.msk.bf16.gmra.mxu3 %vm3072_vm3, %v6174_v49  ;;  %v17448_v52 = vld [vmem:[#allocation64_spill] sm:$0xff]  ;;  %v5619_v54 = vadd.f32 %v14637_v15, %v17449_v61  ;;  %v17450_v55 = vld [vmem:[#allocation66_spill] sm:$0xff] }
 0x5cf   : > { %v14704_v45 = vpack.c.b16 %v6722_v4, %v6721_v50  ;;  %v6063_v28 = vmax.f32 %v5952_v25, 0.0  ;;  %v10586_v4 = vor.u32 %v11389_v44, %v10585_v27 }
 0x5d0   : > { %v6351_v62 = vpop.f32.mrf.mxu3 }
 0x5d1   : > { %v6127_v26 = vadd.f32 %v6063_v28, %v17448_v52  ;;  %v5956_v0 = vpop.f32.mrf.mxu1  ;;  %v6352_v18 = vadd.f32 %v14549_v51, %v6351_v62  ;;  %10784 = vmatmul.msk.bf16.gmra.mxu1 %vm5089_vm4, %v10494_v41  ;;  %v11370_v41 = vld [vmem:[%s13038_s28 + $0x430] sm:$0xf0] }
 0x5d2   : > { %v5784_v58 = vpop.f32.mrf.mxu0 }
 0x5d3   : > { %v5785_v53 = vadd.f32 %v5784_v58, %v5616_v29  ;;  %v6490_v32 = vpack.c.bf16 %v6352_v18, %v6352_v18  ;;  %v10513_v58 = vld [vmem:[%s13038_s28 + $0x420] sm:$0xf]  ;;  %v17451_v18 = vld [vmem:[#allocation51_spill] sm:$0xff] }
 0x5d5   : > { %v5954_v13 = vadd.f32 %v5953_v10, %v5785_v53  ;;  %v10490_v10 = vor.u32 %v11362_v35, %v10487_v17  ;;  %v6723_v62 = vunpack.c.l.b16 %v6490_v32  ;;  %v10507_v32 = vld [vmem:[%s13038_s28 + $0x42c] sm:$0xf0] }
 0x5d7   : > { %v6064_v21 = vmax.f32 %v5954_v13, 0.0  ;;  %v17452_v13 = vld [vmem:[#allocation68_spill] sm:$0xff] }
 0x5d8   : > { %v6353_v42 = vpop.f32.mrf.mxu3 }
 0x5d9   : > { %v6128_v16 = vadd.f32 %v6064_v21, %v17450_v55  ;;  %v6354_v49 = vadd.f32 %v14549_v51, %v6353_v42  ;;  %v5958_v33 = vpop.f32.mrf.mxu1  ;;  %v10514_v21 = vor.u32 %v11370_v41, %v10513_v58  ;;  %v11367_v42 = vld [vmem:[%s13038_s28 + $0x41c] sm:$0xf] }
 0x5da   : > { %v5787_v50 = vpop.f32.mrf.mxu0 }
 0x5db   : > { %v6491_v25 = vpack.c.bf16 %v6354_v49, %v6354_v49  ;;  %v5788_v28 = vadd.f32 %v5787_v50, %v5619_v54  ;;  %v6175_v8 = vpack.c.bf16 %v6128_v16, %v6127_v26  ;;  %5682 = vmatmul.bf16.gmra.mxu2 %v10586_v4  ;;  %v5621_v26 = vadd.f32 %v14648_v37, %v17451_v18  ;;  %v10605_v16 = vld [vmem:[%s13038_s28 + $0x4e0] sm:$0xf]  ;;  %v11394_v49 = vld [vmem:[%s13038_s28 + $0x4f0] sm:$0xf0] }
 0x5dd   : > { %v6724_v43 = vunpack.c.l.b16 %v6491_v25  ;;  %v5957_v15 = vadd.f32 %v5956_v0, %v5788_v28  ;;  %5826 = vmatmul.bf16.gmra.mxu0 %v10490_v10  ;;  %10815 = vmatmul.msk.bf16.gmra.mxu3 %vm3072_vm3, %v6175_v8  ;;  %v14731_v0 = vpop.f32.mrf.mxu2  ;;  %v17453_v10 = vld [vmem:[#allocation53_spill] sm:$0xff]  ;;  %v17454_v25 = vld [vmem:[#allocation70_spill] sm:$0xff] }
 0x5de   : > { %v5624_v37 = vadd.f32 %v14664_v3, %v17453_v10 }
 0x5df   : > { %v14724_v29 = vpack.c.b16 %v6724_v43, %v6723_v62  ;;  %v6065_v52 = vmax.f32 %v5957_v15, 0.0  ;;  %v10510_v62 = vor.u32 %v11367_v42, %v10507_v32 }
 0x5e0   : > { %v6356_v53 = vpop.f32.mrf.mxu3 }
 0x5e1   : > { %v6129_v35 = vadd.f32 %v6065_v52, %v17452_v13  ;;  %v5961_v44 = vpop.f32.mrf.mxu1  ;;  %v6357_v61 = vadd.f32 %v14549_v51, %v6356_v53  ;;  %10785 = vmatmul.msk.bf16.gmra.mxu1 %vm5089_vm4, %v10514_v21  ;;  %v10533_v21 = vld [vmem:[%s13038_s28 + $0x448] sm:$0xf] }
 0x5e2   : > { %v5789_v17 = vpop.f32.mrf.mxu0 }
 0x5e3   : > { %v5790_v27 = vadd.f32 %v5789_v17, %v5621_v26  ;;  %v6492_v4 = vpack.c.bf16 %v6357_v61, %v6357_v61 }
 0x5e5   : > { %v5959_v54 = vadd.f32 %v5958_v33, %v5790_v27  ;;  %v10606_v33 = vor.u32 %v11394_v49, %v10605_v16  ;;  %v14743_v53 = vpop.f32.mrf.mxu2  ;;  %v6725_v18 = vunpack.c.l.b16 %v6492_v4  ;;  %v11375_v27 = vld [vmem:[%s13038_s28 + $0x458] sm:$0xf0]  ;;  %v10527_v4 = vld [vmem:[%s13038_s28 + $0x454] sm:$0xf0] }
 0x5e7   : > { %v6066_v55 = vmax.f32 %v5959_v54, 0.0  ;;  %v17455_v54 = vld [vmem:[#allocation72_spill] sm:$0xff] }
 0x5e8   : > { %v6358_v50 = vpop.f32.mrf.mxu3 }
 0x5e9   : > { %v6130_v28 = vadd.f32 %v6066_v55, %v17454_v25  ;;  %v6359_v8 = vadd.f32 %v14549_v51, %v6358_v50  ;;  %v5963_v58 = vpop.f32.mrf.mxu1  ;;  %v10534_v55 = vor.u32 %v11375_v27, %v10533_v21  ;;  %v11372_v50 = vld [vmem:[%s13038_s28 + $0x444] sm:$0xf] }
 0x5ea   : > { %v5792_v43 = vpop.f32.mrf.mxu0 }
 0x5eb   : > { %v6493_v15 = vpack.c.bf16 %v6359_v8, %v6359_v8  ;;  %v5793_v52 = vadd.f32 %v5792_v43, %v5624_v37  ;;  %v6176_v41 = vpack.c.bf16 %v6130_v28, %v6129_v35  ;;  %5687 = vmatmul.bf16.gmra.mxu2 %v10606_v33  ;;  %v5626_v35 = vadd.f32 %v14679_v6, %v13960_v34  ;;  %v17456_v28 = vld [vmem:[#allocation76_spill] sm:$0xff] }
 0x5ec   : > { %v5629_v8 = vadd.f32 %v14689_v57, %v17456_v28  ;;  %v6548_v28 = vld [vmem:[%s14614_s25 + $0x28] sm:$0xff] }
 0x5ed   : > { %v6726_v26 = vunpack.c.l.b16 %v6493_v15  ;;  %v5962_v3 = vadd.f32 %v5961_v44, %v5793_v52  ;;  %5831 = vmatmul.bf16.gmra.mxu0 %v10510_v62  ;;  %10816 = vmatmul.msk.bf16.gmra.mxu3 %vm3072_vm3, %v6176_v41  ;;  %v14754_v37 = vpop.f32.mrf.mxu2  ;;  %v17457_v62 = vld [vmem:[#allocation74_spill] sm:$0xff]  ;;  %v10530_v15 = vor.u32 %v11372_v50, %v10527_v4 }
 0x5ef   : > { %v14746_v13 = vpack.c.b16 %v6726_v26, %v6725_v18  ;;  %v6067_v17 = vmax.f32 %v5962_v3, 0.0 }
 0x5f0   : > { %v6361_v61 = vpop.f32.mrf.mxu3 }
 0x5f1   : > { %v6131_v42 = vadd.f32 %v6067_v17, %v17455_v54  ;;  %v5966_v16 = vpop.f32.mrf.mxu1  ;;  %v6362_v49 = vadd.f32 %v14549_v51, %v6361_v61  ;;  %10786 = vmatmul.msk.bf16.gmra.mxu1 %vm5089_vm4, %v10534_v55  ;;  %v10553_v61 = vld [vmem:[%s13038_s28 + $0x470] sm:$0xf]  ;;  %v17458_v55 = vld [vmem:[#allocation55_spill] sm:$0xff] }
 0x5f2   : > { %v5794_v32 = vpop.f32.mrf.mxu0 }
 0x5f3   : > { %v5795_v44 = vadd.f32 %v5794_v32, %v5626_v35  ;;  %v6494_v6 = vpack.c.bf16 %v6362_v49, %v6362_v49  ;;  %v11380_v35 = vld [vmem:[%s13038_s28 + $0x480] sm:$0xf0] }
 0x5f4   : > { %v10554_v49 = vor.u32 %v11380_v35, %v10553_v61 }
 0x5f5   : > { %v5964_v10 = vadd.f32 %v5963_v58, %v5795_v44  ;;  %v6727_v3 = vunpack.c.l.b16 %v6494_v6  ;;  %v14768_v54 = vpop.f32.mrf.mxu2  ;;  %v10547_v6 = vld [vmem:[%s13038_s28 + $0x47c] sm:$0xf0] }
 0x5f7   : > { %v6068_v25 = vmax.f32 %v5964_v10, 0.0 }
 0x5f8   : > { %v6363_v34 = vpop.f32.mrf.mxu3 }
 0x5f9   : > { %v6132_v43 = vadd.f32 %v6068_v25, %v17457_v62  ;;  %v6364_v33 = vadd.f32 %v14549_v51, %v6363_v34  ;;  %v5968_v18 = vpop.f32.mrf.mxu1  ;;  %v11377_v34 = vld [vmem:[%s13038_s28 + $0x46c] sm:$0xf] }
 0x5fa   : > { %v5797_v52 = vpop.f32.mrf.mxu0 }
 0x5fb   : > { %v6495_v58 = vpack.c.bf16 %v6364_v33, %v6364_v33  ;;  %v5798_v41 = vadd.f32 %v5797_v52, %v5629_v8  ;;  %v6177_v26 = vpack.c.bf16 %v6132_v43, %v6131_v42  ;;  %v5631_v42 = vadd.f32 %v14702_v60, %v13994_v12  ;;  %v6550_v8 = vld [vmem:[%s14614_s25 + $0x38] sm:$0xff] }
 0x5fc   : > { %v14779_v62 = vpack.c.bf16 %v6550_v8, %v6548_v28  ;;  %v5634_v12 = vadd.f32 %v14719_v36, %v14010_v14  ;;  %v14791_v14 = vld [vmem:[%s17041_s8 + $0x3] ss:$0 sm:$0xff]  ;;  %v17460_v36 = vld [vmem:[#allocation78_spill] sm:$0xff]  ;;  %v17461_v28 = vld [vmem:[#allocation59_spill] sm:$0xff] }
 0x5fd   : > { %v6728_v17 = vunpack.c.l.b16 %v6495_v58  ;;  %v5967_v21 = vadd.f32 %v5966_v16, %v5798_v41  ;;  %5836 = vmatmul.bf16.gmra.mxu0 %v10530_v15  ;;  %10817 = vmatmul.msk.bf16.gmra.mxu3 %vm3072_vm3, %v6177_v26  ;;  %v17459_v15 = vld [vmem:[#allocation57_spill] sm:$0xff]  ;;  %v10550_v41 = vor.u32 %v11377_v34, %v10547_v6  ;;  %v5298_v61 = vadd.f32 %v14791_v14, %v17460_v36 }
 0x5fe   : > { %6660 = vmatpush.bf16.msra.mxu3 %v14779_v62 }
 0x5ff   : > { %v14764_v57 = vpack.c.b16 %v6728_v17, %v6727_v3  ;;  %v6069_v27 = vmax.f32 %v5967_v21, 0.0 }
 0x600   : > { %v6366_v32 = vpop.f32.mrf.mxu3 }
 0x601   : > { %v6133_v44 = vadd.f32 %v6069_v27, %v17458_v55  ;;  %v5971_v50 = vpop.f32.mrf.mxu1  ;;  %v6367_v4 = vadd.f32 %v14549_v51, %v6366_v32  ;;  %10787 = vmatmul.msk.bf16.gmra.mxu1 %vm5089_vm4, %v10554_v49  ;;  %v5467_v55 = vadd.f32 %v14029_v40, %v5298_v61  ;;  %v10573_v49 = vld [vmem:[%s13038_s28 + $0x498] sm:$0xf] }
 0x602   : > { %v5799_v16 = vpop.f32.mrf.mxu0 }
 0x603   : > { %v5800_v10 = vadd.f32 %v5799_v16, %v5631_v42  ;;  %v6496_v33 = vpack.c.bf16 %v6367_v4, %v6367_v4 }
 0x605   : > { %v5969_v25 = vadd.f32 %v5968_v18, %v5800_v10  ;;  %v14786_v18 = vpop.f32.mrf.mxu2  ;;  %v6729_v35 = vunpack.c.l.b16 %v6496_v33  ;;  %v11385_v10 = vld [vmem:[%s13038_s28 + $0x4a8] sm:$0xf0]  ;;  %v11382_v33 = vld [vmem:[%s13038_s28 + $0x494] sm:$0xf] }
 0x606   : > { %v10574_v6 = vor.u32 %v11385_v10, %v10573_v49 }
 0x607   : > { %v6070_v43 = vmax.f32 %v5969_v25, 0.0  ;;  %v5636_v25 = vadd.f32 %v14731_v0, %v5467_v55  ;;  %v17464_v55 = vld [vmem:[#allocation61_spill] sm:$0xff] }
 0x608   : > { %v6368_v60 = vpop.f32.mrf.mxu3 }
 0x609   : > { %v6134_v52 = vadd.f32 %v6070_v43, %v17459_v15  ;;  %v6369_v58 = vadd.f32 %v14549_v51, %v6368_v60  ;;  %v5973_v21 = vpop.f32.mrf.mxu1  ;;  %v10567_v15 = vld [vmem:[%s13038_s28 + $0x4a4] sm:$0xf0] }
 0x60a   : > { %v5802_v26 = vpop.f32.mrf.mxu0  ;;  %v10570_v36 = vor.u32 %v11382_v33, %v10567_v15  ;;  %v17466_v33 = vld [vmem:[#allocation82_spill] sm:$0xff] }
 0x60b   : > { %v6497_v3 = vpack.c.bf16 %v6369_v58, %v6369_v58  ;;  %v5803_v17 = vadd.f32 %v5802_v26, %v5634_v12  ;;  %v6178_v27 = vpack.c.bf16 %v6134_v52, %v6133_v44  ;;  %v17462_v58 = vld [vmem:[#allocation63_spill] sm:$0xff] }
 0x60d   : > { %v6730_v32 = vunpack.c.l.b16 %v6497_v3  ;;  %v5972_v42 = vadd.f32 %v5971_v50, %v5803_v17  ;;  %5841 = vmatmul.bf16.gmra.mxu0 %v10550_v41  ;;  %10818 = vmatmul.msk.bf16.gmra.mxu3 %vm3072_vm3, %v6178_v27  ;;  %v14803_v12 = vpop.f32.mrf.mxu2  ;;  %v5639_v41 = vadd.f32 %v14743_v53, %v17462_v58  ;;  %v17463_v3 = vld [vmem:[#allocation80_spill] sm:$0xff] }
 0x60f   : > { %v14797_v16 = vpack.c.b16 %v6730_v32, %v6729_v35  ;;  %v6071_v44 = vmax.f32 %v5972_v42, 0.0 }
 0x610   : > { %v6371_v4 = vpop.f32.mrf.mxu3 }
 0x611   : > { %v6135_v8 = vadd.f32 %v6071_v44, %v17461_v28  ;;  %v5976_v43 = vpop.f32.mrf.mxu1  ;;  %v6372_v40 = vadd.f32 %v14549_v51, %v6371_v4  ;;  %10788 = vmatmul.msk.bf16.gmra.mxu1 %vm5089_vm4, %v10574_v6  ;;  %v5303_v44 = vadd.f32 %v14791_v14, %v17464_v55  ;;  %v6545_v55 = vld [vmem:[%s14614_s25 + $0x10] sm:$0xff] }
 0x612   : > { %v5804_v34 = vpop.f32.mrf.mxu0 }
 0x613   : > { %v5805_v50 = vadd.f32 %v5804_v34, %v5636_v25  ;;  %v6498_v26 = vpack.c.bf16 %v6372_v40, %v6372_v40  ;;  %v17465_v25 = vld [vmem:[#allocation65_spill] sm:$0xff] }
 0x614   : > { %v5472_v28 = vadd.f32 %v17465_v25, %v5303_v44 }
 0x615   : > { %v5974_v60 = vadd.f32 %v5973_v21, %v5805_v50  ;;  %v6731_v49 = vunpack.c.l.b16 %v6498_v26  ;;  %v14816_v4 = vpop.f32.mrf.mxu2  ;;  %v10593_v50 = vld [vmem:[%s13038_s28 + $0x4c0] sm:$0xf] }
 0x617   : > { %v6072_v52 = vmax.f32 %v5974_v60, 0.0  ;;  %v5641_v60 = vadd.f32 %v14754_v37, %v5472_v28 }
 0x618   : > { %v6373_v0 = vpop.f32.mrf.mxu3 }
 0x619   : > { %v6136_v17 = vadd.f32 %v6072_v52, %v17463_v3  ;;  %v6374_v27 = vadd.f32 %v14549_v51, %v6373_v0  ;;  %v5978_v32 = vpop.f32.mrf.mxu1  ;;  %v11387_v3 = vld [vmem:[%s13038_s28 + $0x4bc] sm:$0xf] }
 0x61a   : > { %v5807_v61 = vpop.f32.mrf.mxu0 }
 0x61b   : > { %v6499_v35 = vpack.c.bf16 %v6374_v27, %v6374_v27  ;;  %v5808_v21 = vadd.f32 %v5807_v61, %v5639_v41  ;;  %v6179_v42 = vpack.c.bf16 %v6136_v17, %v6135_v8  ;;  %v11390_v8 = vld [vmem:[%s13038_s28 + $0x4d0] sm:$0xf0]  ;;  %v10587_v17 = vld [vmem:[%s13038_s28 + $0x4cc] sm:$0xf0] }
 0x61c   : > { %v10594_v52 = vor.u32 %v11390_v8, %v10593_v50 }
 0x61d   : > { %v6732_v10 = vunpack.c.l.b16 %v6499_v35  ;;  %v5977_v53 = vadd.f32 %v5976_v43, %v5808_v21  ;;  %5846 = vmatmul.bf16.gmra.mxu0 %v10570_v36  ;;  %10819 = vmatmul.msk.bf16.gmra.mxu3 %vm3072_vm3, %v6179_v42  ;;  %v17467_v36 = vld [vmem:[#allocation88_spill] sm:$0xff]  ;;  %v14831_v37 = vpop.f32.mrf.mxu2  ;;  %v10590_v21 = vor.u32 %v11387_v3, %v10587_v17  ;;  %v17470_v3 = vld [vmem:[#allocation67_spill] sm:$0xff] }
 0x61e   : > { %v5644_v61 = vadd.f32 %v14768_v54, %v17467_v36  ;;  %v6543_v42 = vld [vmem:[%s14614_s25] sm:$0xff]  ;;  %v17469_v54 = vld [vmem:[#allocation86_spill] sm:$0xff] }
 0x61f   : > { %v14819_v34 = vpack.c.b16 %v6732_v10, %v6731_v49  ;;  %v6073_v6 = vmax.f32 %v5977_v53, 0.0  ;;  %v17468_v49 = vld [vmem:[#allocation84_spill] sm:$0xff] }
 0x620   : > { %v6376_v40 = vpop.f32.mrf.mxu3 }
 0x621   : > { %v6137_v43 = vadd.f32 %v6073_v6, %v17466_v33  ;;  %v5981_v41 = vpop.f32.mrf.mxu1  ;;  %v6377_v0 = vadd.f32 %v14549_v51, %v6376_v40  ;;  %10789 = vmatmul.msk.bf16.gmra.mxu1 %vm5089_vm4, %v10594_v52  ;;  %v5308_v40 = vadd.f32 %v14791_v14, %v17469_v54 }
 0x622   : > { %v5809_v15 = vpop.f32.mrf.mxu0 }
 0x623   : > { %v5810_v58 = vadd.f32 %v5809_v15, %v5641_v60  ;;  %v6500_v44 = vpack.c.bf16 %v6377_v0, %v6377_v0  ;;  %v11395_v0 = vld [vmem:[%s13038_s28 + $0x4f8] sm:$0xf0] }
 0x625   : > { %v5979_v26 = vadd.f32 %v5978_v32, %v5810_v58  ;;  %v6551_v32 = vpack.c.bf16 %v6545_v55, %v6543_v42  ;;  %v6733_v60 = vunpack.c.l.b16 %v6500_v44  ;;  %v10613_v58 = vld [vmem:[%s13038_s28 + $0x4e8] sm:$0xf]  ;;  %v11392_v55 = vld [vmem:[%s13038_s28 + $0x4e4] sm:$0xf] }
 0x626   : > { %v10614_v36 = vor.u32 %v11395_v0, %v10613_v58 }
 0x627   : > { %v6074_v27 = vmax.f32 %v5979_v26, 0.0  ;;  %6572 = vmatpush.bf16.msra.mxu0 %v6551_v32  ;;  %6642 = vmatpush.bf16.msrb.mxu2 %v6551_v32  ;;  %v6544_v32 = vld [vmem:[%s14614_s25 + $0x8] sm:$0xff] }
 0x628   : > { %v6378_v35 = vpop.f32.mrf.mxu3 }
 0x629   : > { %v6138_v10 = vadd.f32 %v6074_v27, %v17468_v49  ;;  %v6379_v53 = vadd.f32 %v14549_v51, %v6378_v35  ;;  %v5983_v50 = vpop.f32.mrf.mxu1  ;;  %v5477_v51 = vadd.f32 %v14116_v39, %v5308_v40  ;;  %v14848_v27 = vpop.f32.mrf.mxu2  ;;  %v14853_v35 = vld [vmem:[%s17044_s11] ss:$0 sm:$0xff]  ;;  %v5649_v49 = vadd.f32 %v14803_v12, %v14132_v31 }
 0x62a   : > { %v5812_v25 = vpop.f32.mrf.mxu0  ;;  %v5313_v31 = vadd.f32 %v14791_v14, %v14119_v23 }
 0x62b   : > { %v6501_v28 = vpack.c.bf16 %v6379_v53, %v6379_v53  ;;  %v5813_v6 = vadd.f32 %v5812_v25, %v5644_v61  ;;  %v6180_v8 = vpack.c.bf16 %v6138_v10, %v6137_v43  ;;  %6584 = vmatpush.bf16.msrb.mxu0 %v14779_v62  ;;  %v5646_v62 = vadd.f32 %v14786_v18, %v5477_v51  ;;  %v10607_v18 = vld [vmem:[%s13038_s28 + $0x4f4] sm:$0xf0]  ;;  %s11439_s28 = sshll.u32 %s12097_s17, 10 }
 0x62c   : > { %v10610_v53 = vor.u32 %v11392_v55, %v10607_v18  ;;  %v6546_v25 = vld [vmem:[%s14614_s25 + $0x18] sm:$0xff]  ;;  %s8823_s1 = scalar_lea.hbm %s17052_s19, %s11439_s28  ;;  %s11926_s28 = scalar_lea.hbm %s17052_s19, 2048 }
 0x62d   : > { %v6734_v33 = vunpack.c.l.b16 %v6501_v28  ;;  %v5982_v15 = vadd.f32 %v5981_v41, %v5813_v6  ;;  %5851 = vmatmul.bf16.gmra.mxu0 %v10590_v21  ;;  %10820 = vmatmul.msk.bf16.gmra.mxu3 %vm3072_vm3, %v6180_v8  ;;  %v17471_v6 = vld [vmem:[#allocation69_spill] sm:$0xff]  ;;  %v6552_v40 = vpack.c.bf16 %v6546_v25, %v6544_v32  ;;  %s8826_s27 = sshll.u32 %s8823_s1, 4  ;;  %s8827_s27 = int_to_ptr.hbm [resolvable:$true] %s8826_s27 }
 0x62e   : > { %s11920_s22 = sshra.s32 %s8827_s27, 4  ;;  %s11921_s22 = int_to_ptr.hbm [resolvable:$true] %s11920_s22 }
 0x62f   : > { %v14842_v52 = vpack.c.b16 %v6734_v33, %v6733_v60  ;;  %v6075_v43 = vmax.f32 %v5982_v15, 0.0  ;;  %6585 = vmatpush.bf16.msrb.mxu0 %v6552_v40  ;;  %6661 = vmatpush.bf16.msra.mxu3 %v6552_v40  ;;  %p11927_p0 = scmp.lt.s32.totalorder %s11921_s22, %s17052_s19 }
 0x630   : > { %v6381_v26 = vpop.f32.mrf.mxu3 }
 0x631   : > { %v6139_v17 = vadd.f32 %v6075_v43, %v17470_v3  ;;  %v5986_v39 = vpop.f32.mrf.mxu1  ;;  %v6382_v21 = vadd.f32 %v14853_v35, %v6381_v26  ;;  %10790 = vmatmul.msk.bf16.gmra.mxu1 %vm5089_vm4, %v10614_v36  ;;  %v5658_v43 = vpop.f32.mrf.mxu2  ;;  %v5482_v26 = vadd.f32 %v14147_v24, %v5313_v31  ;;  %v17475_v31 = vld [vmem:[#allocation79_spill] sm:$0xff] }
 0x632   : > { %v5814_v41 = vpop.f32.mrf.mxu0 }
 0x633   : > { %v5815_v61 = vadd.f32 %v5814_v41, %v5646_v62  ;;  %v6502_v28 = vpack.c.bf16 %v6382_v21, %v6382_v21 }
 0x635   : > { %v5984_v42 = vadd.f32 %v5983_v50, %v5815_v61  ;;  %v6735_v12 = vunpack.c.l.b16 %v6502_v28 }
 0x637   : > { %v6076_v44 = vmax.f32 %v5984_v42, 0.0 }
 0x638   : > { %v6383_v10 = vpop.f32.mrf.mxu3 }
 0x639   : > { %v6140_v8 = vadd.f32 %v6076_v44, %v17471_v6  ;;  %v6384_v54 = vadd.f32 %v14853_v35, %v6383_v10  ;;  %v5988_v15 = vpop.f32.mrf.mxu1  ;;  %v17472_v44 = vld [vmem:[#allocation75_spill] sm:$0xff]  ;;  %v11970_v10 = vmov 0  }
 0x63a   : > { %v5817_v60 = vpop.f32.mrf.mxu0  ;;  %11486 = vset.pattern.permute.xlu0 %v11970_v10  ;;  %11487 = vset.pattern.permute.xlu1 %v11970_v10 }
 0x63b   : > { %v6503_v50 = vpack.c.bf16 %v6384_v54, %v6384_v54  ;;  %v5818_v33 = vadd.f32 %v5817_v60, %v5649_v49  ;;  %v6181_v51 = vpack.c.bf16 %v6140_v8, %v6139_v17  ;;  %v5651_v17 = vadd.f32 %v14816_v4, %v5482_v26  ;;  %v6556_v4 = vld [vmem:[%s17046_s13] sm:$0xff]  ;;  %11488 = vset.pattern.permute.xlu2 %v11970_v10  ;;  %v17474_v60 = vld [vmem:[#allocation71_spill] sm:$0xff]  ;;  %v17477_v10 = vld [vmem:[#allocation77_spill] sm:$0xff] }
 0x63c   : > { %v5654_v49 = vadd.f32 %v14831_v37, %v17472_v44  ;;  %6559 = vperm.xlu0 %11486, %v6556_v4   ;;  %v6555_v37 = vld [vmem:[%s17045_s12] sm:$0xf] }
 0x63d   : > { %v6736_v58 = vunpack.c.l.b16 %v6503_v50  ;;  %v5987_v0 = vadd.f32 %v5986_v39, %v5818_v33  ;;  %5856 = vmatmul.bf16.gmra.mxu0 %v10610_v53  ;;  %10821 = vmatmul.msk.bf16.gmra.mxu3 %vm3072_vm3, %v6181_v51  ;;  %v5660_v39 = vpop.f32.mrf.mxu2  ;;  %v17473_v53 = vld [vmem:[#allocation90_spill] sm:$0xff]  ;;  %v5318_v50 = vadd.f32 %v14791_v14, %v17474_v60 }
 0x63f   : > { %v14869_v62 = vpack.c.b16 %v6736_v58, %v6735_v12  ;;  %v6077_v3 = vmax.f32 %v5987_v0, 0.0  ;;  %v5487_v12 = vadd.f32 %v17475_v31, %v5318_v50  ;;  %v17479_v31 = vld [vmem:[#allocation81_spill] sm:$0xff] }
 0x640   : > { %v6386_v41 = vpop.f32.mrf.mxu3 }
 0x641   : > { %v6141_v36 = vadd.f32 %v6077_v3, %v14123_v5  ;;  %v5991_v42 = vpop.f32.mrf.mxu1  ;;  %v6387_v23 = vadd.f32 %v14853_v35, %v6386_v41  ;;  %v5656_v41 = vadd.f32 %v14848_v27, %v5487_v12 }
 0x642   : > { %v5819_v61 = vpop.f32.mrf.mxu0 }
 0x643   : > { %v5820_v21 = vadd.f32 %v5819_v61, %v5651_v17  ;;  %v6504_v5 = vpack.c.bf16 %v6387_v23, %v6387_v23  ;;  %v17476_v17 = vld [vmem:[#allocation73_spill] sm:$0xff] }
 0x645   : > { %v5989_v55 = vadd.f32 %v5988_v15, %v5820_v21  ;;  %v6737_v33 = vunpack.c.l.b16 %v6504_v5  ;;  %v5663_v26 = vpop.f32.mrf.mxu2 }
 0x647   : > { %v6078_v18 = vmax.f32 %v5989_v55, 0.0 }
 0x648   : > { %v6388_v24 = vpop.f32.mrf.mxu3 }
 0x649   : > { %v6142_v32 = vadd.f32 %v6078_v18, %v17473_v53  ;;  %v6389_v25 = vadd.f32 %v14853_v35, %v6388_v24  ;;  %v5993_v54 = vpop.f32.mrf.mxu1 }
 0x64a   : > { %v5822_v28 = vpop.f32.mrf.mxu0 }
 0x64b   : > { %v6505_v6 = vpack.c.bf16 %v6389_v25, %v6389_v25  ;;  %v5823_v8 = vadd.f32 %v5822_v28, %v5654_v49  ;;  %v6182_v40 = vpack.c.bf16 %v6142_v32, %v6141_v36  ;;  %v5659_v49 = vadd.f32 %v5658_v43, %v14192_v48 }
 0x64d   : > { %v6738_v15 = vunpack.c.l.b16 %v6505_v6  ;;  %v5992_v51 = vadd.f32 %v5991_v42, %v5823_v8  ;;  %10822 = vmatmul.msk.bf16.gmra.mxu3 %vm3072_vm3, %v6182_v40  ;;  %10831 = vmatmul.msk.bf16.vlgmr.msra.gmra.mxu0 %vm3072_vm3, %v6555_v37  ;;  %v5665_v53 = vpop.f32.mrf.mxu2  ;;  %v17478_v8 = vld [vmem:[#allocation96_spill] sm:$0xff] }
 0x64e   : > { %v5323_v40 = vadd.f32 %v14791_v14, %v17478_v8 }
 0x64f   : > { %v14889_v58 = vpack.c.b16 %v6738_v15, %v6737_v33  ;;  %v6079_v0 = vmax.f32 %v5992_v51, 0.0 }
 0x650   : > { %v6391_v3 = vpop.f32.mrf.mxu3  ;;  %v5492_v48 = vadd.f32 %v14207_v2, %v5323_v40  ;;  %v17480_v2 = vld [vmem:[#allocation98_spill] sm:$0xff] }
 0x651   : > { %v6143_v36 = vadd.f32 %v6079_v0, %v17476_v17  ;;  %v5996_v23 = vpop.f32.mrf.mxu1  ;;  %v6392_v42 = vadd.f32 %v14853_v35, %v6391_v3 }
 0x652   : > { %v5824_v61 = vpop.f32.mrf.mxu0  ;;  %v5661_v51 = vadd.f32 %v5660_v39, %v5492_v48 }
 0x653   : > { %v5825_v21 = vadd.f32 %v5824_v61, %v5656_v41  ;;  %v6506_v24 = vpack.c.bf16 %v6392_v42, %v6392_v42 }
 0x655   : > { %v5994_v55 = vadd.f32 %v5993_v54, %v5825_v21  ;;  %v6739_v60 = vunpack.c.l.b16 %v6506_v24  ;;  %v5668_v17 = vpop.f32.mrf.mxu2 }
 0x657   : > { %v6080_v18 = vmax.f32 %v5994_v55, 0.0 }
 0x658   : > { %v6393_v44 = vpop.f32.mrf.mxu3 }
 0x659   : > { %v6144_v4 = vadd.f32 %v6080_v18, %v17477_v10  ;;  %v6394_v5 = vadd.f32 %v14853_v35, %v6393_v44  ;;  %v5998_v28 = vpop.f32.mrf.mxu1 }
 0x65a   : > { %v5827_v32 = vpop.f32.mrf.mxu0 }
 0x65b   : > { %v6507_v27 = vpack.c.bf16 %v6394_v5, %v6394_v5  ;;  %v5828_v25 = vadd.f32 %v5827_v32, %v5659_v49  ;;  %v6183_v6 = vpack.c.bf16 %v6144_v4, %v6143_v36  ;;  %v17481_v4 = vld [vmem:[#allocation83_spill] sm:$0xff] }
 0x65c   : > { %v5328_v5 = vadd.f32 %v14791_v14, %v17481_v4 }
 0x65d   : > { %v6740_v54 = vunpack.c.l.b16 %v6507_v27  ;;  %v5997_v50 = vadd.f32 %v5996_v23, %v5828_v25  ;;  %10823 = vmatmul.msk.bf16.gmra.mxu3 %vm3072_vm3, %v6183_v6  ;;  %10832 = vmatmul.msk.bf16.vlgmr.msrb.gmra.mxu0 %vm3072_vm3, %v6555_v37  ;;  %v5664_v37 = vadd.f32 %v5663_v26, %v14222_v59 }
 0x65e   : > { %v5497_v59 = vadd.f32 %v14237_v22, %v5328_v5  ;;  %v17485_v22 = vld [vmem:[#allocation87_spill] sm:$0xff] }
 0x65f   : > { %v14902_v43 = vpack.c.b16 %v6740_v54, %v6739_v60  ;;  %v6081_v33 = vmax.f32 %v5997_v50, 0.0  ;;  %v17483_v60 = vld [vmem:[#allocation85_spill] sm:$0xff] }
 0x660   : > { %v6396_v15 = vpop.f32.mrf.mxu3  ;;  %v5666_v40 = vadd.f32 %v5665_v53, %v5497_v59 }
 0x661   : > { %v6145_v12 = vadd.f32 %v6081_v33, %v17479_v31  ;;  %v6001_v41 = vpop.f32.mrf.mxu1  ;;  %v6397_v36 = vadd.f32 %v14853_v35, %v6396_v15 }
 0x662   : > { %v5829_v0 = vpop.f32.mrf.mxu0 }
 0x663   : > { %v5830_v3 = vadd.f32 %v5829_v0, %v5661_v51  ;;  %v6508_v42 = vpack.c.bf16 %v6397_v36, %v6397_v36 }
 0x665   : > { %v5999_v61 = vadd.f32 %v5998_v28, %v5830_v3  ;;  %v7838_v32 = vunpack.c.l.b16 %v6508_v42  ;;  %v5670_v28 = vpop.f32.mrf.mxu2  ;;  %v17484_v3 = vld [vmem:[#allocation102_spill] sm:$0xff] }
 0x667   : > { %v6082_v21 = vmax.f32 %v5999_v61, 0.0 }
 0x668   : > { %v6398_v23 = vpop.f32.mrf.mxu3 }
 0x669   : > { %v6146_v55 = vadd.f32 %v6082_v21, %v17480_v2  ;;  %v6399_v18 = vadd.f32 %v14853_v35, %v6398_v23  ;;  %v6003_v24 = vpop.f32.mrf.mxu1 }
 0x66a   : > { %v5832_v44 = vpop.f32.mrf.mxu0 }
 0x66b   : > { %v6509_v39 = vpack.c.bf16 %v6399_v18, %v6399_v18  ;;  %v5833_v49 = vadd.f32 %v5832_v44, %v5664_v37  ;;  %v6184_v10 = vpack.c.bf16 %v6146_v55, %v6145_v12  ;;  %v17486_v55 = vld [vmem:[#allocation101_spill] sm:$0xff] }
 0x66c   : > { %v5333_v18 = vadd.f32 %v14791_v14, %v17486_v55 }
 0x66d   : > { %v7839_v27 = vunpack.c.l.b16 %v6509_v39  ;;  %v6002_v25 = vadd.f32 %v6001_v41, %v5833_v49  ;;  %10824 = vmatmul.msk.bf16.gmra.mxu3 %vm3072_vm3, %v6184_v10  ;;  %v5673_v12 = vpop.f32.mrf.mxu2  ;;  %v5669_v41 = vadd.f32 %v5668_v17, %v17484_v3 }
 0x66f   : > { %v14913_v26 = vpack.c.b16 %v7839_v27, %v7838_v32  ;;  %v6083_v6 = vmax.f32 %v6002_v25, 0.0  ;;  %v17489_v27 = vld [vmem:[#allocation89_spill] sm:$0xff] }
 0x670   : > { %v6401_v8 = vpop.f32.mrf.mxu3 }
 0x671   : > { %17482 = vst [vmem:[#allocation12_spill] sm:$0xff] %v14913_v26  ;;  %v6147_v54 = vadd.f32 %v6083_v6, %v17483_v60  ;;  %v6006_v33 = vpop.f32.mrf.mxu1  ;;  %v6402_v15 = vadd.f32 %v14853_v35, %v6401_v8 }
 0x672   : > { %v5834_v50 = vpop.f32.mrf.mxu0 }
 0x673   : > { %v5835_v48 = vadd.f32 %v5834_v50, %v5666_v40  ;;  %v6510_v36 = vpack.c.bf16 %v6402_v15, %v6402_v15 }
 0x675   : > { %v6004_v51 = vadd.f32 %v6003_v24, %v5835_v48  ;;  %v7840_v44 = vunpack.c.l.b16 %v6510_v36  ;;  %v17487_v24 = vld [vmem:[#allocation103_spill] sm:$0xff]  ;;  %v5675_v59 = vpop.f32.mrf.mxu2 }
 0x676   : > { %v5502_v17 = vadd.f32 %v17487_v24, %v5333_v18  ;;  %v17495_v24 = vld [vmem:[#allocation92_spill] sm:$0xff] }
 0x677   : > { %v6084_v31 = vmax.f32 %v6004_v51, 0.0 }
 0x678   : > { %v6403_v0 = vpop.f32.mrf.mxu3  ;;  %v5671_v32 = vadd.f32 %v5670_v28, %v5502_v17 }
 0x679   : > { %v6148_v61 = vadd.f32 %v6084_v31, %v17485_v22  ;;  %v6404_v21 = vadd.f32 %v14853_v35, %v6403_v0  ;;  %v6008_v42 = vpop.f32.mrf.mxu1  ;;  %v17491_v31 = vld [vmem:[#allocation91_spill] sm:$0xff] }
 0x67a   : > { %v5837_v23 = vpop.f32.mrf.mxu0 }
 0x67b   : > { %v6511_v53 = vpack.c.bf16 %v6404_v21, %v6404_v21  ;;  %v5838_v37 = vadd.f32 %v5837_v23, %v5669_v41  ;;  %v6185_v2 = vpack.c.bf16 %v6148_v61, %v6147_v54  ;;  %v17492_v23 = vld [vmem:[#allocation104_spill] sm:$0xff] }
 0x67d   : > { %v7841_v39 = vunpack.c.l.b16 %v6511_v53  ;;  %v6007_v49 = vadd.f32 %v6006_v33, %v5838_v37  ;;  %10825 = vmatmul.msk.bf16.gmra.mxu3 %vm3072_vm3, %v6185_v2  ;;  %v17490_v33 = vld [vmem:[#allocation105_spill] sm:$0xff]  ;;  %v5678_v21 = vpop.f32.mrf.mxu2  ;;  %v5338_v53 = vadd.f32 %v14791_v14, %v17492_v23 }
 0x67e   : > { %v5674_v15 = vadd.f32 %v5673_v12, %v17490_v33  ;;  %v17493_v12 = vld [vmem:[#allocation106_spill] sm:$0xff]  ;;  %v17499_v23 = vld [vmem:[#allocation109_spill] sm:$0xff] }
 0x67f   : > { %v14924_v10 = vpack.c.b16 %v7841_v39, %v7840_v44  ;;  %v6085_v4 = vmax.f32 %v6007_v49, 0.0  ;;  %v5507_v55 = vadd.f32 %v17493_v12, %v5338_v53 }
 0x680   : > { %v6406_v5 = vpop.f32.mrf.mxu3 }
 0x681   : > { %17488 = vst [vmem:[#allocation100_spill] sm:$0xff] %v14924_v10  ;;  %v6149_v25 = vadd.f32 %v6085_v4, %v17489_v27  ;;  %v6011_v40 = vpop.f32.mrf.mxu1  ;;  %v6407_v60 = vadd.f32 %v14853_v35, %v6406_v5  ;;  %v5676_v49 = vadd.f32 %v5675_v59, %v5507_v55  ;;  %v17501_v55 = vld [vmem:[#allocation94_spill] sm:$0xff] }
 0x682   : > { %v5839_v6 = vpop.f32.mrf.mxu0 }
 0x683   : > { %v5840_v8 = vadd.f32 %v5839_v6, %v5671_v32  ;;  %v6512_v51 = vpack.c.bf16 %v6407_v60, %v6407_v60  ;;  %v17496_v60 = vld [vmem:[#allocation108_spill] sm:$0xff] }
 0x685   : > { %v6009_v54 = vadd.f32 %v6008_v42, %v5840_v8  ;;  %v7842_v37 = vunpack.c.l.b16 %v6512_v51  ;;  %v5680_v6 = vpop.f32.mrf.mxu2 }
 0x687   : > { %v6086_v50 = vmax.f32 %v6009_v54, 0.0  ;;  %v5679_v54 = vadd.f32 %v5678_v21, %v17496_v60 }
 0x688   : > { %v6408_v48 = vpop.f32.mrf.mxu3 }
 0x689   : > { %v6150_v0 = vadd.f32 %v6086_v50, %v17491_v31  ;;  %v6409_v3 = vadd.f32 %v14853_v35, %v6408_v48  ;;  %v6013_v22 = vpop.f32.mrf.mxu1  ;;  %v17497_v48 = vld [vmem:[#allocation93_spill] sm:$0xff] }
 0x68a   : > { %v5842_v41 = vpop.f32.mrf.mxu0 }
 0x68b   : > { %v6513_v28 = vpack.c.bf16 %v6409_v3, %v6409_v3  ;;  %v5843_v36 = vadd.f32 %v5842_v41, %v5674_v15  ;;  %v6186_v61 = vpack.c.bf16 %v6150_v0, %v6149_v25  ;;  %v17498_v41 = vld [vmem:[#allocation107_spill] sm:$0xff] }
 0x68d   : > { %v7843_v42 = vunpack.c.l.b16 %v6513_v28  ;;  %v6012_v2 = vadd.f32 %v6011_v40, %v5843_v36  ;;  %10826 = vmatmul.msk.bf16.gmra.mxu3 %vm3072_vm3, %v6186_v61  ;;  %v5343_v28 = vadd.f32 %v14791_v14, %v17498_v41 }
 0x68f   : > { %v14935_v18 = vpack.c.b16 %v7843_v42, %v7842_v37  ;;  %v6087_v44 = vmax.f32 %v6012_v2, 0.0  ;;  %v5512_v21 = vadd.f32 %v17499_v23, %v5343_v28  ;;  %v5683_v42 = vpop.f32.mrf.mxu2 }
 0x690   : > { %v6411_v39 = vpop.f32.mrf.mxu3 }
 0x691   : > { %17494 = vst [vmem:[#allocation13_spill] sm:$0xff] %v14935_v18  ;;  %v6151_v17 = vadd.f32 %v6087_v44, %v17495_v24  ;;  %v6016_v32 = vpop.f32.mrf.mxu1  ;;  %v6412_v27 = vadd.f32 %v14853_v35, %v6411_v39  ;;  %v5681_v12 = vadd.f32 %v5680_v6, %v5512_v21 }
 0x692   : > { %v5844_v4 = vpop.f32.mrf.mxu0 }
 0x693   : > { %v5845_v5 = vadd.f32 %v5844_v4, %v5676_v49  ;;  %v6514_v50 = vpack.c.bf16 %v6412_v27, %v6412_v27  ;;  %v5684_v27 = vadd.f32 %v5683_v42, %v14333_v19 }
 0x695   : > { %v6014_v25 = vadd.f32 %v6013_v22, %v5845_v5  ;;  %v7844_v36 = vunpack.c.l.b16 %v6514_v50 }
 0x697   : > { %v6088_v8 = vmax.f32 %v6014_v25, 0.0 }
 0x698   : > { %v6413_v40 = vpop.f32.mrf.mxu3 }
 0x699   : > { %v6152_v33 = vadd.f32 %v6088_v8, %v17497_v48  ;;  %v6414_v15 = vadd.f32 %v14853_v35, %v6413_v40  ;;  %v6018_v3 = vpop.f32.mrf.mxu1  ;;  %v17502_v8 = vld [vmem:[#allocation95_spill] sm:$0xff] }
 0x69a   : > { %v5847_v51 = vpop.f32.mrf.mxu0 }
 0x69b   : > { %v6515_v59 = vpack.c.bf16 %v6414_v15, %v6414_v15  ;;  %v5848_v31 = vadd.f32 %v5847_v51, %v5679_v54  ;;  %v6187_v0 = vpack.c.bf16 %v6152_v33, %v6151_v17  ;;  %v5685_v54 = vpop.f32.mrf.mxu2  ;;  %v17503_v15 = vld [vmem:[#allocation110_spill] sm:$0xff] }
 0x69c   : > { %v5348_v51 = vadd.f32 %v14791_v14, %v17503_v15  ;;  %v17507_v15 = vld [vmem:[#allocation99_spill] sm:$0xff] }
 0x69d   : > { %v7845_v22 = vunpack.c.l.b16 %v6515_v59  ;;  %v6017_v61 = vadd.f32 %v6016_v32, %v5848_v31  ;;  %10827 = vmatmul.msk.bf16.gmra.mxu3 %vm3072_vm3, %v6187_v0 }
 0x69e   : > { %v5517_v19 = vadd.f32 %v14349_v38, %v5348_v51 }
 0x69f   : > { %v14946_v53 = vpack.c.b16 %v7845_v22, %v7844_v36  ;;  %v6089_v37 = vmax.f32 %v6017_v61, 0.0  ;;  %v17505_v61 = vld [vmem:[#allocation97_spill] sm:$0xff] }
 0x6a0   : > { %v6416_v2 = vpop.f32.mrf.mxu3  ;;  %v5686_v22 = vadd.f32 %v5685_v54, %v5517_v19 }
 0x6a1   : > { %17500 = vst [vmem:[#allocation22_spill] sm:$0xff] %v14946_v53  ;;  %v6153_v44 = vadd.f32 %v6089_v37, %v17501_v55  ;;  %v6417_v24 = vadd.f32 %v14853_v35, %v6416_v2  ;;  %v6021_v4 = vpop.f32.mrf.mxu1 }
 0x6a2   : > { %v5849_v39 = vpop.f32.mrf.mxu0 }
 0x6a3   : > { %v5850_v49 = vadd.f32 %v5849_v39, %v5681_v12  ;;  %v6516_v25 = vpack.c.bf16 %v6417_v24, %v6417_v24  ;;  %v5688_v42 = vpop.f32.mrf.mxu2 }
 0x6a4   : > { %v5689_v39 = vadd.f32 %v5688_v42, %v14362_v30 }
 0x6a5   : > { %v6019_v17 = vadd.f32 %v6018_v3, %v5850_v49  ;;  %v7846_v59 = vunpack.c.l.b16 %v6516_v25  ;;  %v11434_v25 = vld [vmem:[%s17047_s14] sm:$0xff] }
 0x6a6   : > { %10841 = vmatmul.msk.bf16.vlgmr.msrb.gmra.mxu2 %vm3072_vm3, %v11434_v25 }
 0x6a7   : > { %v6090_v5 = vmax.f32 %v6019_v17, 0.0 }
 0x6a8   : > { %v6418_v32 = vpop.f32.mrf.mxu3 }
 0x6a9   : > { %v6154_v40 = vadd.f32 %v6090_v5, %v17502_v8  ;;  %v6419_v60 = vadd.f32 %v14853_v35, %v6418_v32  ;;  %v6023_v28 = vpop.f32.mrf.mxu1  ;;  %v5353_v8 = vadd.f32 %v14791_v14, %v14352_v1 }
 0x6aa   : > { %v5852_v50 = vpop.f32.mrf.mxu0 }
 0x6ab   : > { %v6517_v6 = vpack.c.bf16 %v6419_v60, %v6419_v60  ;;  %v5853_v48 = vadd.f32 %v5852_v50, %v5684_v27  ;;  %v6188_v33 = vpack.c.bf16 %v6154_v40, %v6153_v44  ;;  %v5522_v54 = vadd.f32 %v14533_v47, %v5353_v8 }
 0x6ad   : > { %v7847_v31 = vunpack.c.l.b16 %v6517_v6  ;;  %v6022_v0 = vadd.f32 %v6021_v4, %v5853_v48  ;;  %10828 = vmatmul.msk.bf16.gmra.mxu3 %vm3072_vm3, %v6188_v33 }
 0x6af   : > { %v14957_v3 = vpack.c.b16 %v7847_v31, %v7846_v59  ;;  %v6091_v41 = vmax.f32 %v6022_v0, 0.0 }
 0x6b0   : > { %v6421_v36 = vpop.f32.mrf.mxu3 }
 0x6b1   : > { %17504 = vst [vmem:[#allocation14_spill] sm:$0xff] %v14957_v3  ;;  %v6155_v23 = vadd.f32 %v6091_v41, %v17505_v61  ;;  %v6422_v2 = vadd.f32 %v14853_v35, %v6421_v36  ;;  %v6026_v17 = vpop.f32.mrf.mxu1  ;;  %v17508_v36 = vld [vmem:[#allocation111_spill] sm:$0xff] }
 0x6b2   : > { %v5854_v21 = vpop.f32.mrf.mxu0 }
 0x6b3   : > { %v5855_v37 = vadd.f32 %v5854_v21, %v5686_v22  ;;  %v6518_v49 = vpack.c.bf16 %v6422_v2, %v6422_v2  ;;  %v6540_v21 = vld [vmem:[%s17049_s16] sm:$0xff] }
 0x6b5   : > { %v6024_v12 = vadd.f32 %v6023_v28, %v5855_v37  ;;  %v7848_v40 = vunpack.c.l.b16 %v6518_v49 }
 0x6b7   : > { %v6092_v55 = vmax.f32 %v6024_v12, 0.0  ;;  %v11435_v12 = vld [vmem:[%s17047_s14 + $0x8] sm:$0xff] }
 0x6b8   : > { %v6423_v44 = vpop.f32.mrf.mxu3  ;;  %10842 = vmatmul.msk.bf16.gmra.mxu2 %vm3072_vm3, %v11435_v12 }
 0x6b9   : > { %v6156_v38 = vadd.f32 %v6092_v55, %v14340_v63  ;;  %v6424_v24 = vadd.f32 %v14853_v35, %v6423_v44  ;;  %v5690_v63 = vpop.f32.mrf.mxu2  ;;  %v6028_v1 = vpop.f32.mrf.mxu1 }
 0x6ba   : > { %v5857_v4 = vpop.f32.mrf.mxu0  ;;  %v5691_v33 = vadd.f32 %v5690_v63, %v5522_v54 }
 0x6bb   : > { %v6519_v5 = vpack.c.bf16 %v6424_v24, %v6424_v24  ;;  %v5858_v32 = vadd.f32 %v5857_v4, %v5689_v39  ;;  %v6189_v27 = vpack.c.bf16 %v6156_v38, %v6155_v23  ;;  %v6560_v23 = vpop.permute.xlu0 %6559 }
 0x6bd   : > { %v7849_v60 = vunpack.c.l.b16 %v6519_v5  ;;  %v6027_v30 = vadd.f32 %v6026_v17, %v5858_v32  ;;  %10829 = vmatmul.msk.bf16.gmra.mxu3 %vm3072_vm3, %v6189_v27 }
 0x6bf   : > { %v14972_v50 = vpack.c.b16 %v7849_v60, %v7848_v40  ;;  %v6093_v6 = vmax.f32 %v6027_v30, 0.0  ;;  %v6541_v40 = vld [vmem:[%s17049_s16 + $0x8] sm:$0xff] }
 0x6c0   : > { %v6426_v48 = vpop.f32.mrf.mxu3 }
 0x6c1   : > { %17506 = vst [vmem:[#allocation24_spill] sm:$0xff] %v14972_v50  ;;  %v6157_v51 = vadd.f32 %v6093_v6, %v17507_v15  ;;  %v6427_v14 = vadd.f32 %v14853_v35, %v6426_v48 }
 0x6c2   : > { %v5859_v59 = vpop.f32.mrf.mxu0 }
 0x6c3   : > { %v5860_v31 = vadd.f32 %v5859_v59, %v5691_v33  ;;  %v6520_v28 = vpack.c.bf16 %v6427_v14, %v6427_v14 }
 0x6c5   : > { %v6029_v0 = vadd.f32 %v6028_v1, %v5860_v31  ;;  %v7850_v55 = vunpack.c.l.b16 %v6520_v28 }
 0x6c7   : > { %v6094_v19 = vmax.f32 %v6029_v0, 0.0 }
 0x6c8   : > { %v6428_v41 = vpop.f32.mrf.mxu3 }
 0x6c9   : > { %v6158_v22 = vadd.f32 %v6094_v19, %v17508_v36  ;;  %v6429_v47 = vadd.f32 %v14853_v35, %v6428_v41 }
 0x6ca   : > { %v6574_v61 = vpop.f32.mrf.mxu0 }
 0x6cb   : > { %v6521_v37 = vpack.c.bf16 %v6429_v47, %v6429_v47  ;;  %v6190_v42 = vpack.c.bf16 %v6158_v22, %v6157_v51  ;;  %v6575_v2 = vadd.f32 %v6574_v61, %v6560_v23 }
 0x6cd   : > { %v7851_v44 = vunpack.c.l.b16 %v6521_v37  ;;  %10830 = vmatmul.msk.bf16.gmra.mxu3 %vm3072_vm3, %v6190_v42  ;;  %v6673_v39 = vadd.f32 %v6575_v2, %v6540_v21 }
 0x6cf   : > { %v14986_v49 = vpack.c.b16 %v7851_v44, %v7850_v55  ;;  %v6675_v38 = vpack.c.bf16 %v6673_v39, %v6673_v39 }
 0x6d0   : > { %v6431_v24 = vpop.f32.mrf.mxu3 }
 0x6d1   : > { %17509 = vst [vmem:[#allocation15_spill] sm:$0xff] %v14986_v49  ;;  %v6807_v17 = vsel %vm1086_vm0, %v6675_v38, 0  ;;  %v6432_v5 = vadd.f32 %v14853_v35, %v6431_v24 }
 0x6d2   : > { %v6576_v4 = vpop.f32.mrf.mxu0  ;;  %6819 = vmatpush.bf16.msrb.mxu3 %v6807_v17 }
 0x6d3   : > { %v6522_v27 = vpack.c.bf16 %v6432_v5, %v6432_v5 }
 0x6d5   : > { %v7852_v54 = vunpack.c.l.b16 %v6522_v27 }
 0x6d8   : > { %v6433_v32 = vpop.f32.mrf.mxu3 }
 0x6d9   : > { %v6434_v8 = vadd.f32 %v14853_v35, %v6433_v32 }
 0x6da   : > { %v6587_v60 = vpop.f32.mrf.mxu0 }
 0x6db   : > { %v6523_v30 = vpack.c.bf16 %v6434_v8, %v6434_v8  ;;  %v6588_v63 = vadd.f32 %v6587_v60, %v6560_v23 }
 0x6dd   : > { %v7853_v6 = vunpack.c.l.b16 %v6523_v30  ;;  %v6674_v48 = vadd.f32 %v6588_v63, %v6541_v40  ;;  %10843 = vmatmul.msk.bf16.vlgmr.msra.gmra.mxu3 %vm3072_vm3, %v11434_v25 }
 0x6df   : > { %v14995_v33 = vpack.c.b16 %v7853_v6, %v7852_v54  ;;  %v6676_v15 = vpack.c.bf16 %v6674_v48, %v6674_v48 }
 0x6e0   : > { %v6436_v51 = vpop.f32.mrf.mxu3 }
 0x6e1   : > { %17510 = vst [vmem:[#allocation26_spill] sm:$0xff] %v14995_v33  ;;  %v6810_v59 = vsel %vm1086_vm0, %v6676_v15, 0  ;;  %v6437_v1 = vadd.f32 %v14853_v35, %v6436_v51 }
 0x6e2   : > { %6908 = vmatpush.bf16.msra.mxu0 %v6810_v59  ;;  %v6589_v31 = vpop.f32.mrf.mxu0 }
 0x6e3   : > { %v6524_v0 = vpack.c.bf16 %v6437_v1, %v6437_v1 }
 0x6e5   : > { %10861 = vmatmul.msk.bf16.vlgmr.msra.gmra.mxu0 %vm6757_vm5, %v14566_v11  ;;  %v7854_v25 = vunpack.c.l.b16 %v6524_v0 }
 0x6e8   : > { %v6438_v14 = vpop.f32.mrf.mxu3 }
 0x6e9   : > { %v6439_v19 = vadd.f32 %v14853_v35, %v6438_v14 }
 0x6eb   : > { %v6525_v41 = vpack.c.bf16 %v6439_v19, %v6439_v19 }
 0x6ed   : > { %v7855_v28 = vunpack.c.l.b16 %v6525_v41  ;;  %10844 = vmatmul.msk.bf16.gmra.mxu3 %vm3072_vm3, %v11435_v12 }
 0x6ef   : > { %v15003_v36 = vpack.c.b16 %v7855_v28, %v7854_v25 }
 0x6f0   : > { %v6441_v22 = vpop.f32.mrf.mxu3 }
 0x6f1   : > { %17511 = vst [vmem:[#allocation16_spill] sm:$0xff] %v15003_v36  ;;  %v6442_v47 = vadd.f32 %v14853_v35, %v6441_v22 }
 0x6f3   : > { %v6526_v23 = vpack.c.bf16 %v6442_v47, %v6442_v47 }
 0x6f5   : > { %10862 = vmatmul.msk.bf16.gmra.mxu0 %vm6757_vm5, %v14588_v46  ;;  %v7856_v42 = vunpack.c.l.b16 %v6526_v23 }
 0x6f8   : > { %v6443_v61 = vpop.f32.mrf.mxu3 }
 0x6f9   : > { %v6444_v21 = vadd.f32 %v14853_v35, %v6443_v61 }
 0x6fb   : > { %v6527_v37 = vpack.c.bf16 %v6444_v21, %v6444_v21 }
 0x6fd   : > { %v7857_v2 = vunpack.c.l.b16 %v6527_v37  ;;  %10845 = vmatmul.msk.bf16.vlgmr.msrb.gmra.mxu3 %vm6757_vm5, %v14566_v11 }
 0x6ff   : > { %v15011_v55 = vpack.c.b16 %v7857_v2, %v7856_v42 }
 0x700   : > { %v6446_v12 = vpop.f32.mrf.mxu3 }
 0x701   : > { %17512 = vst [vmem:[#allocation28_spill] sm:$0xff] %v15011_v55  ;;  %v6447_v44 = vadd.f32 %v14853_v35, %v6446_v12 }
 0x703   : > { %v6528_v38 = vpack.c.bf16 %v6447_v44, %v6447_v44 }
 0x705   : > { %10863 = vmatmul.msk.bf16.gmra.mxu0 %vm6757_vm5, %v14616_v7  ;;  %v7858_v4 = vunpack.c.l.b16 %v6528_v38 }
 0x708   : > { %v6448_v39 = vpop.f32.mrf.mxu3 }
 0x709   : > { %v6449_v24 = vadd.f32 %v14853_v35, %v6448_v39 }
 0x70b   : > { %v6529_v17 = vpack.c.bf16 %v6449_v24, %v6449_v24 }
 0x70d   : > { %v7859_v5 = vunpack.c.l.b16 %v6529_v17  ;;  %10846 = vmatmul.msk.bf16.gmra.mxu3 %vm6757_vm5, %v14588_v46 }
 0x70f   : > { %v15019_v32 = vpack.c.b16 %v7859_v5, %v7858_v4 }
 0x710   : > { %v6451_v11 = vpop.f32.mrf.mxu3 }
 0x711   : > { %17513 = vst [vmem:[#allocation17_spill] sm:$0xff] %v15019_v32  ;;  %v6452_v27 = vadd.f32 %v14853_v35, %v6451_v11 }
 0x713   : > { %v6530_v40 = vpack.c.bf16 %v6452_v27, %v6452_v27 }
 0x715   : > { %10864 = vmatmul.msk.bf16.gmra.mxu0 %vm6757_vm5, %v14640_v9  ;;  %v7860_v63 = vunpack.c.l.b16 %v6530_v40 }
 0x718   : > { %v6453_v8 = vpop.f32.mrf.mxu3 }
 0x719   : > { %v6454_v60 = vadd.f32 %v14853_v35, %v6453_v8 }
 0x71b   : > { %v6531_v30 = vpack.c.bf16 %v6454_v60, %v6454_v60 }
 0x71d   : > { %v7861_v54 = vunpack.c.l.b16 %v6531_v30  ;;  %10847 = vmatmul.msk.bf16.gmra.mxu3 %vm6757_vm5, %v14616_v7 }
 0x71f   : > { %v15027_v6 = vpack.c.b16 %v7861_v54, %v7860_v63 }
 0x720   : > { %v6456_v46 = vpop.f32.mrf.mxu3 }
 0x721   : > { %17514 = vst [vmem:[#allocation30_spill] sm:$0xff] %v15027_v6  ;;  %v6457_v48 = vadd.f32 %v14853_v35, %v6456_v46 }
 0x723   : > { %v6532_v51 = vpack.c.bf16 %v6457_v48, %v6457_v48 }
 0x725   : > { %10865 = vmatmul.msk.bf16.gmra.mxu0 %vm6757_vm5, %v14660_v56  ;;  %v7862_v1 = vunpack.c.l.b16 %v6532_v51 }
 0x728   : > { %v6458_v15 = vpop.f32.mrf.mxu3 }
 0x729   : > { %v6459_v59 = vadd.f32 %v14853_v35, %v6458_v15 }
 0x72b   : > { %v6533_v31 = vpack.c.bf16 %v6459_v59, %v6459_v59 }
 0x72d   : > { %v7863_v14 = vunpack.c.l.b16 %v6533_v31  ;;  %10848 = vmatmul.msk.bf16.gmra.mxu3 %vm6757_vm5, %v14640_v9 }
 0x72f   : > { %v15035_v0 = vpack.c.b16 %v7863_v14, %v7862_v1 }
 0x730   : > { %v6461_v7 = vpop.f32.mrf.mxu3 }
 0x731   : > { %17515 = vst [vmem:[#allocation18_spill] sm:$0xff] %v15035_v0  ;;  %v6462_v19 = vadd.f32 %v14853_v35, %v6461_v7 }
 0x733   : > { %v6534_v25 = vpack.c.bf16 %v6462_v19, %v6462_v19 }
 0x735   : > { %10866 = vmatmul.msk.bf16.gmra.mxu0 %vm6757_vm5, %v14682_v20  ;;  %v7864_v47 = vunpack.c.l.b16 %v6534_v25 }
 0x738   : > { %v6463_v41 = vpop.f32.mrf.mxu3 }
 0x739   : > { %v6464_v28 = vadd.f32 %v14853_v35, %v6463_v41 }
 0x73b   : > { %v6535_v22 = vpack.c.bf16 %v6464_v28, %v6464_v28 }
 0x73d   : > { %v7865_v61 = vunpack.c.l.b16 %v6535_v22  ;;  %10849 = vmatmul.msk.bf16.gmra.mxu3 %vm6757_vm5, %v14660_v56 }
 0x73f   : > { %v15043_v23 = vpack.c.b16 %v7865_v61, %v7864_v47 }
 0x740   : > { %v6466_v9 = vpop.f32.mrf.mxu3 }
 0x741   : > { %17516 = vst [vmem:[#allocation32_spill] sm:$0xff] %v15043_v23  ;;  %v6467_v21 = vadd.f32 %v14853_v35, %v6466_v9 }
 0x743   : > { %v6536_v42 = vpack.c.bf16 %v6467_v21, %v6467_v21 }
 0x745   : > { %10867 = vmatmul.msk.bf16.gmra.mxu0 %vm6757_vm5, %v14704_v45  ;;  %v7866_v44 = vunpack.c.l.b16 %v6536_v42 }
 0x748   : > { %v6468_v37 = vpop.f32.mrf.mxu3 }
 0x749   : > { %v6469_v2 = vadd.f32 %v14853_v35, %v6468_v37 }
 0x74b   : > { %v6537_v12 = vpack.c.bf16 %v6469_v2, %v6469_v2 }
 0x74d   : > { %v7867_v39 = vunpack.c.l.b16 %v6537_v12  ;;  %10850 = vmatmul.msk.bf16.gmra.mxu3 %vm6757_vm5, %v14682_v20 }
 0x74f   : > { %v15051_v38 = vpack.c.b16 %v7867_v39, %v7866_v44 }
 0x750   : > { %v6471_v56 = vpop.f32.mrf.mxu3 }
 0x751   : > { %17517 = vst [vmem:[#allocation19_spill] sm:$0xff] %v15051_v38  ;;  %v6472_v24 = vadd.f32 %v14853_v35, %v6471_v56 }
 0x753   : > { %v6538_v4 = vpack.c.bf16 %v6472_v24, %v6472_v24 }
 0x755   : > { %10868 = vmatmul.msk.bf16.gmra.mxu0 %vm6757_vm5, %v14724_v29  ;;  %v7868_v27 = vunpack.c.l.b16 %v6538_v4 }
 0x758   : > { %v6473_v17 = vpop.f32.mrf.mxu3 }
 0x759   : > { %v6474_v5 = vadd.f32 %v14853_v35, %v6473_v17 }
 0x75b   : > { %v6539_v11 = vpack.c.bf16 %v6474_v5, %v6474_v5 }
 0x75d   : > { %v7869_v8 = vunpack.c.l.b16 %v6539_v11  ;;  %10851 = vmatmul.msk.bf16.gmra.mxu3 %vm6757_vm5, %v14704_v45 }
 0x75f   : > { %v15059_v40 = vpack.c.b16 %v7869_v8, %v7868_v27 }
 0x760   : > { %v15061_v20 = vpop.f32.mrf.mxu3 }
 0x761   : > { %17518 = vst [vmem:[#allocation34_spill] sm:$0xff] %v15059_v40 }
 0x762   : > { %17519 = vst [vmem:[#allocation20_spill] sm:$0xff] %v15061_v20  ;;  %v15063_v60 = vpop.f32.mrf.mxu0 }
 0x765   : > { %10869 = vmatmul.msk.bf16.gmra.mxu0 %vm6757_vm5, %v14746_v13 }
 0x768   : > { %v15067_v30 = vpop.f32.mrf.mxu3 }
 0x769   : > { %17520 = vst [vmem:[#allocation36_spill] sm:$0xff] %v15067_v30 }
 0x76a   : > { %v15069_v63 = vpop.f32.mrf.mxu0 }
 0x76d   : > { %10852 = vmatmul.msk.bf16.gmra.mxu3 %vm6757_vm5, %v14724_v29 }
 0x770   : > { %v15073_v35 = vpop.f32.mrf.mxu3 }
 0x771   : > { %17521 = vst [vmem:[#allocation21_spill] sm:$0xff] %v15073_v35 }
 0x772   : > { %v15075_v54 = vpop.f32.mrf.mxu0 }
 0x775   : > { %10870 = vmatmul.msk.bf16.gmra.mxu0 %vm6757_vm5, %v14764_v57 }
 0x778   : > { %v15079_v45 = vpop.f32.mrf.mxu3 }
 0x779   : > { %17522 = vst [vmem:[#allocation38_spill] sm:$0xff] %v15079_v45 }
 0x77a   : > { %v15081_v46 = vpop.f32.mrf.mxu0 }
 0x77d   : > { %10853 = vmatmul.msk.bf16.gmra.mxu3 %vm6757_vm5, %v14746_v13 }
 0x780   : > { %v15085_v48 = vpop.f32.mrf.mxu3 }
 0x781   : > { %v6990_v15 = vmax.f32 %v15085_v48, %v15063_v60 }
 0x782   : > { %v15089_v29 = vpop.f32.mrf.mxu0 }
 0x783   : > { %6991 = vmax.xlane.f32.xlu1 %v6990_v15 }
 0x785   : > { %10871 = vmatmul.msk.bf16.gmra.mxu0 %vm6757_vm5, %v14797_v16 }
 0x788   : > { %v15093_v51 = vpop.f32.mrf.mxu3 }
 0x789   : > { %v6993_v59 = vmax.f32 %v15093_v51, %v15069_v63 }
 0x78a   : > { %v15097_v31 = vpop.f32.mrf.mxu0 }
 0x78b   : > { %6994 = vmax.xlane.f32.xlu2 %v6993_v59 }
 0x78d   : > { %10854 = vmatmul.msk.bf16.gmra.mxu3 %vm6757_vm5, %v14764_v57 }
 0x790   : > { %v15101_v13 = vpop.f32.mrf.mxu3 }
 0x791   : > { %v6996_v1 = vmax.f32 %v15101_v13, %v15075_v54 }
 0x792   : > { %v15105_v14 = vpop.f32.mrf.mxu0 }
 0x793   : > { %6997 = vmax.xlane.f32.xlu1 %v6996_v1 }
 0x795   : > { %10872 = vmatmul.msk.bf16.gmra.mxu0 %vm6757_vm5, %v14819_v34 }
 0x798   : > { %v15109_v7 = vpop.f32.mrf.mxu3 }
 0x799   : > { %v6999_v19 = vmax.f32 %v15109_v7, %v15081_v46 }
 0x79a   : > { %v15113_v41 = vpop.f32.mrf.mxu0 }
 0x79b   : > { %7000 = vmax.xlane.f32.xlu2 %v6999_v19 }
 0x79d   : > { %10855 = vmatmul.msk.bf16.gmra.mxu3 %vm6757_vm5, %v14797_v16 }
 0x7a0   : > { %v15117_v57 = vpop.f32.mrf.mxu3 }
 0x7a1   : > { %v7002_v25 = vmax.f32 %v15117_v57, %v15089_v29 }
 0x7a2   : > { %v15121_v28 = vpop.f32.mrf.mxu0 }
 0x7a3   : > { %7003 = vmax.xlane.f32.xlu2 %v7002_v25 }
 0x7a5   : > { %10873 = vmatmul.msk.bf16.gmra.mxu0 %vm6757_vm5, %v14842_v52 }
 0x7a8   : > { %v15125_v22 = vpop.f32.mrf.mxu3 }
 0x7a9   : > { %v7005_v47 = vmax.f32 %v15125_v22, %v15097_v31 }
 0x7aa   : > { %v15129_v61 = vpop.f32.mrf.mxu0 }
 0x7ab   : > { %7006 = vmax.xlane.f32.xlu1 %v7005_v47 }
 0x7ad   : > { %10856 = vmatmul.msk.bf16.gmra.mxu3 %vm6757_vm5, %v14819_v34 }
 0x7b0   : > { %v15133_v16 = vpop.f32.mrf.mxu3 }
 0x7b1   : > { %v7008_v9 = vmax.f32 %v15133_v16, %v15105_v14 }
 0x7b2   : > { %v15137_v21 = vpop.f32.mrf.mxu0 }
 0x7b3   : > { %7009 = vmax.xlane.f32.xlu2 %v7008_v9 }
 0x7b5   : > { %10874 = vmatmul.msk.bf16.gmra.mxu0 %vm6757_vm5, %v14869_v62 }
 0x7b8   : > { %v15141_v37 = vpop.f32.mrf.mxu3 }
 0x7b9   : > { %v7011_v42 = vmax.f32 %v15141_v37, %v15113_v41 }
 0x7ba   : > { %v15145_v2 = vpop.f32.mrf.mxu0 }
 0x7bb   : > { %7012 = vmax.xlane.f32.xlu1 %v7011_v42 }
 0x7bd   : > { %10857 = vmatmul.msk.bf16.gmra.mxu3 %vm6757_vm5, %v14842_v52 }
 0x7c0   : > { %v15149_v34 = vpop.f32.mrf.mxu3 }
 0x7c1   : > { %v7014_v12 = vmax.f32 %v15149_v34, %v15121_v28 }
 0x7c2   : > { %v15153_v44 = vpop.f32.mrf.mxu0 }
 0x7c3   : > { %7015 = vmax.xlane.f32.xlu2 %v7014_v12 }
 0x7c5   : > { %10875 = vmatmul.msk.bf16.gmra.mxu0 %vm6757_vm5, %v14889_v58 }
 0x7c8   : > { %v15157_v39 = vpop.f32.mrf.mxu3 }
 0x7c9   : > { %v7017_v56 = vmax.f32 %v15157_v39, %v15129_v61 }
 0x7ca   : > { %v15161_v24 = vpop.f32.mrf.mxu0 }
 0x7cb   : > { %7018 = vmax.xlane.f32.xlu1 %v7017_v56 }
 0x7cd   : > { %10858 = vmatmul.msk.bf16.gmra.mxu3 %vm6757_vm5, %v14869_v62 }
 0x7d0   : > { %v15165_v52 = vpop.f32.mrf.mxu3 }
 0x7d1   : > { %v7020_v17 = vmax.f32 %v15165_v52, %v15137_v21 }
 0x7d2   : > { %v15169_v4 = vpop.f32.mrf.mxu0 }
 0x7d3   : > { %7021 = vmax.xlane.f32.xlu2 %v7020_v17 }
 0x7d5   : > { %10876 = vmatmul.msk.bf16.gmra.mxu0 %vm6757_vm5, %v14902_v43 }
 0x7d8   : > { %v15173_v5 = vpop.f32.mrf.mxu3 }
 0x7d9   : > { %v7023_v11 = vmax.f32 %v15173_v5, %v15145_v2 }
 0x7da   : > { %v15177_v27 = vpop.f32.mrf.mxu0 }
 0x7db   : > { %7024 = vmax.xlane.f32.xlu1 %v7023_v11 }
 0x7dd   : > { %10859 = vmatmul.msk.bf16.gmra.mxu3 %vm6757_vm5, %v14889_v58 }
 0x7e0   : > { %v15181_v62 = vpop.f32.mrf.mxu3 }
 0x7e1   : > { %v7026_v8 = vmax.f32 %v15181_v62, %v15153_v44 }
 0x7e2   : > { %v15185_v15 = vpop.f32.mrf.mxu0 }
 0x7e3   : > { %17523 = vst [vmem:[#allocation23_spill] sm:$0xff] %v15185_v15  ;;  %7027 = vmax.xlane.f32.xlu1 %v7026_v8 }
 0x7e8   : > { %v15187_v59 = vpop.f32.mrf.mxu3 }
 0x7e9   : > { %v7029_v1 = vmax.f32 %v15187_v59, %v15161_v24 }
 0x7ea   : > { %v15191_v19 = vpop.f32.mrf.mxu0 }
 0x7eb   : > { %17524 = vst [vmem:[#allocation40_spill] sm:$0xff] %v15191_v19  ;;  %7030 = vmax.xlane.f32.xlu2 %v7029_v1 }
 0x7ed   : > { %10860 = vmatmul.msk.bf16.gmra.mxu3 %vm6757_vm5, %v14902_v43 }
 0x7f0   : > { %v15195_v58 = vpop.f32.mrf.mxu3 }
 0x7f1   : > { %v7032_v25 = vmax.f32 %v15195_v58, %v15169_v4 }
 0x7f2   : > { %v15199_v47 = vpop.f32.mrf.mxu0 }
 0x7f3   : > { %7033 = vmax.xlane.f32.xlu0 %v7032_v25 }
 0x7f6   : > { %v6992_v9 = vpop.xlane.xlu1 %6991 }
 0x7f7   : > { %v7086_v42 = vsub.f32 %v15085_v48, %v6992_v9  ;;  %v7087_v12 = vsub.f32 %v15063_v60, %v6992_v9 }
 0x7f8   : > { %v15203_v56 = vpop.f32.mrf.mxu3 }
 0x7f9   : > { %v7150_v17 = vmul.f32 1.442695, %v7086_v42  ;;  %v7152_v11 = vmul.f32 1.442695, %v7087_v12  ;;  %v7035_v43 = vmax.f32 %v15203_v56, %v15177_v27 }
 0x7fa   : > { %v15207_v1 = vpop.f32.mrf.mxu0 }
 0x7fb   : > { %11494 = vpow2.f32 %v7150_v17  ;;  %7036 = vmax.xlane.f32.xlu1 %v7035_v43  ;;  %17525 = vst [vmem:[#allocation25_spill] sm:$0xff] %v15207_v1 }
 0x7fc   : > { %11496 = vpow2.f32 %v7152_v11 }
 0x7fe   : > { %v6995_v8 = vpop.xlane.xlu2 %6994 }
 0x7ff   : > { %v7088_v25 = vsub.f32 %v15093_v51, %v6995_v8  ;;  %v7089_v40 = vsub.f32 %v15069_v63, %v6995_v8 }
 0x800   : > { %v15211_v48 = vpop.f32.mrf.mxu3 }
 0x801   : > { %17526 = vst [vmem:[#allocation42_spill] sm:$0xff] %v15211_v48  ;;  %v15213_v60 = vpop.eup %11494  ;;  %v7154_v9 = vmul.f32 1.442695, %v7088_v25  ;;  %v7156_v42 = vmul.f32 1.442695, %v7089_v40  ;;  %v7038_v12 = vmax.f32 %v15211_v48, %v15185_v15 }
 0x802   : > { %v15217_v38 = vpop.eup %11496  ;;  %v15227_v8 = vpop.f32.mrf.mxu0 }
 0x803   : > { %11498 = vpow2.f32 %v7154_v9  ;;  %7039 = vmax.xlane.f32.xlu0 %v7038_v12  ;;  %v7278_v17 = vadd.f32 %v15217_v38, %v15213_v60 }
 0x804   : > { %11500 = vpow2.f32 %v7156_v42 }
 0x805   : > { %7279 = vadd.xlane.f32.xlu1 %v7278_v17 }
 0x806   : > { %v6998_v51 = vpop.xlane.xlu1 %6997 }
 0x807   : > { %v7090_v63 = vsub.f32 %v15101_v13, %v6998_v51  ;;  %v7091_v11 = vsub.f32 %v15075_v54, %v6998_v51 }
 0x808   : > { %v15223_v43 = vpop.f32.mrf.mxu3 }
 0x809   : > { %17527 = vst [vmem:[#allocation27_spill] sm:$0xff] %v15223_v43  ;;  %v15225_v40 = vpop.eup %11498  ;;  %v7041_v25 = vmax.f32 %v15223_v43, %v15191_v19  ;;  %v7158_v12 = vmul.f32 1.442695, %v7090_v63  ;;  %v7160_v17 = vmul.f32 1.442695, %v7091_v11 }
 0x80a   : > { %v15231_v9 = vpop.eup %11500  ;;  %v15241_v6 = vpop.f32.mrf.mxu0 }
 0x80b   : > { %v7281_v42 = vadd.f32 %v15231_v9, %v15225_v40  ;;  %11502 = vpow2.f32 %v7158_v12 }
 0x80c   : > { %11504 = vpow2.f32 %v7160_v17 }
 0x80d   : > { %7282 = vadd.xlane.f32.xlu2 %v7281_v42  ;;  %7042 = vmax.xlane.f32.xlu1 %v7041_v25 }
 0x80e   : > { %v7001_v13 = vpop.xlane.xlu2 %7000 }
 0x80f   : > { %v7092_v54 = vsub.f32 %v15109_v7, %v7001_v13  ;;  %v7093_v51 = vsub.f32 %v15081_v46, %v7001_v13 }
 0x810   : > { %v15237_v23 = vpop.f32.mrf.mxu3 }
 0x811   : > { %v7044_v0 = vmax.f32 %v15237_v23, %v15199_v47  ;;  %v7162_v63 = vmul.f32 1.442695, %v7092_v54  ;;  %v7164_v32 = vmul.f32 1.442695, %v7093_v51  ;;  %v15243_v11 = vpop.eup %11502 }
 0x812   : > { %v15245_v25 = vpop.eup %11504 }
 0x813   : > { %7045 = vmax.xlane.f32.xlu0 %v7044_v0  ;;  %11506 = vpow2.f32 %v7162_v63  ;;  %v7284_v17 = vadd.f32 %v15245_v25, %v15243_v11  ;;  %v15257_v63 = vpop.f32.mrf.mxu0 }
 0x814   : > { %11508 = vpow2.f32 %v7164_v32 }
 0x816   : > { %v7004_v12 = vpop.xlane.xlu2 %7003 }
 0x817   : > { %v7094_v7 = vsub.f32 %v15117_v57, %v7004_v12  ;;  %v7095_v46 = vsub.f32 %v15089_v29, %v7004_v12 }
 0x818   : > { %v15249_v42 = vpop.f32.mrf.mxu3 }
 0x819   : > { %17528 = vst [vmem:[#allocation44_spill] sm:$0xff] %v15249_v42  ;;  %v7047_v0 = vmax.f32 %v15249_v42, %v15207_v1  ;;  %v7166_v13 = vmul.f32 1.442695, %v7094_v7  ;;  %v7168_v54 = vmul.f32 1.442695, %v7095_v46  ;;  %v15255_v51 = vpop.eup %11506 }
 0x81a   : > { %v15259_v57 = vpop.eup %11508 }
 0x81b   : > { %7285 = vadd.xlane.f32.xlu0 %v7284_v17  ;;  %7048 = vmax.xlane.f32.xlu1 %v7047_v0  ;;  %11510 = vpow2.f32 %v7166_v13  ;;  %v7287_v7 = vadd.f32 %v15259_v57, %v15255_v51 }
 0x81c   : > { %11512 = vpow2.f32 %v7168_v54  ;;  %v15273_v54 = vpop.f32.mrf.mxu0 }
 0x81e   : > { %v7007_v32 = vpop.xlane.xlu1 %7006 }
 0x81f   : > { %v7096_v29 = vsub.f32 %v15125_v22, %v7007_v32  ;;  %v7097_v12 = vsub.f32 %v15097_v31, %v7007_v32 }
 0x820   : > { %v15263_v55 = vpop.f32.mrf.mxu3 }
 0x821   : > { %v7050_v46 = vmax.f32 %v15263_v55, %v15227_v8  ;;  %v7170_v17 = vmul.f32 1.442695, %v7096_v29  ;;  %v7172_v0 = vmul.f32 1.442695, %v7097_v12  ;;  %v15269_v36 = vpop.eup %11510 }
 0x822   : > { %v15271_v13 = vpop.eup %11512 }
 0x823   : > { %7288 = vadd.xlane.f32.xlu1 %v7287_v7  ;;  %7051 = vmax.xlane.f32.xlu2 %v7050_v46  ;;  %11514 = vpow2.f32 %v7170_v17  ;;  %v7290_v12 = vadd.f32 %v15271_v13, %v15269_v36 }
 0x824   : > { %11516 = vpow2.f32 %v7172_v0 }
 0x826   : > { %v7010_v22 = vpop.xlane.xlu2 %7009 }
 0x827   : > { %v7098_v31 = vsub.f32 %v15133_v16, %v7010_v22  ;;  %v7099_v32 = vsub.f32 %v15105_v14, %v7010_v22 }
 0x828   : > { %v15277_v33 = vpop.f32.mrf.mxu3 }
 0x829   : > { %v7174_v49 = vmul.f32 1.442695, %v7098_v31  ;;  %v7176_v29 = vmul.f32 1.442695, %v7099_v32  ;;  %v7053_v7 = vmax.f32 %v15277_v33, %v15241_v6  ;;  %v15283_v46 = vpop.eup %11514  ;;  %v15293_v32 = vpop.f32.mrf.mxu0 }
 0x82a   : > { %v15285_v16 = vpop.eup %11516 }
 0x82b   : > { %11518 = vpow2.f32 %v7174_v49  ;;  %7291 = vadd.xlane.f32.xlu2 %v7290_v12  ;;  %7054 = vmax.xlane.f32.xlu0 %v7053_v7 }
 0x82c   : > { %11520 = vpow2.f32 %v7176_v29  ;;  %v7293_v29 = vadd.f32 %v15285_v16, %v15283_v46 }
 0x82e   : > { %v7013_v14 = vpop.xlane.xlu1 %7012 }
 0x82f   : > { %v7100_v17 = vsub.f32 %v15141_v37, %v7013_v14  ;;  %v7101_v0 = vsub.f32 %v15113_v41, %v7013_v14 }
 0x830   : > { %v15289_v22 = vpop.f32.mrf.mxu3 }
 0x831   : > { %v15291_v31 = vpop.eup %11518  ;;  %v7178_v50 = vmul.f32 1.442695, %v7100_v17  ;;  %v7180_v49 = vmul.f32 1.442695, %v7101_v0  ;;  %v7056_v12 = vmax.f32 %v15289_v22, %v15257_v63 }
 0x832   : > { %v15299_v7 = vpop.eup %11520 }
 0x833   : > { %11522 = vpow2.f32 %v7178_v50  ;;  %7294 = vadd.xlane.f32.xlu0 %v7293_v29  ;;  %7057 = vmax.xlane.f32.xlu1 %v7056_v12  ;;  %v7296_v41 = vadd.f32 %v15299_v7, %v15291_v31  ;;  %v15313_v12 = vpop.f32.mrf.mxu0 }
 0x834   : > { %11524 = vpow2.f32 %v7180_v49 }
 0x835   : > { %7297 = vadd.xlane.f32.xlu2 %v7296_v41 }
 0x836   : > { %v7016_v37 = vpop.xlane.xlu2 %7015 }
 0x837   : > { %v7102_v14 = vsub.f32 %v15149_v34, %v7016_v37  ;;  %v7103_v17 = vsub.f32 %v15121_v28, %v7016_v37 }
 0x838   : > { %v15305_v0 = vpop.f32.mrf.mxu3 }
 0x839   : > { %v15307_v3 = vpop.eup %11522  ;;  %v7182_v53 = vmul.f32 1.442695, %v7102_v14  ;;  %v7184_v18 = vmul.f32 1.442695, %v7103_v17  ;;  %v7059_v50 = vmax.f32 %v15305_v0, %v15273_v54 }
 0x83a   : > { %v15311_v29 = vpop.eup %11524 }
 0x83b   : > { %11526 = vpow2.f32 %v7182_v53  ;;  %v7299_v49 = vadd.f32 %v15311_v29, %v15307_v3 }
 0x83c   : > { %11528 = vpow2.f32 %v7184_v18 }
 0x83d   : > { %7300 = vadd.xlane.f32.xlu0 %v7299_v49  ;;  %7060 = vmax.xlane.f32.xlu2 %v7059_v50  ;;  %v15329_v50 = vpop.f32.mrf.mxu0 }
 0x83e   : > { %v7019_v28 = vpop.xlane.xlu1 %7018 }
 0x83f   : > { %v7104_v34 = vsub.f32 %v15157_v39, %v7019_v28  ;;  %v7105_v41 = vsub.f32 %v15129_v61, %v7019_v28 }
 0x840   : > { %v15319_v37 = vpop.f32.mrf.mxu3 }
 0x841   : > { %v15321_v14 = vpop.eup %11526  ;;  %v7186_v17 = vmul.f32 1.442695, %v7104_v34  ;;  %v7188_v10 = vmul.f32 1.442695, %v7105_v41  ;;  %v7062_v53 = vmax.f32 %v15319_v37, %v15293_v32 }
 0x842   : > { %v15325_v26 = vpop.eup %11528 }
 0x843   : > { %11530 = vpow2.f32 %v7186_v17  ;;  %v7302_v18 = vadd.f32 %v15325_v26, %v15321_v14 }
 0x844   : > { %11532 = vpow2.f32 %v7188_v10 }
 0x845   : > { %7303 = vadd.xlane.f32.xlu1 %v7302_v18  ;;  %7063 = vmax.xlane.f32.xlu0 %v7062_v53 }
 0x846   : > { %v7022_v61 = vpop.xlane.xlu2 %7021 }
 0x847   : > { %v7106_v39 = vsub.f32 %v15165_v52, %v7022_v61  ;;  %v7107_v49 = vsub.f32 %v15137_v21, %v7022_v61  ;;  %v15343_v52 = vpop.f32.mrf.mxu0 }
 0x848   : > { %v15333_v28 = vpop.f32.mrf.mxu3 }
 0x849   : > { %v15335_v34 = vpop.eup %11530  ;;  %v7065_v41 = vmax.f32 %v15333_v28, %v15313_v12  ;;  %v7190_v45 = vmul.f32 1.442695, %v7106_v39  ;;  %v7192_v18 = vmul.f32 1.442695, %v7107_v49 }
 0x84a   : > { %v15339_v17 = vpop.eup %11532 }
 0x84b   : > { %v7305_v10 = vadd.f32 %v15339_v17, %v15335_v34  ;;  %11534 = vpow2.f32 %v7190_v45 }
 0x84c   : > { %11536 = vpow2.f32 %v7192_v18 }
 0x84d   : > { %7306 = vadd.xlane.f32.xlu2 %v7305_v10  ;;  %7066 = vmax.xlane.f32.xlu1 %v7065_v41 }
 0x84e   : > { %v7025_v53 = vpop.xlane.xlu1 %7024 }
 0x84f   : > { %v7108_v21 = vsub.f32 %v15173_v5, %v7025_v53  ;;  %v7109_v61 = vsub.f32 %v15145_v2, %v7025_v53  ;;  %v15359_v18 = vpop.f32.mrf.mxu0 }
 0x850   : > { %v15347_v35 = vpop.f32.mrf.mxu3 }
 0x851   : > { %v7068_v39 = vmax.f32 %v15347_v35, %v15329_v50  ;;  %v7194_v30 = vmul.f32 1.442695, %v7108_v21  ;;  %v7196_v20 = vmul.f32 1.442695, %v7109_v61  ;;  %v15351_v49 = vpop.eup %11534 }
 0x852   : > { %v15353_v41 = vpop.eup %11536 }
 0x853   : > { %7069 = vmax.xlane.f32.xlu0 %v7068_v39  ;;  %11538 = vpow2.f32 %v7194_v30  ;;  %v7308_v53 = vadd.f32 %v15353_v41, %v15351_v49 }
 0x854   : > { %11540 = vpow2.f32 %v7196_v20 }
 0x856   : > { %v7028_v10 = vpop.xlane.xlu1 %7027 }
 0x857   : > { %v7110_v45 = vsub.f32 %v15181_v62, %v7028_v10  ;;  %v7111_v5 = vsub.f32 %v15153_v44, %v7028_v10 }
 0x858   : > { %v15357_v2 = vpop.f32.mrf.mxu3 }
 0x859   : > { %v7071_v21 = vmax.f32 %v15357_v2, %v15343_v52  ;;  %v7198_v61 = vmul.f32 1.442695, %v7110_v45  ;;  %v7200_v39 = vmul.f32 1.442695, %v7111_v5  ;;  %v15365_v30 = vpop.eup %11538  ;;  %v15377_v5 = vpop.f32.mrf.mxu0 }
 0x85a   : > { %v15367_v62 = vpop.eup %11540 }
 0x85b   : > { %7309 = vadd.xlane.f32.xlu0 %v7308_v53  ;;  %7072 = vmax.xlane.f32.xlu1 %v7071_v21  ;;  %11542 = vpow2.f32 %v7198_v61  ;;  %v7311_v42 = vadd.f32 %v15367_v62, %v15365_v30 }
 0x85c   : > { %11544 = vpow2.f32 %v7200_v39 }
 0x85e   : > { %v7031_v20 = vpop.xlane.xlu2 %7030 }
 0x85f   : > { %v7112_v44 = vsub.f32 %v15187_v59, %v7031_v20  ;;  %v7113_v10 = vsub.f32 %v15161_v24, %v7031_v20 }
 0x860   : > { %v15371_v1 = vpop.f32.mrf.mxu3 }
 0x861   : > { %v7074_v45 = vmax.f32 %v15371_v1, %v15359_v18  ;;  %v7202_v53 = vmul.f32 1.442695, %v7112_v44  ;;  %v7204_v21 = vmul.f32 1.442695, %v7113_v10  ;;  %v15379_v61 = vpop.eup %11542 }
 0x862   : > { %v15381_v59 = vpop.eup %11544 }
 0x863   : > { %7312 = vadd.xlane.f32.xlu1 %v7311_v42  ;;  %7075 = vmax.xlane.f32.xlu2 %v7074_v45  ;;  %11546 = vpow2.f32 %v7202_v53  ;;  %v7314_v48 = vadd.f32 %v15381_v59, %v15379_v61  ;;  %v15393_v53 = vpop.f32.mrf.mxu0 }
 0x864   : > { %11548 = vpow2.f32 %v7204_v21 }
 0x866   : > { %v7034_v39 = vpop.xlane.xlu0 %7033 }
 0x867   : > { %v7114_v24 = vsub.f32 %v15195_v58, %v7034_v39  ;;  %v7115_v20 = vsub.f32 %v15169_v4, %v7034_v39 }
 0x868   : > { %v15385_v15 = vpop.f32.mrf.mxu3 }
 0x869   : > { %v7077_v42 = vmax.f32 %v15385_v15, %v15377_v5  ;;  %v7206_v44 = vmul.f32 1.442695, %v7114_v24  ;;  %v7208_v10 = vmul.f32 1.442695, %v7115_v20  ;;  %v15391_v45 = vpop.eup %11546 }
 0x86a   : > { %v15395_v58 = vpop.eup %11548 }
 0x86b   : > { %7315 = vadd.xlane.f32.xlu2 %v7314_v48  ;;  %7078 = vmax.xlane.f32.xlu0 %v7077_v42  ;;  %11550 = vpow2.f32 %v7206_v44  ;;  %v7317_v48 = vadd.f32 %v15395_v58, %v15391_v45  ;;  %v15409_v42 = vpop.f32.mrf.mxu0 }
 0x86c   : > { %11552 = vpow2.f32 %v7208_v10 }
 0x86e   : > { %v7037_v21 = vpop.xlane.xlu1 %7036 }
 0x86f   : > { %v7116_v4 = vsub.f32 %v15203_v56, %v7037_v21  ;;  %v7117_v39 = vsub.f32 %v15177_v27, %v7037_v21 }
 0x870   : > { %v15399_v19 = vpop.f32.mrf.mxu3 }
 0x871   : > { %v7210_v43 = vmul.f32 1.442695, %v7116_v4  ;;  %v7212_v24 = vmul.f32 1.442695, %v7117_v39  ;;  %v7080_v20 = vmax.f32 %v15399_v19, %v15393_v53  ;;  %v15405_v56 = vpop.eup %11550 }
 0x872   : > { %17529 = vst [vmem:[#allocation29_spill] sm:$0xff] %v15405_v56  ;;  %v15407_v27 = vpop.eup %11552 }
 0x873   : > { %11554 = vpow2.f32 %v7210_v43  ;;  %7318 = vadd.xlane.f32.xlu0 %v7317_v48  ;;  %7081 = vmax.xlane.f32.xlu2 %v7080_v20  ;;  %17530 = vst [vmem:[#allocation46_spill] sm:$0xff] %v15407_v27  ;;  %v7320_v4 = vadd.f32 %v15407_v27, %v15405_v56 }
 0x874   : > { %11556 = vpow2.f32 %v7212_v24 }
 0x876   : > { %v15426_v48 = vpop.xlane.xlu0 %7039 }
 0x877   : > { %17532 = vst [vmem:[#allocation48_spill] sm:$0xff] %v15426_v48 }
 0x878   : > { %v7280_v44 = vpop.xlane.xlu1 %7279  ;;  %v15411_v10 = vpop.f32.mrf.mxu3 }
 0x879   : > { %v15413_v21 = vpop.eup %11554  ;;  %11558 = vrcp.f32 %v7280_v44  ;;  %v7083_v43 = vmax.f32 %v15411_v10, %v15409_v42 }
 0x87a   : > { %v15420_v39 = vpop.eup %11556 }
 0x87b   : > { %17531 = vst [vmem:[#allocation31_spill] sm:$0xff] %v15420_v39  ;;  %7321 = vadd.xlane.f32.xlu2 %v7320_v4  ;;  %7084 = vmax.xlane.f32.xlu1 %v7083_v43  ;;  %v7323_v24 = vadd.f32 %v15420_v39, %v15413_v21 }
 0x87d   : > { %7324 = vadd.xlane.f32.xlu0 %v7323_v24 }
 0x87f   : > { %v11559_v20 = vpop.eup %11558 }
 0x880   : > { %v7283_v44 = vpop.xlane.xlu2 %7282  ;;  %v15429_v27 = vmul.f32 %v11559_v20, %v15213_v60  ;;  %v15432_v56 = vmul.f32 %v11559_v20, %v15217_v38  ;;  %v15440_v4 = vpop.xlane.xlu1 %7042 }
 0x881   : > { %11560 = vrcp.f32 %v7283_v44  ;;  %17535 = vst [vmem:[#allocation35_spill] sm:$0xff] %v15440_v4 }
 0x882   : > { %17533 = vst [vmem:[#allocation33_spill] sm:$0xff] %v15429_v27 }
 0x883   : > { %17534 = vst [vmem:[#allocation50_spill] sm:$0xff] %v15432_v56 }
 0x884   : > { %7470 = vst [vmem:[%s15434_s3] sm:$0xff] %v15429_v27 }
 0x885   : > { %7471 = vst [vmem:[%s15434_s3 + $0x8] sm:$0xff] %v15432_v56 }
 0x886   : > { %v15442_v43 = vpop.xlane.xlu0 %7045 }
 0x887   : > { %v11561_v60 = vpop.eup %11560 }
 0x888   : > { %v15445_v24 = vmul.f32 %v11561_v60, %v15225_v40  ;;  %v15448_v38 = vmul.f32 %v11561_v60, %v15231_v9  ;;  %v6595_v40 = vld [vmem:[%s17048_s15] sm:$0xff] }
 0x88a   : > { %17536 = vst [vmem:[#allocation52_spill] sm:$0xff] %v15445_v24 }
 0x88b   : > { %17537 = vst [vmem:[#allocation37_spill] sm:$0xff] %v15448_v38 }
 0x88c   : > { %7472 = vst [vmem:[%s15434_s3 + $0x10] sm:$0xff] %v15445_v24 }
 0x88d   : > { %7473 = vst [vmem:[%s15434_s3 + $0x18] sm:$0xff] %v15448_v38 }
 0x88e   : > { %v7286_v48 = vpop.xlane.xlu0 %7285  ;;  %v15458_v4 = vpop.xlane.xlu1 %7048 }
 0x88f   : > { %11562 = vrcp.f32 %v7286_v48 }
 0x894   : > { %6601 = vperm.xlu1 %11487, %v6595_v40  }
 0x895   : > { %v11563_v9 = vpop.eup %11562 }
 0x896   : > { %v7289_v60 = vpop.xlane.xlu1 %7288  ;;  %v15463_v39 = vpop.xlane.xlu2 %7051  ;;  %v15466_v20 = vmul.f32 %v11563_v9, %v15243_v11  ;;  %v15469_v44 = vmul.f32 %v11563_v9, %v15245_v25 }
 0x897   : > { %11564 = vrcp.f32 %v7289_v60 }
 0x898   : > { %17538 = vst [vmem:[#allocation54_spill] sm:$0xff] %v15469_v44 }
 0x899   : > { %7474 = vst [vmem:[%s15434_s3 + $0x20] sm:$0xff] %v15466_v20 }
 0x89a   : > { %7475 = vst [vmem:[%s15434_s3 + $0x28] sm:$0xff] %v15469_v44 }
 0x89d   : > { %v11565_v48 = vpop.eup %11564 }
 0x89e   : > { %v7292_v56 = vpop.xlane.xlu2 %7291  ;;  %v15475_v38 = vpop.xlane.xlu0 %7054  ;;  %v15478_v40 = vmul.f32 %v11565_v48, %v15255_v51  ;;  %v15481_v27 = vmul.f32 %v11565_v48, %v15259_v57 }
 0x89f   : > { %11566 = vrcp.f32 %v7292_v56 }
 0x8a0   : > { %7476 = vst [vmem:[%s15434_s3 + $0x30] sm:$0xff] %v15478_v40 }
 0x8a1   : > { %7477 = vst [vmem:[%s15434_s3 + $0x38] sm:$0xff] %v15481_v27 }
 0x8a5   : > { %v11567_v9 = vpop.eup %11566 }
 0x8a6   : > { %v7295_v60 = vpop.xlane.xlu0 %7294  ;;  %v7058_v51 = vpop.xlane.xlu1 %7057  ;;  %v15492_v24 = vmul.f32 %v11567_v9, %v15269_v36  ;;  %v15495_v57 = vmul.f32 %v11567_v9, %v15271_v13 }
 0x8a7   : > { %11568 = vrcp.f32 %v7295_v60  ;;  %v7130_v56 = vsub.f32 %v15289_v22, %v7058_v51  ;;  %v7131_v48 = vsub.f32 %v15257_v63, %v7058_v51 }
 0x8a8   : > { %v7298_v11 = vpop.xlane.xlu2 %7297  ;;  %7478 = vst [vmem:[%s15434_s3 + $0x40] sm:$0xff] %v15492_v24 }
 0x8a9   : > { %v7238_v25 = vmul.f32 1.442695, %v7130_v56  ;;  %v7240_v44 = vmul.f32 1.442695, %v7131_v48  ;;  %11570 = vrcp.f32 %v7298_v11  ;;  %7479 = vst [vmem:[%s15434_s3 + $0x48] sm:$0xff] %v15495_v57 }
 0x8ab   : > { %11572 = vpow2.f32 %v7238_v25 }
 0x8ac   : > { %11574 = vpow2.f32 %v7240_v44 }
 0x8ad   : > { %v11569_v36 = vpop.eup %11568 }
 0x8ae   : > { %v15504_v13 = vmul.f32 %v11569_v36, %v15283_v46  ;;  %v15507_v22 = vmul.f32 %v11569_v36, %v15285_v16 }
 0x8af   : > { %v11571_v63 = vpop.eup %11570 }
 0x8b0   : > { %v7301_v9 = vpop.xlane.xlu0 %7300  ;;  %v7061_v60 = vpop.xlane.xlu2 %7060  ;;  %v15510_v51 = vmul.f32 %v11571_v63, %v15291_v31  ;;  %v15513_v11 = vmul.f32 %v11571_v63, %v15299_v7  ;;  %7480 = vst [vmem:[%s15434_s3 + $0x50] sm:$0xff] %v15504_v13 }
 0x8b1   : > { %v15521_v16 = vpop.eup %11572  ;;  %11576 = vrcp.f32 %v7301_v9  ;;  %v7132_v25 = vsub.f32 %v15305_v0, %v7061_v60  ;;  %v7133_v56 = vsub.f32 %v15273_v54, %v7061_v60  ;;  %7481 = vst [vmem:[%s15434_s3 + $0x58] sm:$0xff] %v15507_v22 }
 0x8b2   : > { %v15527_v31 = vpop.eup %11574  ;;  %7482 = vst [vmem:[%s15434_s3 + $0x60] sm:$0xff] %v15510_v51 }
 0x8b3   : > { %v7242_v7 = vmul.f32 1.442695, %v7132_v25  ;;  %v7244_v48 = vmul.f32 1.442695, %v7133_v56  ;;  %v7344_v36 = vadd.f32 %v15527_v31, %v15521_v16  ;;  %7483 = vst [vmem:[%s15434_s3 + $0x68] sm:$0xff] %v15513_v11 }
 0x8b5   : > { %11578 = vpow2.f32 %v7242_v7  ;;  %7345 = vadd.xlane.f32.xlu2 %v7344_v36 }
 0x8b6   : > { %11580 = vpow2.f32 %v7244_v48 }
 0x8b7   : > { %v11577_v0 = vpop.eup %11576 }
 0x8b8   : > { %v7304_v54 = vpop.xlane.xlu1 %7303  ;;  %v7064_v63 = vpop.xlane.xlu0 %7063  ;;  %v15536_v9 = vmul.f32 %v11577_v0, %v15307_v3  ;;  %v15539_v60 = vmul.f32 %v11577_v0, %v15311_v29 }
 0x8b9   : > { %11582 = vrcp.f32 %v7304_v54  ;;  %v7134_v25 = vsub.f32 %v15319_v37, %v7064_v63  ;;  %v7135_v56 = vsub.f32 %v15293_v32, %v7064_v63 }
 0x8ba   : > { %7484 = vst [vmem:[%s15434_s3 + $0x70] sm:$0xff] %v15536_v9 }
 0x8bb   : > { %v15549_v36 = vpop.eup %11578  ;;  %v7246_v3 = vmul.f32 1.442695, %v7134_v25  ;;  %v7248_v44 = vmul.f32 1.442695, %v7135_v56  ;;  %7485 = vst [vmem:[%s15434_s3 + $0x78] sm:$0xff] %v15539_v60 }
 0x8bc   : > { %v15553_v29 = vpop.eup %11580 }
 0x8bd   : > { %11584 = vpow2.f32 %v7246_v3  ;;  %v7347_v32 = vadd.f32 %v15553_v29, %v15549_v36 }
 0x8be   : > { %11586 = vpow2.f32 %v7248_v44 }
 0x8bf   : > { %v11583_v37 = vpop.eup %11582  ;;  %7348 = vadd.xlane.f32.xlu0 %v7347_v32 }
 0x8c0   : > { %v7307_v0 = vpop.xlane.xlu2 %7306  ;;  %v7067_v54 = vpop.xlane.xlu1 %7066  ;;  %v15558_v63 = vmul.f32 %v11583_v37, %v15321_v14  ;;  %v15561_v25 = vmul.f32 %v11583_v37, %v15325_v26 }
 0x8c1   : > { %11588 = vrcp.f32 %v7307_v0  ;;  %v7136_v56 = vsub.f32 %v15333_v28, %v7067_v54  ;;  %v7137_v3 = vsub.f32 %v15313_v12, %v7067_v54 }
 0x8c2   : > { %7486 = vst [vmem:[%s15434_s3 + $0x80] sm:$0xff] %v15558_v63 }
 0x8c3   : > { %v15567_v46 = vpop.eup %11584  ;;  %v7250_v44 = vmul.f32 1.442695, %v7136_v56  ;;  %v7252_v32 = vmul.f32 1.442695, %v7137_v3  ;;  %7487 = vst [vmem:[%s15434_s3 + $0x88] sm:$0xff] %v15561_v25 }
 0x8c4   : > { %v15571_v48 = vpop.eup %11586 }
 0x8c5   : > { %11590 = vpow2.f32 %v7250_v44  ;;  %v7350_v26 = vadd.f32 %v15571_v48, %v15567_v46 }
 0x8c6   : > { %11592 = vpow2.f32 %v7252_v32  ;;  %v7070_v14 = vpop.xlane.xlu0 %7069 }
 0x8c7   : > { %v11589_v28 = vpop.eup %11588  ;;  %7351 = vadd.xlane.f32.xlu0 %v7350_v26  ;;  %v7138_v12 = vsub.f32 %v15347_v35, %v7070_v14  ;;  %v7139_v37 = vsub.f32 %v15329_v50, %v7070_v14 }
 0x8c8   : > { %v15578_v0 = vmul.f32 %v11589_v28, %v15335_v34  ;;  %v15581_v54 = vmul.f32 %v11589_v28, %v15339_v17 }
 0x8c9   : > { %v7254_v56 = vmul.f32 1.442695, %v7138_v12  ;;  %v7256_v3 = vmul.f32 1.442695, %v7139_v37  ;;  %v7126_v37 = vsub.f32 %v15263_v55, %v15463_v39 }
 0x8ca   : > { %7488 = vst [vmem:[%s15434_s3 + $0x90] sm:$0xff] %v15578_v0 }
 0x8cb   : > { %v15589_v26 = vpop.eup %11590  ;;  %11594 = vpow2.f32 %v7254_v56  ;;  %7489 = vst [vmem:[%s15434_s3 + $0x98] sm:$0xff] %v15581_v54 }
 0x8cc   : > { %v15593_v35 = vpop.eup %11592  ;;  %11596 = vpow2.f32 %v7256_v3  ;;  %v7127_v3 = vsub.f32 %v15227_v8, %v15463_v39 }
 0x8cd   : > { %v7353_v50 = vadd.f32 %v15593_v35, %v15589_v26 }
 0x8ce   : > { %v7310_v34 = vpop.xlane.xlu0 %7309  ;;  %v7073_v17 = vpop.xlane.xlu1 %7072 }
 0x8cf   : > { %7354 = vadd.xlane.f32.xlu1 %v7353_v50  ;;  %11598 = vrcp.f32 %v7310_v34  ;;  %v7140_v14 = vsub.f32 %v15357_v2, %v7073_v17  ;;  %v7141_v28 = vsub.f32 %v15343_v52, %v7073_v17  ;;  %v7230_v52 = vmul.f32 1.442695, %v7126_v37 }
 0x8d0   : > { %v7232_v34 = vmul.f32 1.442695, %v7127_v3  ;;  %v7128_v37 = vsub.f32 %v15277_v33, %v15475_v38 }
 0x8d1   : > { %v15599_v12 = vpop.eup %11594  ;;  %v7258_v56 = vmul.f32 1.442695, %v7140_v14  ;;  %v7260_v7 = vmul.f32 1.442695, %v7141_v28 }
 0x8d2   : > { %v15603_v32 = vpop.eup %11596 }
 0x8d3   : > { %11600 = vpow2.f32 %v7258_v56  ;;  %v7356_v50 = vadd.f32 %v15603_v32, %v15599_v12 }
 0x8d4   : > { %11602 = vpow2.f32 %v7260_v7 }
 0x8d5   : > { %v11599_v2 = vpop.eup %11598  ;;  %7357 = vadd.xlane.f32.xlu2 %v7356_v50  ;;  %v7234_v50 = vmul.f32 1.442695, %v7128_v37 }
 0x8d6   : > { %v7313_v17 = vpop.xlane.xlu1 %7312  ;;  %v7076_v55 = vpop.xlane.xlu2 %7075  ;;  %v15610_v14 = vmul.f32 %v11599_v2, %v15351_v49  ;;  %v15613_v28 = vmul.f32 %v11599_v2, %v15353_v41 }
 0x8d7   : > { %11604 = vrcp.f32 %v7313_v17  ;;  %v7142_v8 = vsub.f32 %v15371_v1, %v7076_v55  ;;  %v7143_v39 = vsub.f32 %v15359_v18, %v7076_v55  ;;  %v7129_v1 = vsub.f32 %v15241_v6, %v15475_v38 }
 0x8d8   : > { %7490 = vst [vmem:[%s15434_s3 + $0xa0] sm:$0xff] %v15610_v14  ;;  %11606 = vpow2.f32 %v7230_v52 }
 0x8d9   : > { %v15619_v7 = vpop.eup %11600  ;;  %v7262_v56 = vmul.f32 1.442695, %v7142_v8  ;;  %v7264_v3 = vmul.f32 1.442695, %v7143_v39  ;;  %7491 = vst [vmem:[%s15434_s3 + $0xa8] sm:$0xff] %v15613_v28  ;;  %11608 = vpow2.f32 %v7232_v34 }
 0x8da   : > { %v15625_v49 = vpop.eup %11602  ;;  %v7236_v33 = vmul.f32 1.442695, %v7129_v1 }
 0x8db   : > { %11610 = vpow2.f32 %v7262_v56  ;;  %v7359_v41 = vadd.f32 %v15625_v49, %v15619_v7 }
 0x8dc   : > { %11612 = vpow2.f32 %v7264_v3 }
 0x8dd   : > { %v11605_v18 = vpop.eup %11604  ;;  %7360 = vadd.xlane.f32.xlu0 %v7359_v41 }
 0x8de   : > { %v7316_v2 = vpop.xlane.xlu2 %7315  ;;  %v7079_v52 = vpop.xlane.xlu0 %7078  ;;  %v15632_v17 = vmul.f32 %v11605_v18, %v15365_v30  ;;  %v15635_v34 = vmul.f32 %v11605_v18, %v15367_v62  ;;  %v7122_v30 = vsub.f32 %v15237_v23, %v15442_v43 }
 0x8df   : > { %v15637_v6 = vpop.eup %11606  ;;  %11614 = vrcp.f32 %v7316_v2  ;;  %v7144_v38 = vsub.f32 %v15385_v15, %v7079_v52  ;;  %v7145_v55 = vsub.f32 %v15377_v5, %v7079_v52  ;;  %v7123_v15 = vsub.f32 %v15199_v47, %v15442_v43 }
 0x8e0   : > { %v15641_v8 = vpop.eup %11608  ;;  %7492 = vst [vmem:[%s15434_s3 + $0xb0] sm:$0xff] %v15632_v17  ;;  %11616 = vpow2.f32 %v7234_v50  ;;  %v7222_v1 = vmul.f32 1.442695, %v7122_v30 }
 0x8e1   : > { %v15645_v39 = vpop.eup %11610  ;;  %v7266_v37 = vmul.f32 1.442695, %v7144_v38  ;;  %v7268_v62 = vmul.f32 1.442695, %v7145_v55  ;;  %7493 = vst [vmem:[%s15434_s3 + $0xb8] sm:$0xff] %v15635_v34  ;;  %11618 = vpow2.f32 %v7236_v33  ;;  %v7338_v5 = vadd.f32 %v15641_v8, %v15637_v6 }
 0x8e2   : > { %v15651_v56 = vpop.eup %11612  ;;  %v7224_v41 = vmul.f32 1.442695, %v7123_v15 }
 0x8e3   : > { %11620 = vpow2.f32 %v7266_v37  ;;  %v7362_v3 = vadd.f32 %v15651_v56, %v15645_v39 }
 0x8e4   : > { %11622 = vpow2.f32 %v7268_v62 }
 0x8e5   : > { %v11615_v23 = vpop.eup %11614  ;;  %7339 = vadd.xlane.f32.xlu0 %v7338_v5  ;;  %7363 = vadd.xlane.f32.xlu1 %v7362_v3 }
 0x8e6   : > { %v7319_v18 = vpop.xlane.xlu0 %7318  ;;  %v7082_v50 = vpop.xlane.xlu2 %7081  ;;  %v15660_v47 = vmul.f32 %v11615_v23, %v15379_v61  ;;  %v15663_v43 = vmul.f32 %v11615_v23, %v15381_v59 }
 0x8e7   : > { %v15665_v33 = vpop.eup %11616  ;;  %11624 = vrcp.f32 %v7319_v18  ;;  %v7146_v2 = vsub.f32 %v15399_v19, %v7082_v50  ;;  %v7147_v52 = vsub.f32 %v15393_v53, %v7082_v50 }
 0x8e8   : > { %v15669_v38 = vpop.eup %11618  ;;  %7494 = vst [vmem:[%s15434_s3 + $0xc0] sm:$0xff] %v15660_v47  ;;  %11626 = vpow2.f32 %v7222_v1 }
 0x8e9   : > { %v15673_v55 = vpop.eup %11620  ;;  %v7270_v30 = vmul.f32 1.442695, %v7146_v2  ;;  %v7272_v61 = vmul.f32 1.442695, %v7147_v52  ;;  %7495 = vst [vmem:[%s15434_s3 + $0xc8] sm:$0xff] %v15663_v43  ;;  %11628 = vpow2.f32 %v7224_v41  ;;  %v7341_v19 = vadd.f32 %v15669_v38, %v15665_v33 }
 0x8ea   : > { %v15677_v59 = vpop.eup %11622 }
 0x8eb   : > { %11630 = vpow2.f32 %v7270_v30  ;;  %v7365_v53 = vadd.f32 %v15677_v59, %v15673_v55 }
 0x8ec   : > { %11632 = vpow2.f32 %v7272_v61  ;;  %v17539_v61 = vld [vmem:[#allocation29_spill] sm:$0xff] }
 0x8ed   : > { %v11625_v37 = vpop.eup %11624  ;;  %7342 = vadd.xlane.f32.xlu0 %v7341_v19  ;;  %7366 = vadd.xlane.f32.xlu2 %v7365_v53  ;;  %v17540_v53 = vld [vmem:[#allocation46_spill] sm:$0xff] }
 0x8ee   : > { %v7322_v62 = vpop.xlane.xlu2 %7321  ;;  %v7085_v15 = vpop.xlane.xlu1 %7084  ;;  %v7432_v5 = vmul.f32 %v11625_v37, %v15391_v45  ;;  %v7433_v3 = vmul.f32 %v11625_v37, %v15395_v58 }
 0x8ef   : > { %v15685_v23 = vpop.eup %11626  ;;  %11634 = vrcp.f32 %v7322_v62  ;;  %v7148_v1 = vsub.f32 %v15411_v10, %v7085_v15  ;;  %v7149_v41 = vsub.f32 %v15409_v42, %v7085_v15 }
 0x8f0   : > { %v15689_v18 = vpop.eup %11628  ;;  %v7325_v50 = vpop.xlane.xlu0 %7324  ;;  %7496 = vst [vmem:[%s15434_s3 + $0xd0] sm:$0xff] %v7432_v5 }
 0x8f1   : > { %v15692_v2 = vpop.eup %11630  ;;  %v7274_v52 = vmul.f32 1.442695, %v7148_v1  ;;  %v7276_v30 = vmul.f32 1.442695, %v7149_v41  ;;  %11636 = vrcp.f32 %v7325_v50  ;;  %7497 = vst [vmem:[%s15434_s3 + $0xd8] sm:$0xff] %v7433_v3  ;;  %v7332_v58 = vadd.f32 %v15689_v18, %v15685_v23  ;;  %v17541_v1 = vld [vmem:[#allocation31_spill] sm:$0xff] }
 0x8f2   : > { %v15695_v45 = vpop.eup %11632 }
 0x8f3   : > { %11638 = vpow2.f32 %v7274_v52  ;;  %v7368_v42 = vadd.f32 %v15695_v45, %v15692_v2 }
 0x8f4   : > { %11640 = vpow2.f32 %v7276_v30 }
 0x8f5   : > { %v11635_v10 = vpop.eup %11634  ;;  %7333 = vadd.xlane.f32.xlu0 %v7332_v58  ;;  %7369 = vadd.xlane.f32.xlu1 %v7368_v42  ;;  %v7550_v42 = vpack.c.bf16 %v7432_v5, %v15660_v47  ;;  %v6596_v47 = vld [vmem:[%s17048_s15 + $0x8] sm:$0xff]  ;;  %v17547_v5 = vld [vmem:[#allocation27_spill] sm:$0xff] }
 0x8f6   : > { %v7434_v19 = vmul.f32 %v11635_v10, %v17539_v61  ;;  %v7435_v37 = vmul.f32 %v11635_v10, %v17540_v53  ;;  %v6598_v10 = vld [vmem:[%s17048_s15 + $0x18] sm:$0xff]  ;;  %v7548_v61 = vpack.c.bf16 %v15632_v17, %v15610_v14  ;;  %v17543_v14 = vpack.c.bf16 %v15581_v54, %v15561_v25  ;;  %v17548_v53 = vld [vmem:[#allocation40_spill] sm:$0xff] }
 0x8f7   : > { %v11637_v62 = vpop.eup %11636  ;;  %v17545_v17 = vpack.c.bf16 %v15539_v60, %v15513_v11  ;;  %v17553_v11 = vld [vmem:[#allocation23_spill] sm:$0xff] }
 0x8f8   : > { %7498 = vst [vmem:[%s15434_s3 + $0xe0] sm:$0xff] %v7434_v19  ;;  %v7436_v15 = vmul.f32 %v11637_v62, %v15413_v21  ;;  %v7437_v41 = vmul.f32 %v11637_v62, %v17541_v1  ;;  %v7551_v21 = vpack.c.bf16 %v7433_v3, %v15663_v43  ;;  %v17542_v43 = vpack.c.bf16 %v15578_v0, %v15558_v63  ;;  %v17550_v62 = vld [vmem:[#allocation42_spill] sm:$0xff] }
 0x8f9   : > { %v15706_v50 = vpop.eup %11638  ;;  %7499 = vst [vmem:[%s15434_s3 + $0xe8] sm:$0xff] %v7435_v37 }
 0x8fa   : > { %v15709_v52 = vpop.eup %11640  ;;  %7500 = vst [vmem:[%s15434_s3 + $0xf0] sm:$0xff] %v7436_v15  ;;  %v7552_v30 = vpack.c.bf16 %v7436_v15, %v7434_v19  ;;  %v7553_v44 = vpack.c.bf16 %v7437_v41, %v7435_v37  ;;  %v7549_v19 = vpack.c.bf16 %v15635_v34, %v15613_v28  ;;  %v17544_v28 = vpack.c.bf16 %v15536_v9, %v15510_v51  ;;  %v17546_v34 = vld [vmem:[#allocation35_spill] sm:$0xff]  ;;  %v17549_v37 = vld [vmem:[#allocation48_spill] sm:$0xff] }
 0x8fb   : > { %7501 = vst [vmem:[%s15434_s3 + $0xf8] sm:$0xff] %v7437_v41  ;;  %v7371_v58 = vadd.f32 %v15709_v52, %v15706_v50  ;;  %v7120_v3 = vsub.f32 %v17547_v5, %v17546_v34  ;;  %v7121_v63 = vsub.f32 %v17548_v53, %v17546_v34  ;;  %v7118_v25 = vsub.f32 %v17550_v62, %v17549_v37 }
 0x8fc   : > { %7570 = vmatpush.bf16.xpose.msra.mxu2 %v7552_v30  ;;  %7589 = vmatpush.bf16.xpose.msrb.mxu1 %v7553_v44  ;;  %v6597_v44 = vld [vmem:[%s17048_s15 + $0x10] sm:$0xff]  ;;  %v17551_v15 = vpack.c.bf16 %v15504_v13, %v15492_v24  ;;  %v17552_v51 = vpack.c.bf16 %v15507_v22, %v15495_v57  ;;  %v7119_v9 = vsub.f32 %v17553_v11, %v17549_v37  ;;  %v17554_v30 = vld [vmem:[#allocation44_spill] sm:$0xff] }
 0x8fd   : > { %7372 = vadd.xlane.f32.xlu2 %v7371_v58  ;;  %v7218_v0 = vmul.f32 1.442695, %v7120_v3  ;;  %v7220_v54 = vmul.f32 1.442695, %v7121_v63  ;;  %v7214_v60 = vmul.f32 1.442695, %v7118_v25  ;;  %v7124_v58 = vsub.f32 %v17554_v30, %v15458_v4 }
 0x8fe   : > { %v7216_v41 = vmul.f32 1.442695, %v7119_v9  ;;  %v17556_v57 = vpack.c.bf16 %v15478_v40, %v15466_v20  ;;  %v17557_v13 = vld [vmem:[#allocation54_spill] sm:$0xff] }
 0x8ff   : > { %11642 = vpow2.f32 %v7218_v0  ;;  %v17558_v22 = vpack.c.bf16 %v15481_v27, %v17557_v13 }
 0x900   : > { %11644 = vpow2.f32 %v7220_v54 }
 0x904   : > { %7571 = vmatpush.bf16.xpose.msra.mxu2 %v7550_v42  ;;  %7590 = vmatpush.bf16.xpose.msrb.mxu1 %v7551_v21  ;;  %v17555_v42 = vld [vmem:[#allocation25_spill] sm:$0xff] }
 0x905   : > { %v7125_v24 = vsub.f32 %v17555_v42, %v15458_v4  ;;  %v15766_v21 = vpop.eup %11642 }
 0x906   : > { %v15798_v0 = vpop.permute.xlu1 %6601 }
 0x909   : > { %6616 = vperm.xlu0 %11486, %v6598_v10   ;;  %v7226_v10 = vmul.f32 1.442695, %v7124_v58 }
 0x90c   : > { %7572 = vmatpush.bf16.xpose.msra.mxu2 %v7548_v61  ;;  %7591 = vmatpush.bf16.xpose.msrb.mxu1 %v7549_v19  ;;  %v15768_v61 = vpop.eup %11644  ;;  %v7228_v19 = vmul.f32 1.442695, %v7125_v24  ;;  %v7685_v24 = vld [vmem:[%s17046_s13] sm:$0xff] }
 0x90d   : > { %v7329_v27 = vadd.f32 %v15768_v61, %v15766_v21 }
 0x90e   : > { %6611 = vperm.xlu1 %11487, %v6597_v44  }
 0x914   : > { %7573 = vmatpush.bf16.xpose.msra.mxu2 %v17542_v43  ;;  %7592 = vmatpush.bf16.xpose.msrb.mxu1 %v17543_v14 }
 0x915   : > { %6606 = vperm.xlu2 %11488, %v6596_v47  }
 0x91c   : > { %7574 = vmatpush.bf16.xpose.msra.mxu2 %v17544_v28  ;;  %7593 = vmatpush.bf16.xpose.msrb.mxu1 %v17545_v17  ;;  %v17562_v28 = vld [vmem:[#allocation37_spill] sm:$0xff]  ;;  %v17563_v17 = vld [vmem:[#allocation50_spill] sm:$0xff] }
 0x91d   : > { %v17564_v34 = vpack.c.bf16 %v17562_v28, %v17563_v17 }
 0x924   : > { %7575 = vmatpush.bf16.xpose.msra.mxu2 %v17551_v15  ;;  %7594 = vmatpush.bf16.xpose.msrb.mxu1 %v17552_v51 }
 0x928   : > { %v7346_v1 = vpop.xlane.xlu2 %7345 }
 0x929   : > { %11646 = vrcp.f32 %v7346_v1 }
 0x92a   : > { %11648 = vpow2.f32 %v7214_v60 }
 0x92b   : > { %11650 = vpow2.f32 %v7216_v41 }
 0x92c   : > { %7576 = vmatpush.bf16.xpose.msra.mxu2 %v17556_v57  ;;  %7595 = vmatpush.bf16.xpose.msrb.mxu1 %v17558_v22  ;;  %11652 = vpow2.f32 %v7226_v10 }
 0x92d   : > { %11654 = vpow2.f32 %v7228_v19 }
 0x92f   : > { %v11647_v44 = vpop.eup %11646 }
 0x930   : > { %v15771_v4 = vmul.f32 %v11647_v44, %v15521_v16  ;;  %v15774_v20 = vmul.f32 %v11647_v44, %v15527_v31  ;;  %v15778_v40 = vpop.eup %11648  ;;  %v17559_v16 = vld [vmem:[#allocation52_spill] sm:$0xff]  ;;  %v17560_v31 = vld [vmem:[#allocation33_spill] sm:$0xff] }
 0x931   : > { %v15782_v43 = vpop.eup %11650  ;;  %v17561_v14 = vpack.c.bf16 %v17559_v16, %v17560_v31 }
 0x932   : > { %v7349_v47 = vpop.xlane.xlu0 %7348  ;;  %7514 = vst [vmem:[%s15434_s3 + $0x160] sm:$0xff] %v15771_v4  ;;  %v7326_v5 = vadd.f32 %v15782_v43, %v15778_v40  ;;  %v15794_v3 = vpop.eup %11652 }
 0x933   : > { %11656 = vrcp.f32 %v7349_v47  ;;  %7330 = vadd.xlane.f32.xlu0 %v7329_v27  ;;  %7515 = vst [vmem:[%s15434_s3 + $0x168] sm:$0xff] %v15774_v20  ;;  %v15796_v53 = vpop.eup %11654 }
 0x934   : > { %7577 = vmatpush.bf16.xpose.msra.mxu2 %v17561_v14  ;;  %7596 = vmatpush.bf16.xpose.msrb.mxu1 %v17564_v34  ;;  %v7335_v54 = vadd.f32 %v15796_v53, %v15794_v3  ;;  %v6644_v34 = vpop.f32.mrf.mxu2 }
 0x938   : > { %7327 = vadd.xlane.f32.xlu1 %v7326_v5 }
 0x939   : > { %v11657_v63 = vpop.eup %11656 }
 0x93a   : > { %v7352_v37 = vpop.xlane.xlu0 %7351  ;;  %v15801_v62 = vmul.f32 %v11657_v63, %v15549_v36  ;;  %v15804_v25 = vmul.f32 %v11657_v63, %v15553_v29 }
 0x93b   : > { %11658 = vrcp.f32 %v7352_v37 }
 0x93c   : > { %7516 = vst [vmem:[%s15434_s3 + $0x170] sm:$0xff] %v15801_v62  ;;  %v7560_v15 = vpack.c.bf16 %v15801_v62, %v15771_v4  ;;  %v7561_v51 = vpack.c.bf16 %v15804_v25, %v15774_v20 }
 0x93d   : > { %7517 = vst [vmem:[%s15434_s3 + $0x178] sm:$0xff] %v15804_v25 }
 0x93e   : > { %7336 = vadd.xlane.f32.xlu2 %v7335_v54  ;;  %v6646_v54 = vpop.f32.mrf.mxu2 }
 0x941   : > { %v11659_v36 = vpop.eup %11658 }
 0x942   : > { %v7355_v29 = vpop.xlane.xlu1 %7354  ;;  %v15817_v11 = vmul.f32 %v11659_v36, %v15567_v46  ;;  %v15820_v9 = vmul.f32 %v11659_v36, %v15571_v48 }
 0x943   : > { %11660 = vrcp.f32 %v7355_v29 }
 0x944   : > { %7518 = vst [vmem:[%s15434_s3 + $0x180] sm:$0xff] %v15817_v11 }
 0x945   : > { %7519 = vst [vmem:[%s15434_s3 + $0x188] sm:$0xff] %v15820_v9 }
 0x948   : > { %v7358_v60 = vpop.xlane.xlu2 %7357 }
 0x949   : > { %v11661_v1 = vpop.eup %11660  ;;  %11662 = vrcp.f32 %v7358_v60 }
 0x94a   : > { %v15827_v41 = vmul.f32 %v11661_v1, %v15589_v26  ;;  %v15830_v30 = vmul.f32 %v11661_v1, %v15593_v35 }
 0x94c   : > { %7520 = vst [vmem:[%s15434_s3 + $0x190] sm:$0xff] %v15827_v41  ;;  %v7562_v46 = vpack.c.bf16 %v15827_v41, %v15817_v11  ;;  %v7563_v48 = vpack.c.bf16 %v15830_v30, %v15820_v9 }
 0x94d   : > { %7521 = vst [vmem:[%s15434_s3 + $0x198] sm:$0xff] %v15830_v30 }
 0x94f   : > { %v11663_v58 = vpop.eup %11662 }
 0x950   : > { %v7361_v42 = vpop.xlane.xlu0 %7360  ;;  %v15841_v26 = vmul.f32 %v11663_v58, %v15599_v12  ;;  %v15844_v35 = vmul.f32 %v11663_v58, %v15603_v32  ;;  %v17566_v58 = vld [vmem:[#allocation36_spill] sm:$0xff] }
 0x951   : > { %11664 = vrcp.f32 %v7361_v42 }
 0x952   : > { %7522 = vst [vmem:[%s15434_s3 + $0x1a0] sm:$0xff] %v15841_v26 }
 0x953   : > { %7523 = vst [vmem:[%s15434_s3 + $0x1a8] sm:$0xff] %v15844_v35 }
 0x956   : > { %7688 = vperm.xlu2 %11488, %v7685_v24  }
 0x957   : > { %v11665_v57 = vpop.eup %11664 }
 0x958   : > { %v7340_v13 = vpop.xlane.xlu0 %7339  ;;  %v7364_v22 = vpop.xlane.xlu1 %7363  ;;  %v15854_v10 = vmul.f32 %v11665_v57, %v15619_v7  ;;  %v15857_v32 = vmul.f32 %v11665_v57, %v15625_v49 }
 0x959   : > { %11666 = vrcp.f32 %v7340_v13 }
 0x95a   : > { %11668 = vrcp.f32 %v7364_v22  ;;  %7524 = vst [vmem:[%s15434_s3 + $0x1b0] sm:$0xff] %v15854_v10 }
 0x95b   : > { %7525 = vst [vmem:[%s15434_s3 + $0x1b8] sm:$0xff] %v15857_v32 }
 0x95f   : > { %v11667_v12 = vpop.eup %11666 }
 0x960   : > { %v11669_v19 = vpop.eup %11668  ;;  %v7343_v44 = vpop.xlane.xlu0 %7342  ;;  %v15864_v7 = vmul.f32 %v11667_v12, %v15637_v6  ;;  %v15869_v16 = vmul.f32 %v11667_v12, %v15641_v8 }
 0x961   : > { %v7367_v27 = vpop.xlane.xlu2 %7366  ;;  %11670 = vrcp.f32 %v7343_v44  ;;  %v7462_v49 = vmul.f32 %v11669_v19, %v15645_v39  ;;  %v7463_v47 = vmul.f32 %v11669_v19, %v15651_v56 }
 0x962   : > { %11672 = vrcp.f32 %v7367_v27  ;;  %7510 = vst [vmem:[%s15434_s3 + $0x140] sm:$0xff] %v15864_v7 }
 0x963   : > { %7526 = vst [vmem:[%s15434_s3 + $0x1c0] sm:$0xff] %v7462_v49 }
 0x964   : > { %7527 = vst [vmem:[%s15434_s3 + $0x1c8] sm:$0xff] %v7463_v47 }
 0x965   : > { %7511 = vst [vmem:[%s15434_s3 + $0x148] sm:$0xff] %v15869_v16 }
 0x967   : > { %v11671_v6 = vpop.eup %11670 }
 0x968   : > { %v11673_v31 = vpop.eup %11672  ;;  %v7334_v14 = vpop.xlane.xlu0 %7333  ;;  %v15878_v56 = vmul.f32 %v11671_v6, %v15665_v33  ;;  %v15883_v17 = vmul.f32 %v11671_v6, %v15669_v38  ;;  %v17567_v6 = vld [vmem:[#allocation21_spill] sm:$0xff] }
 0x969   : > { %v7370_v39 = vpop.xlane.xlu1 %7369  ;;  %11674 = vrcp.f32 %v7334_v14  ;;  %v7464_v8 = vmul.f32 %v11673_v31, %v15673_v55  ;;  %v7465_v28 = vmul.f32 %v11673_v31, %v15677_v59 }
 0x96a   : > { %11676 = vrcp.f32 %v7370_v39  ;;  %7512 = vst [vmem:[%s15434_s3 + $0x150] sm:$0xff] %v15878_v56  ;;  %v17568_v39 = vld [vmem:[#allocation38_spill] sm:$0xff]  ;;  %v7559_v11 = vpack.c.bf16 %v15883_v17, %v15869_v16 }
 0x96b   : > { %7528 = vst [vmem:[%s15434_s3 + $0x1d0] sm:$0xff] %v7464_v8 }
 0x96c   : > { %7529 = vst [vmem:[%s15434_s3 + $0x1d8] sm:$0xff] %v7465_v28 }
 0x96d   : > { %7513 = vst [vmem:[%s15434_s3 + $0x158] sm:$0xff] %v15883_v17 }
 0x96f   : > { %v11675_v33 = vpop.eup %11674 }
 0x970   : > { %v11677_v5 = vpop.eup %11676  ;;  %v7373_v55 = vpop.xlane.xlu2 %7372  ;;  %v15892_v59 = vmul.f32 %v11675_v33, %v15685_v23  ;;  %v15897_v37 = vmul.f32 %v11675_v33, %v15689_v18  ;;  %v6645_v18 = vadd.f32 %v6644_v34, %v15798_v0  ;;  %v7564_v33 = vpack.c.bf16 %v15854_v10, %v15841_v26  ;;  %v10882_v10 = vld [vmem:[%s14614_s25 + $0x68] sm:$0xff] }
 0x971   : > { %v7466_v38 = vmul.f32 %v11677_v5, %v15692_v2  ;;  %v7467_v63 = vmul.f32 %v11677_v5, %v15695_v45  ;;  %11678 = vrcp.f32 %v7373_v55  ;;  %v17565_v45 = vld [vmem:[#allocation20_spill] sm:$0xff]  ;;  %v7565_v5 = vpack.c.bf16 %v15857_v32, %v15844_v35  ;;  %v10884_v32 = vld [vmem:[%s14614_s25 + $0x78] sm:$0xff] }
 0x972   : > { %7506 = vst [vmem:[%s15434_s3 + $0x120] sm:$0xff] %v15892_v59  ;;  %v6664_v60 = vadd.f32 %v17565_v45, %v15798_v0  ;;  %v7567_v0 = vpack.c.bf16 %v7465_v28, %v7463_v47  ;;  %v7558_v26 = vpack.c.bf16 %v15878_v56, %v15864_v7  ;;  %v7683_v47 = vpack.c.bf16 %v10884_v32, %v10882_v10  ;;  %v10879_v56 = vld [vmem:[%s14614_s25 + $0x50] sm:$0xff]  ;;  %v10880_v28 = vld [vmem:[%s14614_s25 + $0x58] sm:$0xff] }
 0x973   : > { %7530 = vst [vmem:[%s15434_s3 + $0x1e0] sm:$0xff] %v7466_v38  ;;  %v11895_v32 = vld [vmem:[%s14614_s25 + $0x38] sm:$0xff] }
 0x974   : > { %7531 = vst [vmem:[%s15434_s3 + $0x1e8] sm:$0xff] %v7467_v63 }
 0x975   : > { %7507 = vst [vmem:[%s15434_s3 + $0x128] sm:$0xff] %v15897_v37 }
 0x977   : > { %v11679_v36 = vpop.eup %11678 }
 0x978   : > { %v7468_v23 = vmul.f32 %v11679_v36, %v15706_v50  ;;  %v7469_v2 = vmul.f32 %v11679_v36, %v15709_v52  ;;  %v6607_v29 = vpop.permute.xlu2 %6606  ;;  %v6649_v50 = vpop.f32.mrf.mxu2  ;;  %v7566_v52 = vpack.c.bf16 %v7464_v8, %v7462_v49  ;;  %v10878_v8 = vld [vmem:[%s14614_s25 + $0x48] sm:$0xff] }
 0x979   : > { %v6647_v1 = vadd.f32 %v6646_v54, %v6607_v29  ;;  %v6666_v42 = vadd.f32 %v17566_v58, %v6607_v29  ;;  %v15978_v54 = vstv %s6542_s29  ;;  %v11888_v29 = vld [vmem:[%s14614_s25] sm:$0xff]  ;;  %v11889_v58 = vld [vmem:[%s14614_s25 + $0x10] sm:$0xff]  ;;  %s11922_s29 = scalar_lea.hbm %s11921_s22, 1024 }
 0x97a   : > { %7532 = vst [vmem:[%s15434_s3 + $0x1f0] sm:$0xff] %v7468_v23  ;;  %v7568_v24 = vpack.c.bf16 %v7468_v23, %v7466_v38  ;;  %v7569_v57 = vpack.c.bf16 %v7469_v2, %v7467_v63  ;;  %v7684_v38 = vld [vmem:[%s17045_s12] sm:$0xf]  ;;  %p11923_p11 = scmp.ne.s32.totalorder %s11921_s22, %s11922_s29  ;;  %p11928_p1 = scmp.lt.s32.totalorder %s11926_s28, %s11922_s29 }
 0x97b   : > { %7533 = vst [vmem:[%s15434_s3 + $0x1f8] sm:$0xff] %v7469_v2  ;;  %v15913_v13 = vpack.c.bf16 %v6647_v1, %v6645_v18  ;;  %v15915_v22 = vpack.c.bf16 %v6666_v42, %v6664_v60  ;;  %v6617_v44 = vpop.permute.xlu0 %6616 }
 0x97c   : > { %7608 = vmatpush.bf16.xpose.msrb.mxu2 %v7568_v24  ;;  %7627 = vmatpush.bf16.xpose.msra.mxu1 %v7569_v57  ;;  %v6671_v34 = vadd.f32 %v17568_v39, %v6617_v44  ;;  %17569 = vst [vmem:[#allocation39_spill] sm:$0xff] %v15978_v54  ;;  %p11924_p12 = pnand %p11923_p11, %p12114_p5  ;;  %p11929_p2 = por %p11928_p1, %p11927_p0 }
 0x97d   : > { %7578 = vmatmul.bf16.vlgmr.msra.gmra.mxu2 %v15913_v13  ;;  %7597 = vmatmul.bf16.vlgmr.msrb.gmra.mxu1 %v15915_v22 }
 0x97e   : > { %p11925_p13 = pneg %p11924_p12 }
 0x980   : > { %v6612_v12 = vpop.permute.xlu1 %6611  ;;  %v6651_v19 = vpop.f32.mrf.mxu2  ;;  %p11930_p3 = pnand %p11929_p2, %p11925_p13 }
 0x981   : > { %v6650_v27 = vadd.f32 %v6649_v50, %v6612_v12  ;;  %v6669_v31 = vadd.f32 %v17567_v6, %v6612_v12  ;;  %v6652_v14 = vadd.f32 %v6651_v19, %v6617_v44  ;;  %v11890_v50 = vld [vmem:[%s14614_s25 + $0x20] sm:$0xff] }
 0x983   : > { %v15925_v55 = vpack.c.bf16 %v6652_v14, %v6650_v27  ;;  %v15927_v49 = vpack.c.bf16 %v6671_v34, %v6669_v31  ;;  %v11891_v27 = vld [vmem:[%s14614_s25 + $0x30] sm:$0xff]  ;;  %v11436_v31 = vld [vmem:[%s17047_s14] sm:$0xff]  ;;  %v11437_v14 = vld [vmem:[%s17047_s14 + $0x8] sm:$0xff] }
 0x984   : > { %7609 = vmatpush.bf16.xpose.msrb.mxu2 %v7566_v52  ;;  %7628 = vmatpush.bf16.xpose.msra.mxu1 %v7567_v0 }
 0x98c   : > { %7610 = vmatpush.bf16.xpose.msrb.mxu2 %v7564_v33  ;;  %7629 = vmatpush.bf16.xpose.msra.mxu1 %v7565_v5 }
 0x98d   : > { %7583 = vmatmul.bf16.gmra.mxu2 %v15925_v55  ;;  %7602 = vmatmul.bf16.gmra.mxu1 %v15927_v49 }
 0x994   : > { %7611 = vmatpush.bf16.xpose.msrb.mxu2 %v7562_v46  ;;  %7630 = vmatpush.bf16.xpose.msra.mxu1 %v7563_v48 }
 0x99c   : > { %7612 = vmatpush.bf16.xpose.msrb.mxu2 %v7560_v15  ;;  %7631 = vmatpush.bf16.xpose.msra.mxu1 %v7561_v51 }
 0x9a4   : > { %7613 = vmatpush.bf16.xpose.msrb.mxu2 %v7558_v26  ;;  %7632 = vmatpush.bf16.xpose.msra.mxu1 %v7559_v11 }
 0x9a6   : > { %v7331_v9 = vpop.xlane.xlu0 %7330 }
 0x9a7   : > { %11680 = vrcp.f32 %v7331_v9 }
 0x9ab   : > { %v7328_v41 = vpop.xlane.xlu1 %7327 }
 0x9ac   : > { %11682 = vrcp.f32 %v7328_v41 }
 0x9ad   : > { %v11681_v4 = vpop.eup %11680 }
 0x9ae   : > { %v7440_v62 = vmul.f32 %v11681_v4, %v15766_v21  ;;  %v7441_v20 = vmul.f32 %v11681_v4, %v15768_v61 }
 0x9b0   : > { %7504 = vst [vmem:[%s15434_s3 + $0x110] sm:$0xff] %v7440_v62 }
 0x9b1   : > { %v7337_v25 = vpop.xlane.xlu2 %7336  ;;  %7505 = vst [vmem:[%s15434_s3 + $0x118] sm:$0xff] %v7441_v20 }
 0x9b2   : > { %v11683_v15 = vpop.eup %11682  ;;  %11684 = vrcp.f32 %v7337_v25 }
 0x9b3   : > { %v7438_v51 = vmul.f32 %v11683_v15, %v15778_v40  ;;  %v7439_v30 = vmul.f32 %v11683_v15, %v15782_v43  ;;  %v10881_v40 = vld [vmem:[%s14614_s25 + $0x60] sm:$0xff]  ;;  %v10883_v43 = vld [vmem:[%s14614_s25 + $0x70] sm:$0xff] }
 0x9b4   : > { %v7682_v7 = vpack.c.bf16 %v10883_v43, %v10881_v40 }
 0x9b5   : > { %7502 = vst [vmem:[%s15434_s3 + $0x100] sm:$0xff] %v7438_v51  ;;  %v7554_v16 = vpack.c.bf16 %v7440_v62, %v7438_v51  ;;  %v11893_v62 = vld [vmem:[%s14614_s25 + $0x18] sm:$0xff] }
 0x9b6   : > { %7503 = vst [vmem:[%s15434_s3 + $0x108] sm:$0xff] %v7439_v30 }
 0x9b8   : > { %v11685_v21 = vpop.eup %11684 }
 0x9b9   : > { %v7444_v61 = vmul.f32 %v11685_v21, %v15794_v3  ;;  %v7445_v46 = vmul.f32 %v11685_v21, %v15796_v53  ;;  %v10877_v3 = vld [vmem:[%s14614_s25 + $0x40] sm:$0xff]  ;;  %v7555_v53 = vpack.c.bf16 %v7441_v20, %v7439_v30  ;;  %v11894_v21 = vld [vmem:[%s14614_s25 + $0x28] sm:$0xff] }
 0x9ba   : > { %v7680_v17 = vpack.c.bf16 %v10879_v56, %v10877_v3 }
 0x9bb   : > { %7508 = vst [vmem:[%s15434_s3 + $0x130] sm:$0xff] %v7444_v61  ;;  %v7556_v48 = vpack.c.bf16 %v7444_v61, %v15892_v59  ;;  %v7557_v35 = vpack.c.bf16 %v7445_v46, %v15897_v37  ;;  %v7681_v59 = vpack.c.bf16 %v10880_v28, %v10878_v8 }
 0x9bc   : > { %7509 = vst [vmem:[%s15434_s3 + $0x138] sm:$0xff] %v7445_v46 }
 0x9bd   : > { %7614 = vmatpush.bf16.xpose.msrb.mxu2 %v7556_v48  ;;  %7633 = vmatpush.bf16.xpose.msra.mxu1 %v7557_v35  ;;  %v7689_v35 = vpop.permute.xlu2 %7688 }
 0x9c5   : > { %7615 = vmatpush.bf16.xpose.msrb.mxu2 %v7554_v16  ;;  %7634 = vmatpush.bf16.xpose.msra.mxu1 %v7555_v53 }
 0x9cc   : > { %7616 = vmatmul.bf16.vlgmr.msrb.gmra.mxu2 %v15913_v13  ;;  %7635 = vmatmul.bf16.vlgmr.msra.gmra.mxu1 %v15915_v22 }
 0x9cd   : > { %7700 = vmatpush.bf16.msra.mxu2 %v7682_v7  ;;  %7713 = vmatpush.bf16.msrb.mxu1 %v7683_v47 }
 0x9d1   : > { %7701 = vmatpush.bf16.msra.mxu2 %v7680_v17  ;;  %7714 = vmatpush.bf16.msrb.mxu1 %v7681_v59 }
 0x9d5   : > { %7789 = vmatpush.bf16.msra.mxu1 %v7683_v47  ;;  %7770 = vmatpush.bf16.msrb.mxu2 %v7682_v7  ;;  %v11896_v47 = vld [vmem:[%s17049_s16 + $0x8] sm:$0xff] }
 0x9d9   : > { %7790 = vmatpush.bf16.msra.mxu1 %v7681_v59  ;;  %7771 = vmatpush.bf16.msrb.mxu2 %v7680_v17  ;;  %v11897_v17 = vld [vmem:[%s17049_s16] sm:$0xff] }
 0x9dc   : > { %7621 = vmatmul.bf16.gmra.mxu2 %v15925_v55  ;;  %7640 = vmatmul.bf16.gmra.mxu1 %v15927_v49  ;;  %v11892_v49 = vld [vmem:[%s14614_s25 + $0x8] sm:$0xff] }
 0x9ec   : > { %10885 = vmatmul.msk.bf16.vlgmr.msra.gmra.mxu2 %vm3072_vm3, %v7684_v38  ;;  %10886 = vmatmul.msk.bf16.vlgmr.msrb.gmra.mxu1 %vm3072_vm3, %v7684_v38 }
 0x9fa   : > { %v7598_v63 = vpop.f32.mrf.mxu1 }
 0x9fc   : > { %10897 = vmatmul.msk.bf16.vlgmr.msra.gmra.mxu1 %vm3072_vm3, %v11436_v31  ;;  %10895 = vmatmul.msk.bf16.vlgmr.msrb.gmra.mxu2 %vm3072_vm3, %v11436_v31  ;;  %v17587_v31 = vld [vmem:[#allocation28_spill] sm:$0xff] }
 0xa00   : > { %v7579_v37 = vpop.f32.mrf.mxu2 }
 0xa01   : > { %v7599_v36 = vadd.f32 %v7598_v63, %v7579_v37  ;;  %v17570_v63 = vld [vmem:[#allocation12_spill] sm:$0xff] }
 0xa02   : > { %v7600_v2 = vpop.f32.mrf.mxu1 }
 0xa03   : > { %v7647_v23 = vmul.f32 %v15978_v54, %v7599_v36 }
 0xa05   : > { %v7655_v45 = vadd.f32 %v11888_v29, %v7647_v23  ;;  %v17571_v23 = vld [vmem:[#allocation100_spill] sm:$0xff]  ;;  %v17573_v29 = vld [vmem:[#allocation22_spill] sm:$0xff] }
 0xa07   : > { %7663 = vst [vmem:[%s15986_s30] sm:$0xff] %v7655_v45  ;;  %v17574_v45 = vld [vmem:[#allocation14_spill] sm:$0xff] }
 0xa08   : > { %v7581_v60 = vpop.f32.mrf.mxu2 }
 0xa09   : > { %v7601_v18 = vadd.f32 %v7600_v2, %v7581_v60  ;;  %v17572_v2 = vld [vmem:[#allocation13_spill] sm:$0xff]  ;;  %v17575_v60 = vld [vmem:[#allocation24_spill] sm:$0xff] }
 0xa0a   : > { %v7603_v24 = vpop.f32.mrf.mxu1 }
 0xa0b   : > { %v7649_v1 = vmul.f32 %v15978_v54, %v7601_v18 }
 0xa0c   : > { %10898 = vmatmul.msk.bf16.gmra.mxu1 %vm3072_vm3, %v11437_v14  ;;  %10896 = vmatmul.msk.bf16.gmra.mxu2 %vm3072_vm3, %v11437_v14 }
 0xa0d   : > { %v7657_v42 = vadd.f32 %v11889_v58, %v7649_v1  ;;  %v17578_v58 = vld [vmem:[#allocation15_spill] sm:$0xff] }
 0xa0f   : > { %7665 = vst [vmem:[%s15986_s30 + $0x10] sm:$0xff] %v7657_v42 }
 0xa10   : > { %v7584_v57 = vpop.f32.mrf.mxu2 }
 0xa11   : > { %v7604_v13 = vadd.f32 %v7603_v24, %v7584_v57 }
 0xa12   : > { %v7605_v0 = vpop.f32.mrf.mxu1 }
 0xa13   : > { %v7651_v22 = vmul.f32 %v15978_v54, %v7604_v13  ;;  %v17582_v13 = vld [vmem:[#allocation26_spill] sm:$0xff] }
 0xa15   : > { %v7659_v52 = vadd.f32 %v11890_v50, %v7651_v22 }
 0xa17   : > { %7667 = vst [vmem:[%s15986_s30 + $0x20] sm:$0xff] %v7659_v52 }
 0xa18   : > { %v7586_v12 = vpop.f32.mrf.mxu2 }
 0xa19   : > { %v7606_v19 = vadd.f32 %v7605_v0, %v7586_v12  ;;  %v17585_v0 = vld [vmem:[#allocation16_spill] sm:$0xff] }
 0xa1b   : > { %v7653_v44 = vmul.f32 %v15978_v54, %v7606_v19 }
 0xa1d   : > { %v7661_v6 = vadd.f32 %v11891_v27, %v7653_v44 }
 0xa1f   : > { %7669 = vst [vmem:[%s15986_s30 + $0x30] sm:$0xff] %v7661_v6 }
 0xa49   : > { %v7636_v39 = vpop.f32.mrf.mxu1 }
 0xa4f   : > { %v7617_v34 = vpop.f32.mrf.mxu2 }
 0xa50   : > { %v7637_v33 = vadd.f32 %v7636_v39, %v7617_v34 }
 0xa51   : > { %v7638_v5 = vpop.f32.mrf.mxu1 }
 0xa52   : > { %v7648_v55 = vmul.f32 %v15978_v54, %v7637_v33 }
 0xa54   : > { %v7656_v26 = vadd.f32 %v11892_v49, %v7648_v55  ;;  %v17588_v49 = vld [vmem:[#allocation17_spill] sm:$0xff] }
 0xa56   : > { %7664 = vst [vmem:[%s15986_s30 + $0x8] sm:$0xff] %v7656_v26 }
 0xa57   : > { %v7619_v11 = vpop.f32.mrf.mxu2 }
 0xa58   : > { %v7639_v9 = vadd.f32 %v7638_v5, %v7619_v11 }
 0xa59   : > { %v7641_v41 = vpop.f32.mrf.mxu1 }
 0xa5a   : > { %v7650_v4 = vmul.f32 %v15978_v54, %v7639_v9 }
 0xa5c   : > { %v7658_v20 = vadd.f32 %v11893_v62, %v7650_v4 }
 0xa5e   : > { %7666 = vst [vmem:[%s15986_s30 + $0x18] sm:$0xff] %v7658_v20  ;;  %v17589_v20 = vld [vmem:[#allocation30_spill] sm:$0xff] }
 0xa5f   : > { %v7622_v25 = vpop.f32.mrf.mxu2 }
 0xa60   : > { %v7642_v15 = vadd.f32 %v7641_v41, %v7622_v25 }
 0xa61   : > { %v7643_v51 = vpop.f32.mrf.mxu1 }
 0xa62   : > { %v7652_v30 = vmul.f32 %v15978_v54, %v7642_v15 }
 0xa64   : > { %v7660_v61 = vadd.f32 %v11894_v21, %v7652_v30 }
 0xa66   : > { %7668 = vst [vmem:[%s15986_s30 + $0x28] sm:$0xff] %v7660_v61 }
 0xa67   : > { %v7624_v46 = vpop.f32.mrf.mxu2 }
 0xa68   : > { %v7644_v48 = vadd.f32 %v7643_v51, %v7624_v46  ;;  %v17590_v46 = vld [vmem:[#allocation18_spill] sm:$0xff] }
 0xa69   : > { %v7716_v40 = vpop.f32.mrf.mxu1 }
 0xa6a   : > { %v7654_v43 = vmul.f32 %v15978_v54, %v7644_v48  ;;  %v7717_v10 = vadd.f32 %v7716_v40, %v7689_v35 }
 0xa6c   : > { %v7662_v7 = vadd.f32 %v11895_v32, %v7654_v43  ;;  %v7803_v3 = vadd.f32 %v11896_v47, %v7717_v10 }
 0xa6e   : > { %7670 = vst [vmem:[%s15986_s30 + $0x38] sm:$0xff] %v7662_v7  ;;  %v7805_v16 = vpack.c.bf16 %v7803_v3, %v7803_v3  ;;  %v17591_v7 = vld [vmem:[#allocation32_spill] sm:$0xff] }
 0xa6f   : > { %v7703_v53 = vpop.f32.mrf.mxu2 }
 0xa70   : > { %v7704_v56 = vadd.f32 %v7703_v53, %v7689_v35  ;;  %v7938_v8 = vsel %vm1086_vm0, %v7805_v16, 0 }
 0xa71   : > { %8036 = vmatpush.bf16.msrb.mxu1 %v7938_v8  ;;  %v7718_v28 = vpop.f32.mrf.mxu1 }
 0xa72   : > { %v7802_v59 = vadd.f32 %v11897_v17, %v7704_v56  ;;  %v17592_v28 = vld [vmem:[#allocation19_spill] sm:$0xff] }
 0xa74   : > { %v7804_v38 = vpack.c.bf16 %v7802_v59, %v7802_v59  ;;  %10915 = vmatmul.msk.bf16.vlgmr.msrb.gmra.mxu1 %vm6757_vm5, %v17570_v63 }
 0xa76   : > { %v7935_v37 = vsel %vm1086_vm0, %v7804_v38, 0 }
 0xa77   : > { %7947 = vmatpush.bf16.msra.mxu2 %v7935_v37  ;;  %v7705_v36 = vpop.f32.mrf.mxu2 }
 0xa79   : > { %v16051_v18 = vpop.f32.mrf.mxu1 }
 0xa7a   : > { %10899 = vmatmul.msk.bf16.vlgmr.msra.gmra.mxu2 %vm6757_vm5, %v17570_v63  ;;  %17576 = vst [vmem:[#allocation56_spill] sm:$0xff] %v16051_v18 }
 0xa7f   : > { %v16059_v42 = vpop.f32.mrf.mxu2 }
 0xa80   : > { %17579 = vst [vmem:[#allocation58_spill] sm:$0xff] %v16059_v42 }
 0xa81   : > { %v16055_v1 = vpop.f32.mrf.mxu1 }
 0xa82   : > { %17577 = vst [vmem:[#allocation41_spill] sm:$0xff] %v16055_v1 }
 0xa84   : > { %10916 = vmatmul.msk.bf16.gmra.mxu1 %vm6757_vm5, %v17571_v23 }
 0xa87   : > { %v16065_v57 = vpop.f32.mrf.mxu2 }
 0xa88   : > { %17581 = vst [vmem:[#allocation60_spill] sm:$0xff] %v16065_v57 }
 0xa89   : > { %v16063_v24 = vpop.f32.mrf.mxu1 }
 0xa8a   : > { %10900 = vmatmul.msk.bf16.gmra.mxu2 %vm6757_vm5, %v17571_v23  ;;  %17580 = vst [vmem:[#allocation43_spill] sm:$0xff] %v16063_v24  ;;  %v17593_v23 = vld [vmem:[#allocation34_spill] sm:$0xff] }
 0xa8f   : > { %v16073_v50 = vpop.f32.mrf.mxu2 }
 0xa90   : > { %17584 = vst [vmem:[#allocation62_spill] sm:$0xff] %v16073_v50 }
 0xa91   : > { %v16069_v22 = vpop.f32.mrf.mxu1 }
 0xa92   : > { %17583 = vst [vmem:[#allocation45_spill] sm:$0xff] %v16069_v22 }
 0xa94   : > { %10917 = vmatmul.msk.bf16.gmra.mxu1 %vm6757_vm5, %v17572_v2 }
 0xa97   : > { %v16079_v12 = vpop.f32.mrf.mxu2 }
 0xa98   : > { %17586 = vst [vmem:[#allocation47_spill] sm:$0xff] %v16079_v12 }
 0xa9a   : > { %10901 = vmatmul.msk.bf16.gmra.mxu2 %vm6757_vm5, %v17572_v2 }
 0xaa4   : > { %10918 = vmatmul.msk.bf16.gmra.mxu1 %vm6757_vm5, %v17573_v29 }
 0xaaa   : > { %10902 = vmatmul.msk.bf16.gmra.mxu2 %vm6757_vm5, %v17573_v29 }
 0xab4   : > { %10919 = vmatmul.msk.bf16.gmra.mxu1 %vm6757_vm5, %v17574_v45 }
 0xaba   : > { %10903 = vmatmul.msk.bf16.gmra.mxu2 %vm6757_vm5, %v17574_v45 }
 0xac4   : > { %10920 = vmatmul.msk.bf16.gmra.mxu1 %vm6757_vm5, %v17575_v60 }
 0xaca   : > { %10904 = vmatmul.msk.bf16.gmra.mxu2 %vm6757_vm5, %v17575_v60 }
 0xad4   : > { %10921 = vmatmul.msk.bf16.gmra.mxu1 %vm6757_vm5, %v17578_v58 }
 0xada   : > { %10905 = vmatmul.msk.bf16.gmra.mxu2 %vm6757_vm5, %v17578_v58 }
 0xae4   : > { %10922 = vmatmul.msk.bf16.gmra.mxu1 %vm6757_vm5, %v17582_v13 }
 0xaea   : > { %10906 = vmatmul.msk.bf16.gmra.mxu2 %vm6757_vm5, %v17582_v13 }
 0xaf1   : > { %v16075_v52 = vpop.f32.mrf.mxu1 }
 0xaf4   : > { %10923 = vmatmul.msk.bf16.gmra.mxu1 %vm6757_vm5, %v17585_v0 }
 0xaf9   : > { %v16081_v19 = vpop.f32.mrf.mxu1 }
 0xafa   : > { %10907 = vmatmul.msk.bf16.gmra.mxu2 %vm6757_vm5, %v17585_v0 }
 0xafd   : > { %v16085_v44 = vpop.f32.mrf.mxu2 }
 0xafe   : > { %v8118_v27 = vmax.f32 %v16085_v44, %v16075_v52 }
 0xb00   : > { %8119 = vmax.xlane.f32.xlu0 %v8118_v27 }
 0xb01   : > { %v16089_v6 = vpop.f32.mrf.mxu1 }
 0xb04   : > { %10924 = vmatmul.msk.bf16.gmra.mxu1 %vm6757_vm5, %v17587_v31 }
 0xb05   : > { %v16093_v14 = vpop.f32.mrf.mxu2 }
 0xb06   : > { %v8121_v39 = vmax.f32 %v16093_v14, %v16081_v19 }
 0xb08   : > { %8122 = vmax.xlane.f32.xlu2 %v8121_v39 }
 0xb09   : > { %v16097_v34 = vpop.f32.mrf.mxu1 }
 0xb0a   : > { %10908 = vmatmul.msk.bf16.gmra.mxu2 %vm6757_vm5, %v17587_v31 }
 0xb0d   : > { %v16101_v33 = vpop.f32.mrf.mxu2 }
 0xb0e   : > { %v8124_v5 = vmax.f32 %v16101_v33, %v16089_v6 }
 0xb10   : > { %8125 = vmax.xlane.f32.xlu0 %v8124_v5 }
 0xb11   : > { %v16105_v55 = vpop.f32.mrf.mxu1 }
 0xb14   : > { %10925 = vmatmul.msk.bf16.gmra.mxu1 %vm6757_vm5, %v17588_v49 }
 0xb15   : > { %v16109_v26 = vpop.f32.mrf.mxu2 }
 0xb16   : > { %v8127_v11 = vmax.f32 %v16109_v26, %v16097_v34 }
 0xb18   : > { %8128 = vmax.xlane.f32.xlu2 %v8127_v11 }
 0xb19   : > { %v16113_v9 = vpop.f32.mrf.mxu1 }
 0xb1a   : > { %10909 = vmatmul.msk.bf16.gmra.mxu2 %vm6757_vm5, %v17588_v49 }
 0xb1d   : > { %v16117_v41 = vpop.f32.mrf.mxu2 }
 0xb1e   : > { %v8130_v4 = vmax.f32 %v16117_v41, %v16105_v55 }
 0xb20   : > { %8131 = vmax.xlane.f32.xlu1 %v8130_v4 }
 0xb21   : > { %v16121_v62 = vpop.f32.mrf.mxu1 }
 0xb24   : > { %10926 = vmatmul.msk.bf16.gmra.mxu1 %vm6757_vm5, %v17589_v20 }
 0xb25   : > { %v16125_v25 = vpop.f32.mrf.mxu2 }
 0xb26   : > { %v8133_v15 = vmax.f32 %v16125_v25, %v16113_v9 }
 0xb28   : > { %8134 = vmax.xlane.f32.xlu0 %v8133_v15 }
 0xb29   : > { %v16129_v51 = vpop.f32.mrf.mxu1 }
 0xb2a   : > { %10910 = vmatmul.msk.bf16.gmra.mxu2 %vm6757_vm5, %v17589_v20 }
 0xb2d   : > { %v16133_v30 = vpop.f32.mrf.mxu2 }
 0xb2e   : > { %v8136_v21 = vmax.f32 %v16133_v30, %v16121_v62 }
 0xb30   : > { %8137 = vmax.xlane.f32.xlu1 %v8136_v21 }
 0xb31   : > { %v16137_v61 = vpop.f32.mrf.mxu1 }
 0xb34   : > { %10927 = vmatmul.msk.bf16.gmra.mxu1 %vm6757_vm5, %v17590_v46 }
 0xb35   : > { %v16141_v48 = vpop.f32.mrf.mxu2 }
 0xb36   : > { %v8139_v35 = vmax.f32 %v16141_v48, %v16129_v51 }
 0xb38   : > { %8140 = vmax.xlane.f32.xlu0 %v8139_v35 }
 0xb39   : > { %v16145_v40 = vpop.f32.mrf.mxu1 }
 0xb3a   : > { %10911 = vmatmul.msk.bf16.gmra.mxu2 %vm6757_vm5, %v17590_v46 }
 0xb3d   : > { %v16149_v43 = vpop.f32.mrf.mxu2 }
 0xb3e   : > { %v8142_v10 = vmax.f32 %v16149_v43, %v16137_v61 }
 0xb40   : > { %8143 = vmax.xlane.f32.xlu1 %v8142_v10 }
 0xb41   : > { %v16153_v32 = vpop.f32.mrf.mxu1 }
 0xb44   : > { %10928 = vmatmul.msk.bf16.gmra.mxu1 %vm6757_vm5, %v17591_v7 }
 0xb45   : > { %v16157_v47 = vpop.f32.mrf.mxu2 }
 0xb46   : > { %v8145_v3 = vmax.f32 %v16157_v47, %v16145_v40 }
 0xb48   : > { %8146 = vmax.xlane.f32.xlu0 %v8145_v3 }
 0xb49   : > { %v16161_v16 = vpop.f32.mrf.mxu1 }
 0xb4a   : > { %10912 = vmatmul.msk.bf16.gmra.mxu2 %vm6757_vm5, %v17591_v7 }
 0xb4d   : > { %v16165_v53 = vpop.f32.mrf.mxu2 }
 0xb4e   : > { %v8148_v56 = vmax.f32 %v16165_v53, %v16153_v32 }
 0xb50   : > { %8149 = vmax.xlane.f32.xlu1 %v8148_v56 }
 0xb51   : > { %v16169_v8 = vpop.f32.mrf.mxu1 }
 0xb54   : > { %10929 = vmatmul.msk.bf16.gmra.mxu1 %vm6757_vm5, %v17592_v28 }
 0xb55   : > { %v16173_v17 = vpop.f32.mrf.mxu2 }
 0xb56   : > { %v8151_v59 = vmax.f32 %v16173_v17, %v16161_v16 }
 0xb58   : > { %8152 = vmax.xlane.f32.xlu0 %v8151_v59 }
 0xb59   : > { %v16177_v38 = vpop.f32.mrf.mxu1 }
 0xb5a   : > { %10913 = vmatmul.msk.bf16.gmra.mxu2 %vm6757_vm5, %v17592_v28 }
 0xb5d   : > { %v16181_v63 = vpop.f32.mrf.mxu2 }
 0xb5e   : > { %v8154_v37 = vmax.f32 %v16181_v63, %v16169_v8 }
 0xb60   : > { %8155 = vmax.xlane.f32.xlu0 %v8154_v37 }
 0xb61   : > { %v16185_v36 = vpop.f32.mrf.mxu1 }
 0xb64   : > { %10930 = vmatmul.msk.bf16.gmra.mxu1 %vm6757_vm5, %v17593_v23 }
 0xb65   : > { %v16189_v2 = vpop.f32.mrf.mxu2 }
 0xb66   : > { %v8157_v29 = vmax.f32 %v16189_v2, %v16177_v38 }
 0xb68   : > { %8158 = vmax.xlane.f32.xlu2 %v8157_v29 }
 0xb69   : > { %v16193_v45 = vpop.f32.mrf.mxu1 }
 0xb6a   : > { %10914 = vmatmul.msk.bf16.gmra.mxu2 %vm6757_vm5, %v17593_v23 }
 0xb6d   : > { %v16197_v60 = vpop.f32.mrf.mxu2 }
 0xb6e   : > { %v8160_v58 = vmax.f32 %v16197_v60, %v16185_v36 }
 0xb70   : > { %8161 = vmax.xlane.f32.xlu1 %v8160_v58 }
 0xb71   : > { %v16201_v13 = vpop.f32.mrf.mxu1 }
 0xb72   : > { %17594 = vst [vmem:[#allocation64_spill] sm:$0xff] %v16201_v13 }
 0xb73   : > { %v8120_v0 = vpop.xlane.xlu0 %8119 }
 0xb74   : > { %v8214_v27 = vsub.f32 %v16085_v44, %v8120_v0  ;;  %v8215_v31 = vsub.f32 %v16075_v52, %v8120_v0 }
 0xb75   : > { %v16205_v39 = vpop.f32.mrf.mxu2 }
 0xb76   : > { %v8278_v5 = vmul.f32 1.442695, %v8214_v27  ;;  %v8280_v49 = vmul.f32 1.442695, %v8215_v31  ;;  %v8163_v11 = vmax.f32 %v16205_v39, %v16193_v45 }
 0xb78   : > { %11686 = vpow2.f32 %v8278_v5  ;;  %8164 = vmax.xlane.f32.xlu1 %v8163_v11 }
 0xb79   : > { %11688 = vpow2.f32 %v8280_v49  ;;  %v16209_v4 = vpop.f32.mrf.mxu1 }
 0xb7a   : > { %17595 = vst [vmem:[#allocation49_spill] sm:$0xff] %v16209_v4 }
 0xb7b   : > { %v8123_v20 = vpop.xlane.xlu2 %8122 }
 0xb7c   : > { %v8216_v15 = vsub.f32 %v16093_v14, %v8123_v20  ;;  %v8217_v21 = vsub.f32 %v16081_v19, %v8123_v20 }
 0xb7d   : > { %v16213_v44 = vpop.f32.mrf.mxu2 }
 0xb7e   : > { %17596 = vst [vmem:[#allocation66_spill] sm:$0xff] %v16213_v44  ;;  %v16215_v52 = vpop.eup %11686  ;;  %v8282_v46 = vmul.f32 1.442695, %v8216_v15  ;;  %v8284_v35 = vmul.f32 1.442695, %v8217_v21  ;;  %v8166_v10 = vmax.f32 %v16213_v44, %v16201_v13 }
 0xb7f   : > { %v16219_v7 = vpop.eup %11688 }
 0xb80   : > { %11690 = vpow2.f32 %v8282_v46  ;;  %8167 = vmax.xlane.f32.xlu1 %v8166_v10  ;;  %v8406_v3 = vadd.f32 %v16219_v7, %v16215_v52 }
 0xb81   : > { %11692 = vpow2.f32 %v8284_v35  ;;  %v16223_v14 = vpop.f32.mrf.mxu1 }
 0xb82   : > { %8407 = vadd.xlane.f32.xlu0 %v8406_v3 }
 0xb83   : > { %v8126_v19 = vpop.xlane.xlu0 %8125 }
 0xb84   : > { %v8218_v56 = vsub.f32 %v16101_v33, %v8126_v19  ;;  %v8219_v28 = vsub.f32 %v16089_v6, %v8126_v19 }
 0xb85   : > { %v16227_v59 = vpop.f32.mrf.mxu2 }
 0xb86   : > { %17597 = vst [vmem:[#allocation51_spill] sm:$0xff] %v16227_v59  ;;  %v16229_v37 = vpop.eup %11690  ;;  %v8169_v23 = vmax.f32 %v16227_v59, %v16209_v4  ;;  %v8286_v58 = vmul.f32 1.442695, %v8218_v56  ;;  %v8288_v27 = vmul.f32 1.442695, %v8219_v28 }
 0xb87   : > { %v16233_v29 = vpop.eup %11692 }
 0xb88   : > { %v8409_v0 = vadd.f32 %v16233_v29, %v16229_v37  ;;  %11694 = vpow2.f32 %v8286_v58 }
 0xb89   : > { %v16237_v31 = vpop.f32.mrf.mxu1  ;;  %11696 = vpow2.f32 %v8288_v27 }
 0xb8a   : > { %17598 = vst [vmem:[#allocation68_spill] sm:$0xff] %v16237_v31  ;;  %8410 = vadd.xlane.f32.xlu2 %v8409_v0  ;;  %8170 = vmax.xlane.f32.xlu0 %v8169_v23 }
 0xb8b   : > { %v8129_v33 = vpop.xlane.xlu2 %8128 }
 0xb8c   : > { %v8220_v6 = vsub.f32 %v16109_v26, %v8129_v33  ;;  %v8221_v5 = vsub.f32 %v16097_v34, %v8129_v33 }
 0xb8d   : > { %v16241_v49 = vpop.f32.mrf.mxu2 }
 0xb8e   : > { %v8172_v11 = vmax.f32 %v16241_v49, %v16223_v14  ;;  %v8290_v20 = vmul.f32 1.442695, %v8220_v6  ;;  %v8292_v15 = vmul.f32 1.442695, %v8221_v5  ;;  %v16247_v46 = vpop.eup %11694 }
 0xb8f   : > { %v16249_v35 = vpop.eup %11696 }
 0xb90   : > { %8173 = vmax.xlane.f32.xlu1 %v8172_v11  ;;  %11698 = vpow2.f32 %v8290_v20  ;;  %v8412_v19 = vadd.f32 %v16249_v35, %v16247_v46 }
 0xb91   : > { %v16245_v21 = vpop.f32.mrf.mxu1  ;;  %11700 = vpow2.f32 %v8292_v15 }
 0xb93   : > { %v8132_v10 = vpop.xlane.xlu1 %8131 }
 0xb94   : > { %v8222_v26 = vsub.f32 %v16117_v41, %v8132_v10  ;;  %v8223_v34 = vsub.f32 %v16105_v55, %v8132_v10 }
 0xb95   : > { %v16253_v3 = vpop.f32.mrf.mxu2 }
 0xb96   : > { %17599 = vst [vmem:[#allocation53_spill] sm:$0xff] %v16253_v3  ;;  %v8175_v56 = vmax.f32 %v16253_v3, %v16237_v31  ;;  %v8294_v28 = vmul.f32 1.442695, %v8222_v26  ;;  %v8296_v23 = vmul.f32 1.442695, %v8223_v34  ;;  %v16261_v0 = vpop.eup %11698 }
 0xb97   : > { %v16263_v41 = vpop.eup %11700 }
 0xb98   : > { %8413 = vadd.xlane.f32.xlu1 %v8412_v19  ;;  %8176 = vmax.xlane.f32.xlu0 %v8175_v56  ;;  %11702 = vpow2.f32 %v8294_v28  ;;  %v8415_v5 = vadd.f32 %v16263_v41, %v16261_v0 }
 0xb99   : > { %v16259_v58 = vpop.f32.mrf.mxu1  ;;  %11704 = vpow2.f32 %v8296_v23 }
 0xb9b   : > { %v8135_v27 = vpop.xlane.xlu0 %8134 }
 0xb9c   : > { %v8224_v55 = vsub.f32 %v16125_v25, %v8135_v27  ;;  %v8225_v33 = vsub.f32 %v16113_v9, %v8135_v27 }
 0xb9d   : > { %v16267_v6 = vpop.f32.mrf.mxu2 }
 0xb9e   : > { %v8178_v11 = vmax.f32 %v16267_v6, %v16245_v21  ;;  %v8298_v20 = vmul.f32 1.442695, %v8224_v55  ;;  %v8300_v15 = vmul.f32 1.442695, %v8225_v33  ;;  %v16275_v26 = vpop.eup %11702 }
 0xb9f   : > { %v16277_v25 = vpop.eup %11704 }
 0xba0   : > { %8416 = vadd.xlane.f32.xlu0 %v8415_v5  ;;  %8179 = vmax.xlane.f32.xlu2 %v8178_v11  ;;  %11706 = vpow2.f32 %v8298_v20  ;;  %v8418_v27 = vadd.f32 %v16277_v25, %v16275_v26 }
 0xba1   : > { %v16273_v10 = vpop.f32.mrf.mxu1  ;;  %11708 = vpow2.f32 %v8300_v15 }
 0xba3   : > { %v8138_v34 = vpop.xlane.xlu1 %8137 }
 0xba4   : > { %v8226_v9 = vsub.f32 %v16133_v30, %v8138_v34  ;;  %v8227_v19 = vsub.f32 %v16121_v62, %v8138_v34 }
 0xba5   : > { %v16281_v56 = vpop.f32.mrf.mxu2 }
 0xba6   : > { %v8302_v28 = vmul.f32 1.442695, %v8226_v9  ;;  %v8304_v23 = vmul.f32 1.442695, %v8227_v19  ;;  %v8181_v55 = vmax.f32 %v16281_v56, %v16259_v58  ;;  %v16289_v30 = vpop.eup %11706 }
 0xba7   : > { %v16291_v62 = vpop.eup %11708 }
 0xba8   : > { %11710 = vpow2.f32 %v8302_v28  ;;  %8419 = vadd.xlane.f32.xlu2 %v8418_v27  ;;  %8182 = vmax.xlane.f32.xlu1 %v8181_v55  ;;  %v8421_v28 = vadd.f32 %v16291_v62, %v16289_v30 }
 0xba9   : > { %11712 = vpow2.f32 %v8304_v23  ;;  %v16287_v33 = vpop.f32.mrf.mxu1 }
 0xbab   : > { %v8141_v5 = vpop.xlane.xlu0 %8140 }
 0xbac   : > { %v8228_v11 = vsub.f32 %v16141_v48, %v8141_v5  ;;  %v8229_v20 = vsub.f32 %v16129_v51, %v8141_v5 }
 0xbad   : > { %v16295_v15 = vpop.f32.mrf.mxu2 }
 0xbae   : > { %v16297_v34 = vpop.eup %11710  ;;  %v8306_v9 = vmul.f32 1.442695, %v8228_v11  ;;  %v8308_v19 = vmul.f32 1.442695, %v8229_v20  ;;  %v8184_v23 = vmax.f32 %v16295_v15, %v16273_v10 }
 0xbaf   : > { %v16303_v27 = vpop.eup %11712 }
 0xbb0   : > { %11714 = vpow2.f32 %v8306_v9  ;;  %8422 = vadd.xlane.f32.xlu1 %v8421_v28  ;;  %8185 = vmax.xlane.f32.xlu0 %v8184_v23  ;;  %v8424_v51 = vadd.f32 %v16303_v27, %v16297_v34 }
 0xbb1   : > { %11716 = vpow2.f32 %v8308_v19  ;;  %v16307_v48 = vpop.f32.mrf.mxu1 }
 0xbb2   : > { %8425 = vadd.xlane.f32.xlu2 %v8424_v51 }
 0xbb3   : > { %v8144_v55 = vpop.xlane.xlu1 %8143 }
 0xbb4   : > { %v8230_v5 = vsub.f32 %v16149_v43, %v8144_v55  ;;  %v8231_v11 = vsub.f32 %v16137_v61, %v8144_v55 }
 0xbb5   : > { %v16311_v20 = vpop.f32.mrf.mxu2 }
 0xbb6   : > { %v16313_v54 = vpop.eup %11714  ;;  %v8310_v24 = vmul.f32 1.442695, %v8230_v5  ;;  %v8312_v9 = vmul.f32 1.442695, %v8231_v11  ;;  %v8187_v28 = vmax.f32 %v16311_v20, %v16287_v33 }
 0xbb7   : > { %v16317_v23 = vpop.eup %11716 }
 0xbb8   : > { %11718 = vpow2.f32 %v8310_v24  ;;  %v8427_v19 = vadd.f32 %v16317_v23, %v16313_v54 }
 0xbb9   : > { %11720 = vpow2.f32 %v8312_v9  ;;  %v16321_v51 = vpop.f32.mrf.mxu1 }
 0xbba   : > { %8428 = vadd.xlane.f32.xlu1 %v8427_v19  ;;  %8188 = vmax.xlane.f32.xlu2 %v8187_v28 }
 0xbbb   : > { %v8147_v61 = vpop.xlane.xlu0 %8146 }
 0xbbc   : > { %v8232_v43 = vsub.f32 %v16157_v47, %v8147_v61  ;;  %v8233_v55 = vsub.f32 %v16145_v40, %v8147_v61 }
 0xbbd   : > { %v16325_v5 = vpop.f32.mrf.mxu2 }
 0xbbe   : > { %v16327_v11 = vpop.eup %11718  ;;  %v8314_v50 = vmul.f32 1.442695, %v8232_v43  ;;  %v8316_v22 = vmul.f32 1.442695, %v8233_v55  ;;  %v8190_v24 = vmax.f32 %v16325_v5, %v16307_v48 }
 0xbbf   : > { %v16331_v12 = vpop.eup %11720 }
 0xbc0   : > { %11722 = vpow2.f32 %v8314_v50  ;;  %v8430_v9 = vadd.f32 %v16331_v12, %v16327_v11 }
 0xbc1   : > { %11724 = vpow2.f32 %v8316_v22  ;;  %v16335_v28 = vpop.f32.mrf.mxu1 }
 0xbc2   : > { %8431 = vadd.xlane.f32.xlu0 %v8430_v9  ;;  %8191 = vmax.xlane.f32.xlu1 %v8190_v24 }
 0xbc3   : > { %v8150_v40 = vpop.xlane.xlu1 %8149 }
 0xbc4   : > { %v8234_v47 = vsub.f32 %v16165_v53, %v8150_v40  ;;  %v8235_v19 = vsub.f32 %v16153_v32, %v8150_v40 }
 0xbc5   : > { %v16339_v61 = vpop.f32.mrf.mxu2 }
 0xbc6   : > { %v16341_v43 = vpop.eup %11722  ;;  %v8193_v50 = vmax.f32 %v16339_v61, %v16321_v51  ;;  %v8318_v18 = vmul.f32 1.442695, %v8234_v47  ;;  %v8320_v9 = vmul.f32 1.442695, %v8235_v19 }
 0xbc7   : > { %v16345_v55 = vpop.eup %11724 }
 0xbc8   : > { %v8433_v22 = vadd.f32 %v16345_v55, %v16341_v43  ;;  %11726 = vpow2.f32 %v8318_v18 }
 0xbc9   : > { %v16349_v53 = vpop.f32.mrf.mxu1  ;;  %11728 = vpow2.f32 %v8320_v9 }
 0xbca   : > { %8434 = vadd.xlane.f32.xlu2 %v8433_v22  ;;  %8194 = vmax.xlane.f32.xlu0 %v8193_v50 }
 0xbcb   : > { %v8153_v24 = vpop.xlane.xlu0 %8152 }
 0xbcc   : > { %v8236_v32 = vsub.f32 %v16173_v17, %v8153_v24  ;;  %v8237_v40 = vsub.f32 %v16161_v16, %v8153_v24 }
 0xbcd   : > { %v16353_v42 = vpop.f32.mrf.mxu2 }
 0xbce   : > { %v8196_v47 = vmax.f32 %v16353_v42, %v16335_v28  ;;  %v8322_v1 = vmul.f32 1.442695, %v8236_v32  ;;  %v8324_v57 = vmul.f32 1.442695, %v8237_v40  ;;  %v16357_v19 = vpop.eup %11726 }
 0xbcf   : > { %v16359_v50 = vpop.eup %11728 }
 0xbd0   : > { %8197 = vmax.xlane.f32.xlu1 %v8196_v47  ;;  %11730 = vpow2.f32 %v8322_v1  ;;  %v8436_v24 = vadd.f32 %v16359_v50, %v16357_v19 }
 0xbd1   : > { %11732 = vpow2.f32 %v8324_v57  ;;  %v16365_v9 = vpop.f32.mrf.mxu1 }
 0xbd3   : > { %v8156_v18 = vpop.xlane.xlu0 %8155 }
 0xbd4   : > { %v8238_v22 = vsub.f32 %v16181_v63, %v8156_v18  ;;  %v8239_v17 = vsub.f32 %v16169_v8, %v8156_v18 }
 0xbd5   : > { %v16363_v16 = vpop.f32.mrf.mxu2 }
 0xbd6   : > { %v8199_v32 = vmax.f32 %v16363_v16, %v16349_v53  ;;  %v8326_v40 = vmul.f32 1.442695, %v8238_v22  ;;  %v8328_v47 = vmul.f32 1.442695, %v8239_v17  ;;  %v16371_v1 = vpop.eup %11730 }
 0xbd7   : > { %v16373_v63 = vpop.eup %11732 }
 0xbd8   : > { %8437 = vadd.xlane.f32.xlu1 %v8436_v24  ;;  %8200 = vmax.xlane.f32.xlu0 %v8199_v32  ;;  %11734 = vpow2.f32 %v8326_v40  ;;  %v8439_v44 = vadd.f32 %v16373_v63, %v16371_v1 }
 0xbd9   : > { %11736 = vpow2.f32 %v8328_v47  ;;  %v16383_v17 = vpop.f32.mrf.mxu1 }
 0xbdb   : > { %v8159_v57 = vpop.xlane.xlu2 %8158 }
 0xbdc   : > { %v8240_v8 = vsub.f32 %v16189_v2, %v8159_v57  ;;  %v8241_v18 = vsub.f32 %v16177_v38, %v8159_v57 }
 0xbdd   : > { %v16377_v13 = vpop.f32.mrf.mxu2 }
 0xbde   : > { %v8202_v22 = vmax.f32 %v16377_v13, %v16365_v9  ;;  %v8330_v24 = vmul.f32 1.442695, %v8240_v8  ;;  %v8332_v32 = vmul.f32 1.442695, %v8241_v18  ;;  %v16385_v40 = vpop.eup %11734 }
 0xbdf   : > { %v16387_v2 = vpop.eup %11736 }
 0xbe0   : > { %8440 = vadd.xlane.f32.xlu0 %v8439_v44  ;;  %8203 = vmax.xlane.f32.xlu2 %v8202_v22  ;;  %11738 = vpow2.f32 %v8330_v24  ;;  %v8442_v44 = vadd.f32 %v16387_v2, %v16385_v40 }
 0xbe1   : > { %11740 = vpow2.f32 %v8332_v32 }
 0xbe3   : > { %v8162_v47 = vpop.xlane.xlu1 %8161 }
 0xbe4   : > { %v8242_v38 = vsub.f32 %v16197_v60, %v8162_v47  ;;  %v8243_v57 = vsub.f32 %v16185_v36, %v8162_v47  ;;  %v16399_v60 = vpop.f32.mrf.mxu1 }
 0xbe5   : > { %v16391_v31 = vpop.f32.mrf.mxu2 }
 0xbe6   : > { %v8334_v3 = vmul.f32 1.442695, %v8242_v38  ;;  %v8336_v4 = vmul.f32 1.442695, %v8243_v57  ;;  %v8205_v8 = vmax.f32 %v16391_v31, %v16383_v17  ;;  %v16397_v18 = vpop.eup %11738 }
 0xbe7   : > { %v16401_v36 = vpop.eup %11740 }
 0xbe8   : > { %11742 = vpow2.f32 %v8334_v3  ;;  %8443 = vadd.xlane.f32.xlu2 %v8442_v44  ;;  %8206 = vmax.xlane.f32.xlu1 %v8205_v8  ;;  %v8445_v3 = vadd.f32 %v16401_v36, %v16397_v18 }
 0xbe9   : > { %11744 = vpow2.f32 %v8336_v4 }
 0xbeb   : > { %v8165_v22 = vpop.xlane.xlu1 %8164 }
 0xbec   : > { %v8244_v24 = vsub.f32 %v16205_v39, %v8165_v22  ;;  %v8245_v32 = vsub.f32 %v16193_v45, %v8165_v22  ;;  %v16415_v59 = vpop.f32.mrf.mxu1 }
 0xbed   : > { %v16405_v47 = vpop.f32.mrf.mxu2  ;;  %17600 = vst [vmem:[#allocation70_spill] sm:$0xff] %v16415_v59 }
 0xbee   : > { %v16407_v38 = vpop.eup %11742  ;;  %v8338_v4 = vmul.f32 1.442695, %v8244_v24  ;;  %v8340_v8 = vmul.f32 1.442695, %v8245_v32  ;;  %v8208_v24 = vmax.f32 %v16405_v47, %v16399_v60 }
 0xbef   : > { %v16411_v57 = vpop.eup %11744 }
 0xbf0   : > { %8446 = vadd.xlane.f32.xlu1 %v8445_v3  ;;  %v8448_v44 = vadd.f32 %v16411_v57, %v16407_v38  ;;  %11746 = vpow2.f32 %v8338_v4 }
 0xbf1   : > { %11748 = vpow2.f32 %v8340_v8 }
 0xbf2   : > { %8449 = vadd.xlane.f32.xlu2 %v8448_v44 }
 0xbf3   : > { %v16427_v4 = vpop.xlane.xlu1 %8167 }
 0xbf4   : > { %17603 = vst [vmem:[#allocation74_spill] sm:$0xff] %v16427_v4 }
 0xbf5   : > { %v8408_v45 = vpop.xlane.xlu0 %8407  ;;  %v16417_v39 = vpop.f32.mrf.mxu2 }
 0xbf6   : > { %17601 = vst [vmem:[#allocation72_spill] sm:$0xff] %v16417_v39  ;;  %11750 = vrcp.f32 %v8408_v45  ;;  %v8211_v22 = vmax.f32 %v16417_v39, %v16415_v59  ;;  %v16423_v32 = vpop.eup %11746 }
 0xbf7   : > { %v16425_v3 = vpop.eup %11748 }
 0xbf8   : > { %8209 = vmax.xlane.f32.xlu1 %v8208_v24  ;;  %8212 = vmax.xlane.f32.xlu0 %v8211_v22  ;;  %17602 = vst [vmem:[#allocation76_spill] sm:$0xff] %v16425_v3  ;;  %v8451_v22 = vadd.f32 %v16425_v3, %v16423_v32 }
 0xbfc   : > { %v11751_v44 = vpop.eup %11750 }
 0xbfd   : > { %v8411_v8 = vpop.xlane.xlu2 %8410  ;;  %v16430_v45 = vmul.f32 %v11751_v44, %v16215_v52  ;;  %v16433_v59 = vmul.f32 %v11751_v44, %v16219_v7  ;;  %v16441_v24 = vpop.xlane.xlu0 %8170 }
 0xbfe   : > { %11752 = vrcp.f32 %v8411_v8  ;;  %17606 = vst [vmem:[#allocation78_spill] sm:$0xff] %v16441_v24 }
 0xbff   : > { %17604 = vst [vmem:[#allocation55_spill] sm:$0xff] %v16430_v45 }
 0xc00   : > { %17605 = vst [vmem:[#allocation57_spill] sm:$0xff] %v16433_v59  ;;  %8452 = vadd.xlane.f32.xlu1 %v8451_v22 }
 0xc01   : > { %10931 = vst [vmem:[%s15434_s3 + $0x200] sm:$0xff] %v16430_v45 }
 0xc02   : > { %10932 = vst [vmem:[%s15434_s3 + $0x208] sm:$0xff] %v16433_v59 }
 0xc03   : > { %v16443_v4 = vpop.xlane.xlu1 %8173 }
 0xc04   : > { %v11753_v39 = vpop.eup %11752 }
 0xc05   : > { %v16446_v52 = vmul.f32 %v11753_v39, %v16229_v37  ;;  %v16449_v7 = vmul.f32 %v11753_v39, %v16233_v29 }
 0xc07   : > { %17607 = vst [vmem:[#allocation59_spill] sm:$0xff] %v16446_v52 }
 0xc08   : > { %17608 = vst [vmem:[#allocation63_spill] sm:$0xff] %v16449_v7 }
 0xc09   : > { %10933 = vst [vmem:[%s15434_s3 + $0x210] sm:$0xff] %v16446_v52 }
 0xc0a   : > { %10934 = vst [vmem:[%s15434_s3 + $0x218] sm:$0xff] %v16449_v7 }
 0xc0b   : > { %v8414_v22 = vpop.xlane.xlu1 %8413  ;;  %v16459_v24 = vpop.xlane.xlu0 %8176 }
 0xc0c   : > { %11754 = vrcp.f32 %v8414_v22 }
 0xc12   : > { %v11755_v37 = vpop.eup %11754 }
 0xc13   : > { %v8417_v3 = vpop.xlane.xlu0 %8416  ;;  %v16461_v29 = vpop.xlane.xlu2 %8179  ;;  %v16464_v39 = vmul.f32 %v11755_v37, %v16247_v46  ;;  %v16467_v44 = vmul.f32 %v11755_v37, %v16249_v35 }
 0xc14   : > { %11756 = vrcp.f32 %v8417_v3 }
 0xc15   : > { %17609 = vst [vmem:[#allocation80_spill] sm:$0xff] %v16467_v44 }
 0xc16   : > { %10935 = vst [vmem:[%s15434_s3 + $0x220] sm:$0xff] %v16464_v39 }
 0xc17   : > { %10936 = vst [vmem:[%s15434_s3 + $0x228] sm:$0xff] %v16467_v44 }
 0xc1a   : > { %v11757_v8 = vpop.eup %11756 }
 0xc1b   : > { %v8420_v59 = vpop.xlane.xlu2 %8419  ;;  %v16473_v7 = vpop.xlane.xlu1 %8182  ;;  %v16476_v22 = vmul.f32 %v11757_v8, %v16261_v0  ;;  %v16479_v45 = vmul.f32 %v11757_v8, %v16263_v41 }
 0xc1c   : > { %11758 = vrcp.f32 %v8420_v59 }
 0xc1d   : > { %10937 = vst [vmem:[%s15434_s3 + $0x230] sm:$0xff] %v16476_v22 }
 0xc1e   : > { %10938 = vst [vmem:[%s15434_s3 + $0x238] sm:$0xff] %v16479_v45 }
 0xc22   : > { %v11759_v3 = vpop.eup %11758 }
 0xc23   : > { %v8423_v37 = vpop.xlane.xlu1 %8422  ;;  %v8186_v0 = vpop.xlane.xlu0 %8185  ;;  %v16490_v52 = vmul.f32 %v11759_v3, %v16275_v26  ;;  %v16493_v41 = vmul.f32 %v11759_v3, %v16277_v25 }
 0xc24   : > { %11760 = vrcp.f32 %v8423_v37  ;;  %v8258_v59 = vsub.f32 %v16295_v15, %v8186_v0  ;;  %v8259_v8 = vsub.f32 %v16273_v10, %v8186_v0 }
 0xc25   : > { %v8426_v46 = vpop.xlane.xlu2 %8425  ;;  %10939 = vst [vmem:[%s15434_s3 + $0x240] sm:$0xff] %v16490_v52 }
 0xc26   : > { %v8366_v35 = vmul.f32 1.442695, %v8258_v59  ;;  %v8368_v44 = vmul.f32 1.442695, %v8259_v8  ;;  %11762 = vrcp.f32 %v8426_v46  ;;  %10940 = vst [vmem:[%s15434_s3 + $0x248] sm:$0xff] %v16493_v41 }
 0xc28   : > { %11764 = vpow2.f32 %v8366_v35 }
 0xc29   : > { %11766 = vpow2.f32 %v8368_v44 }
 0xc2a   : > { %v11761_v26 = vpop.eup %11760 }
 0xc2b   : > { %v16502_v25 = vmul.f32 %v11761_v26, %v16289_v30  ;;  %v16505_v15 = vmul.f32 %v11761_v26, %v16291_v62 }
 0xc2c   : > { %v11763_v10 = vpop.eup %11762 }
 0xc2d   : > { %v8429_v3 = vpop.xlane.xlu1 %8428  ;;  %v8189_v37 = vpop.xlane.xlu2 %8188  ;;  %v16508_v0 = vmul.f32 %v11763_v10, %v16297_v34  ;;  %v16511_v46 = vmul.f32 %v11763_v10, %v16303_v27  ;;  %10941 = vst [vmem:[%s15434_s3 + $0x250] sm:$0xff] %v16502_v25 }
 0xc2e   : > { %v16519_v62 = vpop.eup %11764  ;;  %11768 = vrcp.f32 %v8429_v3  ;;  %v8260_v35 = vsub.f32 %v16311_v20, %v8189_v37  ;;  %v8261_v59 = vsub.f32 %v16287_v33, %v8189_v37  ;;  %10942 = vst [vmem:[%s15434_s3 + $0x258] sm:$0xff] %v16505_v15 }
 0xc2f   : > { %v16525_v34 = vpop.eup %11766  ;;  %10943 = vst [vmem:[%s15434_s3 + $0x260] sm:$0xff] %v16508_v0 }
 0xc30   : > { %v8370_v27 = vmul.f32 1.442695, %v8260_v35  ;;  %v8372_v8 = vmul.f32 1.442695, %v8261_v59  ;;  %v8472_v26 = vadd.f32 %v16525_v34, %v16519_v62  ;;  %10944 = vst [vmem:[%s15434_s3 + $0x268] sm:$0xff] %v16511_v46 }
 0xc32   : > { %11770 = vpow2.f32 %v8370_v27  ;;  %8473 = vadd.xlane.f32.xlu2 %v8472_v26 }
 0xc33   : > { %11772 = vpow2.f32 %v8372_v8 }
 0xc34   : > { %v11769_v20 = vpop.eup %11768 }
 0xc35   : > { %v8432_v33 = vpop.xlane.xlu0 %8431  ;;  %v8192_v10 = vpop.xlane.xlu1 %8191  ;;  %v16534_v3 = vmul.f32 %v11769_v20, %v16313_v54  ;;  %v16537_v37 = vmul.f32 %v11769_v20, %v16317_v23 }
 0xc36   : > { %11774 = vrcp.f32 %v8432_v33  ;;  %v8262_v35 = vsub.f32 %v16325_v5, %v8192_v10  ;;  %v8263_v59 = vsub.f32 %v16307_v48, %v8192_v10 }
 0xc37   : > { %10945 = vst [vmem:[%s15434_s3 + $0x270] sm:$0xff] %v16534_v3 }
 0xc38   : > { %v16547_v26 = vpop.eup %11770  ;;  %v8374_v54 = vmul.f32 1.442695, %v8262_v35  ;;  %v8376_v44 = vmul.f32 1.442695, %v8263_v59  ;;  %10946 = vst [vmem:[%s15434_s3 + $0x278] sm:$0xff] %v16537_v37 }
 0xc39   : > { %v16551_v23 = vpop.eup %11772 }
 0xc3a   : > { %11776 = vpow2.f32 %v8374_v54  ;;  %v8475_v48 = vadd.f32 %v16551_v23, %v16547_v26 }
 0xc3b   : > { %11778 = vpow2.f32 %v8376_v44 }
 0xc3c   : > { %v11775_v5 = vpop.eup %11774  ;;  %8476 = vadd.xlane.f32.xlu1 %v8475_v48 }
 0xc3d   : > { %v8435_v20 = vpop.xlane.xlu2 %8434  ;;  %v8195_v33 = vpop.xlane.xlu0 %8194  ;;  %v16556_v10 = vmul.f32 %v11775_v5, %v16327_v11  ;;  %v16559_v35 = vmul.f32 %v11775_v5, %v16331_v12 }
 0xc3e   : > { %11780 = vrcp.f32 %v8435_v20  ;;  %v8264_v59 = vsub.f32 %v16339_v61, %v8195_v33  ;;  %v8265_v54 = vsub.f32 %v16321_v51, %v8195_v33 }
 0xc3f   : > { %10947 = vst [vmem:[%s15434_s3 + $0x280] sm:$0xff] %v16556_v10 }
 0xc40   : > { %v16565_v30 = vpop.eup %11776  ;;  %v8378_v44 = vmul.f32 1.442695, %v8264_v59  ;;  %v8380_v48 = vmul.f32 1.442695, %v8265_v54  ;;  %10948 = vst [vmem:[%s15434_s3 + $0x288] sm:$0xff] %v16559_v35 }
 0xc41   : > { %v16569_v8 = vpop.eup %11778 }
 0xc42   : > { %11782 = vpow2.f32 %v8378_v44  ;;  %v8478_v12 = vadd.f32 %v16569_v8, %v16565_v30 }
 0xc43   : > { %11784 = vpow2.f32 %v8380_v48  ;;  %v8198_v11 = vpop.xlane.xlu1 %8197 }
 0xc44   : > { %v11781_v61 = vpop.eup %11780  ;;  %8479 = vadd.xlane.f32.xlu1 %v8478_v12  ;;  %v8266_v51 = vsub.f32 %v16353_v42, %v8198_v11  ;;  %v8267_v5 = vsub.f32 %v16335_v28, %v8198_v11 }
 0xc45   : > { %v16576_v20 = vmul.f32 %v11781_v61, %v16341_v43  ;;  %v16579_v33 = vmul.f32 %v11781_v61, %v16345_v55 }
 0xc46   : > { %v8382_v59 = vmul.f32 1.442695, %v8266_v51  ;;  %v8384_v54 = vmul.f32 1.442695, %v8267_v5  ;;  %v8254_v5 = vsub.f32 %v16267_v6, %v16461_v29 }
 0xc47   : > { %10949 = vst [vmem:[%s15434_s3 + $0x290] sm:$0xff] %v16576_v20  ;;  %v8675_v44 = vpack.c.bf16 %v16576_v20, %v16556_v10  ;;  %v17616_v10 = vld [vmem:[#allocation78_spill] sm:$0xff]  ;;  %v17617_v20 = vld [vmem:[#allocation51_spill] sm:$0xff] }
 0xc48   : > { %v16587_v12 = vpop.eup %11782  ;;  %11786 = vpow2.f32 %v8382_v59  ;;  %10950 = vst [vmem:[%s15434_s3 + $0x298] sm:$0xff] %v16579_v33 }
 0xc49   : > { %v16591_v42 = vpop.eup %11784  ;;  %11788 = vpow2.f32 %v8384_v54  ;;  %v8255_v54 = vsub.f32 %v16245_v21, %v16461_v29 }
 0xc4a   : > { %v8481_v28 = vadd.f32 %v16591_v42, %v16587_v12 }
 0xc4b   : > { %v8438_v43 = vpop.xlane.xlu1 %8437  ;;  %v8201_v55 = vpop.xlane.xlu0 %8200 }
 0xc4c   : > { %8482 = vadd.xlane.f32.xlu0 %v8481_v28  ;;  %11790 = vrcp.f32 %v8438_v43  ;;  %v8268_v11 = vsub.f32 %v16363_v16, %v8201_v55  ;;  %v8269_v61 = vsub.f32 %v16349_v53, %v8201_v55  ;;  %v8358_v53 = vmul.f32 1.442695, %v8254_v5 }
 0xc4d   : > { %v8360_v43 = vmul.f32 1.442695, %v8255_v54  ;;  %v8256_v5 = vsub.f32 %v16281_v56, %v16473_v7 }
 0xc4e   : > { %v16597_v51 = vpop.eup %11786  ;;  %v8386_v59 = vmul.f32 1.442695, %v8268_v11  ;;  %v8388_v27 = vmul.f32 1.442695, %v8269_v61 }
 0xc4f   : > { %v16601_v48 = vpop.eup %11788 }
 0xc50   : > { %11792 = vpow2.f32 %v8386_v59  ;;  %v8484_v28 = vadd.f32 %v16601_v48, %v16597_v51 }
 0xc51   : > { %11794 = vpow2.f32 %v8388_v27 }
 0xc52   : > { %v11791_v16 = vpop.eup %11790  ;;  %8485 = vadd.xlane.f32.xlu2 %v8484_v28  ;;  %v8362_v28 = vmul.f32 1.442695, %v8256_v5 }
 0xc53   : > { %v8441_v55 = vpop.xlane.xlu0 %8440  ;;  %v8204_v6 = vpop.xlane.xlu2 %8203  ;;  %v16608_v11 = vmul.f32 %v11791_v16, %v16357_v19  ;;  %v16611_v61 = vmul.f32 %v11791_v16, %v16359_v50 }
 0xc54   : > { %11796 = vrcp.f32 %v8441_v55  ;;  %v8270_v21 = vsub.f32 %v16377_v13, %v8204_v6  ;;  %v8271_v29 = vsub.f32 %v16365_v9, %v8204_v6  ;;  %v8257_v13 = vsub.f32 %v16259_v58, %v16473_v7 }
 0xc55   : > { %10951 = vst [vmem:[%s15434_s3 + $0x2a0] sm:$0xff] %v16608_v11  ;;  %11798 = vpow2.f32 %v8358_v53 }
 0xc56   : > { %v16617_v27 = vpop.eup %11792  ;;  %v8390_v59 = vmul.f32 1.442695, %v8270_v21  ;;  %v8392_v54 = vmul.f32 1.442695, %v8271_v29  ;;  %10952 = vst [vmem:[%s15434_s3 + $0x2a8] sm:$0xff] %v16611_v61  ;;  %11800 = vpow2.f32 %v8360_v43  ;;  %v8250_v29 = vsub.f32 %v16241_v49, %v16443_v4 }
 0xc57   : > { %v16623_v19 = vpop.eup %11794  ;;  %v8364_v56 = vmul.f32 1.442695, %v8257_v13 }
 0xc58   : > { %11802 = vpow2.f32 %v8390_v59  ;;  %v8487_v50 = vadd.f32 %v16623_v19, %v16617_v27 }
 0xc59   : > { %11804 = vpow2.f32 %v8392_v54  ;;  %v8350_v54 = vmul.f32 1.442695, %v8250_v29 }
 0xc5a   : > { %v11797_v9 = vpop.eup %11796  ;;  %8488 = vadd.xlane.f32.xlu1 %v8487_v50 }
 0xc5b   : > { %v8444_v16 = vpop.xlane.xlu2 %8443  ;;  %v8207_v53 = vpop.xlane.xlu1 %8206  ;;  %v16630_v55 = vmul.f32 %v11797_v9, %v16371_v1  ;;  %v16633_v43 = vmul.f32 %v11797_v9, %v16373_v63 }
 0xc5c   : > { %v16635_v58 = vpop.eup %11798  ;;  %11806 = vrcp.f32 %v8444_v16  ;;  %v8272_v7 = vsub.f32 %v16391_v31, %v8207_v53  ;;  %v8273_v6 = vsub.f32 %v16383_v17, %v8207_v53  ;;  %v8251_v31 = vsub.f32 %v16223_v14, %v16443_v4 }
 0xc5d   : > { %v16639_v21 = vpop.eup %11800  ;;  %10953 = vst [vmem:[%s15434_s3 + $0x2b0] sm:$0xff] %v16630_v55  ;;  %11808 = vpow2.f32 %v8362_v28 }
 0xc5e   : > { %v16645_v5 = vpop.eup %11802  ;;  %v8394_v1 = vmul.f32 1.442695, %v8272_v7  ;;  %v8396_v63 = vmul.f32 1.442695, %v8273_v6  ;;  %10954 = vst [vmem:[%s15434_s3 + $0x2b8] sm:$0xff] %v16633_v43  ;;  %11810 = vpow2.f32 %v8364_v56  ;;  %v8466_v17 = vadd.f32 %v16639_v21, %v16635_v58 }
 0xc5f   : > { %v16649_v59 = vpop.eup %11804  ;;  %v8352_v50 = vmul.f32 1.442695, %v8251_v31 }
 0xc60   : > { %11812 = vpow2.f32 %v8394_v1  ;;  %v8490_v49 = vadd.f32 %v16649_v59, %v16645_v5 }
 0xc61   : > { %11814 = vpow2.f32 %v8396_v63 }
 0xc62   : > { %v11807_v13 = vpop.eup %11806  ;;  %8467 = vadd.xlane.f32.xlu1 %v8466_v17  ;;  %8491 = vadd.xlane.f32.xlu0 %v8490_v49 }
 0xc63   : > { %v8447_v9 = vpop.xlane.xlu1 %8446  ;;  %v8558_v28 = vmul.f32 %v11807_v13, %v16385_v40  ;;  %v8559_v14 = vmul.f32 %v11807_v13, %v16387_v2  ;;  %v16659_v4 = vpop.eup %11808 }
 0xc64   : > { %11816 = vrcp.f32 %v8447_v9  ;;  %v16661_v56 = vpop.eup %11810 }
 0xc65   : > { %11818 = vpow2.f32 %v8350_v54  ;;  %v8450_v16 = vpop.xlane.xlu2 %8449  ;;  %10955 = vst [vmem:[%s15434_s3 + $0x2c0] sm:$0xff] %v8558_v28  ;;  %v8469_v2 = vadd.f32 %v16661_v56, %v16659_v4 }
 0xc66   : > { %v16664_v53 = vpop.eup %11812  ;;  %11820 = vrcp.f32 %v8450_v16  ;;  %10956 = vst [vmem:[%s15434_s3 + $0x2c8] sm:$0xff] %v8559_v14 }
 0xc67   : > { %v16667_v7 = vpop.eup %11814  ;;  %11822 = vpow2.f32 %v8352_v50 }
 0xc68   : > { %v8493_v40 = vadd.f32 %v16667_v7, %v16664_v53 }
 0xc6a   : > { %v11817_v6 = vpop.eup %11816  ;;  %8494 = vadd.xlane.f32.xlu2 %v8493_v40  ;;  %8470 = vadd.xlane.f32.xlu1 %v8469_v2 }
 0xc6b   : > { %v16673_v29 = vpop.eup %11818  ;;  %v8210_v1 = vpop.xlane.xlu1 %8209  ;;  %v8560_v63 = vmul.f32 %v11817_v6, %v16397_v18  ;;  %v8561_v9 = vmul.f32 %v11817_v6, %v16401_v36  ;;  %v17610_v6 = vld [vmem:[#allocation76_spill] sm:$0xff] }
 0xc6c   : > { %v11821_v31 = vpop.eup %11820  ;;  %v8274_v17 = vsub.f32 %v16405_v47, %v8210_v1  ;;  %v8275_v49 = vsub.f32 %v16399_v60, %v8210_v1 }
 0xc6d   : > { %v16678_v54 = vpop.eup %11822  ;;  %v8562_v13 = vmul.f32 %v11821_v31, %v16407_v38  ;;  %v8563_v50 = vmul.f32 %v11821_v31, %v16411_v57  ;;  %10957 = vst [vmem:[%s15434_s3 + $0x2d0] sm:$0xff] %v8560_v63 }
 0xc6e   : > { %v8398_v16 = vmul.f32 1.442695, %v8274_v17  ;;  %v8400_v40 = vmul.f32 1.442695, %v8275_v49  ;;  %v8460_v18 = vadd.f32 %v16678_v54, %v16673_v29  ;;  %10958 = vst [vmem:[%s15434_s3 + $0x2d8] sm:$0xff] %v8561_v9  ;;  %v7725_v49 = vld [vmem:[%s17048_s15 + $0x8] sm:$0xff] }
 0xc6f   : > { %10959 = vst [vmem:[%s15434_s3 + $0x2e0] sm:$0xff] %v8562_v13 }
 0xc70   : > { %10960 = vst [vmem:[%s15434_s3 + $0x2e8] sm:$0xff] %v8563_v50  ;;  %11824 = vpow2.f32 %v8398_v16  ;;  %v8679_v16 = vpack.c.bf16 %v8560_v63, %v8558_v28  ;;  %v8213_v28 = vpop.xlane.xlu0 %8212 }
 0xc71   : > { %11826 = vpow2.f32 %v8400_v40  ;;  %v8680_v40 = vpack.c.bf16 %v8561_v9, %v8559_v14  ;;  %v17611_v14 = vld [vmem:[#allocation72_spill] sm:$0xff]  ;;  %v17612_v9 = vpack.c.bf16 %v16579_v33, %v16559_v35  ;;  %v17618_v35 = vld [vmem:[#allocation49_spill] sm:$0xff] }
 0xc72   : > { %8461 = vadd.xlane.f32.xlu1 %v8460_v18  ;;  %v8678_v18 = vpack.c.bf16 %v16633_v43, %v16611_v61  ;;  %v8276_v63 = vsub.f32 %v17611_v14, %v8213_v28  ;;  %v17614_v61 = vpack.c.bf16 %v16534_v3, %v16508_v0  ;;  %v17615_v43 = vpack.c.bf16 %v16537_v37, %v16511_v46  ;;  %v17620_v0 = vld [vmem:[#allocation68_spill] sm:$0xff] }
 0xc73   : > { %v8453_v60 = vpop.xlane.xlu1 %8452  ;;  %v8249_v33 = vsub.f32 %v17618_v35, %v17616_v10  ;;  %v8253_v3 = vsub.f32 %v17620_v0, %v16459_v24  ;;  %v17621_v37 = vpack.c.bf16 %v16502_v25, %v16490_v52 }
 0xc74   : > { %11828 = vrcp.f32 %v8453_v60  ;;  %v17613_v60 = vld [vmem:[#allocation70_spill] sm:$0xff] }
 0xc75   : > { %v8348_v46 = vmul.f32 1.442695, %v8249_v33  ;;  %v7726_v33 = vld [vmem:[%s17048_s15 + $0x10] sm:$0xff] }
 0xc76   : > { %v16689_v47 = vpop.eup %11824 }
 0xc77   : > { %v16691_v38 = vpop.eup %11826 }
 0xc78   : > { %v8496_v36 = vadd.f32 %v16691_v38, %v16689_v47 }
 0xc7a   : > { %v11829_v57 = vpop.eup %11828  ;;  %8497 = vadd.xlane.f32.xlu0 %v8496_v36  ;;  %v8277_v36 = vsub.f32 %v17613_v60, %v8213_v28 }
 0xc7b   : > { %v8564_v2 = vmul.f32 %v11829_v57, %v16423_v32  ;;  %v8565_v1 = vmul.f32 %v11829_v57, %v17610_v6  ;;  %v7727_v32 = vld [vmem:[%s17048_s15 + $0x18] sm:$0xff]  ;;  %v17619_v57 = vld [vmem:[#allocation53_spill] sm:$0xff] }
 0xc7d   : > { %10961 = vst [vmem:[%s15434_s3 + $0x2f0] sm:$0xff] %v8564_v2  ;;  %v8681_v31 = vpack.c.bf16 %v8564_v2, %v8562_v13  ;;  %v8682_v17 = vpack.c.bf16 %v8565_v1, %v8563_v50  ;;  %v7724_v13 = vld [vmem:[%s17048_s15] sm:$0xff]  ;;  %v8677_v50 = vpack.c.bf16 %v16630_v55, %v16608_v11  ;;  %v8402_v11 = vmul.f32 1.442695, %v8276_v63  ;;  %v17626_v63 = vld [vmem:[#allocation59_spill] sm:$0xff] }
 0xc7e   : > { %10962 = vst [vmem:[%s15434_s3 + $0x2f8] sm:$0xff] %v8565_v1  ;;  %v8404_v55 = vmul.f32 1.442695, %v8277_v36  ;;  %v8252_v2 = vsub.f32 %v17619_v57, %v16459_v24  ;;  %v17629_v36 = vld [vmem:[#allocation63_spill] sm:$0xff] }
 0xc7f   : > { %8699 = vmatpush.bf16.xpose.msra.mxu3 %v8681_v31  ;;  %8718 = vmatpush.bf16.xpose.msrb.mxu0 %v8682_v17  ;;  %11830 = vpow2.f32 %v8402_v11  ;;  %v17630_v11 = vld [vmem:[#allocation57_spill] sm:$0xff] }
 0xc80   : > { %11832 = vpow2.f32 %v8404_v55  ;;  %v17631_v55 = vpack.c.bf16 %v17629_v36, %v17630_v11 }
 0xc82   : > { %7735 = vperm.xlu2 %11488, %v7725_v49   ;;  %v17622_v49 = vpack.c.bf16 %v16505_v15, %v16493_v41 }
 0xc85   : > { %v16732_v6 = vpop.eup %11830 }
 0xc86   : > { %v16736_v17 = vpop.eup %11832 }
 0xc87   : > { %8700 = vmatpush.bf16.xpose.msra.mxu3 %v8679_v16  ;;  %8719 = vmatpush.bf16.xpose.msrb.mxu0 %v8680_v40  ;;  %v8354_v16 = vmul.f32 1.442695, %v8252_v2  ;;  %v8356_v40 = vmul.f32 1.442695, %v8253_v3  ;;  %v8499_v24 = vadd.f32 %v16736_v17, %v16732_v6 }
 0xc8b   : > { %7745 = vperm.xlu1 %11487, %v7727_v32  }
 0xc8e   : > { %7730 = vperm.xlu0 %11486, %v7724_v13   ;;  %v17623_v13 = vpack.c.bf16 %v16476_v22, %v16464_v39 }
 0xc8f   : > { %8701 = vmatpush.bf16.xpose.msra.mxu3 %v8677_v50  ;;  %8720 = vmatpush.bf16.xpose.msrb.mxu0 %v8678_v18  ;;  %v17624_v50 = vld [vmem:[#allocation80_spill] sm:$0xff] }
 0xc90   : > { %v17625_v18 = vpack.c.bf16 %v16479_v45, %v17624_v50 }
 0xc97   : > { %8702 = vmatpush.bf16.xpose.msra.mxu3 %v8675_v44  ;;  %8721 = vmatpush.bf16.xpose.msrb.mxu0 %v17612_v9  ;;  %v8248_v44 = vsub.f32 %v17617_v20, %v17616_v10  ;;  %v17627_v9 = vld [vmem:[#allocation55_spill] sm:$0xff] }
 0xc98   : > { %v17628_v60 = vpack.c.bf16 %v17626_v63, %v17627_v9 }
 0xc99   : > { %v8346_v1 = vmul.f32 1.442695, %v8248_v44 }
 0xc9f   : > { %8703 = vmatpush.bf16.xpose.msra.mxu3 %v17614_v61  ;;  %8722 = vmatpush.bf16.xpose.msrb.mxu0 %v17615_v43 }
 0xca5   : > { %v8474_v31 = vpop.xlane.xlu2 %8473 }
 0xca6   : > { %11834 = vrcp.f32 %v8474_v31 }
 0xca7   : > { %8704 = vmatpush.bf16.xpose.msra.mxu3 %v17621_v37  ;;  %8723 = vmatpush.bf16.xpose.msrb.mxu0 %v17622_v49  ;;  %11836 = vpow2.f32 %v8346_v1 }
 0xca8   : > { %11838 = vpow2.f32 %v8348_v46 }
 0xca9   : > { %11840 = vpow2.f32 %v8354_v16 }
 0xcaa   : > { %11842 = vpow2.f32 %v8356_v40 }
 0xcab   : > { %8500 = vadd.xlane.f32.xlu2 %v8499_v24  ;;  %v17632_v24 = vld [vmem:[#allocation74_spill] sm:$0xff] }
 0xcac   : > { %v11835_v32 = vpop.eup %11834 }
 0xcad   : > { %v16747_v52 = vmul.f32 %v11835_v32, %v16519_v62  ;;  %v16750_v25 = vmul.f32 %v11835_v32, %v16525_v34  ;;  %v16752_v41 = vpop.eup %11836  ;;  %v17633_v32 = vld [vmem:[#allocation66_spill] sm:$0xff] }
 0xcae   : > { %v16762_v28 = vpop.eup %11838 }
 0xcaf   : > { %v8477_v15 = vpop.xlane.xlu1 %8476  ;;  %8705 = vmatpush.bf16.xpose.msra.mxu3 %v17623_v13  ;;  %8724 = vmatpush.bf16.xpose.msrb.mxu0 %v17625_v18  ;;  %10975 = vst [vmem:[%s15434_s3 + $0x360] sm:$0xff] %v16747_v52  ;;  %v16766_v62 = vpop.eup %11840  ;;  %v8457_v39 = vadd.f32 %v16762_v28, %v16752_v41 }
 0xcb0   : > { %11844 = vrcp.f32 %v8477_v15  ;;  %10976 = vst [vmem:[%s15434_s3 + $0x368] sm:$0xff] %v16750_v25  ;;  %v16768_v34 = vpop.eup %11842  ;;  %v8246_v15 = vsub.f32 %v17633_v32, %v17632_v24 }
 0xcb1   : > { %v8463_v45 = vadd.f32 %v16768_v34, %v16766_v62 }
 0xcb2   : > { %v8342_v50 = vmul.f32 1.442695, %v8246_v15  ;;  %v17635_v15 = vld [vmem:[#allocation60_spill] sm:$0xff] }
 0xcb5   : > { %8458 = vadd.xlane.f32.xlu1 %v8457_v39 }
 0xcb6   : > { %v11845_v22 = vpop.eup %11844 }
 0xcb7   : > { %v8480_v14 = vpop.xlane.xlu1 %8479  ;;  %8706 = vmatpush.bf16.xpose.msra.mxu3 %v17628_v60  ;;  %8725 = vmatpush.bf16.xpose.msrb.mxu0 %v17631_v55  ;;  %v16781_v61 = vmul.f32 %v11845_v22, %v16547_v26  ;;  %v16784_v43 = vmul.f32 %v11845_v22, %v16551_v23 }
 0xcb8   : > { %11846 = vrcp.f32 %v8480_v14  ;;  %8464 = vadd.xlane.f32.xlu0 %v8463_v45 }
 0xcb9   : > { %10977 = vst [vmem:[%s15434_s3 + $0x370] sm:$0xff] %v16781_v61  ;;  %v8689_v10 = vpack.c.bf16 %v16781_v61, %v16747_v52  ;;  %v8690_v20 = vpack.c.bf16 %v16784_v43, %v16750_v25 }
 0xcba   : > { %10978 = vst [vmem:[%s15434_s3 + $0x378] sm:$0xff] %v16784_v43 }
 0xcbe   : > { %v11847_v44 = vpop.eup %11846 }
 0xcbf   : > { %v8483_v35 = vpop.xlane.xlu0 %8482  ;;  %v16795_v26 = vmul.f32 %v11847_v44, %v16565_v30  ;;  %v16798_v23 = vmul.f32 %v11847_v44, %v16569_v8 }
 0xcc0   : > { %11848 = vrcp.f32 %v8483_v35 }
 0xcc1   : > { %10979 = vst [vmem:[%s15434_s3 + $0x380] sm:$0xff] %v16795_v26 }
 0xcc2   : > { %10980 = vst [vmem:[%s15434_s3 + $0x388] sm:$0xff] %v16798_v23 }
 0xcc3   : > { %7740 = vperm.xlu2 %11488, %v7726_v33  }
 0xcc5   : > { %v8486_v57 = vpop.xlane.xlu2 %8485 }
 0xcc6   : > { %v11849_v2 = vpop.eup %11848  ;;  %11850 = vrcp.f32 %v8486_v57 }
 0xcc7   : > { %v16808_v30 = vmul.f32 %v11849_v2, %v16587_v12  ;;  %v16811_v8 = vmul.f32 %v11849_v2, %v16591_v42 }
 0xcc9   : > { %10981 = vst [vmem:[%s15434_s3 + $0x390] sm:$0xff] %v16808_v30  ;;  %v8691_v1 = vpack.c.bf16 %v16808_v30, %v16795_v26  ;;  %v8692_v0 = vpack.c.bf16 %v16811_v8, %v16798_v23  ;;  %v17643_v23 = vld [vmem:[#allocation39_spill] sm:$0xff] }
 0xcca   : > { %10982 = vst [vmem:[%s15434_s3 + $0x398] sm:$0xff] %v16811_v8  ;;  %v11898_v8 = vld [vmem:[%s14614_s25 + $0x40] sm:$0xff] }
 0xccc   : > { %v11851_v3 = vpop.eup %11850 }
 0xccd   : > { %v8489_v31 = vpop.xlane.xlu1 %8488  ;;  %v16822_v46 = vmul.f32 %v11851_v3, %v16597_v51  ;;  %v16825_v12 = vmul.f32 %v11851_v3, %v16601_v48 }
 0xcce   : > { %11852 = vrcp.f32 %v8489_v31 }
 0xccf   : > { %10983 = vst [vmem:[%s15434_s3 + $0x3a0] sm:$0xff] %v16822_v46 }
 0xcd0   : > { %10984 = vst [vmem:[%s15434_s3 + $0x3a8] sm:$0xff] %v16825_v12 }
 0xcd4   : > { %v11853_v42 = vpop.eup %11852 }
 0xcd5   : > { %v8468_v37 = vpop.xlane.xlu1 %8467  ;;  %v8492_v49 = vpop.xlane.xlu0 %8491  ;;  %v16832_v16 = vmul.f32 %v11853_v42, %v16617_v27  ;;  %v16835_v40 = vmul.f32 %v11853_v42, %v16623_v19  ;;  %v17634_v27 = vld [vmem:[#allocation64_spill] sm:$0xff] }
 0xcd6   : > { %11854 = vrcp.f32 %v8468_v37  ;;  %v8247_v19 = vsub.f32 %v17634_v27, %v17632_v24  ;;  %v17636_v27 = vld [vmem:[#allocation41_spill] sm:$0xff] }
 0xcd7   : > { %11856 = vrcp.f32 %v8492_v49  ;;  %10985 = vst [vmem:[%s15434_s3 + $0x3b0] sm:$0xff] %v16832_v16  ;;  %v8693_v48 = vpack.c.bf16 %v16832_v16, %v16822_v46  ;;  %v8694_v51 = vpack.c.bf16 %v16835_v40, %v16825_v12 }
 0xcd8   : > { %10986 = vst [vmem:[%s15434_s3 + $0x3b8] sm:$0xff] %v16835_v40  ;;  %v8344_v39 = vmul.f32 1.442695, %v8247_v19  ;;  %v11899_v40 = vld [vmem:[%s14614_s25 + $0x50] sm:$0xff] }
 0xcdc   : > { %v11855_v13 = vpop.eup %11854 }
 0xcdd   : > { %v11857_v18 = vpop.eup %11856  ;;  %v8495_v22 = vpop.xlane.xlu2 %8494  ;;  %v16850_v14 = vmul.f32 %v11855_v13, %v16635_v58  ;;  %v16859_v60 = vmul.f32 %v11855_v13, %v16639_v21 }
 0xcde   : > { %v8471_v45 = vpop.xlane.xlu1 %8470  ;;  %11858 = vrcp.f32 %v8495_v22  ;;  %v16853_v63 = vmul.f32 %v11857_v18, %v16645_v5  ;;  %v16856_v9 = vmul.f32 %v11857_v18, %v16649_v59 }
 0xcdf   : > { %11860 = vrcp.f32 %v8471_v45  ;;  %10971 = vst [vmem:[%s15434_s3 + $0x340] sm:$0xff] %v16850_v14 }
 0xce0   : > { %11862 = vpow2.f32 %v8342_v50  ;;  %10987 = vst [vmem:[%s15434_s3 + $0x3c0] sm:$0xff] %v16853_v63  ;;  %v17638_v50 = vld [vmem:[#allocation56_spill] sm:$0xff] }
 0xce1   : > { %11864 = vpow2.f32 %v8344_v39  ;;  %10988 = vst [vmem:[%s15434_s3 + $0x3c8] sm:$0xff] %v16856_v9 }
 0xce2   : > { %10972 = vst [vmem:[%s15434_s3 + $0x348] sm:$0xff] %v16859_v60 }
 0xce4   : > { %v11859_v58 = vpop.eup %11858 }
 0xce5   : > { %v11861_v5 = vpop.eup %11860  ;;  %v16870_v21 = vmul.f32 %v11859_v58, %v16664_v53  ;;  %v16873_v36 = vmul.f32 %v11859_v58, %v16667_v7  ;;  %v7736_v24 = vpop.permute.xlu2 %7735 }
 0xce6   : > { %v8462_v59 = vpop.xlane.xlu1 %8461  ;;  %v16875_v11 = vpop.eup %11862  ;;  %v16878_v55 = vmul.f32 %v11861_v5, %v16659_v4  ;;  %v16889_v7 = vmul.f32 %v11861_v5, %v16661_v56  ;;  %v7795_v19 = vadd.f32 %v17636_v27, %v7736_v24  ;;  %v17639_v5 = vld [vmem:[#allocation47_spill] sm:$0xff] }
 0xce7   : > { %11866 = vrcp.f32 %v8462_v59  ;;  %v16880_v44 = vpop.eup %11864  ;;  %10989 = vst [vmem:[%s15434_s3 + $0x3d0] sm:$0xff] %v16870_v21  ;;  %v8695_v35 = vpack.c.bf16 %v16870_v21, %v16853_v63  ;;  %v8696_v53 = vpack.c.bf16 %v16873_v36, %v16856_v9  ;;  %v17640_v21 = vld [vmem:[#allocation45_spill] sm:$0xff] }
 0xce8   : > { %10990 = vst [vmem:[%s15434_s3 + $0x3d8] sm:$0xff] %v16873_v36  ;;  %v8687_v4 = vpack.c.bf16 %v16878_v55, %v16850_v14  ;;  %v8688_v33 = vpack.c.bf16 %v16889_v7, %v16859_v60  ;;  %v8454_v57 = vadd.f32 %v16880_v44, %v16875_v11 }
 0xce9   : > { %10973 = vst [vmem:[%s15434_s3 + $0x350] sm:$0xff] %v16878_v55 }
 0xcea   : > { %10974 = vst [vmem:[%s15434_s3 + $0x358] sm:$0xff] %v16889_v7 }
 0xcec   : > { %8455 = vadd.xlane.f32.xlu2 %v8454_v57  ;;  %v17641_v57 = vld [vmem:[#allocation62_spill] sm:$0xff] }
 0xced   : > { %v11867_v2 = vpop.eup %11866  ;;  %v8498_v56 = vpop.xlane.xlu0 %8497 }
 0xcee   : > { %v16904_v3 = vmul.f32 %v11867_v2, %v16673_v29  ;;  %v16907_v31 = vmul.f32 %v11867_v2, %v16678_v54  ;;  %11868 = vrcp.f32 %v8498_v56  ;;  %v7776_v29 = vadd.f32 %v17635_v15, %v7736_v24  ;;  %v17637_v54 = vld [vmem:[#allocation58_spill] sm:$0xff]  ;;  %v17642_v56 = vld [vmem:[#allocation43_spill] sm:$0xff] }
 0xcf0   : > { %10967 = vst [vmem:[%s15434_s3 + $0x320] sm:$0xff] %v16904_v3 }
 0xcf1   : > { %10968 = vst [vmem:[%s15434_s3 + $0x328] sm:$0xff] %v16907_v31 }
 0xcf4   : > { %v11869_v42 = vpop.eup %11868 }
 0xcf5   : > { %v8594_v37 = vmul.f32 %v11869_v42, %v16689_v47  ;;  %v8595_v49 = vmul.f32 %v11869_v42, %v16691_v38 }
 0xcf7   : > { %10991 = vst [vmem:[%s15434_s3 + $0x3e0] sm:$0xff] %v8594_v37 }
 0xcf8   : > { %10992 = vst [vmem:[%s15434_s3 + $0x3e8] sm:$0xff] %v8595_v49 }
 0xcfd   : > { %v7746_v38 = vpop.permute.xlu1 %7745 }
 0xcfe   : > { %v7781_v59 = vadd.f32 %v17639_v5, %v7746_v38  ;;  %v7800_v36 = vadd.f32 %v17640_v21, %v7746_v38 }
 0xd00   : > { %v7731_v32 = vpop.permute.xlu0 %7730 }
 0xd01   : > { %v7774_v13 = vadd.f32 %v17637_v54, %v7731_v32  ;;  %v7793_v18 = vadd.f32 %v17638_v50, %v7731_v32 }
 0xd03   : > { %v16921_v39 = vpack.c.bf16 %v7776_v29, %v7774_v13  ;;  %v16923_v22 = vpack.c.bf16 %v7795_v19, %v7793_v18 }
 0xd05   : > { %8707 = vmatmul.bf16.vlgmr.msra.gmra.mxu3 %v16921_v39  ;;  %8726 = vmatmul.bf16.vlgmr.msrb.gmra.mxu0 %v16923_v22 }
 0xd1e   : > { %v8501_v47 = vpop.xlane.xlu2 %8500 }
 0xd1f   : > { %11870 = vrcp.f32 %v8501_v47 }
 0xd25   : > { %v11871_v45 = vpop.eup %11870 }
 0xd26   : > { %v8596_v63 = vmul.f32 %v11871_v45, %v16732_v6  ;;  %v8597_v9 = vmul.f32 %v11871_v45, %v16736_v17  ;;  %v7741_v58 = vpop.permute.xlu2 %7740 }
 0xd27   : > { %v7779_v2 = vadd.f32 %v17641_v57, %v7741_v58  ;;  %v7798_v42 = vadd.f32 %v17642_v56, %v7741_v58 }
 0xd28   : > { %10993 = vst [vmem:[%s15434_s3 + $0x3f0] sm:$0xff] %v8596_v63  ;;  %v8459_v24 = vpop.xlane.xlu1 %8458  ;;  %v8697_v32 = vpack.c.bf16 %v8596_v63, %v8594_v37  ;;  %v8698_v15 = vpack.c.bf16 %v8597_v9, %v8595_v49 }
 0xd29   : > { %10994 = vst [vmem:[%s15434_s3 + $0x3f8] sm:$0xff] %v8597_v9  ;;  %v8665_v29 = vpack.c.bf16 %v7781_v59, %v7779_v2  ;;  %v8666_v27 = vpack.c.bf16 %v7800_v36, %v7798_v42  ;;  %11872 = vrcp.f32 %v8459_v24 }
 0xd2a   : > { %8737 = vmatpush.bf16.xpose.msrb.mxu3 %v8697_v32  ;;  %8756 = vmatpush.bf16.xpose.msra.mxu0 %v8698_v15 }
 0xd2b   : > { %8712 = vmatmul.bf16.gmra.mxu3 %v8665_v29  ;;  %8731 = vmatmul.bf16.gmra.mxu0 %v8666_v27  ;;  %v8465_v6 = vpop.xlane.xlu0 %8464 }
 0xd2c   : > { %11874 = vrcp.f32 %v8465_v6 }
 0xd2f   : > { %v11873_v17 = vpop.eup %11872 }
 0xd30   : > { %v8568_v19 = vmul.f32 %v11873_v17, %v16752_v41  ;;  %v8569_v37 = vmul.f32 %v11873_v17, %v16762_v28 }
 0xd32   : > { %v11875_v49 = vpop.eup %11874  ;;  %8738 = vmatpush.bf16.xpose.msrb.mxu3 %v8695_v35  ;;  %8757 = vmatpush.bf16.xpose.msra.mxu0 %v8696_v53  ;;  %10965 = vst [vmem:[%s15434_s3 + $0x310] sm:$0xff] %v8568_v19 }
 0xd33   : > { %v8572_v54 = vmul.f32 %v11875_v49, %v16766_v62  ;;  %v8573_v13 = vmul.f32 %v11875_v49, %v16768_v34  ;;  %10966 = vst [vmem:[%s15434_s3 + $0x318] sm:$0xff] %v8569_v37 }
 0xd35   : > { %10969 = vst [vmem:[%s15434_s3 + $0x330] sm:$0xff] %v8572_v54  ;;  %v8685_v41 = vpack.c.bf16 %v8572_v54, %v16904_v3  ;;  %v8686_v28 = vpack.c.bf16 %v8573_v13, %v16907_v31 }
 0xd36   : > { %10970 = vst [vmem:[%s15434_s3 + $0x338] sm:$0xff] %v8573_v13 }
 0xd3a   : > { %8739 = vmatpush.bf16.xpose.msrb.mxu3 %v8693_v48  ;;  %8758 = vmatpush.bf16.xpose.msra.mxu0 %v8694_v51 }
 0xd42   : > { %8740 = vmatpush.bf16.xpose.msrb.mxu3 %v8691_v1  ;;  %8759 = vmatpush.bf16.xpose.msra.mxu0 %v8692_v0 }
 0xd4a   : > { %8741 = vmatpush.bf16.xpose.msrb.mxu3 %v8689_v10  ;;  %8760 = vmatpush.bf16.xpose.msra.mxu0 %v8690_v20 }
 0xd52   : > { %8742 = vmatpush.bf16.xpose.msrb.mxu3 %v8687_v4  ;;  %8761 = vmatpush.bf16.xpose.msra.mxu0 %v8688_v33 }
 0xd5a   : > { %8743 = vmatpush.bf16.xpose.msrb.mxu3 %v8685_v41  ;;  %8762 = vmatpush.bf16.xpose.msra.mxu0 %v8686_v28 }
 0xd5f   : > { %v8456_v52 = vpop.xlane.xlu2 %8455 }
 0xd60   : > { %11876 = vrcp.f32 %v8456_v52 }
 0xd66   : > { %v11877_v62 = vpop.eup %11876 }
 0xd67   : > { %v8566_v25 = vmul.f32 %v11877_v62, %v16875_v11  ;;  %v8567_v34 = vmul.f32 %v11877_v62, %v16880_v44 }
 0xd69   : > { %10963 = vst [vmem:[%s15434_s3 + $0x300] sm:$0xff] %v8566_v25  ;;  %v8683_v61 = vpack.c.bf16 %v8568_v19, %v8566_v25  ;;  %v8684_v43 = vpack.c.bf16 %v8569_v37, %v8567_v34 }
 0xd6a   : > { %10964 = vst [vmem:[%s15434_s3 + $0x308] sm:$0xff] %v8567_v34 }
 0xd6b   : > { %8744 = vmatpush.bf16.xpose.msrb.mxu3 %v8683_v61  ;;  %8763 = vmatpush.bf16.xpose.msra.mxu0 %v8684_v43 }
 0xd72   : > { %8745 = vmatmul.bf16.vlgmr.msrb.gmra.mxu3 %v16921_v39  ;;  %8764 = vmatmul.bf16.vlgmr.msra.gmra.mxu0 %v16923_v22 }
 0xd82   : > { %8750 = vmatmul.bf16.gmra.mxu3 %v8665_v29  ;;  %8769 = vmatmul.bf16.gmra.mxu0 %v8666_v27  ;;  %v8727_v10 = vpop.f32.mrf.mxu0 }
 0xd88   : > { %v8708_v20 = vpop.f32.mrf.mxu3 }
 0xd89   : > { %v8728_v26 = vadd.f32 %v8727_v10, %v8708_v20 }
 0xd8a   : > { %v8729_v0 = vpop.f32.mrf.mxu0 }
 0xd8b   : > { %v8775_v30 = vmul.f32 %v8728_v26, %v17643_v23 }
 0xd8d   : > { %v8783_v1 = vadd.f32 %v11898_v8, %v8775_v30 }
 0xd8f   : > { %10995 = vst [vmem:[%s15986_s30 + $0x40] sm:$0xff] %v8783_v1 }
 0xd90   : > { %v8710_v46 = vpop.f32.mrf.mxu3 }
 0xd91   : > { %v8730_v12 = vadd.f32 %v8729_v0, %v8710_v46 }
 0xd93   : > { %v8777_v16 = vmul.f32 %v8730_v12, %v17643_v23 }
 0xd95   : > { %v8785_v48 = vadd.f32 %v11899_v40, %v8777_v16 }
 0xd97   : > { %10997 = vst [vmem:[%s15986_s30 + $0x50] sm:$0xff] %v8785_v48 }
 0xd98   : > { %11933 = shalt.err (!%p11930_p3)
}
 0xd99   : > { %s11971_s20 = smov 256   ;;  %s11972_s3 = smov 16   ;;  %v11900_v55 = vld [vmem:[%s14614_s25 + $0x60] sm:$0xff]  ;;  %v11901_v33 = vld [vmem:[%s14614_s25 + $0x70] sm:$0xff]  ;;  %v11902_v47 = vld [vmem:[%s14614_s25 + $0x48] sm:$0xff] }
 0xd9a   : > { %11444 = dma.vmem_to_hbm [thread:$0]  (%p12114_p5), %s8825_s24, 16384, %s8827_s27, %s8807_s0, %s11971_s20, %s11971_s20, %s11972_s3  }
 0xd9b   : > { %v11903_v58 = vld [vmem:[%s14614_s25 + $0x58] sm:$0xff]  ;;  %v11904_v2 = vld [vmem:[%s14614_s25 + $0x68] sm:$0xff] }
 0xd9c   : > { %v11905_v29 = vld [vmem:[%s14614_s25 + $0x78] sm:$0xff] }
 0xda8   : > { %v8732_v51 = vpop.f32.mrf.mxu0 }
 0xdae   : > { %v8713_v14 = vpop.f32.mrf.mxu3 }
 0xdaf   : > { %v8733_v60 = vadd.f32 %v8732_v51, %v8713_v14 }
 0xdb0   : > { %v8734_v35 = vpop.f32.mrf.mxu0 }
 0xdb1   : > { %v8779_v11 = vmul.f32 %v8733_v60, %v17643_v23 }
 0xdb3   : > { %v8787_v44 = vadd.f32 %v11900_v55, %v8779_v11 }
 0xdb5   : > { %10999 = vst [vmem:[%s15986_s30 + $0x60] sm:$0xff] %v8787_v44 }
 0xdb6   : > { %v8715_v53 = vpop.f32.mrf.mxu3 }
 0xdb7   : > { %v8735_v7 = vadd.f32 %v8734_v35, %v8715_v53 }
 0xdb9   : > { %v8781_v4 = vmul.f32 %v8735_v7, %v17643_v23 }
 0xdbb   : > { %v8789_v3 = vadd.f32 %v11901_v33, %v8781_v4 }
 0xdbd   : > { %11001 = vst [vmem:[%s15986_s30 + $0x70] sm:$0xff] %v8789_v3 }
 0xdef   : > { %v8765_v31 = vpop.f32.mrf.mxu0 }
 0xdf5   : > { %v8746_v50 = vpop.f32.mrf.mxu3 }
 0xdf6   : > { %v8766_v18 = vadd.f32 %v8765_v31, %v8746_v50 }
 0xdf7   : > { %v8767_v22 = vpop.f32.mrf.mxu0 }
 0xdf8   : > { %v8776_v39 = vmul.f32 %v8766_v18, %v17643_v23 }
 0xdfa   : > { %v8784_v38 = vadd.f32 %v11902_v47, %v8776_v39 }
 0xdfc   : > { %10996 = vst [vmem:[%s15986_s30 + $0x48] sm:$0xff] %v8784_v38 }
 0xdfd   : > { %v8748_v45 = vpop.f32.mrf.mxu3 }
 0xdfe   : > { %v8768_v63 = vadd.f32 %v8767_v22, %v8748_v45 }
 0xdff   : > { %v8770_v59 = vpop.f32.mrf.mxu0 }
 0xe00   : > { %v8778_v9 = vmul.f32 %v8768_v63, %v17643_v23 }
 0xe02   : > { %v8786_v5 = vadd.f32 %v11903_v58, %v8778_v9 }
 0xe04   : > { %10998 = vst [vmem:[%s15986_s30 + $0x58] sm:$0xff] %v8786_v5 }
 0xe05   : > { %v8751_v21 = vpop.f32.mrf.mxu3 }
 0xe06   : > { %v8771_v36 = vadd.f32 %v8770_v59, %v8751_v21 }
 0xe07   : > { %v8772_v42 = vpop.f32.mrf.mxu0 }
 0xe08   : > { %v8780_v57 = vmul.f32 %v8771_v36, %v17643_v23 }
 0xe0a   : > { %v8788_v56 = vadd.f32 %v11904_v2, %v8780_v57 }
 0xe0c   : > { %11000 = vst [vmem:[%s15986_s30 + $0x68] sm:$0xff] %v8788_v56 }
 0xe0d   : > { %v8753_v24 = vpop.f32.mrf.mxu3 }
 0xe0e   : > { %v8773_v32 = vadd.f32 %v8772_v42, %v8753_v24 }
 0xe10   : > { %v8782_v15 = vmul.f32 %v8773_v32, %v17643_v23 }
 0xe12   : > { %v8790_v27 = vadd.f32 %v11905_v29, %v8782_v15 }
 0xe14   : > { %11002 = vst [vmem:[%s15986_s30 + $0x78] sm:$0xff] %v8790_v27 }
 0xe15 PF: > { %s17644_s4 = sld [smem:[#allocation8_spill]] }
 0xe16   : > { %s17645_s26 = sld [smem:[#allocation6_spill]] }
 0xe1b   : > { %p11450_p4 = scmp.ge.s32.totalorder %s17644_s4, 2 }
 0xe1c   : > { %s8850_s24 = sand.u32 1, %s17645_s26  }
 0xe1d   : > { %p11447_p5 = pnand %p11450_p4, %p12118_p6  ;;  %s8851_s27 = scalar_lea.sflag [#allocation4], %s8850_s24 }
 0xe1f   : > { %p11448_p7 = pneg %p11447_p5 }
 0xe21   : > { %11951 = dma.done.wait (%p11448_p7), %s8851_s27, 16384  }
 0xe22   : > { %11953 = vsyncadd (%p11448_p7), %s8851_s27, 4294950912  ;;  %s17647_s22 = sld [smem:[#allocation9_spill]]  ;;  %s17650_s20 = smov %s11960_s21 }
 0xe23   : > { %s17648_s0 = sld [smem:[#allocation7_spill]] }
 0xe24   : > { %s17649_s1 = sld [smem:[#allocation10_spill]] }
 0xe28   : > { %p31_p8 = scmp.ge.s32.totalorder %s17647_s22, 4  }
 0xe29   : > { %s17651_s21 = smov %s17648_s0 }
 0xe2a   :  { %33 = sbr.rel (!%p31_p8) target bundleno = 10 (0xa), region = 157 }
 0xe2f   :  { %8857 = vsyncpa [#allocation4], 1 }
 0xe30   :  { %8859 = vsyncpa [#allocation4 + $0x1], 1 }

</bundles_post_ra>
